<compile_context>
chip_gen: v7x
topology: tpu7x:2x2x1
jax: 0.10.0
libtpu: 0.0.40
codegen_flags: <defaults>
</compile_context>

<pallas_src>
import jax
import jax.numpy as jnp
from jax.experimental import pallas as pl
from jax.experimental.pallas import tpu as pltpu

DIM = 32
BN_EPS = 1e-5
_LPAD = 8  # canvas interior starts at this column -> sublane-aligned stores


# ----------------------------------------------------------------------------
# Fused encoder kernel: stem GEMM + layer1 + layer2 + final 1x1 projection.
# One grid step == one image; all activations stay in VMEM.
# ----------------------------------------------------------------------------
def _encoder_kernel(p0_ref, dsb_ref, *rest):
    (ws, bs, w10a, b10a, w10b, b10b, w11a, b11a, w11b, b11b,
     w20a, b20a, wdn, bdn, w20b, b20b, w21a, b21a, w21b, b21b,
     wout, bout, out_ref, ca, cb) = rest

    H1 = ca.shape[0] - 2
    W1 = ca.shape[1] - _LPAD - 1
    C1 = ca.shape[2]
    H2 = cb.shape[0] - 2
    W2 = cb.shape[1] - _LPAD - 1
    C2 = cb.shape[2]

    relu = lambda t: jnp.maximum(t, 0.0)

    # Zero the canvases every step: the halo border must be zero and the
    # interiors are fully overwritten below.  Unconditional so v7x megacore
    # grid partitioning (which may never run program_id == 0 on a core) is
    # still correct.
    ca[...] = jnp.zeros_like(ca)
    cb[...] = jnp.zeros_like(cb)

    def put(canvas, v, H, W, C):
        canvas[1:H + 1, _LPAD:_LPAD + W, :] = v.reshape(H, W, C)

    def conv3x3(canvas, w_ref, H, W, C):
        """3x3 stride-1 conv of the canvas interior -> (H*W, Cout) f32."""
        M = H * W
        acc = jnp.zeros((M, w_ref.shape[2]), jnp.float32)
        for kh in range(3):
            for kw in range(3):
                c0 = _LPAD - 1 + kw
                sub = canvas[kh:kh + H, c0:c0 + W, :].reshape(M, C)
                acc = acc + jnp.dot(sub.astype(jnp.bfloat16),
                                    w_ref[kh * 3 + kw],
                                    preferred_element_type=jnp.float32)
        return acc

    # --- stem: 7x7/s2 conv (host-side im2col) + folded BN + ReLU -------------
    a = relu(jnp.dot(p0_ref[0], ws[...],
                     preferred_element_type=jnp.float32) + bs[...])   # (M1,C1)

    # --- layer1_0 (ResidualBlock, stride 1) -----------------------------------
    put(ca, a, H1, W1, C1)
    y = relu(conv3x3(ca, w10a, H1, W1, C1) + b10a[...])
    put(ca, y, H1, W1, C1)
    y = relu(conv3x3(ca, w10b, H1, W1, C1) + b10b[...])
    a = relu(a + y)

    # --- layer1_1 -------------------------------------------------------------
    put(ca, a, H1, W1, C1)
    y = relu(conv3x3(ca, w11a, H1, W1, C1) + b11a[...])
    put(ca, y, H1, W1, C1)
    y = relu(conv3x3(ca, w11b, H1, W1, C1) + b11b[...])
    a = relu(a + y)                                                    # (M1,C1)

    # --- layer2_0 (ResidualBlock, stride 2) ------------------------------------
    # stride-2 conv == stride-1 conv followed by exact even-pixel decimation,
    # expressed as a (M2, M1) 0/1 matmul, so no strided memory ops are needed.
    dsel = dsb_ref[...]                                                # (M2,M1)
    put(ca, a, H1, W1, C1)
    full = conv3x3(ca, w20a, H1, W1, C1)                               # (M1,C2)
    y = relu(jnp.dot(dsel, full, preferred_element_type=jnp.float32)
             + b20a[...])                                              # (M2,C2)
    put(cb, y, H2, W2, C2)
    y = relu(conv3x3(cb, w20b, H2, W2, C2) + b20b[...])
    xd = jnp.dot(dsel, a, preferred_element_type=jnp.float32)          # (M2,C1)
    xd = jnp.dot(xd.astype(jnp.bfloat16), wdn[...],
                 preferred_element_type=jnp.float32) + bdn[...]        # 1x1/s2
    a = relu(xd + y)                                                   # (M2,C2)

    # --- layer2_1 -------------------------------------------------------------
    put(cb, a, H2, W2, C2)
    y = relu(conv3x3(cb, w21a, H2, W2, C2) + b21a[...])
    put(cb, y, H2, W2, C2)
    y = relu(conv3x3(cb, w21b, H2, W2, C2) + b21b[...])
    a = relu(a + y)                                                    # (M2,C2)

    # --- final 1x1 projection (no norm / relu), lane-dense 128-ch output -----
    out_ref[0] = jnp.dot(a.astype(jnp.bfloat16), wout[...],
                         preferred_element_type=jnp.float32) + bout[...]


# ----------------------------------------------------------------------------
# Wrapper: host-side stem im2col + the single fused pallas_call.
# ----------------------------------------------------------------------------
def _const_spec(arr):
    nd = arr.ndim
    return pl.BlockSpec(arr.shape, lambda i, _nd=nd: (0,) * _nd)


def basic_encoder_forward(x, prep):
    """x: (b, n, bins, H, W) f32 -> (b, n, output_dim, H//4, W//4) f32."""
    weights = prep["weights"]
    dim = weights[0].shape[1]            # ws:   (49*bins, dim)
    dim2 = weights[12].shape[1]          # wdn:  (dim, 2*dim)
    out_ch = weights[21].shape[1]        # bout: (1, output_dim)

    b, n, c1, h1, w1 = x.shape
    assert h1 % 4 == 0 and w1 % 4 == 0, "spatial dims must be multiples of 4"
    N = b * n
    H1, W1 = h1 // 2, w1 // 2
    H2, W2 = H1 // 2, W1 // 2
    M1, M2 = H1 * W1, H2 * W2

    x = jnp.transpose(x.reshape(N, c1, h1, w1), (0, 2, 3, 1))          # NHWC

    # Stem im2col (7x7 / stride 2 / pad 3); tap-major, channel-minor, bf16.
    xp = jnp.pad(x, ((0, 0), (3, 3), (3, 3), (0, 0)))
    cols = [xp[:, kh:kh + 2 * H1:2, kw:kw + 2 * W1:2, :]
            for kh in range(7) for kw in range(7)]
    p0 = jnp.stack(cols, axis=3).reshape(N, M1, 49 * c1).astype(jnp.bfloat16)

    # Exact even-pixel decimation matrix used in-kernel by the stride-2 convs.
    m = jnp.arange(M2, dtype=jnp.int32)
    sel = (2 * (m // W2)) * W1 + 2 * (m % W2)
    dselb = (sel[:, None] == jnp.arange(M1, dtype=jnp.int32)[None, :]
             ).astype(jnp.float32)                                     # (M2,M1)

    in_specs = ([pl.BlockSpec((1, M1, 49 * c1), lambda i: (i, 0, 0)),
                 _const_spec(dselb)]
                + [_const_spec(w) for w in weights])

    flops = 2 * N * (M1 * 49 * c1 * dim          # stem GEMM
                     + 4 * M1 * 9 * dim * dim    # layer1 convs
                     + M1 * 9 * dim * dim2       # layer2_0 conv1 (full res)
                     + M2 * M1 * (dim2 + dim)    # decimation matmuls
                     + M2 * dim * dim2           # 1x1 downsample
                     + 3 * M2 * 9 * dim2 * dim2  # remaining 3x3 convs
                     + M2 * dim2 * out_ch)       # final projection
    bytes_accessed = (p0.size * 2 + dselb.size * 4
                      + sum(w.size * w.dtype.itemsize for w in weights)
                      + N * M2 * out_ch * 4)

    out = pl.pallas_call(
        _encoder_kernel,
        out_shape=jax.ShapeDtypeStruct((N, M2, out_ch), jnp.float32),
        grid=(N,),
        in_specs=in_specs,
        out_specs=pl.BlockSpec((1, M2, out_ch), lambda i: (i, 0, 0)),
        scratch_shapes=[
            pltpu.VMEM((H1 + 2, W1 + _LPAD + 1, dim), jnp.float32),
            pltpu.VMEM((H2 + 2, W2 + _LPAD + 1, dim2), jnp.float32),
        ],
        compiler_params=pltpu.CompilerParams(
            dimension_semantics=("parallel",),
            vmem_limit_bytes=32 * 1024 * 1024),
        cost_estimate=pl.CostEstimate(flops=int(flops), transcendentals=0,
                                      bytes_accessed=int(bytes_accessed)),
    )(p0, dselb, *weights)

    out = jnp.transpose(out.reshape(N, H2, W2, out_ch), (0, 3, 1, 2))   # NCHW
    return out.reshape(b, n, out_ch, H2, W2)


# ----------------------------------------------------------------------------
# Deterministic parameters (kaiming_normal fan_out, like __init__) and
# host-side preparation (BN/bias folding, bf16 weights) -- OUTSIDE jit.
# ----------------------------------------------------------------------------
def _make_conv(key, cout, cin, k, bn):
    k1, k2 = jax.random.split(key)
    std = (2.0 / (cout * k * k)) ** 0.5         # kaiming_normal, fan_out, relu
    w = jax.random.normal(k1, (cout, cin, k, k), jnp.float32) * std
    bound = 1.0 / (cin * k * k) ** 0.5          # default PyTorch conv-bias init
    b = jax.random.uniform(k2, (cout,), jnp.float32, -bound, bound)
    return {"w": w, "b": b, "bn": bn}           # bn: plain Python bool


def make_params(key, bins=5, output_dim=128, dim=DIM):
    keys = jax.random.split(key, 11)
    return {
        "conv1": _make_conv(keys[0], dim, bins, 7, bn=True),
        "layer1_0": {"conv1": _make_conv(keys[1], dim, dim, 3, True),
                     "conv2": _make_conv(keys[2], dim, dim, 3, True)},
        "layer1_1": {"conv1": _make_conv(keys[3], dim, dim, 3, True),
                     "conv2": _make_conv(keys[4], dim, dim, 3, True)},
        "layer2_0": {"conv1": _make_conv(keys[5], 2 * dim, dim, 3, True),
                     "conv2": _make_conv(keys[6], 2 * dim, 2 * dim, 3, True),
                     "down": _make_conv(keys[7], 2 * dim, dim, 1, True)},
        "layer2_1": {"conv1": _make_conv(keys[8], 2 * dim, 2 * dim, 3, True),
                     "conv2": _make_conv(keys[9], 2 * dim, 2 * dim, 3, True)},
        "conv2": _make_conv(keys[10], output_dim, 2 * dim, 1, bn=False),
    }


def _fold_scale(conv):
    # Eval-mode BatchNorm with fresh stats (mean=0, var=1, gamma=1, beta=0):
    # y = conv(x) / sqrt(1 + eps)  ->  fold 1/sqrt(1+eps) into weight & bias.
    return (1.0 + BN_EPS) ** -0.5 if conv["bn"] else 1.0


def _prep_gemm(conv):
    """(cout, cin, k, k) -> ((k*k*cin, cout) bf16, (1, cout) f32); tap-major."""
    cout, cin, k, _ = conv["w"].shape
    s = _fold_scale(conv)
    wm = jnp.transpose(conv["w"], (2, 3, 1, 0)).reshape(k * k * cin, cout) * s
    return wm.astype(jnp.bfloat16), (conv["b"] * s)[None, :].astype(jnp.float32)


def _prep_k3(conv):
    """(cout, cin, 3, 3) -> ((9, cin, cout) bf16, (1, cout) f32)."""
    cout, cin, _, _ = conv["w"].shape
    s = _fold_scale(conv)
    w9 = jnp.transpose(conv["w"], (2, 3, 1, 0)).reshape(9, cin, cout) * s
    return w9.astype(jnp.bfloat16), (conv["b"] * s)[None, :].astype(jnp.float32)


def prepare_params(params):
    """Runs outside jit: consumes the Python `bn` flags and folds eval-mode BN
    plus the conv bias into the fused-kernel weight layout."""
    ws, bs = _prep_gemm(params["conv1"])
    w10a, b10a = _prep_k3(params["layer1_0"]["conv1"])
    w10b, b10b = _prep_k3(params["layer1_0"]["conv2"])
    w11a, b11a = _prep_k3(params["layer1_1"]["conv1"])
    w11b, b11b = _prep_k3(params["layer1_1"]["conv2"])
    w20a, b20a = _prep_k3(params["layer2_0"]["conv1"])
    wdn, bdn = _prep_gemm(params["layer2_0"]["down"])
    w20b, b20b = _prep_k3(params["layer2_0"]["conv2"])
    w21a, b21a = _prep_k3(params["layer2_1"]["conv1"])
    w21b, b21b = _prep_k3(params["layer2_1"]["conv2"])
    wout, bout = _prep_gemm(params["conv2"])
    return {"weights": [ws, bs, w10a, b10a, w10b, b10b, w11a, b11a, w11b, b11b,
                        w20a, b20a, wdn, bdn, w20b, b20b, w21a, b21a,
                        w21b, b21b, wout, bout]}


if __name__ == "__main__":
    key = jax.random.PRNGKey(0)
    kx, kp = jax.random.split(key)

    # Input: (b, n, bins, H, W) = (1, 2, 5, 32, 32)
    x = jax.random.normal(kx, (1, 2, 5, 32, 32), jnp.float32)
    params = make_params(kp)
    prep = prepare_params(params)          # outside jit: no traced booleans

    fwd = jax.jit(basic_encoder_forward)
    out = jax.block_until_ready(fwd(x, prep))

    assert out.shape == (1, 2, 128, 8, 8), out.shape
    assert bool(jnp.all(jnp.isfinite(out)))
    print("KERNEL_OK")
</pallas_src>

<mosaic_0001>
module attributes {stable_mosaic.version = 11 : i64} {
  func.func @_encoder_kernel(%arg0: i32, %arg1: memref<1x256x245xbf16, #tpu.memory_space<vmem>>, %arg2: memref<64x256xf32, #tpu.memory_space<vmem>>, %arg3: memref<245x32xbf16, #tpu.memory_space<vmem>>, %arg4: memref<1x32xf32, #tpu.memory_space<vmem>>, %arg5: memref<9x32x32xbf16, #tpu.memory_space<vmem>>, %arg6: memref<1x32xf32, #tpu.memory_space<vmem>>, %arg7: memref<9x32x32xbf16, #tpu.memory_space<vmem>>, %arg8: memref<1x32xf32, #tpu.memory_space<vmem>>, %arg9: memref<9x32x32xbf16, #tpu.memory_space<vmem>>, %arg10: memref<1x32xf32, #tpu.memory_space<vmem>>, %arg11: memref<9x32x32xbf16, #tpu.memory_space<vmem>>, %arg12: memref<1x32xf32, #tpu.memory_space<vmem>>, %arg13: memref<9x32x64xbf16, #tpu.memory_space<vmem>>, %arg14: memref<1x64xf32, #tpu.memory_space<vmem>>, %arg15: memref<32x64xbf16, #tpu.memory_space<vmem>>, %arg16: memref<1x64xf32, #tpu.memory_space<vmem>>, %arg17: memref<9x64x64xbf16, #tpu.memory_space<vmem>>, %arg18: memref<1x64xf32, #tpu.memory_space<vmem>>, %arg19: memref<9x64x64xbf16, #tpu.memory_space<vmem>>, %arg20: memref<1x64xf32, #tpu.memory_space<vmem>>, %arg21: memref<9x64x64xbf16, #tpu.memory_space<vmem>>, %arg22: memref<1x64xf32, #tpu.memory_space<vmem>>, %arg23: memref<64x128xbf16, #tpu.memory_space<vmem>>, %arg24: memref<1x128xf32, #tpu.memory_space<vmem>>, %arg25: memref<1x64x128xf32, #tpu.memory_space<vmem>>, %arg26: memref<18x25x32xf32, #tpu.memory_space<vmem>>, %arg27: memref<10x17x64xf32, #tpu.memory_space<vmem>>) attributes {dimension_semantics = [#tpu.dimension_semantics<parallel>], iteration_bounds = array<i64: 2>, scalar_prefetch = 0 : i64, scratch_operands = 2 : i64, tpu.core_type = #tpu.core_type<tc>, window_params = [{transform_indices = @transform_0, window_bounds = array<i64: 1, 256, 245>}, {pipeline_mode = #tpu.pipeline_mode<synchronous>, transform_indices = @transform_1, window_bounds = array<i64: 64, 256>}, {pipeline_mode = #tpu.pipeline_mode<synchronous>, transform_indices = @transform_2, window_bounds = array<i64: 245, 32>}, {pipeline_mode = #tpu.pipeline_mode<synchronous>, transform_indices = @transform_3, window_bounds = array<i64: 1, 32>}, {pipeline_mode = #tpu.pipeline_mode<synchronous>, transform_indices = @transform_4, window_bounds = array<i64: 9, 32, 32>}, {pipeline_mode = #tpu.pipeline_mode<synchronous>, transform_indices = @transform_5, window_bounds = array<i64: 1, 32>}, {pipeline_mode = #tpu.pipeline_mode<synchronous>, transform_indices = @transform_6, window_bounds = array<i64: 9, 32, 32>}, {pipeline_mode = #tpu.pipeline_mode<synchronous>, transform_indices = @transform_7, window_bounds = array<i64: 1, 32>}, {pipeline_mode = #tpu.pipeline_mode<synchronous>, transform_indices = @transform_8, window_bounds = array<i64: 9, 32, 32>}, {pipeline_mode = #tpu.pipeline_mode<synchronous>, transform_indices = @transform_9, window_bounds = array<i64: 1, 32>}, {pipeline_mode = #tpu.pipeline_mode<synchronous>, transform_indices = @transform_10, window_bounds = array<i64: 9, 32, 32>}, {pipeline_mode = #tpu.pipeline_mode<synchronous>, transform_indices = @transform_11, window_bounds = array<i64: 1, 32>}, {pipeline_mode = #tpu.pipeline_mode<synchronous>, transform_indices = @transform_12, window_bounds = array<i64: 9, 32, 64>}, {pipeline_mode = #tpu.pipeline_mode<synchronous>, transform_indices = @transform_13, window_bounds = array<i64: 1, 64>}, {pipeline_mode = #tpu.pipeline_mode<synchronous>, transform_indices = @transform_14, window_bounds = array<i64: 32, 64>}, {pipeline_mode = #tpu.pipeline_mode<synchronous>, transform_indices = @transform_15, window_bounds = array<i64: 1, 64>}, {pipeline_mode = #tpu.pipeline_mode<synchronous>, transform_indices = @transform_16, window_bounds = array<i64: 9, 64, 64>}, {pipeline_mode = #tpu.pipeline_mode<synchronous>, transform_indices = @transform_17, window_bounds = array<i64: 1, 64>}, {pipeline_mode = #tpu.pipeline_mode<synchronous>, transform_indices = @transform_18, window_bounds = array<i64: 9, 64, 64>}, {pipeline_mode = #tpu.pipeline_mode<synchronous>, transform_indices = @transform_19, window_bounds = array<i64: 1, 64>}, {pipeline_mode = #tpu.pipeline_mode<synchronous>, transform_indices = @transform_20, window_bounds = array<i64: 9, 64, 64>}, {pipeline_mode = #tpu.pipeline_mode<synchronous>, transform_indices = @transform_21, window_bounds = array<i64: 1, 64>}, {pipeline_mode = #tpu.pipeline_mode<synchronous>, transform_indices = @transform_22, window_bounds = array<i64: 64, 128>}, {pipeline_mode = #tpu.pipeline_mode<synchronous>, transform_indices = @transform_23, window_bounds = array<i64: 1, 128>}, {transform_indices = @transform_24, window_bounds = array<i64: 1, 64, 128>}]} {
    %cst = arith.constant 0.000000e+00 : f32
    %0 = vector.broadcast %cst : f32 to vector<18x25x32xf32>
    %c0 = arith.constant 0 : index
    %c0_0 = arith.constant 0 : index
    %c0_1 = arith.constant 0 : index
    %1 = vector.load %arg26[%c0, %c0_0, %c0_1] : memref<18x25x32xf32, #tpu.memory_space<vmem>>, vector<18x25x32xf32>
    tpu.vector_store %arg26[%c0, %c0_0, %c0_1], %0 {strides = array<i32>} : memref<18x25x32xf32, #tpu.memory_space<vmem>>, vector<18x25x32xf32>,
    %cst_2 = arith.constant 0.000000e+00 : f32
    %2 = vector.broadcast %cst_2 : f32 to vector<10x17x64xf32>
    %c0_3 = arith.constant 0 : index
    %c0_4 = arith.constant 0 : index
    %c0_5 = arith.constant 0 : index
    %3 = vector.load %arg27[%c0_3, %c0_4, %c0_5] : memref<10x17x64xf32, #tpu.memory_space<vmem>>, vector<10x17x64xf32>
    tpu.vector_store %arg27[%c0_3, %c0_4, %c0_5], %2 {strides = array<i32>} : memref<10x17x64xf32, #tpu.memory_space<vmem>>, vector<10x17x64xf32>,
    %c0_6 = arith.constant 0 : index
    %c0_7 = arith.constant 0 : index
    %c0_8 = arith.constant 0 : index
    %4 = vector.load %arg1[%c0_6, %c0_7, %c0_8] : memref<1x256x245xbf16, #tpu.memory_space<vmem>>, vector<1x256x245xbf16>
    %5 = vector.shape_cast %4 : vector<1x256x245xbf16> to vector<256x245xbf16>
    %c0_9 = arith.constant 0 : index
    %c0_10 = arith.constant 0 : index
    %6 = vector.load %arg3[%c0_9, %c0_10] : memref<245x32xbf16, #tpu.memory_space<vmem>>, vector<245x32xbf16>
    %cst_11 = arith.constant dense<0.000000e+00> : vector<256x32xf32>
    %7 = tpu.matmul %5, %6, %cst_11 {dimension_numbers = #tpu.dot_dimension_numbers<[1], [0], [0], [1], [0, 0, 1, 1], [], []>} : vector<256x245xbf16>, vector<245x32xbf16>, vector<256x32xf32> -> vector<256x32xf32>
    %c0_12 = arith.constant 0 : index
    %c0_13 = arith.constant 0 : index
    %8 = vector.load %arg4[%c0_12, %c0_13] : memref<1x32xf32, #tpu.memory_space<vmem>>, vector<1x32xf32>
    %9 = vector.broadcast %8 : vector<1x32xf32> to vector<256x32xf32>
    %10 = arith.addf %7, %9 : vector<256x32xf32>
    %cst_14 = arith.constant 0.000000e+00 : f32
    %11 = vector.broadcast %cst_14 : f32 to vector<256x32xf32>
    %12 = arith.maximumf %10, %11 : vector<256x32xf32>
    %13 = vector.shape_cast %12 : vector<256x32xf32> to vector<16x16x32xf32>
    %c1 = arith.constant 1 : index
    %c8 = arith.constant 8 : index
    %c0_15 = arith.constant 0 : index
    %14 = vector.load %arg26[%c1, %c8, %c0_15] : memref<18x25x32xf32, #tpu.memory_space<vmem>>, vector<16x16x32xf32>
    tpu.vector_store %arg26[%c1, %c8, %c0_15], %13 {strides = array<i32>} : memref<18x25x32xf32, #tpu.memory_space<vmem>>, vector<16x16x32xf32>,
    %cst_16 = arith.constant 0.000000e+00 : f32
    %15 = vector.broadcast %cst_16 : f32 to vector<256x32xf32>
    %c0_17 = arith.constant 0 : index
    %c7 = arith.constant 7 : index
    %c0_18 = arith.constant 0 : index
    %16 = vector.load %arg26[%c0_17, %c7, %c0_18] : memref<18x25x32xf32, #tpu.memory_space<vmem>>, vector<16x16x32xf32>
    %17 = vector.shape_cast %16 : vector<16x16x32xf32> to vector<256x32xf32>
    %18 = arith.truncf %17 : vector<256x32xf32> to vector<256x32xbf16>
    %c0_19 = arith.constant 0 : index
    %c0_20 = arith.constant 0 : index
    %c0_21 = arith.constant 0 : index
    %19 = vector.load %arg5[%c0_19, %c0_20, %c0_21] : memref<9x32x32xbf16, #tpu.memory_space<vmem>>, vector<1x32x32xbf16>
    %20 = vector.shape_cast %19 : vector<1x32x32xbf16> to vector<32x32xbf16>
    %cst_22 = arith.constant dense<0.000000e+00> : vector<256x32xf32>
    %21 = tpu.matmul %18, %20, %cst_22 {dimension_numbers = #tpu.dot_dimension_numbers<[1], [0], [0], [1], [0, 0, 1, 1], [], []>} : vector<256x32xbf16>, vector<32x32xbf16>, vector<256x32xf32> -> vector<256x32xf32>
    %22 = arith.addf %15, %21 : vector<256x32xf32>
    %c0_23 = arith.constant 0 : index
    %c8_24 = arith.constant 8 : index
    %c0_25 = arith.constant 0 : index
    %23 = vector.load %arg26[%c0_23, %c8_24, %c0_25] : memref<18x25x32xf32, #tpu.memory_space<vmem>>, vector<16x16x32xf32>
    %24 = vector.shape_cast %23 : vector<16x16x32xf32> to vector<256x32xf32>
    %25 = arith.truncf %24 : vector<256x32xf32> to vector<256x32xbf16>
    %c1_26 = arith.constant 1 : index
    %c0_27 = arith.constant 0 : index
    %c0_28 = arith.constant 0 : index
    %26 = vector.load %arg5[%c1_26, %c0_27, %c0_28] : memref<9x32x32xbf16, #tpu.memory_space<vmem>>, vector<1x32x32xbf16>
    %27 = vector.shape_cast %26 : vector<1x32x32xbf16> to vector<32x32xbf16>
    %cst_29 = arith.constant dense<0.000000e+00> : vector<256x32xf32>
    %28 = tpu.matmul %25, %27, %cst_29 {dimension_numbers = #tpu.dot_dimension_numbers<[1], [0], [0], [1], [0, 0, 1, 1], [], []>} : vector<256x32xbf16>, vector<32x32xbf16>, vector<256x32xf32> -> vector<256x32xf32>
    %29 = arith.addf %22, %28 : vector<256x32xf32>
    %c0_30 = arith.constant 0 : index
    %c9 = arith.constant 9 : index
    %c0_31 = arith.constant 0 : index
    %30 = vector.load %arg26[%c0_30, %c9, %c0_31] : memref<18x25x32xf32, #tpu.memory_space<vmem>>, vector<16x16x32xf32>
    %31 = vector.shape_cast %30 : vector<16x16x32xf32> to vector<256x32xf32>
    %32 = arith.truncf %31 : vector<256x32xf32> to vector<256x32xbf16>
    %c2 = arith.constant 2 : index
    %c0_32 = arith.constant 0 : index
    %c0_33 = arith.constant 0 : index
    %33 = vector.load %arg5[%c2, %c0_32, %c0_33] : memref<9x32x32xbf16, #tpu.memory_space<vmem>>, vector<1x32x32xbf16>
    %34 = vector.shape_cast %33 : vector<1x32x32xbf16> to vector<32x32xbf16>
    %cst_34 = arith.constant dense<0.000000e+00> : vector<256x32xf32>
    %35 = tpu.matmul %32, %34, %cst_34 {dimension_numbers = #tpu.dot_dimension_numbers<[1], [0], [0], [1], [0, 0, 1, 1], [], []>} : vector<256x32xbf16>, vector<32x32xbf16>, vector<256x32xf32> -> vector<256x32xf32>
    %36 = arith.addf %29, %35 : vector<256x32xf32>
    %c1_35 = arith.constant 1 : index
    %c7_36 = arith.constant 7 : index
    %c0_37 = arith.constant 0 : index
    %37 = vector.load %arg26[%c1_35, %c7_36, %c0_37] : memref<18x25x32xf32, #tpu.memory_space<vmem>>, vector<16x16x32xf32>
    %38 = vector.shape_cast %37 : vector<16x16x32xf32> to vector<256x32xf32>
    %39 = arith.truncf %38 : vector<256x32xf32> to vector<256x32xbf16>
    %c3 = arith.constant 3 : index
    %c0_38 = arith.constant 0 : index
    %c0_39 = arith.constant 0 : index
    %40 = vector.load %arg5[%c3, %c0_38, %c0_39] : memref<9x32x32xbf16, #tpu.memory_space<vmem>>, vector<1x32x32xbf16>
    %41 = vector.shape_cast %40 : vector<1x32x32xbf16> to vector<32x32xbf16>
    %cst_40 = arith.constant dense<0.000000e+00> : vector<256x32xf32>
    %42 = tpu.matmul %39, %41, %cst_40 {dimension_numbers = #tpu.dot_dimension_numbers<[1], [0], [0], [1], [0, 0, 1, 1], [], []>} : vector<256x32xbf16>, vector<32x32xbf16>, vector<256x32xf32> -> vector<256x32xf32>
    %43 = arith.addf %36, %42 : vector<256x32xf32>
    %c1_41 = arith.constant 1 : index
    %c8_42 = arith.constant 8 : index
    %c0_43 = arith.constant 0 : index
    %44 = vector.load %arg26[%c1_41, %c8_42, %c0_43] : memref<18x25x32xf32, #tpu.memory_space<vmem>>, vector<16x16x32xf32>
    %45 = vector.shape_cast %44 : vector<16x16x32xf32> to vector<256x32xf32>
    %46 = arith.truncf %45 : vector<256x32xf32> to vector<256x32xbf16>
    %c4 = arith.constant 4 : index
    %c0_44 = arith.constant 0 : index
    %c0_45 = arith.constant 0 : index
    %47 = vector.load %arg5[%c4, %c0_44, %c0_45] : memref<9x32x32xbf16, #tpu.memory_space<vmem>>, vector<1x32x32xbf16>
    %48 = vector.shape_cast %47 : vector<1x32x32xbf16> to vector<32x32xbf16>
    %cst_46 = arith.constant dense<0.000000e+00> : vector<256x32xf32>
    %49 = tpu.matmul %46, %48, %cst_46 {dimension_numbers = #tpu.dot_dimension_numbers<[1], [0], [0], [1], [0, 0, 1, 1], [], []>} : vector<256x32xbf16>, vector<32x32xbf16>, vector<256x32xf32> -> vector<256x32xf32>
    %50 = arith.addf %43, %49 : vector<256x32xf32>
    %c1_47 = arith.constant 1 : index
    %c9_48 = arith.constant 9 : index
    %c0_49 = arith.constant 0 : index
    %51 = vector.load %arg26[%c1_47, %c9_48, %c0_49] : memref<18x25x32xf32, #tpu.memory_space<vmem>>, vector<16x16x32xf32>
    %52 = vector.shape_cast %51 : vector<16x16x32xf32> to vector<256x32xf32>
    %53 = arith.truncf %52 : vector<256x32xf32> to vector<256x32xbf16>
    %c5 = arith.constant 5 : index
    %c0_50 = arith.constant 0 : index
    %c0_51 = arith.constant 0 : index
    %54 = vector.load %arg5[%c5, %c0_50, %c0_51] : memref<9x32x32xbf16, #tpu.memory_space<vmem>>, vector<1x32x32xbf16>
    %55 = vector.shape_cast %54 : vector<1x32x32xbf16> to vector<32x32xbf16>
    %cst_52 = arith.constant dense<0.000000e+00> : vector<256x32xf32>
    %56 = tpu.matmul %53, %55, %cst_52 {dimension_numbers = #tpu.dot_dimension_numbers<[1], [0], [0], [1], [0, 0, 1, 1], [], []>} : vector<256x32xbf16>, vector<32x32xbf16>, vector<256x32xf32> -> vector<256x32xf32>
    %57 = arith.addf %50, %56 : vector<256x32xf32>
    %c2_53 = arith.constant 2 : index
    %c7_54 = arith.constant 7 : index
    %c0_55 = arith.constant 0 : index
    %58 = vector.load %arg26[%c2_53, %c7_54, %c0_55] : memref<18x25x32xf32, #tpu.memory_space<vmem>>, vector<16x16x32xf32>
    %59 = vector.shape_cast %58 : vector<16x16x32xf32> to vector<256x32xf32>
    %60 = arith.truncf %59 : vector<256x32xf32> to vector<256x32xbf16>
    %c6 = arith.constant 6 : index
    %c0_56 = arith.constant 0 : index
    %c0_57 = arith.constant 0 : index
    %61 = vector.load %arg5[%c6, %c0_56, %c0_57] : memref<9x32x32xbf16, #tpu.memory_space<vmem>>, vector<1x32x32xbf16>
    %62 = vector.shape_cast %61 : vector<1x32x32xbf16> to vector<32x32xbf16>
    %cst_58 = arith.constant dense<0.000000e+00> : vector<256x32xf32>
    %63 = tpu.matmul %60, %62, %cst_58 {dimension_numbers = #tpu.dot_dimension_numbers<[1], [0], [0], [1], [0, 0, 1, 1], [], []>} : vector<256x32xbf16>, vector<32x32xbf16>, vector<256x32xf32> -> vector<256x32xf32>
    %64 = arith.addf %57, %63 : vector<256x32xf32>
    %c2_59 = arith.constant 2 : index
    %c8_60 = arith.constant 8 : index
    %c0_61 = arith.constant 0 : index
    %65 = vector.load %arg26[%c2_59, %c8_60, %c0_61] : memref<18x25x32xf32, #tpu.memory_space<vmem>>, vector<16x16x32xf32>
    %66 = vector.shape_cast %65 : vector<16x16x32xf32> to vector<256x32xf32>
    %67 = arith.truncf %66 : vector<256x32xf32> to vector<256x32xbf16>
    %c7_62 = arith.constant 7 : index
    %c0_63 = arith.constant 0 : index
    %c0_64 = arith.constant 0 : index
    %68 = vector.load %arg5[%c7_62, %c0_63, %c0_64] : memref<9x32x32xbf16, #tpu.memory_space<vmem>>, vector<1x32x32xbf16>
    %69 = vector.shape_cast %68 : vector<1x32x32xbf16> to vector<32x32xbf16>
    %cst_65 = arith.constant dense<0.000000e+00> : vector<256x32xf32>
    %70 = tpu.matmul %67, %69, %cst_65 {dimension_numbers = #tpu.dot_dimension_numbers<[1], [0], [0], [1], [0, 0, 1, 1], [], []>} : vector<256x32xbf16>, vector<32x32xbf16>, vector<256x32xf32> -> vector<256x32xf32>
    %71 = arith.addf %64, %70 : vector<256x32xf32>
    %c2_66 = arith.constant 2 : index
    %c9_67 = arith.constant 9 : index
    %c0_68 = arith.constant 0 : index
    %72 = vector.load %arg26[%c2_66, %c9_67, %c0_68] : memref<18x25x32xf32, #tpu.memory_space<vmem>>, vector<16x16x32xf32>
    %73 = vector.shape_cast %72 : vector<16x16x32xf32> to vector<256x32xf32>
    %74 = arith.truncf %73 : vector<256x32xf32> to vector<256x32xbf16>
    %c8_69 = arith.constant 8 : index
    %c0_70 = arith.constant 0 : index
    %c0_71 = arith.constant 0 : index
    %75 = vector.load %arg5[%c8_69, %c0_70, %c0_71] : memref<9x32x32xbf16, #tpu.memory_space<vmem>>, vector<1x32x32xbf16>
    %76 = vector.shape_cast %75 : vector<1x32x32xbf16> to vector<32x32xbf16>
    %cst_72 = arith.constant dense<0.000000e+00> : vector<256x32xf32>
    %77 = tpu.matmul %74, %76, %cst_72 {dimension_numbers = #tpu.dot_dimension_numbers<[1], [0], [0], [1], [0, 0, 1, 1], [], []>} : vector<256x32xbf16>, vector<32x32xbf16>, vector<256x32xf32> -> vector<256x32xf32>
    %78 = arith.addf %71, %77 : vector<256x32xf32>
    %c0_73 = arith.constant 0 : index
    %c0_74 = arith.constant 0 : index
    %79 = vector.load %arg6[%c0_73, %c0_74] : memref<1x32xf32, #tpu.memory_space<vmem>>, vector<1x32xf32>
    %80 = vector.broadcast %79 : vector<1x32xf32> to vector<256x32xf32>
    %81 = arith.addf %78, %80 : vector<256x32xf32>
    %cst_75 = arith.constant 0.000000e+00 : f32
    %82 = vector.broadcast %cst_75 : f32 to vector<256x32xf32>
    %83 = arith.maximumf %81, %82 : vector<256x32xf32>
    %84 = vector.shape_cast %83 : vector<256x32xf32> to vector<16x16x32xf32>
    %c1_76 = arith.constant 1 : index
    %c8_77 = arith.constant 8 : index
    %c0_78 = arith.constant 0 : index
    %85 = vector.load %arg26[%c1_76, %c8_77, %c0_78] : memref<18x25x32xf32, #tpu.memory_space<vmem>>, vector<16x16x32xf32>
    tpu.vector_store %arg26[%c1_76, %c8_77, %c0_78], %84 {strides = array<i32>} : memref<18x25x32xf32, #tpu.memory_space<vmem>>, vector<16x16x32xf32>,
    %cst_79 = arith.constant 0.000000e+00 : f32
    %86 = vector.broadcast %cst_79 : f32 to vector<256x32xf32>
    %c0_80 = arith.constant 0 : index
    %c7_81 = arith.constant 7 : index
    %c0_82 = arith.constant 0 : index
    %87 = vector.load %arg26[%c0_80, %c7_81, %c0_82] : memref<18x25x32xf32, #tpu.memory_space<vmem>>, vector<16x16x32xf32>
    %88 = vector.shape_cast %87 : vector<16x16x32xf32> to vector<256x32xf32>
    %89 = arith.truncf %88 : vector<256x32xf32> to vector<256x32xbf16>
    %c0_83 = arith.constant 0 : index
    %c0_84 = arith.constant 0 : index
    %c0_85 = arith.constant 0 : index
    %90 = vector.load %arg7[%c0_83, %c0_84, %c0_85] : memref<9x32x32xbf16, #tpu.memory_space<vmem>>, vector<1x32x32xbf16>
    %91 = vector.shape_cast %90 : vector<1x32x32xbf16> to vector<32x32xbf16>
    %cst_86 = arith.constant dense<0.000000e+00> : vector<256x32xf32>
    %92 = tpu.matmul %89, %91, %cst_86 {dimension_numbers = #tpu.dot_dimension_numbers<[1], [0], [0], [1], [0, 0, 1, 1], [], []>} : vector<256x32xbf16>, vector<32x32xbf16>, vector<256x32xf32> -> vector<256x32xf32>
    %93 = arith.addf %86, %92 : vector<256x32xf32>
    %c0_87 = arith.constant 0 : index
    %c8_88 = arith.constant 8 : index
    %c0_89 = arith.constant 0 : index
    %94 = vector.load %arg26[%c0_87, %c8_88, %c0_89] : memref<18x25x32xf32, #tpu.memory_space<vmem>>, vector<16x16x32xf32>
    %95 = vector.shape_cast %94 : vector<16x16x32xf32> to vector<256x32xf32>
    %96 = arith.truncf %95 : vector<256x32xf32> to vector<256x32xbf16>
    %c1_90 = arith.constant 1 : index
    %c0_91 = arith.constant 0 : index
    %c0_92 = arith.constant 0 : index
    %97 = vector.load %arg7[%c1_90, %c0_91, %c0_92] : memref<9x32x32xbf16, #tpu.memory_space<vmem>>, vector<1x32x32xbf16>
    %98 = vector.shape_cast %97 : vector<1x32x32xbf16> to vector<32x32xbf16>
    %cst_93 = arith.constant dense<0.000000e+00> : vector<256x32xf32>
    %99 = tpu.matmul %96, %98, %cst_93 {dimension_numbers = #tpu.dot_dimension_numbers<[1], [0], [0], [1], [0, 0, 1, 1], [], []>} : vector<256x32xbf16>, vector<32x32xbf16>, vector<256x32xf32> -> vector<256x32xf32>
    %100 = arith.addf %93, %99 : vector<256x32xf32>
    %c0_94 = arith.constant 0 : index
    %c9_95 = arith.constant 9 : index
    %c0_96 = arith.constant 0 : index
    %101 = vector.load %arg26[%c0_94, %c9_95, %c0_96] : memref<18x25x32xf32, #tpu.memory_space<vmem>>, vector<16x16x32xf32>
    %102 = vector.shape_cast %101 : vector<16x16x32xf32> to vector<256x32xf32>
    %103 = arith.truncf %102 : vector<256x32xf32> to vector<256x32xbf16>
    %c2_97 = arith.constant 2 : index
    %c0_98 = arith.constant 0 : index
    %c0_99 = arith.constant 0 : index
    %104 = vector.load %arg7[%c2_97, %c0_98, %c0_99] : memref<9x32x32xbf16, #tpu.memory_space<vmem>>, vector<1x32x32xbf16>
    %105 = vector.shape_cast %104 : vector<1x32x32xbf16> to vector<32x32xbf16>
    %cst_100 = arith.constant dense<0.000000e+00> : vector<256x32xf32>
    %106 = tpu.matmul %103, %105, %cst_100 {dimension_numbers = #tpu.dot_dimension_numbers<[1], [0], [0], [1], [0, 0, 1, 1], [], []>} : vector<256x32xbf16>, vector<32x32xbf16>, vector<256x32xf32> -> vector<256x32xf32>
    %107 = arith.addf %100, %106 : vector<256x32xf32>
    %c1_101 = arith.constant 1 : index
    %c7_102 = arith.constant 7 : index
    %c0_103 = arith.constant 0 : index
    %108 = vector.load %arg26[%c1_101, %c7_102, %c0_103] : memref<18x25x32xf32, #tpu.memory_space<vmem>>, vector<16x16x32xf32>
    %109 = vector.shape_cast %108 : vector<16x16x32xf32> to vector<256x32xf32>
    %110 = arith.truncf %109 : vector<256x32xf32> to vector<256x32xbf16>
    %c3_104 = arith.constant 3 : index
    %c0_105 = arith.constant 0 : index
    %c0_106 = arith.constant 0 : index
    %111 = vector.load %arg7[%c3_104, %c0_105, %c0_106] : memref<9x32x32xbf16, #tpu.memory_space<vmem>>, vector<1x32x32xbf16>
    %112 = vector.shape_cast %111 : vector<1x32x32xbf16> to vector<32x32xbf16>
    %cst_107 = arith.constant dense<0.000000e+00> : vector<256x32xf32>
    %113 = tpu.matmul %110, %112, %cst_107 {dimension_numbers = #tpu.dot_dimension_numbers<[1], [0], [0], [1], [0, 0, 1, 1], [], []>} : vector<256x32xbf16>, vector<32x32xbf16>, vector<256x32xf32> -> vector<256x32xf32>
    %114 = arith.addf %107, %113 : vector<256x32xf32>
    %c1_108 = arith.constant 1 : index
    %c8_109 = arith.constant 8 : index
    %c0_110 = arith.constant 0 : index
    %115 = vector.load %arg26[%c1_108, %c8_109, %c0_110] : memref<18x25x32xf32, #tpu.memory_space<vmem>>, vector<16x16x32xf32>
    %116 = vector.shape_cast %115 : vector<16x16x32xf32> to vector<256x32xf32>
    %117 = arith.truncf %116 : vector<256x32xf32> to vector<256x32xbf16>
    %c4_111 = arith.constant 4 : index
    %c0_112 = arith.constant 0 : index
    %c0_113 = arith.constant 0 : index
    %118 = vector.load %arg7[%c4_111, %c0_112, %c0_113] : memref<9x32x32xbf16, #tpu.memory_space<vmem>>, vector<1x32x32xbf16>
    %119 = vector.shape_cast %118 : vector<1x32x32xbf16> to vector<32x32xbf16>
    %cst_114 = arith.constant dense<0.000000e+00> : vector<256x32xf32>
    %120 = tpu.matmul %117, %119, %cst_114 {dimension_numbers = #tpu.dot_dimension_numbers<[1], [0], [0], [1], [0, 0, 1, 1], [], []>} : vector<256x32xbf16>, vector<32x32xbf16>, vector<256x32xf32> -> vector<256x32xf32>
    %121 = arith.addf %114, %120 : vector<256x32xf32>
    %c1_115 = arith.constant 1 : index
    %c9_116 = arith.constant 9 : index
    %c0_117 = arith.constant 0 : index
    %122 = vector.load %arg26[%c1_115, %c9_116, %c0_117] : memref<18x25x32xf32, #tpu.memory_space<vmem>>, vector<16x16x32xf32>
    %123 = vector.shape_cast %122 : vector<16x16x32xf32> to vector<256x32xf32>
    %124 = arith.truncf %123 : vector<256x32xf32> to vector<256x32xbf16>
    %c5_118 = arith.constant 5 : index
    %c0_119 = arith.constant 0 : index
    %c0_120 = arith.constant 0 : index
    %125 = vector.load %arg7[%c5_118, %c0_119, %c0_120] : memref<9x32x32xbf16, #tpu.memory_space<vmem>>, vector<1x32x32xbf16>
    %126 = vector.shape_cast %125 : vector<1x32x32xbf16> to vector<32x32xbf16>
    %cst_121 = arith.constant dense<0.000000e+00> : vector<256x32xf32>
    %127 = tpu.matmul %124, %126, %cst_121 {dimension_numbers = #tpu.dot_dimension_numbers<[1], [0], [0], [1], [0, 0, 1, 1], [], []>} : vector<256x32xbf16>, vector<32x32xbf16>, vector<256x32xf32> -> vector<256x32xf32>
    %128 = arith.addf %121, %127 : vector<256x32xf32>
    %c2_122 = arith.constant 2 : index
    %c7_123 = arith.constant 7 : index
    %c0_124 = arith.constant 0 : index
    %129 = vector.load %arg26[%c2_122, %c7_123, %c0_124] : memref<18x25x32xf32, #tpu.memory_space<vmem>>, vector<16x16x32xf32>
    %130 = vector.shape_cast %129 : vector<16x16x32xf32> to vector<256x32xf32>
    %131 = arith.truncf %130 : vector<256x32xf32> to vector<256x32xbf16>
    %c6_125 = arith.constant 6 : index
    %c0_126 = arith.constant 0 : index
    %c0_127 = arith.constant 0 : index
    %132 = vector.load %arg7[%c6_125, %c0_126, %c0_127] : memref<9x32x32xbf16, #tpu.memory_space<vmem>>, vector<1x32x32xbf16>
    %133 = vector.shape_cast %132 : vector<1x32x32xbf16> to vector<32x32xbf16>
    %cst_128 = arith.constant dense<0.000000e+00> : vector<256x32xf32>
    %134 = tpu.matmul %131, %133, %cst_128 {dimension_numbers = #tpu.dot_dimension_numbers<[1], [0], [0], [1], [0, 0, 1, 1], [], []>} : vector<256x32xbf16>, vector<32x32xbf16>, vector<256x32xf32> -> vector<256x32xf32>
    %135 = arith.addf %128, %134 : vector<256x32xf32>
    %c2_129 = arith.constant 2 : index
    %c8_130 = arith.constant 8 : index
    %c0_131 = arith.constant 0 : index
    %136 = vector.load %arg26[%c2_129, %c8_130, %c0_131] : memref<18x25x32xf32, #tpu.memory_space<vmem>>, vector<16x16x32xf32>
    %137 = vector.shape_cast %136 : vector<16x16x32xf32> to vector<256x32xf32>
    %138 = arith.truncf %137 : vector<256x32xf32> to vector<256x32xbf16>
    %c7_132 = arith.constant 7 : index
    %c0_133 = arith.constant 0 : index
    %c0_134 = arith.constant 0 : index
    %139 = vector.load %arg7[%c7_132, %c0_133, %c0_134] : memref<9x32x32xbf16, #tpu.memory_space<vmem>>, vector<1x32x32xbf16>
    %140 = vector.shape_cast %139 : vector<1x32x32xbf16> to vector<32x32xbf16>
    %cst_135 = arith.constant dense<0.000000e+00> : vector<256x32xf32>
    %141 = tpu.matmul %138, %140, %cst_135 {dimension_numbers = #tpu.dot_dimension_numbers<[1], [0], [0], [1], [0, 0, 1, 1], [], []>} : vector<256x32xbf16>, vector<32x32xbf16>, vector<256x32xf32> -> vector<256x32xf32>
    %142 = arith.addf %135, %141 : vector<256x32xf32>
    %c2_136 = arith.constant 2 : index
    %c9_137 = arith.constant 9 : index
    %c0_138 = arith.constant 0 : index
    %143 = vector.load %arg26[%c2_136, %c9_137, %c0_138] : memref<18x25x32xf32, #tpu.memory_space<vmem>>, vector<16x16x32xf32>
    %144 = vector.shape_cast %143 : vector<16x16x32xf32> to vector<256x32xf32>
    %145 = arith.truncf %144 : vector<256x32xf32> to vector<256x32xbf16>
    %c8_139 = arith.constant 8 : index
    %c0_140 = arith.constant 0 : index
    %c0_141 = arith.constant 0 : index
    %146 = vector.load %arg7[%c8_139, %c0_140, %c0_141] : memref<9x32x32xbf16, #tpu.memory_space<vmem>>, vector<1x32x32xbf16>
    %147 = vector.shape_cast %146 : vector<1x32x32xbf16> to vector<32x32xbf16>
    %cst_142 = arith.constant dense<0.000000e+00> : vector<256x32xf32>
    %148 = tpu.matmul %145, %147, %cst_142 {dimension_numbers = #tpu.dot_dimension_numbers<[1], [0], [0], [1], [0, 0, 1, 1], [], []>} : vector<256x32xbf16>, vector<32x32xbf16>, vector<256x32xf32> -> vector<256x32xf32>
    %149 = arith.addf %142, %148 : vector<256x32xf32>
    %c0_143 = arith.constant 0 : index
    %c0_144 = arith.constant 0 : index
    %150 = vector.load %arg8[%c0_143, %c0_144] : memref<1x32xf32, #tpu.memory_space<vmem>>, vector<1x32xf32>
    %151 = vector.broadcast %150 : vector<1x32xf32> to vector<256x32xf32>
    %152 = arith.addf %149, %151 : vector<256x32xf32>
    %cst_145 = arith.constant 0.000000e+00 : f32
    %153 = vector.broadcast %cst_145 : f32 to vector<256x32xf32>
    %154 = arith.maximumf %152, %153 : vector<256x32xf32>
    %155 = arith.addf %12, %154 : vector<256x32xf32>
    %cst_146 = arith.constant 0.000000e+00 : f32
    %156 = vector.broadcast %cst_146 : f32 to vector<256x32xf32>
    %157 = arith.maximumf %155, %156 : vector<256x32xf32>
    %158 = vector.shape_cast %157 : vector<256x32xf32> to vector<16x16x32xf32>
    %c1_147 = arith.constant 1 : index
    %c8_148 = arith.constant 8 : index
    %c0_149 = arith.constant 0 : index
    %159 = vector.load %arg26[%c1_147, %c8_148, %c0_149] : memref<18x25x32xf32, #tpu.memory_space<vmem>>, vector<16x16x32xf32>
    tpu.vector_store %arg26[%c1_147, %c8_148, %c0_149], %158 {strides = array<i32>} : memref<18x25x32xf32, #tpu.memory_space<vmem>>, vector<16x16x32xf32>,
    %cst_150 = arith.constant 0.000000e+00 : f32
    %160 = vector.broadcast %cst_150 : f32 to vector<256x32xf32>
    %c0_151 = arith.constant 0 : index
    %c7_152 = arith.constant 7 : index
    %c0_153 = arith.constant 0 : index
    %161 = vector.load %arg26[%c0_151, %c7_152, %c0_153] : memref<18x25x32xf32, #tpu.memory_space<vmem>>, vector<16x16x32xf32>
    %162 = vector.shape_cast %161 : vector<16x16x32xf32> to vector<256x32xf32>
    %163 = arith.truncf %162 : vector<256x32xf32> to vector<256x32xbf16>
    %c0_154 = arith.constant 0 : index
    %c0_155 = arith.constant 0 : index
    %c0_156 = arith.constant 0 : index
    %164 = vector.load %arg9[%c0_154, %c0_155, %c0_156] : memref<9x32x32xbf16, #tpu.memory_space<vmem>>, vector<1x32x32xbf16>
    %165 = vector.shape_cast %164 : vector<1x32x32xbf16> to vector<32x32xbf16>
    %cst_157 = arith.constant dense<0.000000e+00> : vector<256x32xf32>
    %166 = tpu.matmul %163, %165, %cst_157 {dimension_numbers = #tpu.dot_dimension_numbers<[1], [0], [0], [1], [0, 0, 1, 1], [], []>} : vector<256x32xbf16>, vector<32x32xbf16>, vector<256x32xf32> -> vector<256x32xf32>
    %167 = arith.addf %160, %166 : vector<256x32xf32>
    %c0_158 = arith.constant 0 : index
    %c8_159 = arith.constant 8 : index
    %c0_160 = arith.constant 0 : index
    %168 = vector.load %arg26[%c0_158, %c8_159, %c0_160] : memref<18x25x32xf32, #tpu.memory_space<vmem>>, vector<16x16x32xf32>
    %169 = vector.shape_cast %168 : vector<16x16x32xf32> to vector<256x32xf32>
    %170 = arith.truncf %169 : vector<256x32xf32> to vector<256x32xbf16>
    %c1_161 = arith.constant 1 : index
    %c0_162 = arith.constant 0 : index
    %c0_163 = arith.constant 0 : index
    %171 = vector.load %arg9[%c1_161, %c0_162, %c0_163] : memref<9x32x32xbf16, #tpu.memory_space<vmem>>, vector<1x32x32xbf16>
    %172 = vector.shape_cast %171 : vector<1x32x32xbf16> to vector<32x32xbf16>
    %cst_164 = arith.constant dense<0.000000e+00> : vector<256x32xf32>
    %173 = tpu.matmul %170, %172, %cst_164 {dimension_numbers = #tpu.dot_dimension_numbers<[1], [0], [0], [1], [0, 0, 1, 1], [], []>} : vector<256x32xbf16>, vector<32x32xbf16>, vector<256x32xf32> -> vector<256x32xf32>
    %174 = arith.addf %167, %173 : vector<256x32xf32>
    %c0_165 = arith.constant 0 : index
    %c9_166 = arith.constant 9 : index
    %c0_167 = arith.constant 0 : index
    %175 = vector.load %arg26[%c0_165, %c9_166, %c0_167] : memref<18x25x32xf32, #tpu.memory_space<vmem>>, vector<16x16x32xf32>
    %176 = vector.shape_cast %175 : vector<16x16x32xf32> to vector<256x32xf32>
    %177 = arith.truncf %176 : vector<256x32xf32> to vector<256x32xbf16>
    %c2_168 = arith.constant 2 : index
    %c0_169 = arith.constant 0 : index
    %c0_170 = arith.constant 0 : index
    %178 = vector.load %arg9[%c2_168, %c0_169, %c0_170] : memref<9x32x32xbf16, #tpu.memory_space<vmem>>, vector<1x32x32xbf16>
    %179 = vector.shape_cast %178 : vector<1x32x32xbf16> to vector<32x32xbf16>
    %cst_171 = arith.constant dense<0.000000e+00> : vector<256x32xf32>
    %180 = tpu.matmul %177, %179, %cst_171 {dimension_numbers = #tpu.dot_dimension_numbers<[1], [0], [0], [1], [0, 0, 1, 1], [], []>} : vector<256x32xbf16>, vector<32x32xbf16>, vector<256x32xf32> -> vector<256x32xf32>
    %181 = arith.addf %174, %180 : vector<256x32xf32>
    %c1_172 = arith.constant 1 : index
    %c7_173 = arith.constant 7 : index
    %c0_174 = arith.constant 0 : index
    %182 = vector.load %arg26[%c1_172, %c7_173, %c0_174] : memref<18x25x32xf32, #tpu.memory_space<vmem>>, vector<16x16x32xf32>
    %183 = vector.shape_cast %182 : vector<16x16x32xf32> to vector<256x32xf32>
    %184 = arith.truncf %183 : vector<256x32xf32> to vector<256x32xbf16>
    %c3_175 = arith.constant 3 : index
    %c0_176 = arith.constant 0 : index
    %c0_177 = arith.constant 0 : index
    %185 = vector.load %arg9[%c3_175, %c0_176, %c0_177] : memref<9x32x32xbf16, #tpu.memory_space<vmem>>, vector<1x32x32xbf16>
    %186 = vector.shape_cast %185 : vector<1x32x32xbf16> to vector<32x32xbf16>
    %cst_178 = arith.constant dense<0.000000e+00> : vector<256x32xf32>
    %187 = tpu.matmul %184, %186, %cst_178 {dimension_numbers = #tpu.dot_dimension_numbers<[1], [0], [0], [1], [0, 0, 1, 1], [], []>} : vector<256x32xbf16>, vector<32x32xbf16>, vector<256x32xf32> -> vector<256x32xf32>
    %188 = arith.addf %181, %187 : vector<256x32xf32>
    %c1_179 = arith.constant 1 : index
    %c8_180 = arith.constant 8 : index
    %c0_181 = arith.constant 0 : index
    %189 = vector.load %arg26[%c1_179, %c8_180, %c0_181] : memref<18x25x32xf32, #tpu.memory_space<vmem>>, vector<16x16x32xf32>
    %190 = vector.shape_cast %189 : vector<16x16x32xf32> to vector<256x32xf32>
    %191 = arith.truncf %190 : vector<256x32xf32> to vector<256x32xbf16>
    %c4_182 = arith.constant 4 : index
    %c0_183 = arith.constant 0 : index
    %c0_184 = arith.constant 0 : index
    %192 = vector.load %arg9[%c4_182, %c0_183, %c0_184] : memref<9x32x32xbf16, #tpu.memory_space<vmem>>, vector<1x32x32xbf16>
    %193 = vector.shape_cast %192 : vector<1x32x32xbf16> to vector<32x32xbf16>
    %cst_185 = arith.constant dense<0.000000e+00> : vector<256x32xf32>
    %194 = tpu.matmul %191, %193, %cst_185 {dimension_numbers = #tpu.dot_dimension_numbers<[1], [0], [0], [1], [0, 0, 1, 1], [], []>} : vector<256x32xbf16>, vector<32x32xbf16>, vector<256x32xf32> -> vector<256x32xf32>
    %195 = arith.addf %188, %194 : vector<256x32xf32>
    %c1_186 = arith.constant 1 : index
    %c9_187 = arith.constant 9 : index
    %c0_188 = arith.constant 0 : index
    %196 = vector.load %arg26[%c1_186, %c9_187, %c0_188] : memref<18x25x32xf32, #tpu.memory_space<vmem>>, vector<16x16x32xf32>
    %197 = vector.shape_cast %196 : vector<16x16x32xf32> to vector<256x32xf32>
    %198 = arith.truncf %197 : vector<256x32xf32> to vector<256x32xbf16>
    %c5_189 = arith.constant 5 : index
    %c0_190 = arith.constant 0 : index
    %c0_191 = arith.constant 0 : index
    %199 = vector.load %arg9[%c5_189, %c0_190, %c0_191] : memref<9x32x32xbf16, #tpu.memory_space<vmem>>, vector<1x32x32xbf16>
    %200 = vector.shape_cast %199 : vector<1x32x32xbf16> to vector<32x32xbf16>
    %cst_192 = arith.constant dense<0.000000e+00> : vector<256x32xf32>
    %201 = tpu.matmul %198, %200, %cst_192 {dimension_numbers = #tpu.dot_dimension_numbers<[1], [0], [0], [1], [0, 0, 1, 1], [], []>} : vector<256x32xbf16>, vector<32x32xbf16>, vector<256x32xf32> -> vector<256x32xf32>
    %202 = arith.addf %195, %201 : vector<256x32xf32>
    %c2_193 = arith.constant 2 : index
    %c7_194 = arith.constant 7 : index
    %c0_195 = arith.constant 0 : index
    %203 = vector.load %arg26[%c2_193, %c7_194, %c0_195] : memref<18x25x32xf32, #tpu.memory_space<vmem>>, vector<16x16x32xf32>
    %204 = vector.shape_cast %203 : vector<16x16x32xf32> to vector<256x32xf32>
    %205 = arith.truncf %204 : vector<256x32xf32> to vector<256x32xbf16>
    %c6_196 = arith.constant 6 : index
    %c0_197 = arith.constant 0 : index
    %c0_198 = arith.constant 0 : index
    %206 = vector.load %arg9[%c6_196, %c0_197, %c0_198] : memref<9x32x32xbf16, #tpu.memory_space<vmem>>, vector<1x32x32xbf16>
    %207 = vector.shape_cast %206 : vector<1x32x32xbf16> to vector<32x32xbf16>
    %cst_199 = arith.constant dense<0.000000e+00> : vector<256x32xf32>
    %208 = tpu.matmul %205, %207, %cst_199 {dimension_numbers = #tpu.dot_dimension_numbers<[1], [0], [0], [1], [0, 0, 1, 1], [], []>} : vector<256x32xbf16>, vector<32x32xbf16>, vector<256x32xf32> -> vector<256x32xf32>
    %209 = arith.addf %202, %208 : vector<256x32xf32>
    %c2_200 = arith.constant 2 : index
    %c8_201 = arith.constant 8 : index
    %c0_202 = arith.constant 0 : index
    %210 = vector.load %arg26[%c2_200, %c8_201, %c0_202] : memref<18x25x32xf32, #tpu.memory_space<vmem>>, vector<16x16x32xf32>
    %211 = vector.shape_cast %210 : vector<16x16x32xf32> to vector<256x32xf32>
    %212 = arith.truncf %211 : vector<256x32xf32> to vector<256x32xbf16>
    %c7_203 = arith.constant 7 : index
    %c0_204 = arith.constant 0 : index
    %c0_205 = arith.constant 0 : index
    %213 = vector.load %arg9[%c7_203, %c0_204, %c0_205] : memref<9x32x32xbf16, #tpu.memory_space<vmem>>, vector<1x32x32xbf16>
    %214 = vector.shape_cast %213 : vector<1x32x32xbf16> to vector<32x32xbf16>
    %cst_206 = arith.constant dense<0.000000e+00> : vector<256x32xf32>
    %215 = tpu.matmul %212, %214, %cst_206 {dimension_numbers = #tpu.dot_dimension_numbers<[1], [0], [0], [1], [0, 0, 1, 1], [], []>} : vector<256x32xbf16>, vector<32x32xbf16>, vector<256x32xf32> -> vector<256x32xf32>
    %216 = arith.addf %209, %215 : vector<256x32xf32>
    %c2_207 = arith.constant 2 : index
    %c9_208 = arith.constant 9 : index
    %c0_209 = arith.constant 0 : index
    %217 = vector.load %arg26[%c2_207, %c9_208, %c0_209] : memref<18x25x32xf32, #tpu.memory_space<vmem>>, vector<16x16x32xf32>
    %218 = vector.shape_cast %217 : vector<16x16x32xf32> to vector<256x32xf32>
    %219 = arith.truncf %218 : vector<256x32xf32> to vector<256x32xbf16>
    %c8_210 = arith.constant 8 : index
    %c0_211 = arith.constant 0 : index
    %c0_212 = arith.constant 0 : index
    %220 = vector.load %arg9[%c8_210, %c0_211, %c0_212] : memref<9x32x32xbf16, #tpu.memory_space<vmem>>, vector<1x32x32xbf16>
    %221 = vector.shape_cast %220 : vector<1x32x32xbf16> to vector<32x32xbf16>
    %cst_213 = arith.constant dense<0.000000e+00> : vector<256x32xf32>
    %222 = tpu.matmul %219, %221, %cst_213 {dimension_numbers = #tpu.dot_dimension_numbers<[1], [0], [0], [1], [0, 0, 1, 1], [], []>} : vector<256x32xbf16>, vector<32x32xbf16>, vector<256x32xf32> -> vector<256x32xf32>
    %223 = arith.addf %216, %222 : vector<256x32xf32>
    %c0_214 = arith.constant 0 : index
    %c0_215 = arith.constant 0 : index
    %224 = vector.load %arg10[%c0_214, %c0_215] : memref<1x32xf32, #tpu.memory_space<vmem>>, vector<1x32xf32>
    %225 = vector.broadcast %224 : vector<1x32xf32> to vector<256x32xf32>
    %226 = arith.addf %223, %225 : vector<256x32xf32>
    %cst_216 = arith.constant 0.000000e+00 : f32
    %227 = vector.broadcast %cst_216 : f32 to vector<256x32xf32>
    %228 = arith.maximumf %226, %227 : vector<256x32xf32>
    %229 = vector.shape_cast %228 : vector<256x32xf32> to vector<16x16x32xf32>
    %c1_217 = arith.constant 1 : index
    %c8_218 = arith.constant 8 : index
    %c0_219 = arith.constant 0 : index
    %230 = vector.load %arg26[%c1_217, %c8_218, %c0_219] : memref<18x25x32xf32, #tpu.memory_space<vmem>>, vector<16x16x32xf32>
    tpu.vector_store %arg26[%c1_217, %c8_218, %c0_219], %229 {strides = array<i32>} : memref<18x25x32xf32, #tpu.memory_space<vmem>>, vector<16x16x32xf32>,
    %cst_220 = arith.constant 0.000000e+00 : f32
    %231 = vector.broadcast %cst_220 : f32 to vector<256x32xf32>
    %c0_221 = arith.constant 0 : index
    %c7_222 = arith.constant 7 : index
    %c0_223 = arith.constant 0 : index
    %232 = vector.load %arg26[%c0_221, %c7_222, %c0_223] : memref<18x25x32xf32, #tpu.memory_space<vmem>>, vector<16x16x32xf32>
    %233 = vector.shape_cast %232 : vector<16x16x32xf32> to vector<256x32xf32>
    %234 = arith.truncf %233 : vector<256x32xf32> to vector<256x32xbf16>
    %c0_224 = arith.constant 0 : index
    %c0_225 = arith.constant 0 : index
    %c0_226 = arith.constant 0 : index
    %235 = vector.load %arg11[%c0_224, %c0_225, %c0_226] : memref<9x32x32xbf16, #tpu.memory_space<vmem>>, vector<1x32x32xbf16>
    %236 = vector.shape_cast %235 : vector<1x32x32xbf16> to vector<32x32xbf16>
    %cst_227 = arith.constant dense<0.000000e+00> : vector<256x32xf32>
    %237 = tpu.matmul %234, %236, %cst_227 {dimension_numbers = #tpu.dot_dimension_numbers<[1], [0], [0], [1], [0, 0, 1, 1], [], []>} : vector<256x32xbf16>, vector<32x32xbf16>, vector<256x32xf32> -> vector<256x32xf32>
    %238 = arith.addf %231, %237 : vector<256x32xf32>
    %c0_228 = arith.constant 0 : index
    %c8_229 = arith.constant 8 : index
    %c0_230 = arith.constant 0 : index
    %239 = vector.load %arg26[%c0_228, %c8_229, %c0_230] : memref<18x25x32xf32, #tpu.memory_space<vmem>>, vector<16x16x32xf32>
    %240 = vector.shape_cast %239 : vector<16x16x32xf32> to vector<256x32xf32>
    %241 = arith.truncf %240 : vector<256x32xf32> to vector<256x32xbf16>
    %c1_231 = arith.constant 1 : index
    %c0_232 = arith.constant 0 : index
    %c0_233 = arith.constant 0 : index
    %242 = vector.load %arg11[%c1_231, %c0_232, %c0_233] : memref<9x32x32xbf16, #tpu.memory_space<vmem>>, vector<1x32x32xbf16>
    %243 = vector.shape_cast %242 : vector<1x32x32xbf16> to vector<32x32xbf16>
    %cst_234 = arith.constant dense<0.000000e+00> : vector<256x32xf32>
    %244 = tpu.matmul %241, %243, %cst_234 {dimension_numbers = #tpu.dot_dimension_numbers<[1], [0], [0], [1], [0, 0, 1, 1], [], []>} : vector<256x32xbf16>, vector<32x32xbf16>, vector<256x32xf32> -> vector<256x32xf32>
    %245 = arith.addf %238, %244 : vector<256x32xf32>
    %c0_235 = arith.constant 0 : index
    %c9_236 = arith.constant 9 : index
    %c0_237 = arith.constant 0 : index
    %246 = vector.load %arg26[%c0_235, %c9_236, %c0_237] : memref<18x25x32xf32, #tpu.memory_space<vmem>>, vector<16x16x32xf32>
    %247 = vector.shape_cast %246 : vector<16x16x32xf32> to vector<256x32xf32>
    %248 = arith.truncf %247 : vector<256x32xf32> to vector<256x32xbf16>
    %c2_238 = arith.constant 2 : index
    %c0_239 = arith.constant 0 : index
    %c0_240 = arith.constant 0 : index
    %249 = vector.load %arg11[%c2_238, %c0_239, %c0_240] : memref<9x32x32xbf16, #tpu.memory_space<vmem>>, vector<1x32x32xbf16>
    %250 = vector.shape_cast %249 : vector<1x32x32xbf16> to vector<32x32xbf16>
    %cst_241 = arith.constant dense<0.000000e+00> : vector<256x32xf32>
    %251 = tpu.matmul %248, %250, %cst_241 {dimension_numbers = #tpu.dot_dimension_numbers<[1], [0], [0], [1], [0, 0, 1, 1], [], []>} : vector<256x32xbf16>, vector<32x32xbf16>, vector<256x32xf32> -> vector<256x32xf32>
    %252 = arith.addf %245, %251 : vector<256x32xf32>
    %c1_242 = arith.constant 1 : index
    %c7_243 = arith.constant 7 : index
    %c0_244 = arith.constant 0 : index
    %253 = vector.load %arg26[%c1_242, %c7_243, %c0_244] : memref<18x25x32xf32, #tpu.memory_space<vmem>>, vector<16x16x32xf32>
    %254 = vector.shape_cast %253 : vector<16x16x32xf32> to vector<256x32xf32>
    %255 = arith.truncf %254 : vector<256x32xf32> to vector<256x32xbf16>
    %c3_245 = arith.constant 3 : index
    %c0_246 = arith.constant 0 : index
    %c0_247 = arith.constant 0 : index
    %256 = vector.load %arg11[%c3_245, %c0_246, %c0_247] : memref<9x32x32xbf16, #tpu.memory_space<vmem>>, vector<1x32x32xbf16>
    %257 = vector.shape_cast %256 : vector<1x32x32xbf16> to vector<32x32xbf16>
    %cst_248 = arith.constant dense<0.000000e+00> : vector<256x32xf32>
    %258 = tpu.matmul %255, %257, %cst_248 {dimension_numbers = #tpu.dot_dimension_numbers<[1], [0], [0], [1], [0, 0, 1, 1], [], []>} : vector<256x32xbf16>, vector<32x32xbf16>, vector<256x32xf32> -> vector<256x32xf32>
    %259 = arith.addf %252, %258 : vector<256x32xf32>
    %c1_249 = arith.constant 1 : index
    %c8_250 = arith.constant 8 : index
    %c0_251 = arith.constant 0 : index
    %260 = vector.load %arg26[%c1_249, %c8_250, %c0_251] : memref<18x25x32xf32, #tpu.memory_space<vmem>>, vector<16x16x32xf32>
    %261 = vector.shape_cast %260 : vector<16x16x32xf32> to vector<256x32xf32>
    %262 = arith.truncf %261 : vector<256x32xf32> to vector<256x32xbf16>
    %c4_252 = arith.constant 4 : index
    %c0_253 = arith.constant 0 : index
    %c0_254 = arith.constant 0 : index
    %263 = vector.load %arg11[%c4_252, %c0_253, %c0_254] : memref<9x32x32xbf16, #tpu.memory_space<vmem>>, vector<1x32x32xbf16>
    %264 = vector.shape_cast %263 : vector<1x32x32xbf16> to vector<32x32xbf16>
    %cst_255 = arith.constant dense<0.000000e+00> : vector<256x32xf32>
    %265 = tpu.matmul %262, %264, %cst_255 {dimension_numbers = #tpu.dot_dimension_numbers<[1], [0], [0], [1], [0, 0, 1, 1], [], []>} : vector<256x32xbf16>, vector<32x32xbf16>, vector<256x32xf32> -> vector<256x32xf32>
    %266 = arith.addf %259, %265 : vector<256x32xf32>
    %c1_256 = arith.constant 1 : index
    %c9_257 = arith.constant 9 : index
    %c0_258 = arith.constant 0 : index
    %267 = vector.load %arg26[%c1_256, %c9_257, %c0_258] : memref<18x25x32xf32, #tpu.memory_space<vmem>>, vector<16x16x32xf32>
    %268 = vector.shape_cast %267 : vector<16x16x32xf32> to vector<256x32xf32>
    %269 = arith.truncf %268 : vector<256x32xf32> to vector<256x32xbf16>
    %c5_259 = arith.constant 5 : index
    %c0_260 = arith.constant 0 : index
    %c0_261 = arith.constant 0 : index
    %270 = vector.load %arg11[%c5_259, %c0_260, %c0_261] : memref<9x32x32xbf16, #tpu.memory_space<vmem>>, vector<1x32x32xbf16>
    %271 = vector.shape_cast %270 : vector<1x32x32xbf16> to vector<32x32xbf16>
    %cst_262 = arith.constant dense<0.000000e+00> : vector<256x32xf32>
    %272 = tpu.matmul %269, %271, %cst_262 {dimension_numbers = #tpu.dot_dimension_numbers<[1], [0], [0], [1], [0, 0, 1, 1], [], []>} : vector<256x32xbf16>, vector<32x32xbf16>, vector<256x32xf32> -> vector<256x32xf32>
    %273 = arith.addf %266, %272 : vector<256x32xf32>
    %c2_263 = arith.constant 2 : index
    %c7_264 = arith.constant 7 : index
    %c0_265 = arith.constant 0 : index
    %274 = vector.load %arg26[%c2_263, %c7_264, %c0_265] : memref<18x25x32xf32, #tpu.memory_space<vmem>>, vector<16x16x32xf32>
    %275 = vector.shape_cast %274 : vector<16x16x32xf32> to vector<256x32xf32>
    %276 = arith.truncf %275 : vector<256x32xf32> to vector<256x32xbf16>
    %c6_266 = arith.constant 6 : index
    %c0_267 = arith.constant 0 : index
    %c0_268 = arith.constant 0 : index
    %277 = vector.load %arg11[%c6_266, %c0_267, %c0_268] : memref<9x32x32xbf16, #tpu.memory_space<vmem>>, vector<1x32x32xbf16>
    %278 = vector.shape_cast %277 : vector<1x32x32xbf16> to vector<32x32xbf16>
    %cst_269 = arith.constant dense<0.000000e+00> : vector<256x32xf32>
    %279 = tpu.matmul %276, %278, %cst_269 {dimension_numbers = #tpu.dot_dimension_numbers<[1], [0], [0], [1], [0, 0, 1, 1], [], []>} : vector<256x32xbf16>, vector<32x32xbf16>, vector<256x32xf32> -> vector<256x32xf32>
    %280 = arith.addf %273, %279 : vector<256x32xf32>
    %c2_270 = arith.constant 2 : index
    %c8_271 = arith.constant 8 : index
    %c0_272 = arith.constant 0 : index
    %281 = vector.load %arg26[%c2_270, %c8_271, %c0_272] : memref<18x25x32xf32, #tpu.memory_space<vmem>>, vector<16x16x32xf32>
    %282 = vector.shape_cast %281 : vector<16x16x32xf32> to vector<256x32xf32>
    %283 = arith.truncf %282 : vector<256x32xf32> to vector<256x32xbf16>
    %c7_273 = arith.constant 7 : index
    %c0_274 = arith.constant 0 : index
    %c0_275 = arith.constant 0 : index
    %284 = vector.load %arg11[%c7_273, %c0_274, %c0_275] : memref<9x32x32xbf16, #tpu.memory_space<vmem>>, vector<1x32x32xbf16>
    %285 = vector.shape_cast %284 : vector<1x32x32xbf16> to vector<32x32xbf16>
    %cst_276 = arith.constant dense<0.000000e+00> : vector<256x32xf32>
    %286 = tpu.matmul %283, %285, %cst_276 {dimension_numbers = #tpu.dot_dimension_numbers<[1], [0], [0], [1], [0, 0, 1, 1], [], []>} : vector<256x32xbf16>, vector<32x32xbf16>, vector<256x32xf32> -> vector<256x32xf32>
    %287 = arith.addf %280, %286 : vector<256x32xf32>
    %c2_277 = arith.constant 2 : index
    %c9_278 = arith.constant 9 : index
    %c0_279 = arith.constant 0 : index
    %288 = vector.load %arg26[%c2_277, %c9_278, %c0_279] : memref<18x25x32xf32, #tpu.memory_space<vmem>>, vector<16x16x32xf32>
    %289 = vector.shape_cast %288 : vector<16x16x32xf32> to vector<256x32xf32>
    %290 = arith.truncf %289 : vector<256x32xf32> to vector<256x32xbf16>
    %c8_280 = arith.constant 8 : index
    %c0_281 = arith.constant 0 : index
    %c0_282 = arith.constant 0 : index
    %291 = vector.load %arg11[%c8_280, %c0_281, %c0_282] : memref<9x32x32xbf16, #tpu.memory_space<vmem>>, vector<1x32x32xbf16>
    %292 = vector.shape_cast %291 : vector<1x32x32xbf16> to vector<32x32xbf16>
    %cst_283 = arith.constant dense<0.000000e+00> : vector<256x32xf32>
    %293 = tpu.matmul %290, %292, %cst_283 {dimension_numbers = #tpu.dot_dimension_numbers<[1], [0], [0], [1], [0, 0, 1, 1], [], []>} : vector<256x32xbf16>, vector<32x32xbf16>, vector<256x32xf32> -> vector<256x32xf32>
    %294 = arith.addf %287, %293 : vector<256x32xf32>
    %c0_284 = arith.constant 0 : index
    %c0_285 = arith.constant 0 : index
    %295 = vector.load %arg12[%c0_284, %c0_285] : memref<1x32xf32, #tpu.memory_space<vmem>>, vector<1x32xf32>
    %296 = vector.broadcast %295 : vector<1x32xf32> to vector<256x32xf32>
    %297 = arith.addf %294, %296 : vector<256x32xf32>
    %cst_286 = arith.constant 0.000000e+00 : f32
    %298 = vector.broadcast %cst_286 : f32 to vector<256x32xf32>
    %299 = arith.maximumf %297, %298 : vector<256x32xf32>
    %300 = arith.addf %157, %299 : vector<256x32xf32>
    %cst_287 = arith.constant 0.000000e+00 : f32
    %301 = vector.broadcast %cst_287 : f32 to vector<256x32xf32>
    %302 = arith.maximumf %300, %301 : vector<256x32xf32>
    %c0_288 = arith.constant 0 : index
    %c0_289 = arith.constant 0 : index
    %303 = vector.load %arg2[%c0_288, %c0_289] : memref<64x256xf32, #tpu.memory_space<vmem>>, vector<64x256xf32>
    %304 = vector.shape_cast %302 : vector<256x32xf32> to vector<16x16x32xf32>
    %c1_290 = arith.constant 1 : index
    %c8_291 = arith.constant 8 : index
    %c0_292 = arith.constant 0 : index
    %305 = vector.load %arg26[%c1_290, %c8_291, %c0_292] : memref<18x25x32xf32, #tpu.memory_space<vmem>>, vector<16x16x32xf32>
    tpu.vector_store %arg26[%c1_290, %c8_291, %c0_292], %304 {strides = array<i32>} : memref<18x25x32xf32, #tpu.memory_space<vmem>>, vector<16x16x32xf32>,
    %cst_293 = arith.constant 0.000000e+00 : f32
    %306 = vector.broadcast %cst_293 : f32 to vector<256x64xf32>
    %c0_294 = arith.constant 0 : index
    %c7_295 = arith.constant 7 : index
    %c0_296 = arith.constant 0 : index
    %307 = vector.load %arg26[%c0_294, %c7_295, %c0_296] : memref<18x25x32xf32, #tpu.memory_space<vmem>>, vector<16x16x32xf32>
    %308 = vector.shape_cast %307 : vector<16x16x32xf32> to vector<256x32xf32>
    %309 = arith.truncf %308 : vector<256x32xf32> to vector<256x32xbf16>
    %c0_297 = arith.constant 0 : index
    %c0_298 = arith.constant 0 : index
    %c0_299 = arith.constant 0 : index
    %310 = vector.load %arg13[%c0_297, %c0_298, %c0_299] : memref<9x32x64xbf16, #tpu.memory_space<vmem>>, vector<1x32x64xbf16>
    %311 = vector.shape_cast %310 : vector<1x32x64xbf16> to vector<32x64xbf16>
    %cst_300 = arith.constant dense<0.000000e+00> : vector<256x64xf32>
    %312 = tpu.matmul %309, %311, %cst_300 {dimension_numbers = #tpu.dot_dimension_numbers<[1], [0], [0], [1], [0, 0, 1, 1], [], []>} : vector<256x32xbf16>, vector<32x64xbf16>, vector<256x64xf32> -> vector<256x64xf32>
    %313 = arith.addf %306, %312 : vector<256x64xf32>
    %c0_301 = arith.constant 0 : index
    %c8_302 = arith.constant 8 : index
    %c0_303 = arith.constant 0 : index
    %314 = vector.load %arg26[%c0_301, %c8_302, %c0_303] : memref<18x25x32xf32, #tpu.memory_space<vmem>>, vector<16x16x32xf32>
    %315 = vector.shape_cast %314 : vector<16x16x32xf32> to vector<256x32xf32>
    %316 = arith.truncf %315 : vector<256x32xf32> to vector<256x32xbf16>
    %c1_304 = arith.constant 1 : index
    %c0_305 = arith.constant 0 : index
    %c0_306 = arith.constant 0 : index
    %317 = vector.load %arg13[%c1_304, %c0_305, %c0_306] : memref<9x32x64xbf16, #tpu.memory_space<vmem>>, vector<1x32x64xbf16>
    %318 = vector.shape_cast %317 : vector<1x32x64xbf16> to vector<32x64xbf16>
    %cst_307 = arith.constant dense<0.000000e+00> : vector<256x64xf32>
    %319 = tpu.matmul %316, %318, %cst_307 {dimension_numbers = #tpu.dot_dimension_numbers<[1], [0], [0], [1], [0, 0, 1, 1], [], []>} : vector<256x32xbf16>, vector<32x64xbf16>, vector<256x64xf32> -> vector<256x64xf32>
    %320 = arith.addf %313, %319 : vector<256x64xf32>
    %c0_308 = arith.constant 0 : index
    %c9_309 = arith.constant 9 : index
    %c0_310 = arith.constant 0 : index
    %321 = vector.load %arg26[%c0_308, %c9_309, %c0_310] : memref<18x25x32xf32, #tpu.memory_space<vmem>>, vector<16x16x32xf32>
    %322 = vector.shape_cast %321 : vector<16x16x32xf32> to vector<256x32xf32>
    %323 = arith.truncf %322 : vector<256x32xf32> to vector<256x32xbf16>
    %c2_311 = arith.constant 2 : index
    %c0_312 = arith.constant 0 : index
    %c0_313 = arith.constant 0 : index
    %324 = vector.load %arg13[%c2_311, %c0_312, %c0_313] : memref<9x32x64xbf16, #tpu.memory_space<vmem>>, vector<1x32x64xbf16>
    %325 = vector.shape_cast %324 : vector<1x32x64xbf16> to vector<32x64xbf16>
    %cst_314 = arith.constant dense<0.000000e+00> : vector<256x64xf32>
    %326 = tpu.matmul %323, %325, %cst_314 {dimension_numbers = #tpu.dot_dimension_numbers<[1], [0], [0], [1], [0, 0, 1, 1], [], []>} : vector<256x32xbf16>, vector<32x64xbf16>, vector<256x64xf32> -> vector<256x64xf32>
    %327 = arith.addf %320, %326 : vector<256x64xf32>
    %c1_315 = arith.constant 1 : index
    %c7_316 = arith.constant 7 : index
    %c0_317 = arith.constant 0 : index
    %328 = vector.load %arg26[%c1_315, %c7_316, %c0_317] : memref<18x25x32xf32, #tpu.memory_space<vmem>>, vector<16x16x32xf32>
    %329 = vector.shape_cast %328 : vector<16x16x32xf32> to vector<256x32xf32>
    %330 = arith.truncf %329 : vector<256x32xf32> to vector<256x32xbf16>
    %c3_318 = arith.constant 3 : index
    %c0_319 = arith.constant 0 : index
    %c0_320 = arith.constant 0 : index
    %331 = vector.load %arg13[%c3_318, %c0_319, %c0_320] : memref<9x32x64xbf16, #tpu.memory_space<vmem>>, vector<1x32x64xbf16>
    %332 = vector.shape_cast %331 : vector<1x32x64xbf16> to vector<32x64xbf16>
    %cst_321 = arith.constant dense<0.000000e+00> : vector<256x64xf32>
    %333 = tpu.matmul %330, %332, %cst_321 {dimension_numbers = #tpu.dot_dimension_numbers<[1], [0], [0], [1], [0, 0, 1, 1], [], []>} : vector<256x32xbf16>, vector<32x64xbf16>, vector<256x64xf32> -> vector<256x64xf32>
    %334 = arith.addf %327, %333 : vector<256x64xf32>
    %c1_322 = arith.constant 1 : index
    %c8_323 = arith.constant 8 : index
    %c0_324 = arith.constant 0 : index
    %335 = vector.load %arg26[%c1_322, %c8_323, %c0_324] : memref<18x25x32xf32, #tpu.memory_space<vmem>>, vector<16x16x32xf32>
    %336 = vector.shape_cast %335 : vector<16x16x32xf32> to vector<256x32xf32>
    %337 = arith.truncf %336 : vector<256x32xf32> to vector<256x32xbf16>
    %c4_325 = arith.constant 4 : index
    %c0_326 = arith.constant 0 : index
    %c0_327 = arith.constant 0 : index
    %338 = vector.load %arg13[%c4_325, %c0_326, %c0_327] : memref<9x32x64xbf16, #tpu.memory_space<vmem>>, vector<1x32x64xbf16>
    %339 = vector.shape_cast %338 : vector<1x32x64xbf16> to vector<32x64xbf16>
    %cst_328 = arith.constant dense<0.000000e+00> : vector<256x64xf32>
    %340 = tpu.matmul %337, %339, %cst_328 {dimension_numbers = #tpu.dot_dimension_numbers<[1], [0], [0], [1], [0, 0, 1, 1], [], []>} : vector<256x32xbf16>, vector<32x64xbf16>, vector<256x64xf32> -> vector<256x64xf32>
    %341 = arith.addf %334, %340 : vector<256x64xf32>
    %c1_329 = arith.constant 1 : index
    %c9_330 = arith.constant 9 : index
    %c0_331 = arith.constant 0 : index
    %342 = vector.load %arg26[%c1_329, %c9_330, %c0_331] : memref<18x25x32xf32, #tpu.memory_space<vmem>>, vector<16x16x32xf32>
    %343 = vector.shape_cast %342 : vector<16x16x32xf32> to vector<256x32xf32>
    %344 = arith.truncf %343 : vector<256x32xf32> to vector<256x32xbf16>
    %c5_332 = arith.constant 5 : index
    %c0_333 = arith.constant 0 : index
    %c0_334 = arith.constant 0 : index
    %345 = vector.load %arg13[%c5_332, %c0_333, %c0_334] : memref<9x32x64xbf16, #tpu.memory_space<vmem>>, vector<1x32x64xbf16>
    %346 = vector.shape_cast %345 : vector<1x32x64xbf16> to vector<32x64xbf16>
    %cst_335 = arith.constant dense<0.000000e+00> : vector<256x64xf32>
    %347 = tpu.matmul %344, %346, %cst_335 {dimension_numbers = #tpu.dot_dimension_numbers<[1], [0], [0], [1], [0, 0, 1, 1], [], []>} : vector<256x32xbf16>, vector<32x64xbf16>, vector<256x64xf32> -> vector<256x64xf32>
    %348 = arith.addf %341, %347 : vector<256x64xf32>
    %c2_336 = arith.constant 2 : index
    %c7_337 = arith.constant 7 : index
    %c0_338 = arith.constant 0 : index
    %349 = vector.load %arg26[%c2_336, %c7_337, %c0_338] : memref<18x25x32xf32, #tpu.memory_space<vmem>>, vector<16x16x32xf32>
    %350 = vector.shape_cast %349 : vector<16x16x32xf32> to vector<256x32xf32>
    %351 = arith.truncf %350 : vector<256x32xf32> to vector<256x32xbf16>
    %c6_339 = arith.constant 6 : index
    %c0_340 = arith.constant 0 : index
    %c0_341 = arith.constant 0 : index
    %352 = vector.load %arg13[%c6_339, %c0_340, %c0_341] : memref<9x32x64xbf16, #tpu.memory_space<vmem>>, vector<1x32x64xbf16>
    %353 = vector.shape_cast %352 : vector<1x32x64xbf16> to vector<32x64xbf16>
    %cst_342 = arith.constant dense<0.000000e+00> : vector<256x64xf32>
    %354 = tpu.matmul %351, %353, %cst_342 {dimension_numbers = #tpu.dot_dimension_numbers<[1], [0], [0], [1], [0, 0, 1, 1], [], []>} : vector<256x32xbf16>, vector<32x64xbf16>, vector<256x64xf32> -> vector<256x64xf32>
    %355 = arith.addf %348, %354 : vector<256x64xf32>
    %c2_343 = arith.constant 2 : index
    %c8_344 = arith.constant 8 : index
    %c0_345 = arith.constant 0 : index
    %356 = vector.load %arg26[%c2_343, %c8_344, %c0_345] : memref<18x25x32xf32, #tpu.memory_space<vmem>>, vector<16x16x32xf32>
    %357 = vector.shape_cast %356 : vector<16x16x32xf32> to vector<256x32xf32>
    %358 = arith.truncf %357 : vector<256x32xf32> to vector<256x32xbf16>
    %c7_346 = arith.constant 7 : index
    %c0_347 = arith.constant 0 : index
    %c0_348 = arith.constant 0 : index
    %359 = vector.load %arg13[%c7_346, %c0_347, %c0_348] : memref<9x32x64xbf16, #tpu.memory_space<vmem>>, vector<1x32x64xbf16>
    %360 = vector.shape_cast %359 : vector<1x32x64xbf16> to vector<32x64xbf16>
    %cst_349 = arith.constant dense<0.000000e+00> : vector<256x64xf32>
    %361 = tpu.matmul %358, %360, %cst_349 {dimension_numbers = #tpu.dot_dimension_numbers<[1], [0], [0], [1], [0, 0, 1, 1], [], []>} : vector<256x32xbf16>, vector<32x64xbf16>, vector<256x64xf32> -> vector<256x64xf32>
    %362 = arith.addf %355, %361 : vector<256x64xf32>
    %c2_350 = arith.constant 2 : index
    %c9_351 = arith.constant 9 : index
    %c0_352 = arith.constant 0 : index
    %363 = vector.load %arg26[%c2_350, %c9_351, %c0_352] : memref<18x25x32xf32, #tpu.memory_space<vmem>>, vector<16x16x32xf32>
    %364 = vector.shape_cast %363 : vector<16x16x32xf32> to vector<256x32xf32>
    %365 = arith.truncf %364 : vector<256x32xf32> to vector<256x32xbf16>
    %c8_353 = arith.constant 8 : index
    %c0_354 = arith.constant 0 : index
    %c0_355 = arith.constant 0 : index
    %366 = vector.load %arg13[%c8_353, %c0_354, %c0_355] : memref<9x32x64xbf16, #tpu.memory_space<vmem>>, vector<1x32x64xbf16>
    %367 = vector.shape_cast %366 : vector<1x32x64xbf16> to vector<32x64xbf16>
    %cst_356 = arith.constant dense<0.000000e+00> : vector<256x64xf32>
    %368 = tpu.matmul %365, %367, %cst_356 {dimension_numbers = #tpu.dot_dimension_numbers<[1], [0], [0], [1], [0, 0, 1, 1], [], []>} : vector<256x32xbf16>, vector<32x64xbf16>, vector<256x64xf32> -> vector<256x64xf32>
    %369 = arith.addf %362, %368 : vector<256x64xf32>
    %cst_357 = arith.constant dense<0.000000e+00> : vector<64x64xf32>
    %370 = tpu.matmul %303, %369, %cst_357 {dimension_numbers = #tpu.dot_dimension_numbers<[1], [0], [0], [1], [0, 0, 1, 1], [], []>} : vector<64x256xf32>, vector<256x64xf32>, vector<64x64xf32> -> vector<64x64xf32>
    %c0_358 = arith.constant 0 : index
    %c0_359 = arith.constant 0 : index
    %371 = vector.load %arg14[%c0_358, %c0_359] : memref<1x64xf32, #tpu.memory_space<vmem>>, vector<1x64xf32>
    %372 = vector.broadcast %371 : vector<1x64xf32> to vector<64x64xf32>
    %373 = arith.addf %370, %372 : vector<64x64xf32>
    %cst_360 = arith.constant 0.000000e+00 : f32
    %374 = vector.broadcast %cst_360 : f32 to vector<64x64xf32>
    %375 = arith.maximumf %373, %374 : vector<64x64xf32>
    %376 = vector.shape_cast %375 : vector<64x64xf32> to vector<8x8x64xf32>
    %c1_361 = arith.constant 1 : index
    %c8_362 = arith.constant 8 : index
    %c0_363 = arith.constant 0 : index
    %377 = vector.load %arg27[%c1_361, %c8_362, %c0_363] : memref<10x17x64xf32, #tpu.memory_space<vmem>>, vector<8x8x64xf32>
    tpu.vector_store %arg27[%c1_361, %c8_362, %c0_363], %376 {strides = array<i32>} : memref<10x17x64xf32, #tpu.memory_space<vmem>>, vector<8x8x64xf32>,
    %cst_364 = arith.constant 0.000000e+00 : f32
    %378 = vector.broadcast %cst_364 : f32 to vector<64x64xf32>
    %c0_365 = arith.constant 0 : index
    %c7_366 = arith.constant 7 : index
    %c0_367 = arith.constant 0 : index
    %379 = vector.load %arg27[%c0_365, %c7_366, %c0_367] : memref<10x17x64xf32, #tpu.memory_space<vmem>>, vector<8x8x64xf32>
    %380 = vector.shape_cast %379 : vector<8x8x64xf32> to vector<64x64xf32>
    %381 = arith.truncf %380 : vector<64x64xf32> to vector<64x64xbf16>
    %c0_368 = arith.constant 0 : index
    %c0_369 = arith.constant 0 : index
    %c0_370 = arith.constant 0 : index
    %382 = vector.load %arg17[%c0_368, %c0_369, %c0_370] : memref<9x64x64xbf16, #tpu.memory_space<vmem>>, vector<1x64x64xbf16>
    %383 = vector.shape_cast %382 : vector<1x64x64xbf16> to vector<64x64xbf16>
    %cst_371 = arith.constant dense<0.000000e+00> : vector<64x64xf32>
    %384 = tpu.matmul %381, %383, %cst_371 {dimension_numbers = #tpu.dot_dimension_numbers<[1], [0], [0], [1], [0, 0, 1, 1], [], []>} : vector<64x64xbf16>, vector<64x64xbf16>, vector<64x64xf32> -> vector<64x64xf32>
    %385 = arith.addf %378, %384 : vector<64x64xf32>
    %c0_372 = arith.constant 0 : index
    %c8_373 = arith.constant 8 : index
    %c0_374 = arith.constant 0 : index
    %386 = vector.load %arg27[%c0_372, %c8_373, %c0_374] : memref<10x17x64xf32, #tpu.memory_space<vmem>>, vector<8x8x64xf32>
    %387 = vector.shape_cast %386 : vector<8x8x64xf32> to vector<64x64xf32>
    %388 = arith.truncf %387 : vector<64x64xf32> to vector<64x64xbf16>
    %c1_375 = arith.constant 1 : index
    %c0_376 = arith.constant 0 : index
    %c0_377 = arith.constant 0 : index
    %389 = vector.load %arg17[%c1_375, %c0_376, %c0_377] : memref<9x64x64xbf16, #tpu.memory_space<vmem>>, vector<1x64x64xbf16>
    %390 = vector.shape_cast %389 : vector<1x64x64xbf16> to vector<64x64xbf16>
    %cst_378 = arith.constant dense<0.000000e+00> : vector<64x64xf32>
    %391 = tpu.matmul %388, %390, %cst_378 {dimension_numbers = #tpu.dot_dimension_numbers<[1], [0], [0], [1], [0, 0, 1, 1], [], []>} : vector<64x64xbf16>, vector<64x64xbf16>, vector<64x64xf32> -> vector<64x64xf32>
    %392 = arith.addf %385, %391 : vector<64x64xf32>
    %c0_379 = arith.constant 0 : index
    %c9_380 = arith.constant 9 : index
    %c0_381 = arith.constant 0 : index
    %393 = vector.load %arg27[%c0_379, %c9_380, %c0_381] : memref<10x17x64xf32, #tpu.memory_space<vmem>>, vector<8x8x64xf32>
    %394 = vector.shape_cast %393 : vector<8x8x64xf32> to vector<64x64xf32>
    %395 = arith.truncf %394 : vector<64x64xf32> to vector<64x64xbf16>
    %c2_382 = arith.constant 2 : index
    %c0_383 = arith.constant 0 : index
    %c0_384 = arith.constant 0 : index
    %396 = vector.load %arg17[%c2_382, %c0_383, %c0_384] : memref<9x64x64xbf16, #tpu.memory_space<vmem>>, vector<1x64x64xbf16>
    %397 = vector.shape_cast %396 : vector<1x64x64xbf16> to vector<64x64xbf16>
    %cst_385 = arith.constant dense<0.000000e+00> : vector<64x64xf32>
    %398 = tpu.matmul %395, %397, %cst_385 {dimension_numbers = #tpu.dot_dimension_numbers<[1], [0], [0], [1], [0, 0, 1, 1], [], []>} : vector<64x64xbf16>, vector<64x64xbf16>, vector<64x64xf32> -> vector<64x64xf32>
    %399 = arith.addf %392, %398 : vector<64x64xf32>
    %c1_386 = arith.constant 1 : index
    %c7_387 = arith.constant 7 : index
    %c0_388 = arith.constant 0 : index
    %400 = vector.load %arg27[%c1_386, %c7_387, %c0_388] : memref<10x17x64xf32, #tpu.memory_space<vmem>>, vector<8x8x64xf32>
    %401 = vector.shape_cast %400 : vector<8x8x64xf32> to vector<64x64xf32>
    %402 = arith.truncf %401 : vector<64x64xf32> to vector<64x64xbf16>
    %c3_389 = arith.constant 3 : index
    %c0_390 = arith.constant 0 : index
    %c0_391 = arith.constant 0 : index
    %403 = vector.load %arg17[%c3_389, %c0_390, %c0_391] : memref<9x64x64xbf16, #tpu.memory_space<vmem>>, vector<1x64x64xbf16>
    %404 = vector.shape_cast %403 : vector<1x64x64xbf16> to vector<64x64xbf16>
    %cst_392 = arith.constant dense<0.000000e+00> : vector<64x64xf32>
    %405 = tpu.matmul %402, %404, %cst_392 {dimension_numbers = #tpu.dot_dimension_numbers<[1], [0], [0], [1], [0, 0, 1, 1], [], []>} : vector<64x64xbf16>, vector<64x64xbf16>, vector<64x64xf32> -> vector<64x64xf32>
    %406 = arith.addf %399, %405 : vector<64x64xf32>
    %c1_393 = arith.constant 1 : index
    %c8_394 = arith.constant 8 : index
    %c0_395 = arith.constant 0 : index
    %407 = vector.load %arg27[%c1_393, %c8_394, %c0_395] : memref<10x17x64xf32, #tpu.memory_space<vmem>>, vector<8x8x64xf32>
    %408 = vector.shape_cast %407 : vector<8x8x64xf32> to vector<64x64xf32>
    %409 = arith.truncf %408 : vector<64x64xf32> to vector<64x64xbf16>
    %c4_396 = arith.constant 4 : index
    %c0_397 = arith.constant 0 : index
    %c0_398 = arith.constant 0 : index
    %410 = vector.load %arg17[%c4_396, %c0_397, %c0_398] : memref<9x64x64xbf16, #tpu.memory_space<vmem>>, vector<1x64x64xbf16>
    %411 = vector.shape_cast %410 : vector<1x64x64xbf16> to vector<64x64xbf16>
    %cst_399 = arith.constant dense<0.000000e+00> : vector<64x64xf32>
    %412 = tpu.matmul %409, %411, %cst_399 {dimension_numbers = #tpu.dot_dimension_numbers<[1], [0], [0], [1], [0, 0, 1, 1], [], []>} : vector<64x64xbf16>, vector<64x64xbf16>, vector<64x64xf32> -> vector<64x64xf32>
    %413 = arith.addf %406, %412 : vector<64x64xf32>
    %c1_400 = arith.constant 1 : index
    %c9_401 = arith.constant 9 : index
    %c0_402 = arith.constant 0 : index
    %414 = vector.load %arg27[%c1_400, %c9_401, %c0_402] : memref<10x17x64xf32, #tpu.memory_space<vmem>>, vector<8x8x64xf32>
    %415 = vector.shape_cast %414 : vector<8x8x64xf32> to vector<64x64xf32>
    %416 = arith.truncf %415 : vector<64x64xf32> to vector<64x64xbf16>
    %c5_403 = arith.constant 5 : index
    %c0_404 = arith.constant 0 : index
    %c0_405 = arith.constant 0 : index
    %417 = vector.load %arg17[%c5_403, %c0_404, %c0_405] : memref<9x64x64xbf16, #tpu.memory_space<vmem>>, vector<1x64x64xbf16>
    %418 = vector.shape_cast %417 : vector<1x64x64xbf16> to vector<64x64xbf16>
    %cst_406 = arith.constant dense<0.000000e+00> : vector<64x64xf32>
    %419 = tpu.matmul %416, %418, %cst_406 {dimension_numbers = #tpu.dot_dimension_numbers<[1], [0], [0], [1], [0, 0, 1, 1], [], []>} : vector<64x64xbf16>, vector<64x64xbf16>, vector<64x64xf32> -> vector<64x64xf32>
    %420 = arith.addf %413, %419 : vector<64x64xf32>
    %c2_407 = arith.constant 2 : index
    %c7_408 = arith.constant 7 : index
    %c0_409 = arith.constant 0 : index
    %421 = vector.load %arg27[%c2_407, %c7_408, %c0_409] : memref<10x17x64xf32, #tpu.memory_space<vmem>>, vector<8x8x64xf32>
    %422 = vector.shape_cast %421 : vector<8x8x64xf32> to vector<64x64xf32>
    %423 = arith.truncf %422 : vector<64x64xf32> to vector<64x64xbf16>
    %c6_410 = arith.constant 6 : index
    %c0_411 = arith.constant 0 : index
    %c0_412 = arith.constant 0 : index
    %424 = vector.load %arg17[%c6_410, %c0_411, %c0_412] : memref<9x64x64xbf16, #tpu.memory_space<vmem>>, vector<1x64x64xbf16>
    %425 = vector.shape_cast %424 : vector<1x64x64xbf16> to vector<64x64xbf16>
    %cst_413 = arith.constant dense<0.000000e+00> : vector<64x64xf32>
    %426 = tpu.matmul %423, %425, %cst_413 {dimension_numbers = #tpu.dot_dimension_numbers<[1], [0], [0], [1], [0, 0, 1, 1], [], []>} : vector<64x64xbf16>, vector<64x64xbf16>, vector<64x64xf32> -> vector<64x64xf32>
    %427 = arith.addf %420, %426 : vector<64x64xf32>
    %c2_414 = arith.constant 2 : index
    %c8_415 = arith.constant 8 : index
    %c0_416 = arith.constant 0 : index
    %428 = vector.load %arg27[%c2_414, %c8_415, %c0_416] : memref<10x17x64xf32, #tpu.memory_space<vmem>>, vector<8x8x64xf32>
    %429 = vector.shape_cast %428 : vector<8x8x64xf32> to vector<64x64xf32>
    %430 = arith.truncf %429 : vector<64x64xf32> to vector<64x64xbf16>
    %c7_417 = arith.constant 7 : index
    %c0_418 = arith.constant 0 : index
    %c0_419 = arith.constant 0 : index
    %431 = vector.load %arg17[%c7_417, %c0_418, %c0_419] : memref<9x64x64xbf16, #tpu.memory_space<vmem>>, vector<1x64x64xbf16>
    %432 = vector.shape_cast %431 : vector<1x64x64xbf16> to vector<64x64xbf16>
    %cst_420 = arith.constant dense<0.000000e+00> : vector<64x64xf32>
    %433 = tpu.matmul %430, %432, %cst_420 {dimension_numbers = #tpu.dot_dimension_numbers<[1], [0], [0], [1], [0, 0, 1, 1], [], []>} : vector<64x64xbf16>, vector<64x64xbf16>, vector<64x64xf32> -> vector<64x64xf32>
    %434 = arith.addf %427, %433 : vector<64x64xf32>
    %c2_421 = arith.constant 2 : index
    %c9_422 = arith.constant 9 : index
    %c0_423 = arith.constant 0 : index
    %435 = vector.load %arg27[%c2_421, %c9_422, %c0_423] : memref<10x17x64xf32, #tpu.memory_space<vmem>>, vector<8x8x64xf32>
    %436 = vector.shape_cast %435 : vector<8x8x64xf32> to vector<64x64xf32>
    %437 = arith.truncf %436 : vector<64x64xf32> to vector<64x64xbf16>
    %c8_424 = arith.constant 8 : index
    %c0_425 = arith.constant 0 : index
    %c0_426 = arith.constant 0 : index
    %438 = vector.load %arg17[%c8_424, %c0_425, %c0_426] : memref<9x64x64xbf16, #tpu.memory_space<vmem>>, vector<1x64x64xbf16>
    %439 = vector.shape_cast %438 : vector<1x64x64xbf16> to vector<64x64xbf16>
    %cst_427 = arith.constant dense<0.000000e+00> : vector<64x64xf32>
    %440 = tpu.matmul %437, %439, %cst_427 {dimension_numbers = #tpu.dot_dimension_numbers<[1], [0], [0], [1], [0, 0, 1, 1], [], []>} : vector<64x64xbf16>, vector<64x64xbf16>, vector<64x64xf32> -> vector<64x64xf32>
    %441 = arith.addf %434, %440 : vector<64x64xf32>
    %c0_428 = arith.constant 0 : index
    %c0_429 = arith.constant 0 : index
    %442 = vector.load %arg18[%c0_428, %c0_429] : memref<1x64xf32, #tpu.memory_space<vmem>>, vector<1x64xf32>
    %443 = vector.broadcast %442 : vector<1x64xf32> to vector<64x64xf32>
    %444 = arith.addf %441, %443 : vector<64x64xf32>
    %cst_430 = arith.constant 0.000000e+00 : f32
    %445 = vector.broadcast %cst_430 : f32 to vector<64x64xf32>
    %446 = arith.maximumf %444, %445 : vector<64x64xf32>
    %cst_431 = arith.constant dense<0.000000e+00> : vector<64x32xf32>
    %447 = tpu.matmul %303, %302, %cst_431 {dimension_numbers = #tpu.dot_dimension_numbers<[1], [0], [0], [1], [0, 0, 1, 1], [], []>} : vector<64x256xf32>, vector<256x32xf32>, vector<64x32xf32> -> vector<64x32xf32>
    %448 = arith.truncf %447 : vector<64x32xf32> to vector<64x32xbf16>
    %c0_432 = arith.constant 0 : index
    %c0_433 = arith.constant 0 : index
    %449 = vector.load %arg15[%c0_432, %c0_433] : memref<32x64xbf16, #tpu.memory_space<vmem>>, vector<32x64xbf16>
    %cst_434 = arith.constant dense<0.000000e+00> : vector<64x64xf32>
    %450 = tpu.matmul %448, %449, %cst_434 {dimension_numbers = #tpu.dot_dimension_numbers<[1], [0], [0], [1], [0, 0, 1, 1], [], []>} : vector<64x32xbf16>, vector<32x64xbf16>, vector<64x64xf32> -> vector<64x64xf32>
    %c0_435 = arith.constant 0 : index
    %c0_436 = arith.constant 0 : index
    %451 = vector.load %arg16[%c0_435, %c0_436] : memref<1x64xf32, #tpu.memory_space<vmem>>, vector<1x64xf32>
    %452 = vector.broadcast %451 : vector<1x64xf32> to vector<64x64xf32>
    %453 = arith.addf %450, %452 : vector<64x64xf32>
    %454 = arith.addf %453, %446 : vector<64x64xf32>
    %cst_437 = arith.constant 0.000000e+00 : f32
    %455 = vector.broadcast %cst_437 : f32 to vector<64x64xf32>
    %456 = arith.maximumf %454, %455 : vector<64x64xf32>
    %457 = vector.shape_cast %456 : vector<64x64xf32> to vector<8x8x64xf32>
    %c1_438 = arith.constant 1 : index
    %c8_439 = arith.constant 8 : index
    %c0_440 = arith.constant 0 : index
    %458 = vector.load %arg27[%c1_438, %c8_439, %c0_440] : memref<10x17x64xf32, #tpu.memory_space<vmem>>, vector<8x8x64xf32>
    tpu.vector_store %arg27[%c1_438, %c8_439, %c0_440], %457 {strides = array<i32>} : memref<10x17x64xf32, #tpu.memory_space<vmem>>, vector<8x8x64xf32>,
    %cst_441 = arith.constant 0.000000e+00 : f32
    %459 = vector.broadcast %cst_441 : f32 to vector<64x64xf32>
    %c0_442 = arith.constant 0 : index
    %c7_443 = arith.constant 7 : index
    %c0_444 = arith.constant 0 : index
    %460 = vector.load %arg27[%c0_442, %c7_443, %c0_444] : memref<10x17x64xf32, #tpu.memory_space<vmem>>, vector<8x8x64xf32>
    %461 = vector.shape_cast %460 : vector<8x8x64xf32> to vector<64x64xf32>
    %462 = arith.truncf %461 : vector<64x64xf32> to vector<64x64xbf16>
    %c0_445 = arith.constant 0 : index
    %c0_446 = arith.constant 0 : index
    %c0_447 = arith.constant 0 : index
    %463 = vector.load %arg19[%c0_445, %c0_446, %c0_447] : memref<9x64x64xbf16, #tpu.memory_space<vmem>>, vector<1x64x64xbf16>
    %464 = vector.shape_cast %463 : vector<1x64x64xbf16> to vector<64x64xbf16>
    %cst_448 = arith.constant dense<0.000000e+00> : vector<64x64xf32>
    %465 = tpu.matmul %462, %464, %cst_448 {dimension_numbers = #tpu.dot_dimension_numbers<[1], [0], [0], [1], [0, 0, 1, 1], [], []>} : vector<64x64xbf16>, vector<64x64xbf16>, vector<64x64xf32> -> vector<64x64xf32>
    %466 = arith.addf %459, %465 : vector<64x64xf32>
    %c0_449 = arith.constant 0 : index
    %c8_450 = arith.constant 8 : index
    %c0_451 = arith.constant 0 : index
    %467 = vector.load %arg27[%c0_449, %c8_450, %c0_451] : memref<10x17x64xf32, #tpu.memory_space<vmem>>, vector<8x8x64xf32>
    %468 = vector.shape_cast %467 : vector<8x8x64xf32> to vector<64x64xf32>
    %469 = arith.truncf %468 : vector<64x64xf32> to vector<64x64xbf16>
    %c1_452 = arith.constant 1 : index
    %c0_453 = arith.constant 0 : index
    %c0_454 = arith.constant 0 : index
    %470 = vector.load %arg19[%c1_452, %c0_453, %c0_454] : memref<9x64x64xbf16, #tpu.memory_space<vmem>>, vector<1x64x64xbf16>
    %471 = vector.shape_cast %470 : vector<1x64x64xbf16> to vector<64x64xbf16>
    %cst_455 = arith.constant dense<0.000000e+00> : vector<64x64xf32>
    %472 = tpu.matmul %469, %471, %cst_455 {dimension_numbers = #tpu.dot_dimension_numbers<[1], [0], [0], [1], [0, 0, 1, 1], [], []>} : vector<64x64xbf16>, vector<64x64xbf16>, vector<64x64xf32> -> vector<64x64xf32>
    %473 = arith.addf %466, %472 : vector<64x64xf32>
    %c0_456 = arith.constant 0 : index
    %c9_457 = arith.constant 9 : index
    %c0_458 = arith.constant 0 : index
    %474 = vector.load %arg27[%c0_456, %c9_457, %c0_458] : memref<10x17x64xf32, #tpu.memory_space<vmem>>, vector<8x8x64xf32>
    %475 = vector.shape_cast %474 : vector<8x8x64xf32> to vector<64x64xf32>
    %476 = arith.truncf %475 : vector<64x64xf32> to vector<64x64xbf16>
    %c2_459 = arith.constant 2 : index
    %c0_460 = arith.constant 0 : index
    %c0_461 = arith.constant 0 : index
    %477 = vector.load %arg19[%c2_459, %c0_460, %c0_461] : memref<9x64x64xbf16, #tpu.memory_space<vmem>>, vector<1x64x64xbf16>
    %478 = vector.shape_cast %477 : vector<1x64x64xbf16> to vector<64x64xbf16>
    %cst_462 = arith.constant dense<0.000000e+00> : vector<64x64xf32>
    %479 = tpu.matmul %476, %478, %cst_462 {dimension_numbers = #tpu.dot_dimension_numbers<[1], [0], [0], [1], [0, 0, 1, 1], [], []>} : vector<64x64xbf16>, vector<64x64xbf16>, vector<64x64xf32> -> vector<64x64xf32>
    %480 = arith.addf %473, %479 : vector<64x64xf32>
    %c1_463 = arith.constant 1 : index
    %c7_464 = arith.constant 7 : index
    %c0_465 = arith.constant 0 : index
    %481 = vector.load %arg27[%c1_463, %c7_464, %c0_465] : memref<10x17x64xf32, #tpu.memory_space<vmem>>, vector<8x8x64xf32>
    %482 = vector.shape_cast %481 : vector<8x8x64xf32> to vector<64x64xf32>
    %483 = arith.truncf %482 : vector<64x64xf32> to vector<64x64xbf16>
    %c3_466 = arith.constant 3 : index
    %c0_467 = arith.constant 0 : index
    %c0_468 = arith.constant 0 : index
    %484 = vector.load %arg19[%c3_466, %c0_467, %c0_468] : memref<9x64x64xbf16, #tpu.memory_space<vmem>>, vector<1x64x64xbf16>
    %485 = vector.shape_cast %484 : vector<1x64x64xbf16> to vector<64x64xbf16>
    %cst_469 = arith.constant dense<0.000000e+00> : vector<64x64xf32>
    %486 = tpu.matmul %483, %485, %cst_469 {dimension_numbers = #tpu.dot_dimension_numbers<[1], [0], [0], [1], [0, 0, 1, 1], [], []>} : vector<64x64xbf16>, vector<64x64xbf16>, vector<64x64xf32> -> vector<64x64xf32>
    %487 = arith.addf %480, %486 : vector<64x64xf32>
    %c1_470 = arith.constant 1 : index
    %c8_471 = arith.constant 8 : index
    %c0_472 = arith.constant 0 : index
    %488 = vector.load %arg27[%c1_470, %c8_471, %c0_472] : memref<10x17x64xf32, #tpu.memory_space<vmem>>, vector<8x8x64xf32>
    %489 = vector.shape_cast %488 : vector<8x8x64xf32> to vector<64x64xf32>
    %490 = arith.truncf %489 : vector<64x64xf32> to vector<64x64xbf16>
    %c4_473 = arith.constant 4 : index
    %c0_474 = arith.constant 0 : index
    %c0_475 = arith.constant 0 : index
    %491 = vector.load %arg19[%c4_473, %c0_474, %c0_475] : memref<9x64x64xbf16, #tpu.memory_space<vmem>>, vector<1x64x64xbf16>
    %492 = vector.shape_cast %491 : vector<1x64x64xbf16> to vector<64x64xbf16>
    %cst_476 = arith.constant dense<0.000000e+00> : vector<64x64xf32>
    %493 = tpu.matmul %490, %492, %cst_476 {dimension_numbers = #tpu.dot_dimension_numbers<[1], [0], [0], [1], [0, 0, 1, 1], [], []>} : vector<64x64xbf16>, vector<64x64xbf16>, vector<64x64xf32> -> vector<64x64xf32>
    %494 = arith.addf %487, %493 : vector<64x64xf32>
    %c1_477 = arith.constant 1 : index
    %c9_478 = arith.constant 9 : index
    %c0_479 = arith.constant 0 : index
    %495 = vector.load %arg27[%c1_477, %c9_478, %c0_479] : memref<10x17x64xf32, #tpu.memory_space<vmem>>, vector<8x8x64xf32>
    %496 = vector.shape_cast %495 : vector<8x8x64xf32> to vector<64x64xf32>
    %497 = arith.truncf %496 : vector<64x64xf32> to vector<64x64xbf16>
    %c5_480 = arith.constant 5 : index
    %c0_481 = arith.constant 0 : index
    %c0_482 = arith.constant 0 : index
    %498 = vector.load %arg19[%c5_480, %c0_481, %c0_482] : memref<9x64x64xbf16, #tpu.memory_space<vmem>>, vector<1x64x64xbf16>
    %499 = vector.shape_cast %498 : vector<1x64x64xbf16> to vector<64x64xbf16>
    %cst_483 = arith.constant dense<0.000000e+00> : vector<64x64xf32>
    %500 = tpu.matmul %497, %499, %cst_483 {dimension_numbers = #tpu.dot_dimension_numbers<[1], [0], [0], [1], [0, 0, 1, 1], [], []>} : vector<64x64xbf16>, vector<64x64xbf16>, vector<64x64xf32> -> vector<64x64xf32>
    %501 = arith.addf %494, %500 : vector<64x64xf32>
    %c2_484 = arith.constant 2 : index
    %c7_485 = arith.constant 7 : index
    %c0_486 = arith.constant 0 : index
    %502 = vector.load %arg27[%c2_484, %c7_485, %c0_486] : memref<10x17x64xf32, #tpu.memory_space<vmem>>, vector<8x8x64xf32>
    %503 = vector.shape_cast %502 : vector<8x8x64xf32> to vector<64x64xf32>
    %504 = arith.truncf %503 : vector<64x64xf32> to vector<64x64xbf16>
    %c6_487 = arith.constant 6 : index
    %c0_488 = arith.constant 0 : index
    %c0_489 = arith.constant 0 : index
    %505 = vector.load %arg19[%c6_487, %c0_488, %c0_489] : memref<9x64x64xbf16, #tpu.memory_space<vmem>>, vector<1x64x64xbf16>
    %506 = vector.shape_cast %505 : vector<1x64x64xbf16> to vector<64x64xbf16>
    %cst_490 = arith.constant dense<0.000000e+00> : vector<64x64xf32>
    %507 = tpu.matmul %504, %506, %cst_490 {dimension_numbers = #tpu.dot_dimension_numbers<[1], [0], [0], [1], [0, 0, 1, 1], [], []>} : vector<64x64xbf16>, vector<64x64xbf16>, vector<64x64xf32> -> vector<64x64xf32>
    %508 = arith.addf %501, %507 : vector<64x64xf32>
    %c2_491 = arith.constant 2 : index
    %c8_492 = arith.constant 8 : index
    %c0_493 = arith.constant 0 : index
    %509 = vector.load %arg27[%c2_491, %c8_492, %c0_493] : memref<10x17x64xf32, #tpu.memory_space<vmem>>, vector<8x8x64xf32>
    %510 = vector.shape_cast %509 : vector<8x8x64xf32> to vector<64x64xf32>
    %511 = arith.truncf %510 : vector<64x64xf32> to vector<64x64xbf16>
    %c7_494 = arith.constant 7 : index
    %c0_495 = arith.constant 0 : index
    %c0_496 = arith.constant 0 : index
    %512 = vector.load %arg19[%c7_494, %c0_495, %c0_496] : memref<9x64x64xbf16, #tpu.memory_space<vmem>>, vector<1x64x64xbf16>
    %513 = vector.shape_cast %512 : vector<1x64x64xbf16> to vector<64x64xbf16>
    %cst_497 = arith.constant dense<0.000000e+00> : vector<64x64xf32>
    %514 = tpu.matmul %511, %513, %cst_497 {dimension_numbers = #tpu.dot_dimension_numbers<[1], [0], [0], [1], [0, 0, 1, 1], [], []>} : vector<64x64xbf16>, vector<64x64xbf16>, vector<64x64xf32> -> vector<64x64xf32>
    %515 = arith.addf %508, %514 : vector<64x64xf32>
    %c2_498 = arith.constant 2 : index
    %c9_499 = arith.constant 9 : index
    %c0_500 = arith.constant 0 : index
    %516 = vector.load %arg27[%c2_498, %c9_499, %c0_500] : memref<10x17x64xf32, #tpu.memory_space<vmem>>, vector<8x8x64xf32>
    %517 = vector.shape_cast %516 : vector<8x8x64xf32> to vector<64x64xf32>
    %518 = arith.truncf %517 : vector<64x64xf32> to vector<64x64xbf16>
    %c8_501 = arith.constant 8 : index
    %c0_502 = arith.constant 0 : index
    %c0_503 = arith.constant 0 : index
    %519 = vector.load %arg19[%c8_501, %c0_502, %c0_503] : memref<9x64x64xbf16, #tpu.memory_space<vmem>>, vector<1x64x64xbf16>
    %520 = vector.shape_cast %519 : vector<1x64x64xbf16> to vector<64x64xbf16>
    %cst_504 = arith.constant dense<0.000000e+00> : vector<64x64xf32>
    %521 = tpu.matmul %518, %520, %cst_504 {dimension_numbers = #tpu.dot_dimension_numbers<[1], [0], [0], [1], [0, 0, 1, 1], [], []>} : vector<64x64xbf16>, vector<64x64xbf16>, vector<64x64xf32> -> vector<64x64xf32>
    %522 = arith.addf %515, %521 : vector<64x64xf32>
    %c0_505 = arith.constant 0 : index
    %c0_506 = arith.constant 0 : index
    %523 = vector.load %arg20[%c0_505, %c0_506] : memref<1x64xf32, #tpu.memory_space<vmem>>, vector<1x64xf32>
    %524 = vector.broadcast %523 : vector<1x64xf32> to vector<64x64xf32>
    %525 = arith.addf %522, %524 : vector<64x64xf32>
    %cst_507 = arith.constant 0.000000e+00 : f32
    %526 = vector.broadcast %cst_507 : f32 to vector<64x64xf32>
    %527 = arith.maximumf %525, %526 : vector<64x64xf32>
    %528 = vector.shape_cast %527 : vector<64x64xf32> to vector<8x8x64xf32>
    %c1_508 = arith.constant 1 : index
    %c8_509 = arith.constant 8 : index
    %c0_510 = arith.constant 0 : index
    %529 = vector.load %arg27[%c1_508, %c8_509, %c0_510] : memref<10x17x64xf32, #tpu.memory_space<vmem>>, vector<8x8x64xf32>
    tpu.vector_store %arg27[%c1_508, %c8_509, %c0_510], %528 {strides = array<i32>} : memref<10x17x64xf32, #tpu.memory_space<vmem>>, vector<8x8x64xf32>,
    %cst_511 = arith.constant 0.000000e+00 : f32
    %530 = vector.broadcast %cst_511 : f32 to vector<64x64xf32>
    %c0_512 = arith.constant 0 : index
    %c7_513 = arith.constant 7 : index
    %c0_514 = arith.constant 0 : index
    %531 = vector.load %arg27[%c0_512, %c7_513, %c0_514] : memref<10x17x64xf32, #tpu.memory_space<vmem>>, vector<8x8x64xf32>
    %532 = vector.shape_cast %531 : vector<8x8x64xf32> to vector<64x64xf32>
    %533 = arith.truncf %532 : vector<64x64xf32> to vector<64x64xbf16>
    %c0_515 = arith.constant 0 : index
    %c0_516 = arith.constant 0 : index
    %c0_517 = arith.constant 0 : index
    %534 = vector.load %arg21[%c0_515, %c0_516, %c0_517] : memref<9x64x64xbf16, #tpu.memory_space<vmem>>, vector<1x64x64xbf16>
    %535 = vector.shape_cast %534 : vector<1x64x64xbf16> to vector<64x64xbf16>
    %cst_518 = arith.constant dense<0.000000e+00> : vector<64x64xf32>
    %536 = tpu.matmul %533, %535, %cst_518 {dimension_numbers = #tpu.dot_dimension_numbers<[1], [0], [0], [1], [0, 0, 1, 1], [], []>} : vector<64x64xbf16>, vector<64x64xbf16>, vector<64x64xf32> -> vector<64x64xf32>
    %537 = arith.addf %530, %536 : vector<64x64xf32>
    %c0_519 = arith.constant 0 : index
    %c8_520 = arith.constant 8 : index
    %c0_521 = arith.constant 0 : index
    %538 = vector.load %arg27[%c0_519, %c8_520, %c0_521] : memref<10x17x64xf32, #tpu.memory_space<vmem>>, vector<8x8x64xf32>
    %539 = vector.shape_cast %538 : vector<8x8x64xf32> to vector<64x64xf32>
    %540 = arith.truncf %539 : vector<64x64xf32> to vector<64x64xbf16>
    %c1_522 = arith.constant 1 : index
    %c0_523 = arith.constant 0 : index
    %c0_524 = arith.constant 0 : index
    %541 = vector.load %arg21[%c1_522, %c0_523, %c0_524] : memref<9x64x64xbf16, #tpu.memory_space<vmem>>, vector<1x64x64xbf16>
    %542 = vector.shape_cast %541 : vector<1x64x64xbf16> to vector<64x64xbf16>
    %cst_525 = arith.constant dense<0.000000e+00> : vector<64x64xf32>
    %543 = tpu.matmul %540, %542, %cst_525 {dimension_numbers = #tpu.dot_dimension_numbers<[1], [0], [0], [1], [0, 0, 1, 1], [], []>} : vector<64x64xbf16>, vector<64x64xbf16>, vector<64x64xf32> -> vector<64x64xf32>
    %544 = arith.addf %537, %543 : vector<64x64xf32>
    %c0_526 = arith.constant 0 : index
    %c9_527 = arith.constant 9 : index
    %c0_528 = arith.constant 0 : index
    %545 = vector.load %arg27[%c0_526, %c9_527, %c0_528] : memref<10x17x64xf32, #tpu.memory_space<vmem>>, vector<8x8x64xf32>
    %546 = vector.shape_cast %545 : vector<8x8x64xf32> to vector<64x64xf32>
    %547 = arith.truncf %546 : vector<64x64xf32> to vector<64x64xbf16>
    %c2_529 = arith.constant 2 : index
    %c0_530 = arith.constant 0 : index
    %c0_531 = arith.constant 0 : index
    %548 = vector.load %arg21[%c2_529, %c0_530, %c0_531] : memref<9x64x64xbf16, #tpu.memory_space<vmem>>, vector<1x64x64xbf16>
    %549 = vector.shape_cast %548 : vector<1x64x64xbf16> to vector<64x64xbf16>
    %cst_532 = arith.constant dense<0.000000e+00> : vector<64x64xf32>
    %550 = tpu.matmul %547, %549, %cst_532 {dimension_numbers = #tpu.dot_dimension_numbers<[1], [0], [0], [1], [0, 0, 1, 1], [], []>} : vector<64x64xbf16>, vector<64x64xbf16>, vector<64x64xf32> -> vector<64x64xf32>
    %551 = arith.addf %544, %550 : vector<64x64xf32>
    %c1_533 = arith.constant 1 : index
    %c7_534 = arith.constant 7 : index
    %c0_535 = arith.constant 0 : index
    %552 = vector.load %arg27[%c1_533, %c7_534, %c0_535] : memref<10x17x64xf32, #tpu.memory_space<vmem>>, vector<8x8x64xf32>
    %553 = vector.shape_cast %552 : vector<8x8x64xf32> to vector<64x64xf32>
    %554 = arith.truncf %553 : vector<64x64xf32> to vector<64x64xbf16>
    %c3_536 = arith.constant 3 : index
    %c0_537 = arith.constant 0 : index
    %c0_538 = arith.constant 0 : index
    %555 = vector.load %arg21[%c3_536, %c0_537, %c0_538] : memref<9x64x64xbf16, #tpu.memory_space<vmem>>, vector<1x64x64xbf16>
    %556 = vector.shape_cast %555 : vector<1x64x64xbf16> to vector<64x64xbf16>
    %cst_539 = arith.constant dense<0.000000e+00> : vector<64x64xf32>
    %557 = tpu.matmul %554, %556, %cst_539 {dimension_numbers = #tpu.dot_dimension_numbers<[1], [0], [0], [1], [0, 0, 1, 1], [], []>} : vector<64x64xbf16>, vector<64x64xbf16>, vector<64x64xf32> -> vector<64x64xf32>
    %558 = arith.addf %551, %557 : vector<64x64xf32>
    %c1_540 = arith.constant 1 : index
    %c8_541 = arith.constant 8 : index
    %c0_542 = arith.constant 0 : index
    %559 = vector.load %arg27[%c1_540, %c8_541, %c0_542] : memref<10x17x64xf32, #tpu.memory_space<vmem>>, vector<8x8x64xf32>
    %560 = vector.shape_cast %559 : vector<8x8x64xf32> to vector<64x64xf32>
    %561 = arith.truncf %560 : vector<64x64xf32> to vector<64x64xbf16>
    %c4_543 = arith.constant 4 : index
    %c0_544 = arith.constant 0 : index
    %c0_545 = arith.constant 0 : index
    %562 = vector.load %arg21[%c4_543, %c0_544, %c0_545] : memref<9x64x64xbf16, #tpu.memory_space<vmem>>, vector<1x64x64xbf16>
    %563 = vector.shape_cast %562 : vector<1x64x64xbf16> to vector<64x64xbf16>
    %cst_546 = arith.constant dense<0.000000e+00> : vector<64x64xf32>
    %564 = tpu.matmul %561, %563, %cst_546 {dimension_numbers = #tpu.dot_dimension_numbers<[1], [0], [0], [1], [0, 0, 1, 1], [], []>} : vector<64x64xbf16>, vector<64x64xbf16>, vector<64x64xf32> -> vector<64x64xf32>
    %565 = arith.addf %558, %564 : vector<64x64xf32>
    %c1_547 = arith.constant 1 : index
    %c9_548 = arith.constant 9 : index
    %c0_549 = arith.constant 0 : index
    %566 = vector.load %arg27[%c1_547, %c9_548, %c0_549] : memref<10x17x64xf32, #tpu.memory_space<vmem>>, vector<8x8x64xf32>
    %567 = vector.shape_cast %566 : vector<8x8x64xf32> to vector<64x64xf32>
    %568 = arith.truncf %567 : vector<64x64xf32> to vector<64x64xbf16>
    %c5_550 = arith.constant 5 : index
    %c0_551 = arith.constant 0 : index
    %c0_552 = arith.constant 0 : index
    %569 = vector.load %arg21[%c5_550, %c0_551, %c0_552] : memref<9x64x64xbf16, #tpu.memory_space<vmem>>, vector<1x64x64xbf16>
    %570 = vector.shape_cast %569 : vector<1x64x64xbf16> to vector<64x64xbf16>
    %cst_553 = arith.constant dense<0.000000e+00> : vector<64x64xf32>
    %571 = tpu.matmul %568, %570, %cst_553 {dimension_numbers = #tpu.dot_dimension_numbers<[1], [0], [0], [1], [0, 0, 1, 1], [], []>} : vector<64x64xbf16>, vector<64x64xbf16>, vector<64x64xf32> -> vector<64x64xf32>
    %572 = arith.addf %565, %571 : vector<64x64xf32>
    %c2_554 = arith.constant 2 : index
    %c7_555 = arith.constant 7 : index
    %c0_556 = arith.constant 0 : index
    %573 = vector.load %arg27[%c2_554, %c7_555, %c0_556] : memref<10x17x64xf32, #tpu.memory_space<vmem>>, vector<8x8x64xf32>
    %574 = vector.shape_cast %573 : vector<8x8x64xf32> to vector<64x64xf32>
    %575 = arith.truncf %574 : vector<64x64xf32> to vector<64x64xbf16>
    %c6_557 = arith.constant 6 : index
    %c0_558 = arith.constant 0 : index
    %c0_559 = arith.constant 0 : index
    %576 = vector.load %arg21[%c6_557, %c0_558, %c0_559] : memref<9x64x64xbf16, #tpu.memory_space<vmem>>, vector<1x64x64xbf16>
    %577 = vector.shape_cast %576 : vector<1x64x64xbf16> to vector<64x64xbf16>
    %cst_560 = arith.constant dense<0.000000e+00> : vector<64x64xf32>
    %578 = tpu.matmul %575, %577, %cst_560 {dimension_numbers = #tpu.dot_dimension_numbers<[1], [0], [0], [1], [0, 0, 1, 1], [], []>} : vector<64x64xbf16>, vector<64x64xbf16>, vector<64x64xf32> -> vector<64x64xf32>
    %579 = arith.addf %572, %578 : vector<64x64xf32>
    %c2_561 = arith.constant 2 : index
    %c8_562 = arith.constant 8 : index
    %c0_563 = arith.constant 0 : index
    %580 = vector.load %arg27[%c2_561, %c8_562, %c0_563] : memref<10x17x64xf32, #tpu.memory_space<vmem>>, vector<8x8x64xf32>
    %581 = vector.shape_cast %580 : vector<8x8x64xf32> to vector<64x64xf32>
    %582 = arith.truncf %581 : vector<64x64xf32> to vector<64x64xbf16>
    %c7_564 = arith.constant 7 : index
    %c0_565 = arith.constant 0 : index
    %c0_566 = arith.constant 0 : index
    %583 = vector.load %arg21[%c7_564, %c0_565, %c0_566] : memref<9x64x64xbf16, #tpu.memory_space<vmem>>, vector<1x64x64xbf16>
    %584 = vector.shape_cast %583 : vector<1x64x64xbf16> to vector<64x64xbf16>
    %cst_567 = arith.constant dense<0.000000e+00> : vector<64x64xf32>
    %585 = tpu.matmul %582, %584, %cst_567 {dimension_numbers = #tpu.dot_dimension_numbers<[1], [0], [0], [1], [0, 0, 1, 1], [], []>} : vector<64x64xbf16>, vector<64x64xbf16>, vector<64x64xf32> -> vector<64x64xf32>
    %586 = arith.addf %579, %585 : vector<64x64xf32>
    %c2_568 = arith.constant 2 : index
    %c9_569 = arith.constant 9 : index
    %c0_570 = arith.constant 0 : index
    %587 = vector.load %arg27[%c2_568, %c9_569, %c0_570] : memref<10x17x64xf32, #tpu.memory_space<vmem>>, vector<8x8x64xf32>
    %588 = vector.shape_cast %587 : vector<8x8x64xf32> to vector<64x64xf32>
    %589 = arith.truncf %588 : vector<64x64xf32> to vector<64x64xbf16>
    %c8_571 = arith.constant 8 : index
    %c0_572 = arith.constant 0 : index
    %c0_573 = arith.constant 0 : index
    %590 = vector.load %arg21[%c8_571, %c0_572, %c0_573] : memref<9x64x64xbf16, #tpu.memory_space<vmem>>, vector<1x64x64xbf16>
    %591 = vector.shape_cast %590 : vector<1x64x64xbf16> to vector<64x64xbf16>
    %cst_574 = arith.constant dense<0.000000e+00> : vector<64x64xf32>
    %592 = tpu.matmul %589, %591, %cst_574 {dimension_numbers = #tpu.dot_dimension_numbers<[1], [0], [0], [1], [0, 0, 1, 1], [], []>} : vector<64x64xbf16>, vector<64x64xbf16>, vector<64x64xf32> -> vector<64x64xf32>
    %593 = arith.addf %586, %592 : vector<64x64xf32>
    %c0_575 = arith.constant 0 : index
    %c0_576 = arith.constant 0 : index
    %594 = vector.load %arg22[%c0_575, %c0_576] : memref<1x64xf32, #tpu.memory_space<vmem>>, vector<1x64xf32>
    %595 = vector.broadcast %594 : vector<1x64xf32> to vector<64x64xf32>
    %596 = arith.addf %593, %595 : vector<64x64xf32>
    %cst_577 = arith.constant 0.000000e+00 : f32
    %597 = vector.broadcast %cst_577 : f32 to vector<64x64xf32>
    %598 = arith.maximumf %596, %597 : vector<64x64xf32>
    %599 = arith.addf %456, %598 : vector<64x64xf32>
    %cst_578 = arith.constant 0.000000e+00 : f32
    %600 = vector.broadcast %cst_578 : f32 to vector<64x64xf32>
    %601 = arith.maximumf %599, %600 : vector<64x64xf32>
    %602 = arith.truncf %601 : vector<64x64xf32> to vector<64x64xbf16>
    %c0_579 = arith.constant 0 : index
    %c0_580 = arith.constant 0 : index
    %603 = vector.load %arg23[%c0_579, %c0_580] : memref<64x128xbf16, #tpu.memory_space<vmem>>, vector<64x128xbf16>
    %cst_581 = arith.constant dense<0.000000e+00> : vector<64x128xf32>
    %604 = tpu.matmul %602, %603, %cst_581 {dimension_numbers = #tpu.dot_dimension_numbers<[1], [0], [0], [1], [0, 0, 1, 1], [], []>} : vector<64x64xbf16>, vector<64x128xbf16>, vector<64x128xf32> -> vector<64x128xf32>
    %c0_582 = arith.constant 0 : index
    %c0_583 = arith.constant 0 : index
    %605 = vector.load %arg24[%c0_582, %c0_583] : memref<1x128xf32, #tpu.memory_space<vmem>>, vector<1x128xf32>
    %606 = vector.broadcast %605 : vector<1x128xf32> to vector<64x128xf32>
    %607 = arith.addf %604, %606 : vector<64x128xf32>
    %c0_584 = arith.constant 0 : index
    %c0_585 = arith.constant 0 : index
    %c0_586 = arith.constant 0 : index
    %608 = vector.load %arg25[%c0_584, %c0_585, %c0_586] : memref<1x64x128xf32, #tpu.memory_space<vmem>>, vector<1x64x128xf32>
    %609 = vector.shape_cast %608 : vector<1x64x128xf32> to vector<64x128xf32>
    %610 = vector.shape_cast %607 : vector<64x128xf32> to vector<1x64x128xf32>
    tpu.vector_store %arg25[%c0_584, %c0_585, %c0_586], %610 {strides = array<i32>} : memref<1x64x128xf32, #tpu.memory_space<vmem>>, vector<1x64x128xf32>,
    return
  }
  func.func @transform_0(%arg0: i32) -> (i32, i32, i32) {
    %c0_i32 = arith.constant 0 : i32
    %c0_i32_0 = arith.constant 0 : i32
    %c0_i32_1 = arith.constant 0 : i32
    return %arg0, %c0_i32, %c0_i32_0 : i32, i32, i32
  }
  func.func @transform_1(%arg0: i32) -> (i32, i32) {
    %c0_i32 = arith.constant 0 : i32
    %c0_i32_0 = arith.constant 0 : i32
    %c0_i32_1 = arith.constant 0 : i32
    return %c0_i32, %c0_i32_0 : i32, i32
  }
  func.func @transform_2(%arg0: i32) -> (i32, i32) {
    %c0_i32 = arith.constant 0 : i32
    %c0_i32_0 = arith.constant 0 : i32
    %c0_i32_1 = arith.constant 0 : i32
    return %c0_i32, %c0_i32_0 : i32, i32
  }
  func.func @transform_3(%arg0: i32) -> (i32, i32) {
    %c0_i32 = arith.constant 0 : i32
    %c0_i32_0 = arith.constant 0 : i32
    %c0_i32_1 = arith.constant 0 : i32
    return %c0_i32, %c0_i32_0 : i32, i32
  }
  func.func @transform_4(%arg0: i32) -> (i32, i32, i32) {
    %c0_i32 = arith.constant 0 : i32
    %c0_i32_0 = arith.constant 0 : i32
    %c0_i32_1 = arith.constant 0 : i32
    %c0_i32_2 = arith.constant 0 : i32
    return %c0_i32, %c0_i32_0, %c0_i32_1 : i32, i32, i32
  }
  func.func @transform_5(%arg0: i32) -> (i32, i32) {
    %c0_i32 = arith.constant 0 : i32
    %c0_i32_0 = arith.constant 0 : i32
    %c0_i32_1 = arith.constant 0 : i32
    return %c0_i32, %c0_i32_0 : i32, i32
  }
  func.func @transform_6(%arg0: i32) -> (i32, i32, i32) {
    %c0_i32 = arith.constant 0 : i32
    %c0_i32_0 = arith.constant 0 : i32
    %c0_i32_1 = arith.constant 0 : i32
    %c0_i32_2 = arith.constant 0 : i32
    return %c0_i32, %c0_i32_0, %c0_i32_1 : i32, i32, i32
  }
  func.func @transform_7(%arg0: i32) -> (i32, i32) {
    %c0_i32 = arith.constant 0 : i32
    %c0_i32_0 = arith.constant 0 : i32
    %c0_i32_1 = arith.constant 0 : i32
    return %c0_i32, %c0_i32_0 : i32, i32
  }
  func.func @transform_8(%arg0: i32) -> (i32, i32, i32) {
    %c0_i32 = arith.constant 0 : i32
    %c0_i32_0 = arith.constant 0 : i32
    %c0_i32_1 = arith.constant 0 : i32
    %c0_i32_2 = arith.constant 0 : i32
    return %c0_i32, %c0_i32_0, %c0_i32_1 : i32, i32, i32
  }
  func.func @transform_9(%arg0: i32) -> (i32, i32) {
    %c0_i32 = arith.constant 0 : i32
    %c0_i32_0 = arith.constant 0 : i32
    %c0_i32_1 = arith.constant 0 : i32
    return %c0_i32, %c0_i32_0 : i32, i32
  }
  func.func @transform_10(%arg0: i32) -> (i32, i32, i32) {
    %c0_i32 = arith.constant 0 : i32
    %c0_i32_0 = arith.constant 0 : i32
    %c0_i32_1 = arith.constant 0 : i32
    %c0_i32_2 = arith.constant 0 : i32
    return %c0_i32, %c0_i32_0, %c0_i32_1 : i32, i32, i32
  }
  func.func @transform_11(%arg0: i32) -> (i32, i32) {
    %c0_i32 = arith.constant 0 : i32
    %c0_i32_0 = arith.constant 0 : i32
    %c0_i32_1 = arith.constant 0 : i32
    return %c0_i32, %c0_i32_0 : i32, i32
  }
  func.func @transform_12(%arg0: i32) -> (i32, i32, i32) {
    %c0_i32 = arith.constant 0 : i32
    %c0_i32_0 = arith.constant 0 : i32
    %c0_i32_1 = arith.constant 0 : i32
    %c0_i32_2 = arith.constant 0 : i32
    return %c0_i32, %c0_i32_0, %c0_i32_1 : i32, i32, i32
  }
  func.func @transform_13(%arg0: i32) -> (i32, i32) {
    %c0_i32 = arith.constant 0 : i32
    %c0_i32_0 = arith.constant 0 : i32
    %c0_i32_1 = arith.constant 0 : i32
    return %c0_i32, %c0_i32_0 : i32, i32
  }
  func.func @transform_14(%arg0: i32) -> (i32, i32) {
    %c0_i32 = arith.constant 0 : i32
    %c0_i32_0 = arith.constant 0 : i32
    %c0_i32_1 = arith.constant 0 : i32
    return %c0_i32, %c0_i32_0 : i32, i32
  }
  func.func @transform_15(%arg0: i32) -> (i32, i32) {
    %c0_i32 = arith.constant 0 : i32
    %c0_i32_0 = arith.constant 0 : i32
    %c0_i32_1 = arith.constant 0 : i32
    return %c0_i32, %c0_i32_0 : i32, i32
  }
  func.func @transform_16(%arg0: i32) -> (i32, i32, i32) {
    %c0_i32 = arith.constant 0 : i32
    %c0_i32_0 = arith.constant 0 : i32
    %c0_i32_1 = arith.constant 0 : i32
    %c0_i32_2 = arith.constant 0 : i32
    return %c0_i32, %c0_i32_0, %c0_i32_1 : i32, i32, i32
  }
  func.func @transform_17(%arg0: i32) -> (i32, i32) {
    %c0_i32 = arith.constant 0 : i32
    %c0_i32_0 = arith.constant 0 : i32
    %c0_i32_1 = arith.constant 0 : i32
    return %c0_i32, %c0_i32_0 : i32, i32
  }
  func.func @transform_18(%arg0: i32) -> (i32, i32, i32) {
    %c0_i32 = arith.constant 0 : i32
    %c0_i32_0 = arith.constant 0 : i32
    %c0_i32_1 = arith.constant 0 : i32
    %c0_i32_2 = arith.constant 0 : i32
    return %c0_i32, %c0_i32_0, %c0_i32_1 : i32, i32, i32
  }
  func.func @transform_19(%arg0: i32) -> (i32, i32) {
    %c0_i32 = arith.constant 0 : i32
    %c0_i32_0 = arith.constant 0 : i32
    %c0_i32_1 = arith.constant 0 : i32
    return %c0_i32, %c0_i32_0 : i32, i32
  }
  func.func @transform_20(%arg0: i32) -> (i32, i32, i32) {
    %c0_i32 = arith.constant 0 : i32
    %c0_i32_0 = arith.constant 0 : i32
    %c0_i32_1 = arith.constant 0 : i32
    %c0_i32_2 = arith.constant 0 : i32
    return %c0_i32, %c0_i32_0, %c0_i32_1 : i32, i32, i32
  }
  func.func @transform_21(%arg0: i32) -> (i32, i32) {
    %c0_i32 = arith.constant 0 : i32
    %c0_i32_0 = arith.constant 0 : i32
    %c0_i32_1 = arith.constant 0 : i32
    return %c0_i32, %c0_i32_0 : i32, i32
  }
  func.func @transform_22(%arg0: i32) -> (i32, i32) {
    %c0_i32 = arith.constant 0 : i32
    %c0_i32_0 = arith.constant 0 : i32
    %c0_i32_1 = arith.constant 0 : i32
    return %c0_i32, %c0_i32_0 : i32, i32
  }
  func.func @transform_23(%arg0: i32) -> (i32, i32) {
    %c0_i32 = arith.constant 0 : i32
    %c0_i32_0 = arith.constant 0 : i32
    %c0_i32_1 = arith.constant 0 : i32
    return %c0_i32, %c0_i32_0 : i32, i32
  }
  func.func @transform_24(%arg0: i32) -> (i32, i32, i32) {
    %c0_i32 = arith.constant 0 : i32
    %c0_i32_0 = arith.constant 0 : i32
    %c0_i32_1 = arith.constant 0 : i32
    return %arg0, %c0_i32, %c0_i32_0 : i32, i32, i32
  }
}

</mosaic_0001>

<bundles_post_ra>
// kernel: basic_encoder_forward.1
= control target key start
LH: loop header
LB: loop body
LE: loop exit
PB: predicated region body
PF: predicated region fallthrough
CT: control target
= control target key end

     0   :  { %s30854_s0 = inlined_call_operand.vmem [shape: bf16[2,256,245], index: 0, kind: input, shape index: {}]   ;;  %s30855_s1 = inlined_call_operand.vmem [shape: f32[64,256], index: 1, kind: input, shape index: {}]   ;;  %s30856_s2 = inlined_call_operand.vmem [shape: bf16[245,32], index: 2, kind: input, shape index: {}]   ;;  %s30857_s3 = inlined_call_operand.vmem [shape: f32[1,32], index: 3, kind: input, shape index: {}]   ;;  %s30858_s4 = inlined_call_operand.vmem [shape: bf16[9,32,32], index: 4, kind: input, shape index: {}]   ;;  %s30859_s5 = inlined_call_operand.vmem [shape: f32[1,32], index: 5, kind: input, shape index: {}]   ;;  %s30860_s6 = inlined_call_operand.vmem [shape: bf16[9,32,32], index: 6, kind: input, shape index: {}]   ;;  %s30861_s7 = inlined_call_operand.vmem [shape: f32[1,32], index: 7, kind: input, shape index: {}]   ;;  %s30862_s8 = inlined_call_operand.vmem [shape: bf16[9,32,32], index: 8, kind: input, shape index: {}]   ;;  %s30863_s9 = inlined_call_operand.vmem [shape: f32[1,32], index: 9, kind: input, shape index: {}]   ;;  %s30864_s10 = inlined_call_operand.vmem [shape: bf16[9,32,32], index: 10, kind: input, shape index: {}]   ;;  %s30865_s11 = inlined_call_operand.vmem [shape: f32[1,32], index: 11, kind: input, shape index: {}]   ;;  %s30866_s12 = inlined_call_operand.vmem [shape: bf16[9,32,64], index: 12, kind: input, shape index: {}]   ;;  %s30867_s13 = inlined_call_operand.vmem [shape: f32[1,64], index: 13, kind: input, shape index: {}]   ;;  %s30868_s14 = inlined_call_operand.vmem [shape: bf16[32,64], index: 14, kind: input, shape index: {}]   ;;  %s30869_s15 = inlined_call_operand.vmem [shape: f32[1,64], index: 15, kind: input, shape index: {}]   ;;  %s30870_s16 = inlined_call_operand.vmem [shape: bf16[9,64,64], index: 16, kind: input, shape index: {}]   ;;  %s30871_s17 = inlined_call_operand.vmem [shape: f32[1,64], index: 17, kind: input, shape index: {}]   ;;  %s30872_s18 = inlined_call_operand.vmem [shape: bf16[9,64,64], index: 18, kind: input, shape index: {}]   ;;  %s30873_s19 = inlined_call_operand.vmem [shape: f32[1,64], index: 19, kind: input, shape index: {}]   ;;  %s30874_s20 = inlined_call_operand.vmem [shape: bf16[9,64,64], index: 20, kind: input, shape index: {}]   ;;  %s30875_s21 = inlined_call_operand.vmem [shape: f32[1,64], index: 21, kind: input, shape index: {}]   ;;  %s30876_s22 = inlined_call_operand.vmem [shape: bf16[64,128], index: 22, kind: input, shape index: {}]   ;;  %s30877_s23 = inlined_call_operand.vmem [shape: f32[1,128], index: 23, kind: input, shape index: {}]   ;;  %s30878_s24 = inlined_call_operand.hbm [shape: f32[2,64,128], index: 24, kind: output, shape index: {}]  }
   0x1   :  { %31006 = sst [smem:[#allocation36_spill]] %s30854_s0 }
   0x2   :  { %31007 = sst [smem:[#allocation37_spill]] %s30855_s1 }
   0x3   :  { %31008 = sst [smem:[#allocation38_spill]] %s30856_s2 }
   0x4   :  { %31009 = sst [smem:[#allocation39_spill]] %s30857_s3 }
   0x5   :  { %31010 = sst [smem:[#allocation40_spill]] %s30858_s4 }
   0x6   :  { %31011 = sst [smem:[#allocation41_spill]] %s30859_s5 }
   0x7   :  { %31012 = sst [smem:[#allocation42_spill]] %s30860_s6 }
   0x8   :  { %31013 = sst [smem:[#allocation43_spill]] %s30861_s7 }
   0x9   :  { %31014 = sst [smem:[#allocation44_spill]] %s30862_s8 }
   0xa   :  { %31015 = sst [smem:[#allocation45_spill]] %s30878_s24 }
   0xb   :  { %29 = vsyncpa [#allocation5], 0 }
   0xc   :  { %31 = vsyncpa [#allocation5 + $0x1], 0  ;;  %s26419_s5 = smov 0   ;;  %s26421_s26 = smov 0  }
   0xd   :  { %s26423_s27 = smov 0   ;;  %s26425_s28 = smov 0  }
   0xe LB: > { %31016 = sst [smem:[#allocation7_spill]] %s26275_s5  ;;  %s26440_s6 = sadd.s32 4294967295, %s26287_s28   ;;  %s26287_s28 = sphi %s26425_s28, %s31200_s28   ;;  %s26283_s27 = sphi %s26423_s27, %s31202_s27   ;;  %s26279_s26 = sphi %s26421_s26, %s31204_s26   ;;  %s26275_s5 = sphi %s26419_s5, %s31203_s5  }
   0xf   : > { %31017 = sst [smem:[#allocation8_spill]] %s26283_s27  ;;  %s19553_s2 = sadd.s32 4294967294, %s26287_s28  }
  0x10   : > { %31018 = sst [smem:[#allocation9_spill]] %s26287_s28  ;;  %s26444_s29 = sadd.s32 1, %s26287_s28  }
  0x11   : > { %31019 = sst [smem:[#allocation10_spill]] %s26440_s6  ;;  %s553_s0 = sadd.s32 1, %s26283_s27 }
  0x12   : > { %31020 = sst [smem:[#allocation11_spill]] %s26444_s29  ;;  %s550_s7 = ssub.s32 %s26287_s28, %s26444_s29 }
  0x13   : > { %p563_p0 = scmp.ne.s32.totalorder %s26283_s27, %s26279_s26  ;;  %p551_p1 = scmp.eq.s32.totalorder %s550_s7, 0 }
  0x14   : > { %p564_p2 = scmp.eq.s32.totalorder %s26440_s6, 1  ;;  %p569_p3 = scmp.ne.s32.totalorder %s26279_s26, %s26275_s5 }
  0x15   : > { %p570_p4 = scmp.eq.s32.totalorder %s19553_s2, 1  ;;  %p19556_p7 = scmp.ge.s32.totalorder %s26287_s28, 1 }
  0x16   : > { %s26455_s30 = scalar_select %p551_p1, %s26283_s27, %s553_s0  }
  0x17   : > { %p26457_p5 = por %p564_p2, %p563_p0  ;;  %p26461_p6 = por %p570_p4, %p569_p3 }
  0x18   : > { %31021 = sst [smem:[#allocation12_spill]] %s26455_s30  ;;  %p665_p8 = scmp.lt.s32.totalorder %s26287_s28, 3 }
  0x19   : > { %s31022_s3 = scalar_select %p26457_p5, 1, 0 }
  0x1a   : > { %s31024_s25 = scalar_select %p26461_p6, 1, 0 }
  0x1b   : > { %31023 = sst [smem:[#allocation13_spill]] %s31022_s3  ;;  %p666_p9 = pnand %p19556_p7, %p665_p8 }
  0x1c   : > { %31025 = sst [smem:[#allocation14_spill]] %s31024_s25 }
  0x1d   : > { %669 = sbr.rel (%p666_p9) target bundleno = 5698 (0x1642), region = 116 }
  0x24   : > { %s31026_s1 = sld [smem:[#allocation38_spill]]  ;;  %p731_p10 = scmp.lt.s32.totalorder %s26440_s6, 1  ;;  %vm1199_vm0 = vcmask 1041408   ;;  %vm1150_vm1 = vcmask 957440   ;;  %vm1200_vm2 = vcmask 1042432   ;;  %v26289_v12 = vmov 65535  }
  0x25   : > { %s31027_s2 = sld [smem:[#allocation36_spill]]  ;;  %v1201_v13 = vsel %vm1199_vm0, 4294967295, %v26289_v12  ;;  %vm737_vm3 = vcmask 261120   ;;  %v30894_v45 = vmov 0.0   ;;  %vm741_vm4 = vcmask 253952   ;;  %s31028_s30 = sld [smem:[#allocation40_spill]] }
  0x26   : > { %s732_s0 = scalar_select %p731_p10, %s26440_s6, 1  ;;  %v1202_v17 = vsel %vm1200_vm2, %v1201_v13, 0  ;;  %744 = vst.msk [vmem:[#allocation2 + $0x28] sm:$0xff] %vm737_vm3, %v30894_v45  ;;  %738 = vst.msk [vmem:[#allocation2] sm:$0xff] %vm737_vm3, %v30894_v45  ;;  %vm811_vm5 = vcmask 523264   ;;  %vm814_vm6 = vcmask 516096  }
  0x27   : > { %739 = vst.msk [vmem:[#allocation2 + $0x8] sm:$0xff] %vm737_vm3, %v30894_v45  ;;  %740 = vst.msk [vmem:[#allocation2 + $0x10] sm:$0xff] %vm737_vm3, %v30894_v45  ;;  %s31029_s29 = sld [smem:[#allocation39_spill]]  ;;  %s31053_s6 = sld [smem:[#allocation44_spill]] }
  0x28   : > { %s21032_s5 = sshll.u32 %s732_s0, 8  ;;  %743 = vst.msk [vmem:[#allocation2 + $0x20] sm:$0xff] %vm737_vm3, %v30894_v45  ;;  %745 = vst.msk [vmem:[#allocation2 + $0x30] sm:$0xff] %vm737_vm3, %v30894_v45  ;;  %s31054_s0 = sld [smem:[#allocation43_spill]] }
  0x29   : > { %747 = vst.msk [vmem:[#allocation2 + $0x40] sm:$0xff] %vm737_vm3, %v30894_v45  ;;  %748 = vst.msk [vmem:[#allocation2 + $0x48] sm:$0xff] %vm737_vm3, %v30894_v45  ;;  %s31192_s4 = sld [smem:[#allocation37_spill]]  ;;  %s728_s25 = sand.u32 1, %s26279_s26  }
  0x2a   : > { %v25957_v0 = vld [vmem:[%s31026_s1 + $0x40] sm:$0xff]   ;;  %v25959_v2 = vld [vmem:[%s31026_s1 + $0x48] sm:$0xff]   ;;  %v25961_v4 = vld [vmem:[%s31026_s1 + $0x50] sm:$0xff]   ;;  %749 = vst.msk [vmem:[#allocation2 + $0x50] sm:$0xff] %vm737_vm3, %v30894_v45  ;;  %s19557_s8 = sshll.u32 %s728_s25, 6  ;;  %s31194_s28 = sld [smem:[#allocation10_spill]] }
  0x2b   : > { %v25958_v1 = vld [vmem:[%s31026_s1] sm:$0xff]   ;;  %21034 = vmatprep.subr.bf16.mxu0 %v25957_v0  ;;  %v25960_v3 = vld [vmem:[%s31026_s1 + $0x8] sm:$0xff]   ;;  %v25962_v5 = vld [vmem:[%s31026_s1 + $0x10] sm:$0xff]   ;;  %s26499_s24 = scalar_lea.vmem %s31027_s2, %s21032_s5  ;;  %751 = vst.msk [vmem:[#allocation2 + $0x60] sm:$0xff] %vm737_vm3, %v30894_v45  ;;  %s31051_s2 = sld [smem:[#allocation42_spill]] }
  0x2c   : > { %21035 = vmatpush3.bf16.msra.mxu0 %v25958_v1  ;;  %v25963_v6 = vld [vmem:[%s31026_s1 + $0x58] sm:$0xff]   ;;  %v25965_v8 = vld [vmem:[%s31026_s1 + $0x60] sm:$0xff]   ;;  %v25967_v10 = vld [vmem:[%s31026_s1 + $0x68] sm:$0xff]   ;;  %752 = vst.msk [vmem:[#allocation2 + $0x68] sm:$0xff] %vm737_vm3, %v30894_v45  ;;  %s730_s3 = scalar_lea.vmem [#allocation4], %s19557_s8 }
  0x2d   : > { %21036 = vmatprep.subr.bf16.mxu0 %v25959_v2  ;;  %v25964_v7 = vld [vmem:[%s31026_s1 + $0x18] sm:$0xff]   ;;  %v25966_v9 = vld [vmem:[%s31026_s1 + $0x20] sm:$0xff]   ;;  %v25968_v14 = vld [vmem:[%s31026_s1 + $0x28] sm:$0xff]   ;;  %753 = vst.msk [vmem:[#allocation2 + $0x70] sm:$0xff] %vm737_vm3, %v30894_v45  ;;  %s19491_s27 = sshll.u32 %s730_s3, 4  ;;  %s30809_s27 = int_to_ptr.vmem [resolvable:$true] %s19491_s27 }
  0x2e   : > { %v25975_v11 = vld [vmem:[%s26499_s24 + $0x4] ss:$8 sps:$4 sm:$0xff]   ;;  %v25969_v15 = vld [vmem:[%s31026_s1 + $0x70] sm:$0xff]   ;;  %v25971_v16 = vld [vmem:[%s31026_s1 + $0x78] ss:$0 sps:$4 sm:$0x77]  }
  0x2f   : > { %19609 = vmatprep.mubr.msk.bf16.mxu0 %vm1150_vm1, %v25975_v11  ;;  %v25970_v18 = vld [vmem:[%s31026_s1 + $0x30] sm:$0xff]   ;;  %v1204_v19 = vand.u32 %v25971_v16, %v1202_v17  ;;  %v25972_v20 = vld [vmem:[%s31026_s1 + $0x38] sm:$0xff]   ;;  %v25973_v21 = vld [vmem:[%s26499_s24] ss:$8 sps:$4 sm:$0xff]   ;;  %755 = vst.msk [vmem:[#allocation2 + $0x80] sm:$0xff] %vm737_vm3, %v30894_v45  ;;  %s26225_s1 = scalar_lea.vmem %s30809_s27, 1024 }
  0x30   : > { %21037 = vmatpush3.bf16.msra.mxu0 %v25960_v3  ;;  %v25976_v22 = vld [vmem:[%s26499_s24 + $0x14] ss:$8 sps:$4 sm:$0xff]   ;;  %v25978_v23 = vld [vmem:[%s26499_s24 + $0x10] ss:$8 sps:$4 sm:$0xff]   ;;  %v25979_v24 = vld [vmem:[%s26499_s24 + $0x24] ss:$8 sps:$4 sm:$0xff]   ;;  %p26226_p11 = scmp.ne.s32.totalorder %s30809_s27, %s26225_s1 }
  0x31   : > { %21038 = vmatprep.subr.bf16.mxu0 %v25961_v4  ;;  %v25981_v25 = vld [vmem:[%s26499_s24 + $0x20] ss:$8 sps:$4 sm:$0xff]   ;;  %v25982_v26 = vld [vmem:[%s26499_s24 + $0x34] ss:$8 sps:$4 sm:$0xff]   ;;  %v25984_v27 = vld [vmem:[%s26499_s24 + $0x30] ss:$8 sps:$4 sm:$0xff]  }
  0x32   : > { %v25985_v28 = vld [vmem:[%s26499_s24 + $0x44] ss:$8 sps:$4 sm:$0xff]   ;;  %v25987_v29 = vld [vmem:[%s26499_s24 + $0x40] ss:$8 sps:$4 sm:$0xff]   ;;  %v25988_v30 = vld [vmem:[%s26499_s24 + $0x54] ss:$8 sps:$4 sm:$0xff]   ;;  %p26227_p12 = pnand %p26226_p11, %p26457_p5 }
  0x33   : > { %v25990_v31 = vld [vmem:[%s26499_s24 + $0x50] ss:$8 sps:$4 sm:$0xff]   ;;  %v25991_v32 = vld [vmem:[%s26499_s24 + $0x64] ss:$8 sps:$4 sm:$0xff]   ;;  %v25993_v33 = vld [vmem:[%s26499_s24 + $0x60] ss:$8 sps:$4 sm:$0xff]  }
  0x34   : > { %21039 = vmatpush3.bf16.msra.mxu0 %v25962_v5  ;;  %v25994_v34 = vld [vmem:[%s26499_s24 + $0x74] ss:$8 sps:$4 sm:$0xff]   ;;  %v25996_v35 = vld [vmem:[%s26499_s24 + $0x70] ss:$8 sps:$4 sm:$0xff]   ;;  %v25997_v36 = vld [vmem:[%s26499_s24 + $0x84] ss:$8 sps:$4 sm:$0xff]   ;;  %p26228_p13 = pneg %p26227_p12 }
  0x35   : > { %21040 = vmatprep.subr.bf16.mxu0 %v25963_v6  ;;  %v25999_v37 = vld [vmem:[%s26499_s24 + $0x80] ss:$8 sps:$4 sm:$0xff]   ;;  %v26000_v38 = vld [vmem:[%s26499_s24 + $0x94] ss:$8 sps:$4 sm:$0xff]   ;;  %v26002_v39 = vld [vmem:[%s26499_s24 + $0x90] ss:$8 sps:$4 sm:$0xff]  }
  0x36   : > { %v26003_v40 = vld [vmem:[%s26499_s24 + $0xa4] ss:$8 sps:$4 sm:$0xff]   ;;  %v26005_v41 = vld [vmem:[%s26499_s24 + $0xa0] ss:$8 sps:$4 sm:$0xff]   ;;  %v26006_v42 = vld [vmem:[%s26499_s24 + $0xb4] ss:$8 sps:$4 sm:$0xff]  }
  0x37   : > { %v26008_v43 = vld [vmem:[%s26499_s24 + $0xb0] ss:$8 sps:$4 sm:$0xff]   ;;  %v26009_v44 = vld [vmem:[%s26499_s24 + $0xc4] ss:$8 sps:$4 sm:$0xff]   ;;  %756 = vst.msk [vmem:[#allocation2 + $0x88] sm:$0xff] %vm737_vm3, %v30894_v45  ;;  %757 = vst.msk [vmem:[#allocation2 + $0x90] sm:$0xff] %vm737_vm3, %v30894_v45 }
  0x38   : > { %21041 = vmatpush3.bf16.msra.mxu0 %v25964_v7  ;;  %759 = vst.msk [vmem:[#allocation2 + $0xa0] sm:$0xff] %vm737_vm3, %v30894_v45  ;;  %760 = vst.msk [vmem:[#allocation2 + $0xa8] sm:$0xff] %vm737_vm3, %v30894_v45  ;;  %v26011_v46 = vld [vmem:[%s26499_s24 + $0xc0] ss:$8 sps:$4 sm:$0xff]   ;;  %v26012_v47 = vld [vmem:[%s26499_s24 + $0xd4] ss:$8 sps:$4 sm:$0xff]  }
  0x39   : > { %21042 = vmatprep.subr.bf16.mxu0 %v25965_v8  ;;  %761 = vst.msk [vmem:[#allocation2 + $0xb0] sm:$0xff] %vm737_vm3, %v30894_v45  ;;  %763 = vst.msk [vmem:[#allocation2 + $0xc0] sm:$0xff] %vm737_vm3, %v30894_v45  ;;  %v26018_v48 = vld [vmem:[%s31028_s30 + $0x10] sm:$0xff]   ;;  %v26019_v49 = vld [vmem:[%s31028_s30 + $0x18] sm:$0xff]   ;;  %s21033_s7 = sshll.u32 %s31194_s28, 10  ;;  %s30813_s28 = scalar_lea.sflag [#allocation5], %s728_s25 }
  0x3a   : > { %764 = vst.msk [vmem:[#allocation2 + $0xc8] sm:$0xff] %vm737_vm3, %v30894_v45  ;;  %765 = vst.msk [vmem:[#allocation2 + $0xd0] sm:$0xff] %vm737_vm3, %v30894_v45  ;;  %22298 = vmatprep.subr.bf16.mxu1 %v26018_v48  ;;  %v26014_v50 = vld [vmem:[%s26499_s24 + $0xd0] ss:$8 sps:$4 sm:$0xff]   ;;  %v26015_v51 = vld [vmem:[%s26499_s24 + $0xe4] ss:$8 sps:$4 sm:$0xff]  }
  0x3b   : > { %767 = vst.msk [vmem:[#allocation2 + $0xe0] sm:$0xff] %vm737_vm3, %v30894_v45  ;;  %768 = vst.msk [vmem:[#allocation2 + $0xe8] sm:$0xff] %vm737_vm3, %v30894_v45  ;;  %22299 = vmatpush3.bf16.msra.mxu1 %v26018_v48  ;;  %v1484_v52 = vld [vmem:[#allocation2 + $0x8] sm:$0xff]  ;;  %v1485_v53 = vld [vmem:[#allocation2 + $0x10] sm:$0xff] }
  0x3c   : > { %21043 = vmatpush3.bf16.msra.mxu0 %v25966_v9  ;;  %769 = vst.msk [vmem:[#allocation2 + $0xf0] sm:$0xff] %vm737_vm3, %v30894_v45  ;;  %771 = vst.msk [vmem:[#allocation2 + $0x100] sm:$0xff] %vm737_vm3, %v30894_v45  ;;  %22300 = vmatprep.subr.bf16.mxu1 %v26019_v49  ;;  %v1516_v54 = vpack.c.bf16 %v1485_v53, %v1484_v52  ;;  %v26017_v55 = vld [vmem:[%s26499_s24 + $0xe0] ss:$8 sps:$4 sm:$0xff]   ;;  %v26020_v56 = vld [vmem:[%s26499_s24 + $0xf4] ss:$8 sps:$4 sm:$0xff]  }
  0x3d   : > { %21044 = vmatprep.subr.bf16.mxu0 %v25967_v10  ;;  %772 = vst.msk [vmem:[#allocation2 + $0x108] sm:$0xff] %vm737_vm3, %v30894_v45  ;;  %773 = vst.msk [vmem:[#allocation2 + $0x110] sm:$0xff] %vm737_vm3, %v30894_v45  ;;  %v26022_v57 = vld [vmem:[%s26499_s24 + $0xf0] ss:$8 sps:$4 sm:$0xff]   ;;  %v26023_v58 = vld [vmem:[%s31028_s30] sm:$0xff]   ;;  %s31052_s24 = sld [smem:[#allocation41_spill]] }
  0x3e   : > { %775 = vst.msk [vmem:[#allocation2 + $0x120] sm:$0xff] %vm737_vm3, %v30894_v45  ;;  %776 = vst.msk [vmem:[#allocation2 + $0x128] sm:$0xff] %vm737_vm3, %v30894_v45  ;;  %22302 = vmatprep.mubr.msk.bf16.mxu1 %vm737_vm3, %v1516_v54  ;;  %v26727_v60 = vld [vmem:[%s31029_s29] ss:$0 sm:$0xff] }
  0x3f   : > { %777 = vst.msk [vmem:[#allocation2 + $0x130] sm:$0xff] %vm737_vm3, %v30894_v45  ;;  %779 = vst.msk [vmem:[#allocation2 + $0x140] sm:$0xff] %vm737_vm3, %v30894_v45  ;;  %22301 = vmatpush3.bf16.msra.mxu1 %v26019_v49 }
  0x40   : > { %21045 = vmatpush3.bf16.msra.mxu0 %v25968_v14  ;;  %780 = vst.msk [vmem:[#allocation2 + $0x148] sm:$0xff] %vm737_vm3, %v30894_v45  ;;  %781 = vst.msk [vmem:[#allocation2 + $0x150] sm:$0xff] %vm737_vm3, %v30894_v45  ;;  %22334 = vmatprep.subr.bf16.mxu1 %v26023_v58 }
  0x41   : > { %21046 = vmatprep.subr.bf16.mxu0 %v25969_v15  ;;  %783 = vst.msk [vmem:[#allocation2 + $0x160] sm:$0xff] %vm737_vm3, %v30894_v45  ;;  %784 = vst.msk [vmem:[#allocation2 + $0x168] sm:$0xff] %vm737_vm3, %v30894_v45 }
  0x42   : > { %785 = vst.msk [vmem:[#allocation2 + $0x170] sm:$0xff] %vm737_vm3, %v30894_v45  ;;  %787 = vst.msk [vmem:[#allocation2 + $0x180] sm:$0xff] %vm737_vm3, %v30894_v45 }
  0x43   : > { %788 = vst.msk [vmem:[#allocation2 + $0x188] sm:$0xff] %vm737_vm3, %v30894_v45  ;;  %789 = vst.msk [vmem:[#allocation2 + $0x190] sm:$0xff] %vm737_vm3, %v30894_v45 }
  0x44   : > { %21047 = vmatpush3.bf16.msra.mxu0 %v25970_v18  ;;  %791 = vst.msk [vmem:[#allocation2 + $0x1a0] sm:$0xff] %vm737_vm3, %v30894_v45  ;;  %792 = vst.msk [vmem:[#allocation2 + $0x1a8] sm:$0xff] %vm737_vm3, %v30894_v45 }
  0x45   : > { %21048 = vmatprep.subr.bf16.mxu0 %v1204_v19  ;;  %793 = vst.msk [vmem:[#allocation2 + $0x1b0] sm:$0xff] %vm737_vm3, %v30894_v45  ;;  %795 = vst.msk [vmem:[#allocation2 + $0x1c0] sm:$0xff] %vm737_vm3, %v30894_v45 }
  0x46   : > { %796 = vst.msk [vmem:[#allocation2 + $0x1c8] sm:$0xff] %vm737_vm3, %v30894_v45  ;;  %797 = vst.msk [vmem:[#allocation2 + $0x1d0] sm:$0xff] %vm737_vm3, %v30894_v45 }
  0x47   : > { %799 = vst.msk [vmem:[#allocation2 + $0x1e0] sm:$0xff] %vm737_vm3, %v30894_v45  ;;  %800 = vst.msk [vmem:[#allocation2 + $0x1e8] sm:$0xff] %vm737_vm3, %v30894_v45 }
  0x48   : > { %21049 = vmatpush3.bf16.msra.mxu0 %v25972_v20  ;;  %801 = vst.msk [vmem:[#allocation2 + $0x1f0] sm:$0xff] %vm737_vm3, %v30894_v45  ;;  %803 = vst.msk [vmem:[#allocation2 + $0x200] sm:$0xff] %vm737_vm3, %v30894_v45 }
  0x49   : > { %804 = vst.msk [vmem:[#allocation2 + $0x208] sm:$0xff] %vm737_vm3, %v30894_v45  ;;  %805 = vst.msk [vmem:[#allocation2 + $0x210] sm:$0xff] %vm737_vm3, %v30894_v45 }
  0x4a   : > { %807 = vst.msk [vmem:[#allocation2 + $0x220] sm:$0xff] %vm737_vm3, %v30894_v45  ;;  %808 = vst.msk [vmem:[#allocation2 + $0x228] sm:$0xff] %vm737_vm3, %v30894_v45 }
  0x4b   : > { %1239 = vmatmul.mubr.bf16.vlgmr.msra.gmra.mrb[0].mxu0 %v25973_v21  ;;  %809 = vst.msk [vmem:[#allocation2 + $0x230] sm:$0xff] %vm737_vm3, %v30894_v45 }
  0x4c   : > { %19610 = vmatprep.mubr.msk.bf16.mxu0 %vm1150_vm1, %v25976_v22  ;;  %742 = vst.msk [vmem:[#allocation2 + $0x18] sm:$0x1] %vm741_vm4, %v30894_v45  ;;  %746 = vst.msk [vmem:[#allocation2 + $0x38] sm:$0x1] %vm741_vm4, %v30894_v45 }
  0x4d   : > { %750 = vst.msk [vmem:[#allocation2 + $0x58] sm:$0x1] %vm741_vm4, %v30894_v45  ;;  %754 = vst.msk [vmem:[#allocation2 + $0x78] sm:$0x1] %vm741_vm4, %v30894_v45 }
  0x4e   : > { %758 = vst.msk [vmem:[#allocation2 + $0x98] sm:$0x1] %vm741_vm4, %v30894_v45  ;;  %762 = vst.msk [vmem:[#allocation2 + $0xb8] sm:$0x1] %vm741_vm4, %v30894_v45 }
  0x4f   : > { %766 = vst.msk [vmem:[#allocation2 + $0xd8] sm:$0x1] %vm741_vm4, %v30894_v45  ;;  %770 = vst.msk [vmem:[#allocation2 + $0xf8] sm:$0x1] %vm741_vm4, %v30894_v45 }
  0x50   : > { %774 = vst.msk [vmem:[#allocation2 + $0x118] sm:$0x1] %vm741_vm4, %v30894_v45  ;;  %778 = vst.msk [vmem:[#allocation2 + $0x138] sm:$0x1] %vm741_vm4, %v30894_v45 }
  0x51   : > { %782 = vst.msk [vmem:[#allocation2 + $0x158] sm:$0x1] %vm741_vm4, %v30894_v45  ;;  %786 = vst.msk [vmem:[#allocation2 + $0x178] sm:$0x1] %vm741_vm4, %v30894_v45 }
  0x52   : > { %790 = vst.msk [vmem:[#allocation2 + $0x198] sm:$0x1] %vm741_vm4, %v30894_v45  ;;  %794 = vst.msk [vmem:[#allocation2 + $0x1b8] sm:$0x1] %vm741_vm4, %v30894_v45 }
  0x53   : > { %1247 = vmatmul.mubr.bf16.gmra.mrb[4].mxu0 %v25978_v23  ;;  %798 = vst.msk [vmem:[#allocation2 + $0x1d8] sm:$0x1] %vm741_vm4, %v30894_v45  ;;  %802 = vst.msk [vmem:[#allocation2 + $0x1f8] sm:$0x1] %vm741_vm4, %v30894_v45  ;;  %v26024_v23 = vld [vmem:[%s31028_s30 + $0x8] sm:$0xff]  }
  0x54   : > { %19611 = vmatprep.mubr.msk.bf16.mxu0 %vm1150_vm1, %v25979_v24  ;;  %806 = vst.msk [vmem:[#allocation2 + $0x218] sm:$0x1] %vm741_vm4, %v30894_v45  ;;  %810 = vst.msk [vmem:[#allocation2 + $0x238] sm:$0x1] %vm741_vm4, %v30894_v45 }
  0x5b   : > { %1255 = vmatmul.mubr.bf16.gmra.mrb[8].mxu0 %v25981_v25 }
  0x5c   : > { %19612 = vmatprep.mubr.msk.bf16.mxu0 %vm1150_vm1, %v25982_v26 }
  0x63   : > { %1263 = vmatmul.mubr.bf16.gmra.mrb[12].mxu0 %v25984_v27 }
  0x64   : > { %19613 = vmatprep.mubr.msk.bf16.mxu0 %vm1150_vm1, %v25985_v28 }
  0x6b   : > { %1271 = vmatmul.mubr.bf16.gmra.mrb[16].mxu0 %v25987_v29 }
  0x6c   : > { %19614 = vmatprep.mubr.msk.bf16.mxu0 %vm1150_vm1, %v25988_v30 }
  0x73   : > { %1279 = vmatmul.mubr.bf16.gmra.mrb[20].mxu0 %v25990_v31 }
  0x74   : > { %19615 = vmatprep.mubr.msk.bf16.mxu0 %vm1150_vm1, %v25991_v32 }
  0x7b   : > { %1287 = vmatmul.mubr.bf16.gmra.mrb[24].mxu0 %v25993_v33 }
  0x7c   : > { %19616 = vmatprep.mubr.msk.bf16.mxu0 %vm1150_vm1, %v25994_v34 }
  0x83   : > { %1295 = vmatmul.mubr.bf16.gmra.mrb[28].mxu0 %v25996_v35 }
  0x84   : > { %19617 = vmatprep.mubr.msk.bf16.mxu0 %vm1150_vm1, %v25997_v36 }
  0x8b   : > { %1303 = vmatmul.mubr.bf16.gmra.mrb[32].mxu0 %v25999_v37 }
  0x8c   : > { %19618 = vmatprep.mubr.msk.bf16.mxu0 %vm1150_vm1, %v26000_v38 }
  0x93   : > { %1311 = vmatmul.mubr.bf16.gmra.mrb[36].mxu0 %v26002_v39 }
  0x94   : > { %19619 = vmatprep.mubr.msk.bf16.mxu0 %vm1150_vm1, %v26003_v40 }
  0x9b   : > { %1319 = vmatmul.mubr.bf16.gmra.mrb[40].mxu0 %v26005_v41 }
  0x9c   : > { %19620 = vmatprep.mubr.msk.bf16.mxu0 %vm1150_vm1, %v26006_v42 }
  0xa3   : > { %1327 = vmatmul.mubr.bf16.gmra.mrb[44].mxu0 %v26008_v43 }
  0xa4   : > { %19621 = vmatprep.mubr.msk.bf16.mxu0 %vm1150_vm1, %v26009_v44 }
  0xab   : > { %1335 = vmatmul.mubr.bf16.gmra.mrb[48].mxu0 %v26011_v46 }
  0xac   : > { %19622 = vmatprep.mubr.msk.bf16.mxu0 %vm1150_vm1, %v26012_v47 }
  0xb3   : > { %1343 = vmatmul.mubr.bf16.gmra.mrb[52].mxu0 %v26014_v50 }
  0xb4   : > { %19623 = vmatprep.mubr.msk.bf16.mxu0 %vm1150_vm1, %v26015_v51 }
  0xbb   : > { %1351 = vmatmul.mubr.bf16.gmra.mrb[56].mxu0 %v26017_v55 }
  0xbc   : > { %19624 = vmatprep.mubr.msk.bf16.mxu0 %vm1150_vm1, %v26020_v56 }
  0xc3   : > { %1359 = vmatmul.mubr.bf16.gmra.mrb[60].mxu0 %v26022_v57 }
 0x11e   : > { %v21050_v59 = vpop.f32.mrb[0].mxu0 }
 0x11f   : > { %v21051_v61 = vpop.f32.mrb[1].mxu0 }
 0x120   : > { %v21052_v62 = vadd.f32 %v21051_v61, %v21050_v59  ;;  %v21053_v63 = vpop.f32.mrb[2].mxu0 }
 0x121   : > { %v21054_v0 = vpop.f32.mrb[3].mxu0 }
 0x122   : > { %v26730_v1 = vadd.f32 %v21052_v62, %v26727_v60  ;;  %v21055_v2 = vadd.f32 %v21054_v0, %v21053_v63 }
 0x124   : > { %v30924_v3 = vmax.f32 %v26730_v1, 0.0  ;;  %v26734_v4 = vadd.f32 %v21055_v2, %v26727_v60 }
 0x126   : > { %1400 = vst.msk [vmem:[#allocation2 + $0x28] sm:$0xff] %vm737_vm3, %v30924_v3  ;;  %v30922_v5 = vmax.f32 %v26734_v4, 0.0  ;;  %v21056_v6 = vpop.f32.mrb[4].mxu0 }
 0x127   : > { %v21057_v7 = vpop.f32.mrb[5].mxu0 }
 0x128   : > { %1401 = vst.msk [vmem:[#allocation2 + $0x30] sm:$0xff] %vm737_vm3, %v30922_v5  ;;  %v21058_v8 = vadd.f32 %v21057_v7, %v21056_v6  ;;  %v21059_v9 = vpop.f32.mrb[6].mxu0 }
 0x129   : > { %v21060_v10 = vpop.f32.mrb[7].mxu0 }
 0x12a   : > { %v26744_v11 = vadd.f32 %v21058_v8, %v26727_v60  ;;  %v21061_v12 = vadd.f32 %v21060_v10, %v21059_v9  ;;  %v26824_v8 = vld [vmem:[%s31028_s30 + $0x20] sm:$0xff]  }
 0x12c   : > { %v30925_v13 = vmax.f32 %v26744_v11, 0.0  ;;  %v26748_v14 = vadd.f32 %v21061_v12, %v26727_v60 }
 0x12d   : > { %v1486_v18 = vld [vmem:[#allocation2 + $0x28] sm:$0xff] }
 0x12e   : > { %1402 = vst.msk [vmem:[#allocation2 + $0x48] sm:$0xff] %vm737_vm3, %v30925_v13  ;;  %v30923_v15 = vmax.f32 %v26748_v14, 0.0  ;;  %v21062_v16 = vpop.f32.mrb[8].mxu0 }
 0x12f   : > { %v21063_v17 = vpop.f32.mrb[9].mxu0  ;;  %v1487_v19 = vld [vmem:[#allocation2 + $0x30] sm:$0xff] }
 0x130   : > { %1403 = vst.msk [vmem:[#allocation2 + $0x50] sm:$0xff] %vm737_vm3, %v30923_v15  ;;  %v21064_v20 = vadd.f32 %v21063_v17, %v21062_v16  ;;  %v21065_v21 = vpop.f32.mrb[10].mxu0  ;;  %v26757_v22 = vpack.c.bf16 %v1487_v19, %v1486_v18 }
 0x131   : > { %v21066_v24 = vpop.f32.mrb[11].mxu0 }
 0x132   : > { %v26763_v25 = vadd.f32 %v21064_v20, %v26727_v60  ;;  %v21067_v26 = vadd.f32 %v21066_v24, %v21065_v21  ;;  %22303 = vmatmul.mubr.msk.bf16.vlgmr.msra.gmra.mrb[0].mxu1 %vm737_vm3, %v26757_v22 }
 0x133   : > { %22335 = vmatpush3.bf16.msra.mxu1 %v26023_v58 }
 0x134   : > { %v30920_v27 = vmax.f32 %v26763_v25, 0.0  ;;  %v26769_v28 = vadd.f32 %v21067_v26, %v26727_v60  ;;  %22336 = vmatprep.subr.bf16.mxu1 %v26024_v23 }
 0x135   : > { %v1488_v32 = vld [vmem:[#allocation2 + $0x48] sm:$0xff] }
 0x136   : > { %1404 = vst.msk [vmem:[#allocation2 + $0x68] sm:$0xff] %vm737_vm3, %v30920_v27  ;;  %v30917_v29 = vmax.f32 %v26769_v28, 0.0  ;;  %v21068_v30 = vpop.f32.mrb[12].mxu0 }
 0x137   : > { %v21069_v31 = vpop.f32.mrb[13].mxu0  ;;  %v1489_v33 = vld [vmem:[#allocation2 + $0x50] sm:$0xff]  ;;  %22337 = vmatpush3.bf16.msra.mxu1 %v26024_v23 }
 0x138   : > { %1405 = vst.msk [vmem:[#allocation2 + $0x70] sm:$0xff] %vm737_vm3, %v30917_v29  ;;  %v21070_v34 = vadd.f32 %v21069_v31, %v21068_v30  ;;  %v21071_v35 = vpop.f32.mrb[14].mxu0  ;;  %v26778_v36 = vpack.c.bf16 %v1489_v33, %v1488_v32  ;;  %22370 = vmatprep.subr.bf16.mxu1 %v26824_v8  ;;  %v1437_v29 = vld [vmem:[#allocation2 + $0x4f] sm:$0xff] }
 0x139   : > { %v21072_v37 = vpop.f32.mrb[15].mxu0 }
 0x13a   : > { %v26781_v38 = vadd.f32 %v21070_v34, %v26727_v60  ;;  %v21073_v39 = vadd.f32 %v21072_v37, %v21071_v35  ;;  %22306 = vmatprep.mubr.msk.bf16.mxu1 %vm737_vm3, %v26778_v36 }
 0x13c   : > { %v30921_v40 = vmax.f32 %v26781_v38, 0.0  ;;  %v26787_v41 = vadd.f32 %v21073_v39, %v26727_v60 }
 0x13d   : > { %v1490_v46 = vld [vmem:[#allocation2 + $0x68] sm:$0xff] }
 0x13e   : > { %1406 = vst.msk [vmem:[#allocation2 + $0x88] sm:$0xff] %vm737_vm3, %v30921_v40  ;;  %v30919_v42 = vmax.f32 %v26787_v41, 0.0  ;;  %v21074_v43 = vpop.f32.mrb[16].mxu0 }
 0x13f   : > { %v21075_v44 = vpop.f32.mrb[17].mxu0  ;;  %v1491_v47 = vld [vmem:[#allocation2 + $0x70] sm:$0xff] }
 0x140   : > { %1407 = vst.msk [vmem:[#allocation2 + $0x90] sm:$0xff] %vm737_vm3, %v30919_v42  ;;  %v21076_v48 = vadd.f32 %v21075_v44, %v21074_v43  ;;  %v21077_v49 = vpop.f32.mrb[18].mxu0  ;;  %v26796_v50 = vpack.c.bf16 %v1491_v47, %v1490_v46  ;;  %v26026_v42 = vld [vmem:[%s31028_s30 + $0x28] sm:$0xff]  }
 0x141   : > { %v21078_v51 = vpop.f32.mrb[19].mxu0 }
 0x142   : > { %v26799_v52 = vadd.f32 %v21076_v48, %v26727_v60  ;;  %v21079_v53 = vadd.f32 %v21078_v51, %v21077_v49  ;;  %22307 = vmatmul.mubr.msk.bf16.gmra.mrb[4].mxu1 %vm737_vm3, %v26796_v50 }
 0x144   : > { %v30913_v54 = vmax.f32 %v26799_v52, 0.0  ;;  %v26805_v55 = vadd.f32 %v21079_v53, %v26727_v60 }
 0x145   : > { %v1492_v59 = vld [vmem:[#allocation2 + $0x88] sm:$0xff] }
 0x146   : > { %31030 = vst [vmem:[#allocation15_spill] sm:$0xff] %v26805_v55  ;;  %1408 = vst.msk [vmem:[#allocation2 + $0xa8] sm:$0xff] %vm737_vm3, %v30913_v54  ;;  %v30910_v56 = vmax.f32 %v26805_v55, 0.0  ;;  %v21080_v57 = vpop.f32.mrb[20].mxu0 }
 0x147   : > { %v21081_v58 = vpop.f32.mrb[21].mxu0  ;;  %v1493_v61 = vld [vmem:[#allocation2 + $0x90] sm:$0xff] }
 0x148   : > { %1409 = vst.msk [vmem:[#allocation2 + $0xb0] sm:$0xff] %vm737_vm3, %v30910_v56  ;;  %v21082_v62 = vadd.f32 %v21081_v58, %v21080_v57  ;;  %v21083_v63 = vpop.f32.mrb[22].mxu0  ;;  %v26814_v0 = vpack.c.bf16 %v1493_v61, %v1492_v59 }
 0x149   : > { %v21084_v2 = vpop.f32.mrb[23].mxu0 }
 0x14a   : > { %v26817_v6 = vadd.f32 %v21082_v62, %v26727_v60  ;;  %v21085_v7 = vadd.f32 %v21084_v2, %v21083_v63  ;;  %22310 = vmatprep.mubr.msk.bf16.mxu1 %vm737_vm3, %v26814_v0 }
 0x14c   : > { %v30915_v9 = vmax.f32 %v26817_v6, 0.0  ;;  %v26828_v10 = vadd.f32 %v21085_v7, %v26727_v60 }
 0x14d   : > { %v1494_v18 = vld [vmem:[#allocation2 + $0xa8] sm:$0xff] }
 0x14e   : > { %1410 = vst.msk [vmem:[#allocation2 + $0xc8] sm:$0xff] %vm737_vm3, %v30915_v9  ;;  %v30911_v12 = vmax.f32 %v26828_v10, 0.0  ;;  %v21086_v16 = vpop.f32.mrb[24].mxu0 }
 0x14f   : > { %v21087_v17 = vpop.f32.mrb[25].mxu0  ;;  %v1495_v19 = vld [vmem:[#allocation2 + $0xb0] sm:$0xff] }
 0x150   : > { %1411 = vst.msk [vmem:[#allocation2 + $0xd0] sm:$0xff] %vm737_vm3, %v30911_v12  ;;  %v21088_v20 = vadd.f32 %v21087_v17, %v21086_v16  ;;  %v21089_v21 = vpop.f32.mrb[26].mxu0  ;;  %v26838_v23 = vpack.c.bf16 %v1495_v19, %v1494_v18 }
 0x151   : > { %v21090_v24 = vpop.f32.mrb[27].mxu0 }
 0x152   : > { %v26841_v26 = vadd.f32 %v21088_v20, %v26727_v60  ;;  %v21091_v30 = vadd.f32 %v21090_v24, %v21089_v21  ;;  %22311 = vmatmul.mubr.msk.bf16.gmra.mrb[8].mxu1 %vm737_vm3, %v26838_v23 }
 0x154   : > { %31031 = vst [vmem:[#allocation16_spill] sm:$0xff] %v26841_v26  ;;  %v30906_v31 = vmax.f32 %v26841_v26, 0.0  ;;  %v26847_v32 = vadd.f32 %v21091_v30, %v26727_v60 }
 0x155   : > { %v1496_v37 = vld [vmem:[#allocation2 + $0xc8] sm:$0xff] }
 0x156   : > { %31032 = vst [vmem:[#allocation17_spill] sm:$0xff] %v26847_v32  ;;  %1412 = vst.msk [vmem:[#allocation2 + $0xe8] sm:$0xff] %vm737_vm3, %v30906_v31  ;;  %v30903_v33 = vmax.f32 %v26847_v32, 0.0  ;;  %v21092_v34 = vpop.f32.mrb[28].mxu0  ;;  %v1444_v5 = vld [vmem:[#allocation2 + $0xc7] sm:$0xff] }
 0x157   : > { %v21093_v35 = vpop.f32.mrb[29].mxu0  ;;  %v1497_v39 = vld [vmem:[#allocation2 + $0xd0] sm:$0xff] }
 0x158   : > { %1413 = vst.msk [vmem:[#allocation2 + $0xf0] sm:$0xff] %vm737_vm3, %v30903_v33  ;;  %v21094_v43 = vadd.f32 %v21093_v35, %v21092_v34  ;;  %v21095_v44 = vpop.f32.mrb[30].mxu0  ;;  %v26856_v46 = vpack.c.bf16 %v1497_v39, %v1496_v37 }
 0x159   : > { %v21096_v47 = vpop.f32.mrb[31].mxu0 }
 0x15a   : > { %v26859_v48 = vadd.f32 %v21094_v43, %v26727_v60  ;;  %v21097_v49 = vadd.f32 %v21096_v47, %v21095_v44  ;;  %22314 = vmatprep.mubr.msk.bf16.mxu1 %vm737_vm3, %v26856_v46 }
 0x15c   : > { %31033 = vst [vmem:[#allocation18_spill] sm:$0xff] %v26859_v48  ;;  %v30908_v51 = vmax.f32 %v26859_v48, 0.0  ;;  %v26865_v53 = vadd.f32 %v21097_v49, %v26727_v60 }
 0x15d   : > { %v1498_v61 = vld [vmem:[#allocation2 + $0xe8] sm:$0xff] }
 0x15e   : > { %31034 = vst [vmem:[#allocation19_spill] sm:$0xff] %v26865_v53  ;;  %1414 = vst.msk [vmem:[#allocation2 + $0x108] sm:$0xff] %vm737_vm3, %v30908_v51  ;;  %v30905_v57 = vmax.f32 %v26865_v53, 0.0  ;;  %v21098_v58 = vpop.f32.mrb[32].mxu0 }
 0x15f   : > { %v21099_v59 = vpop.f32.mrb[33].mxu0  ;;  %v1499_v62 = vld [vmem:[#allocation2 + $0xf0] sm:$0xff] }
 0x160   : > { %1415 = vst.msk [vmem:[#allocation2 + $0x110] sm:$0xff] %vm737_vm3, %v30905_v57  ;;  %v21100_v63 = vadd.f32 %v21099_v59, %v21098_v58  ;;  %v21101_v2 = vpop.f32.mrb[34].mxu0  ;;  %v26874_v7 = vpack.c.bf16 %v1499_v62, %v1498_v61 }
 0x161   : > { %v21102_v16 = vpop.f32.mrb[35].mxu0 }
 0x162   : > { %v26877_v17 = vadd.f32 %v21100_v63, %v26727_v60  ;;  %v21103_v18 = vadd.f32 %v21102_v16, %v21101_v2  ;;  %22315 = vmatmul.mubr.msk.bf16.gmra.mrb[12].mxu1 %vm737_vm3, %v26874_v7 }
 0x164   : > { %31035 = vst [vmem:[#allocation20_spill] sm:$0xff] %v26877_v17  ;;  %v30900_v19 = vmax.f32 %v26877_v17, 0.0  ;;  %v26883_v20 = vadd.f32 %v21103_v18, %v26727_v60 }
 0x165   : > { %v1500_v34 = vld [vmem:[#allocation2 + $0x108] sm:$0xff] }
 0x166   : > { %31036 = vst [vmem:[#allocation21_spill] sm:$0xff] %v26883_v20  ;;  %1416 = vst.msk [vmem:[#allocation2 + $0x128] sm:$0xff] %vm737_vm3, %v30900_v19  ;;  %v30896_v21 = vmax.f32 %v26883_v20, 0.0  ;;  %v21104_v24 = vpop.f32.mrb[36].mxu0  ;;  %v1448_v15 = vld [vmem:[#allocation2 + $0x107] sm:$0xff] }
 0x167   : > { %v21105_v30 = vpop.f32.mrb[37].mxu0  ;;  %v1501_v35 = vld [vmem:[#allocation2 + $0x110] sm:$0xff] }
 0x168   : > { %1417 = vst.msk [vmem:[#allocation2 + $0x130] sm:$0xff] %vm737_vm3, %v30896_v21  ;;  %v21106_v37 = vadd.f32 %v21105_v30, %v21104_v24  ;;  %v21107_v39 = vpop.f32.mrb[38].mxu0  ;;  %v26892_v43 = vpack.c.bf16 %v1501_v35, %v1500_v34 }
 0x169   : > { %v21108_v44 = vpop.f32.mrb[39].mxu0 }
 0x16a   : > { %v26895_v47 = vadd.f32 %v21106_v37, %v26727_v60  ;;  %v21109_v49 = vadd.f32 %v21108_v44, %v21107_v39  ;;  %22318 = vmatprep.mubr.msk.bf16.mxu1 %vm737_vm3, %v26892_v43 }
 0x16c   : > { %31037 = vst [vmem:[#allocation22_spill] sm:$0xff] %v26895_v47  ;;  %v30901_v58 = vmax.f32 %v26895_v47, 0.0  ;;  %v26901_v59 = vadd.f32 %v21109_v49, %v26727_v60 }
 0x16d   : > { %v1502_v2 = vld [vmem:[#allocation2 + $0x128] sm:$0xff] }
 0x16e   : > { %31038 = vst [vmem:[#allocation23_spill] sm:$0xff] %v26901_v59  ;;  %1418 = vst.msk [vmem:[#allocation2 + $0x148] sm:$0xff] %vm737_vm3, %v30901_v58  ;;  %v30898_v61 = vmax.f32 %v26901_v59, 0.0  ;;  %v21110_v62 = vpop.f32.mrb[40].mxu0 }
 0x16f   : > { %v21111_v63 = vpop.f32.mrb[41].mxu0  ;;  %v1503_v16 = vld [vmem:[#allocation2 + $0x130] sm:$0xff] }
 0x170   : > { %1419 = vst.msk [vmem:[#allocation2 + $0x150] sm:$0xff] %vm737_vm3, %v30898_v61  ;;  %v21112_v18 = vadd.f32 %v21111_v63, %v21110_v62  ;;  %v21113_v24 = vpop.f32.mrb[42].mxu0  ;;  %v26910_v30 = vpack.c.bf16 %v1503_v16, %v1502_v2 }
 0x171   : > { %v21114_v34 = vpop.f32.mrb[43].mxu0 }
 0x172   : > { %v26913_v35 = vadd.f32 %v21112_v18, %v26727_v60  ;;  %v21115_v37 = vadd.f32 %v21114_v34, %v21113_v24  ;;  %22319 = vmatmul.mubr.msk.bf16.gmra.mrb[16].mxu1 %vm737_vm3, %v26910_v30 }
 0x174   : > { %31039 = vst [vmem:[#allocation24_spill] sm:$0xff] %v26913_v35  ;;  %v30897_v39 = vmax.f32 %v26913_v35, 0.0  ;;  %v26919_v44 = vadd.f32 %v21115_v37, %v26727_v60 }
 0x175   : > { %v1504_v2 = vld [vmem:[#allocation2 + $0x148] sm:$0xff] }
 0x176   : > { %31040 = vst [vmem:[#allocation25_spill] sm:$0xff] %v26919_v44  ;;  %1420 = vst.msk [vmem:[#allocation2 + $0x168] sm:$0xff] %vm737_vm3, %v30897_v39  ;;  %v30899_v49 = vmax.f32 %v26919_v44, 0.0  ;;  %v21116_v62 = vpop.f32.mrb[44].mxu0  ;;  %v1452_v13 = vld [vmem:[#allocation2 + $0x147] sm:$0xff] }
 0x177   : > { %v21117_v63 = vpop.f32.mrb[45].mxu0  ;;  %v1505_v16 = vld [vmem:[#allocation2 + $0x150] sm:$0xff] }
 0x178   : > { %1421 = vst.msk [vmem:[#allocation2 + $0x170] sm:$0xff] %vm737_vm3, %v30899_v49  ;;  %v21118_v18 = vadd.f32 %v21117_v63, %v21116_v62  ;;  %v21119_v24 = vpop.f32.mrb[46].mxu0  ;;  %v26928_v34 = vpack.c.bf16 %v1505_v16, %v1504_v2 }
 0x179   : > { %v21120_v37 = vpop.f32.mrb[47].mxu0 }
 0x17a   : > { %v26931_v45 = vadd.f32 %v21118_v18, %v26727_v60  ;;  %v21121_v21 = vadd.f32 %v21120_v37, %v21119_v24  ;;  %22322 = vmatprep.mubr.msk.bf16.mxu1 %vm737_vm3, %v26928_v34 }
 0x17c   : > { %31041 = vst [vmem:[#allocation26_spill] sm:$0xff] %v26931_v45  ;;  %v30902_v39 = vmax.f32 %v26931_v45, 0.0  ;;  %v26937_v61 = vadd.f32 %v21121_v21, %v26727_v60  ;;  %v1992_v45 = vld [vmem:[#allocation2 + $0xd1] sm:$0xff] }
 0x17d   : > { %v1506_v16 = vld [vmem:[#allocation2 + $0x168] sm:$0xff] }
 0x17e   : > { %31042 = vst [vmem:[#allocation27_spill] sm:$0xff] %v26937_v61  ;;  %1422 = vst.msk [vmem:[#allocation2 + $0x188] sm:$0xff] %vm737_vm3, %v30902_v39  ;;  %v30904_v62 = vmax.f32 %v26937_v61, 0.0  ;;  %v21122_v63 = vpop.f32.mrb[48].mxu0 }
 0x17f   : > { %v21123_v2 = vpop.f32.mrb[49].mxu0  ;;  %v1507_v18 = vld [vmem:[#allocation2 + $0x170] sm:$0xff] }
 0x180   : > { %1423 = vst.msk [vmem:[#allocation2 + $0x190] sm:$0xff] %vm737_vm3, %v30904_v62  ;;  %v21124_v24 = vadd.f32 %v21123_v2, %v21122_v63  ;;  %v21125_v37 = vpop.f32.mrb[50].mxu0  ;;  %v26946_v49 = vpack.c.bf16 %v1507_v18, %v1506_v16 }
 0x181   : > { %v21126_v21 = vpop.f32.mrb[51].mxu0 }
 0x182   : > { %v26949_v19 = vadd.f32 %v21124_v24, %v26727_v60  ;;  %v21127_v58 = vadd.f32 %v21126_v21, %v21125_v37  ;;  %22323 = vmatmul.mubr.msk.bf16.gmra.mrb[20].mxu1 %vm737_vm3, %v26946_v49 }
 0x184   : > { %31043 = vst [vmem:[#allocation28_spill] sm:$0xff] %v26949_v19  ;;  %v30907_v39 = vmax.f32 %v26949_v19, 0.0  ;;  %v26955_v33 = vadd.f32 %v21127_v58, %v26727_v60  ;;  %v1454_v19 = vld [vmem:[#allocation2 + $0x167] sm:$0xff] }
 0x185   : > { %v1508_v18 = vld [vmem:[#allocation2 + $0x188] sm:$0xff] }
 0x186   : > { %31044 = vst [vmem:[#allocation29_spill] sm:$0xff] %v26955_v33  ;;  %1424 = vst.msk [vmem:[#allocation2 + $0x1a8] sm:$0xff] %vm737_vm3, %v30907_v39  ;;  %v30909_v63 = vmax.f32 %v26955_v33, 0.0  ;;  %v21128_v2 = vpop.f32.mrb[52].mxu0 }
 0x187   : > { %v21129_v16 = vpop.f32.mrb[53].mxu0  ;;  %v1509_v24 = vld [vmem:[#allocation2 + $0x190] sm:$0xff] }
 0x188   : > { %1425 = vst.msk [vmem:[#allocation2 + $0x1b0] sm:$0xff] %vm737_vm3, %v30909_v63  ;;  %v21130_v37 = vadd.f32 %v21129_v16, %v21128_v2  ;;  %v21131_v21 = vpop.f32.mrb[54].mxu0  ;;  %v26964_v62 = vpack.c.bf16 %v1509_v24, %v1508_v18  ;;  %v1457_v33 = vld [vmem:[#allocation2 + $0x18f] sm:$0xff] }
 0x189   : > { %v21132_v58 = vpop.f32.mrb[55].mxu0 }
 0x18a   : > { %v26967_v57 = vadd.f32 %v21130_v37, %v26727_v60  ;;  %v21133_v31 = vadd.f32 %v21132_v58, %v21131_v21  ;;  %22326 = vmatprep.mubr.msk.bf16.mxu1 %vm737_vm3, %v26964_v62 }
 0x18c   : > { %31045 = vst [vmem:[#allocation30_spill] sm:$0xff] %v26967_v57  ;;  %v30912_v39 = vmax.f32 %v26967_v57, 0.0  ;;  %v26973_v51 = vadd.f32 %v21133_v31, %v26727_v60 }
 0x18d   : > { %v1510_v24 = vld [vmem:[#allocation2 + $0x1a8] sm:$0xff] }
 0x18e   : > { %31046 = vst [vmem:[#allocation31_spill] sm:$0xff] %v26973_v51  ;;  %1426 = vst.msk [vmem:[#allocation2 + $0x1c8] sm:$0xff] %vm737_vm3, %v30912_v39  ;;  %v30914_v2 = vmax.f32 %v26973_v51, 0.0  ;;  %v21134_v16 = vpop.f32.mrb[56].mxu0 }
 0x18f   : > { %v21135_v18 = vpop.f32.mrb[57].mxu0  ;;  %v1511_v37 = vld [vmem:[#allocation2 + $0x1b0] sm:$0xff] }
 0x190   : > { %1427 = vst.msk [vmem:[#allocation2 + $0x1d0] sm:$0xff] %vm737_vm3, %v30914_v2  ;;  %v21136_v21 = vadd.f32 %v21135_v18, %v21134_v16  ;;  %v21137_v58 = vpop.f32.mrb[58].mxu0  ;;  %v26982_v63 = vpack.c.bf16 %v1511_v37, %v1510_v24 }
 0x191   : > { %v21138_v31 = vpop.f32.mrb[59].mxu0 }
 0x192   : > { %v26985_v56 = vadd.f32 %v21136_v21, %v26727_v60  ;;  %v21139_v12 = vadd.f32 %v21138_v31, %v21137_v58  ;;  %22327 = vmatmul.mubr.msk.bf16.gmra.mrb[24].mxu1 %vm737_vm3, %v26982_v63  ;;  %v1432_v21 = vld [vmem:[#allocation2 + $0x7] sm:$0xff] }
 0x194   : > { %31047 = vst [vmem:[#allocation32_spill] sm:$0xff] %v26985_v56  ;;  %v30916_v39 = vmax.f32 %v26985_v56, 0.0  ;;  %v26991_v54 = vadd.f32 %v21139_v12, %v26727_v60  ;;  %v1433_v12 = vld [vmem:[#allocation2 + $0xf] sm:$0xff] }
 0x195   : > { %v1512_v18 = vld [vmem:[#allocation2 + $0x1c8] sm:$0xff]  ;;  %v1464_v2 = vpack.c.bf16 %v1433_v12, %v1432_v21 }
 0x196   : > { %31048 = vst [vmem:[#allocation33_spill] sm:$0xff] %v26991_v54  ;;  %1428 = vst.msk [vmem:[#allocation2 + $0x1e8] sm:$0xff] %vm737_vm3, %v30916_v39  ;;  %v30918_v16 = vmax.f32 %v26991_v54, 0.0  ;;  %v1435_v39 = vld [vmem:[#allocation2 + $0x2f] sm:$0xff]  ;;  %v1438_v21 = vld [vmem:[#allocation2 + $0x67] sm:$0xff] }
 0x197   : > { %v1513_v24 = vld [vmem:[#allocation2 + $0x1d0] sm:$0xff]  ;;  %v1440_v12 = vld [vmem:[#allocation2 + $0x87] sm:$0xff] }
 0x198   : > { %1429 = vst.msk [vmem:[#allocation2 + $0x1f0] sm:$0xff] %vm737_vm3, %v30918_v16  ;;  %v27000_v37 = vpack.c.bf16 %v1513_v24, %v1512_v18  ;;  %v1434_v16 = vld [vmem:[#allocation2 + $0x27] sm:$0xff] }
 0x199   : > { %v27009_v18 = vpack.c.bf16 %v1435_v39, %v1434_v16  ;;  %v1436_v24 = vld [vmem:[#allocation2 + $0x47] sm:$0xff]  ;;  %v27024_v39 = vld [vmem:[%s31028_s30 + $0x30] sm:$0xff]  }
 0x19a   : > { %22330 = vmatprep.mubr.msk.bf16.mxu1 %vm737_vm3, %v27000_v37  ;;  %v27014_v27 = vpack.c.bf16 %v1437_v29, %v1436_v24  ;;  %v1441_v16 = vld [vmem:[#allocation2 + $0x8f] sm:$0xff]  ;;  %v1442_v24 = vld [vmem:[#allocation2 + $0xa7] sm:$0xff] }
 0x19d   : > { %v1514_v58 = vld [vmem:[#allocation2 + $0x1e8] sm:$0xff] }
 0x19f   : > { %v1515_v31 = vld [vmem:[#allocation2 + $0x1f0] sm:$0xff] }
 0x1a0   : > { %v27004_v9 = vpack.c.bf16 %v1515_v31, %v1514_v58  ;;  %v27029_v58 = vpack.c.bf16 %v1441_v16, %v1440_v12  ;;  %v1445_v31 = vld [vmem:[#allocation2 + $0xcf] sm:$0xff] }
 0x1a1   : > { %v1449_v16 = vld [vmem:[#allocation2 + $0x10f] sm:$0xff] }
 0x1a2   : > { %22331 = vmatmul.mubr.msk.bf16.gmra.mrb[28].mxu1 %vm737_vm3, %v27004_v9  ;;  %v27045_v3 = vpack.c.bf16 %v1449_v16, %v1448_v15  ;;  %v21140_v15 = vpop.f32.mrb[60].mxu0  ;;  %v1455_v16 = vld [vmem:[#allocation2 + $0x16f] sm:$0xff] }
 0x1a3   : > { %22338 = vmatprep.mubr.msk.bf16.mxu1 %vm737_vm3, %v1464_v2  ;;  %v1439_v2 = vld [vmem:[#allocation2 + $0x6f] sm:$0xff] }
 0x1a4   : > { %v27026_v29 = vpack.c.bf16 %v1439_v2, %v1438_v21  ;;  %v1447_v2 = vld [vmem:[#allocation2 + $0xef] sm:$0xff]  ;;  %v1446_v21 = vld [vmem:[#allocation2 + $0xe7] sm:$0xff] }
 0x1a5   : > { %v27043_v12 = vpack.c.bf16 %v1447_v2, %v1446_v21  ;;  %v21141_v2 = vpop.f32.mrb[61].mxu0 }
 0x1a6   : > { %v21142_v21 = vadd.f32 %v21141_v2, %v21140_v15  ;;  %v21143_v56 = vpop.f32.mrb[62].mxu0  ;;  %v1460_v15 = vld [vmem:[#allocation2 + $0x1c7] sm:$0xff] }
 0x1a7   : > { %v21144_v51 = vpop.f32.mrb[63].mxu0 }
 0x1aa   : > { %22339 = vmatmul.mubr.msk.bf16.vlgmr.msra.gmra.mrb[0].mxu1 %vm737_vm3, %v27009_v18 }
 0x1ab   : > { %22342 = vmatprep.mubr.msk.bf16.mxu1 %vm737_vm3, %v27014_v27  ;;  %22371 = vmatpush3.bf16.msra.mxu1 %v26824_v8  ;;  %v1443_v8 = vld [vmem:[#allocation2 + $0xaf] sm:$0xff] }
 0x1ac   : > { %22372 = vmatprep.subr.bf16.mxu1 %v26026_v42  ;;  %v27035_v40 = vpack.c.bf16 %v1443_v8, %v1442_v24  ;;  %v1453_v8 = vld [vmem:[#allocation2 + $0x14f] sm:$0xff] }
 0x1ad   : > { %v27053_v54 = vpack.c.bf16 %v1453_v8, %v1452_v13  ;;  %v27062_v13 = vpack.c.bf16 %v1455_v16, %v1454_v19  ;;  %v1456_v8 = vld [vmem:[#allocation2 + $0x187] sm:$0xff] }
 0x1ae   : > { %v27064_v57 = vpack.c.bf16 %v1457_v33, %v1456_v8  ;;  %v1461_v33 = vld [vmem:[#allocation2 + $0x1cf] sm:$0xff]  ;;  %v1462_v8 = vld [vmem:[#allocation2 + $0x1e7] sm:$0xff] }
 0x1af   : > { %22373 = vmatpush3.bf16.msra.mxu1 %v26026_v42  ;;  %v27037_v42 = vpack.c.bf16 %v1445_v31, %v1444_v5  ;;  %v1451_v5 = vld [vmem:[#allocation2 + $0x12f] sm:$0xff]  ;;  %v1450_v31 = vld [vmem:[#allocation2 + $0x127] sm:$0xff]  ;;  %v27083_v2 = vpack.c.bf16 %v1461_v33, %v1460_v15 }
 0x1b0   : > { %22406 = vmatprep.subr.bf16.mxu1 %v27024_v39  ;;  %v27051_v24 = vpack.c.bf16 %v1451_v5, %v1450_v31  ;;  %v27060_v5 = vadd.f32 %v21142_v21, %v26727_v60  ;;  %v21145_v31 = vadd.f32 %v21144_v51, %v21143_v56  ;;  %v1459_v51 = vld [vmem:[#allocation2 + $0x1af] sm:$0xff] }
 0x1b1   : > { %v1979_v16 = vld [vmem:[#allocation2 + $0x9] sm:$0xff]  ;;  %v1980_v21 = vld [vmem:[#allocation2 + $0x11] sm:$0xff] }
 0x1b2   : > { %22343 = vmatmul.mubr.msk.bf16.gmra.mrb[4].mxu1 %vm737_vm3, %v27026_v29  ;;  %31049 = vst [vmem:[#allocation34_spill] sm:$0xff] %v27060_v5  ;;  %v30934_v44 = vmax.f32 %v27060_v5, 0.0  ;;  %v27068_v61 = vadd.f32 %v21145_v31, %v26727_v60  ;;  %v1458_v60 = vld [vmem:[#allocation2 + $0x1a7] sm:$0xff]  ;;  %v1463_v31 = vld [vmem:[#allocation2 + $0x1ef] sm:$0xff]  ;;  %v26028_v5 = vld [vmem:[%s31028_s30 + $0x38] sm:$0xff]  }
 0x1b3   : > { %22346 = vmatprep.mubr.msk.bf16.mxu1 %vm737_vm3, %v27029_v58  ;;  %v27081_v19 = vpack.c.bf16 %v1459_v51, %v1458_v60  ;;  %v1981_v51 = vld [vmem:[#allocation2 + $0x29] sm:$0xff]  ;;  %v1982_v33 = vld [vmem:[#allocation2 + $0x31] sm:$0xff] }
 0x1b4   : > { %31050 = vst [vmem:[#allocation35_spill] sm:$0xff] %v27068_v61  ;;  %1430 = vst.msk [vmem:[#allocation2 + $0x208] sm:$0xff] %vm737_vm3, %v30934_v44  ;;  %v30936_v56 = vmax.f32 %v27068_v61, 0.0  ;;  %v2011_v44 = vpack.c.bf16 %v1980_v21, %v1979_v16  ;;  %v27089_v61 = vpack.c.bf16 %v1463_v31, %v1462_v8  ;;  %v1983_v60 = vld [vmem:[#allocation2 + $0x49] sm:$0xff]  ;;  %v1984_v15 = vld [vmem:[#allocation2 + $0x51] sm:$0xff] }
 0x1b5   : > { %v27099_v35 = vpack.c.bf16 %v1984_v15, %v1983_v60  ;;  %v1985_v16 = vld [vmem:[#allocation2 + $0x69] sm:$0xff]  ;;  %v1986_v21 = vld [vmem:[#allocation2 + $0x71] sm:$0xff] }
 0x1b6   : > { %1431 = vst.msk [vmem:[#allocation2 + $0x210] sm:$0xff] %vm737_vm3, %v30936_v56  ;;  %v27094_v56 = vpack.c.bf16 %v1982_v33, %v1981_v51  ;;  %v1987_v31 = vld [vmem:[#allocation2 + $0x89] sm:$0xff]  ;;  %v1988_v8 = vld [vmem:[#allocation2 + $0x91] sm:$0xff]  ;;  %v27109_v51 = vpack.c.bf16 %v1986_v21, %v1985_v16 }
 0x1b7   : > { %v27111_v33 = vpack.c.bf16 %v1988_v8, %v1987_v31  ;;  %v1990_v60 = vld [vmem:[#allocation2 + $0xb1] sm:$0xff]  ;;  %v1991_v15 = vld [vmem:[#allocation2 + $0xc9] sm:$0xff] }
 0x1b8   : > { %v27119_v59 = vpack.c.bf16 %v1992_v45, %v1991_v15  ;;  %v1994_v16 = vld [vmem:[#allocation2 + $0xf1] sm:$0xff]  ;;  %v1995_v21 = vld [vmem:[#allocation2 + $0x109] sm:$0xff] }
 0x1b9   : > { %v1996_v31 = vld [vmem:[#allocation2 + $0x111] sm:$0xff]  ;;  %v1997_v45 = vld [vmem:[#allocation2 + $0x129] sm:$0xff] }
 0x1ba   : > { %22347 = vmatmul.mubr.msk.bf16.gmra.mrb[8].mxu1 %vm737_vm3, %v27035_v40  ;;  %v27127_v17 = vpack.c.bf16 %v1996_v31, %v1995_v21  ;;  %v2000_v15 = vld [vmem:[#allocation2 + $0x151] sm:$0xff]  ;;  %v2003_v21 = vld [vmem:[#allocation2 + $0x189] sm:$0xff] }
 0x1bb   : > { %22350 = vmatprep.mubr.msk.bf16.mxu1 %vm737_vm3, %v27037_v42  ;;  %v2004_v31 = vld [vmem:[#allocation2 + $0x191] sm:$0xff] }
 0x1bc   : > { %v27143_v26 = vpack.c.bf16 %v2004_v31, %v2003_v21  ;;  %v26030_v31 = vld [vmem:[%s31028_s30 + $0x48] sm:$0xff]  }
 0x1c2   : > { %22351 = vmatmul.mubr.msk.bf16.gmra.mrb[12].mxu1 %vm737_vm3, %v27043_v12 }
 0x1c3   : > { %22354 = vmatprep.mubr.msk.bf16.mxu1 %vm737_vm3, %v27045_v3 }
 0x1ca   : > { %22355 = vmatmul.mubr.msk.bf16.gmra.mrb[16].mxu1 %vm737_vm3, %v27051_v24 }
 0x1cb   : > { %22358 = vmatprep.mubr.msk.bf16.mxu1 %vm737_vm3, %v27053_v54 }
 0x1d2   : > { %22359 = vmatmul.mubr.msk.bf16.gmra.mrb[20].mxu1 %vm737_vm3, %v27062_v13 }
 0x1d3   : > { %22362 = vmatprep.mubr.msk.bf16.mxu1 %vm737_vm3, %v27064_v57 }
 0x1da   : > { %22363 = vmatmul.mubr.msk.bf16.gmra.mrb[24].mxu1 %vm737_vm3, %v27081_v19 }
 0x1db   : > { %22366 = vmatprep.mubr.msk.bf16.mxu1 %vm737_vm3, %v27083_v2 }
 0x1e2   : > { %22367 = vmatmul.mubr.msk.bf16.gmra.mrb[28].mxu1 %vm737_vm3, %v27089_v61 }
 0x1e3   : > { %22374 = vmatprep.mubr.msk.bf16.mxu1 %vm737_vm3, %v2011_v44  ;;  %v26029_v44 = vld [vmem:[%s31028_s30 + $0x40] sm:$0xff]  }
 0x1ea   : > { %22375 = vmatmul.mubr.msk.bf16.vlgmr.msra.gmra.mrb[0].mxu1 %vm737_vm3, %v27094_v56 }
 0x1eb   : > { %22378 = vmatprep.mubr.msk.bf16.mxu1 %vm737_vm3, %v27099_v35  ;;  %22407 = vmatpush3.bf16.msra.mxu1 %v27024_v39  ;;  %v1989_v39 = vld [vmem:[#allocation2 + $0xa9] sm:$0xff] }
 0x1ec   : > { %22408 = vmatprep.subr.bf16.mxu1 %v26028_v5  ;;  %v27117_v20 = vpack.c.bf16 %v1990_v60, %v1989_v39  ;;  %v1998_v39 = vld [vmem:[#allocation2 + $0x131] sm:$0xff]  ;;  %v1999_v60 = vld [vmem:[#allocation2 + $0x149] sm:$0xff] }
 0x1ed   : > { %v27133_v47 = vpack.c.bf16 %v1998_v39, %v1997_v45  ;;  %v27135_v32 = vpack.c.bf16 %v2000_v15, %v1999_v60  ;;  %v2005_v45 = vld [vmem:[#allocation2 + $0x1a9] sm:$0xff]  ;;  %v2006_v39 = vld [vmem:[#allocation2 + $0x1b1] sm:$0xff] }
 0x1ee   : > { %v2007_v60 = vld [vmem:[#allocation2 + $0x1c9] sm:$0xff]  ;;  %v2008_v15 = vld [vmem:[#allocation2 + $0x1d1] sm:$0xff]  ;;  %v27149_v48 = vpack.c.bf16 %v2006_v39, %v2005_v45 }
 0x1ef   : > { %22409 = vmatpush3.bf16.msra.mxu1 %v26028_v5  ;;  %v1993_v5 = vld [vmem:[#allocation2 + $0xe9] sm:$0xff]  ;;  %v27151_v55 = vpack.c.bf16 %v2008_v15, %v2007_v60  ;;  %v26032_v60 = vld [vmem:[%s31028_s30 + $0x58] sm:$0xff]   ;;  %v26033_v15 = vld [vmem:[%s31028_s30 + $0x60] sm:$0xff]  }
 0x1f0   : > { %22442 = vmatprep.subr.bf16.mxu1 %v26029_v44  ;;  %v27125_v8 = vpack.c.bf16 %v1994_v16, %v1993_v5  ;;  %v2001_v5 = vld [vmem:[#allocation2 + $0x169] sm:$0xff]  ;;  %v2002_v16 = vld [vmem:[#allocation2 + $0x171] sm:$0xff] }
 0x1f1   : > { %v27141_v53 = vpack.c.bf16 %v2002_v16, %v2001_v5  ;;  %v2009_v5 = vld [vmem:[#allocation2 + $0x1e9] sm:$0xff]  ;;  %v2010_v16 = vld [vmem:[#allocation2 + $0x1f1] sm:$0xff] }
 0x1f2   : > { %22379 = vmatmul.mubr.msk.bf16.gmra.mrb[4].mxu1 %vm737_vm3, %v27109_v51  ;;  %v27157_v21 = vpack.c.bf16 %v2010_v16, %v2009_v5  ;;  %v26031_v45 = vld [vmem:[%s31028_s30 + $0x50] sm:$0xff]  }
 0x1f3   : > { %22382 = vmatprep.mubr.msk.bf16.mxu1 %vm737_vm3, %v27111_v33  ;;  %v3521_v16 = vld [vmem:[#allocation2 + $0xf0] sm:$0xff] }
 0x1fa   : > { %22383 = vmatmul.mubr.msk.bf16.gmra.mrb[8].mxu1 %vm737_vm3, %v27117_v20 }
 0x1fb   : > { %22386 = vmatprep.mubr.msk.bf16.mxu1 %vm737_vm3, %v27119_v59 }
 0x202   : > { %22387 = vmatmul.mubr.msk.bf16.gmra.mrb[12].mxu1 %vm737_vm3, %v27125_v8 }
 0x203   : > { %22390 = vmatprep.mubr.msk.bf16.mxu1 %vm737_vm3, %v27127_v17 }
 0x20a   : > { %22391 = vmatmul.mubr.msk.bf16.gmra.mrb[16].mxu1 %vm737_vm3, %v27133_v47 }
 0x20b   : > { %22394 = vmatprep.mubr.msk.bf16.mxu1 %vm737_vm3, %v27135_v32 }
 0x212   : > { %22395 = vmatmul.mubr.msk.bf16.gmra.mrb[20].mxu1 %vm737_vm3, %v27141_v53 }
 0x213   : > { %22398 = vmatprep.mubr.msk.bf16.mxu1 %vm737_vm3, %v27143_v26 }
 0x21a   : > { %22399 = vmatmul.mubr.msk.bf16.gmra.mrb[24].mxu1 %vm737_vm3, %v27149_v48 }
 0x21b   : > { %22402 = vmatprep.mubr.msk.bf16.mxu1 %vm737_vm3, %v27151_v55 }
 0x222   : > { %22403 = vmatmul.mubr.msk.bf16.gmra.mrb[28].mxu1 %vm737_vm3, %v27157_v21 }
 0x223   : > { %22410 = vmatprep.mubr.msk.bf16.mxu1 %vm737_vm3, %v27009_v18  ;;  %v2315_v18 = vld [vmem:[#allocation2 + $0x207] sm:$0xff] }
 0x22a   : > { %22411 = vmatmul.mubr.msk.bf16.vlgmr.msra.gmra.mrb[0].mxu1 %vm737_vm3, %v27014_v27 }
 0x22b   : > { %22414 = vmatprep.mubr.msk.bf16.mxu1 %vm737_vm3, %v27026_v29  ;;  %22443 = vmatpush3.bf16.msra.mxu1 %v26029_v44  ;;  %v2316_v44 = vld [vmem:[#allocation2 + $0x20f] sm:$0xff] }
 0x22c   : > { %22444 = vmatprep.subr.bf16.mxu1 %v26030_v31  ;;  %v27197_v39 = vpack.c.bf16 %v2316_v44, %v2315_v18  ;;  %v3522_v44 = vld [vmem:[#allocation2 + $0x108] sm:$0xff] }
 0x22f   : > { %22445 = vmatpush3.bf16.msra.mxu1 %v26030_v31  ;;  %v3523_v31 = vld [vmem:[#allocation2 + $0x110] sm:$0xff] }
 0x230   : > { %22478 = vmatprep.subr.bf16.mxu1 %v26031_v45 }
 0x232   : > { %22415 = vmatmul.mubr.msk.bf16.gmra.mrb[4].mxu1 %vm737_vm3, %v27029_v58 }
 0x233   : > { %22418 = vmatprep.mubr.msk.bf16.mxu1 %vm737_vm3, %v27035_v40 }
 0x23a   : > { %22419 = vmatmul.mubr.msk.bf16.gmra.mrb[8].mxu1 %vm737_vm3, %v27037_v42 }
 0x23b   : > { %22422 = vmatprep.mubr.msk.bf16.mxu1 %vm737_vm3, %v27043_v12 }
 0x242   : > { %22423 = vmatmul.mubr.msk.bf16.gmra.mrb[12].mxu1 %vm737_vm3, %v27045_v3 }
 0x243   : > { %22426 = vmatprep.mubr.msk.bf16.mxu1 %vm737_vm3, %v27051_v24 }
 0x24a   : > { %22427 = vmatmul.mubr.msk.bf16.gmra.mrb[16].mxu1 %vm737_vm3, %v27053_v54 }
 0x24b   : > { %22430 = vmatprep.mubr.msk.bf16.mxu1 %vm737_vm3, %v27062_v13 }
 0x252   : > { %22431 = vmatmul.mubr.msk.bf16.gmra.mrb[20].mxu1 %vm737_vm3, %v27064_v57 }
 0x253   : > { %22434 = vmatprep.mubr.msk.bf16.mxu1 %vm737_vm3, %v27081_v19 }
 0x25a   : > { %22435 = vmatmul.mubr.msk.bf16.gmra.mrb[24].mxu1 %vm737_vm3, %v27083_v2 }
 0x25b   : > { %22438 = vmatprep.mubr.msk.bf16.mxu1 %vm737_vm3, %v27089_v61 }
 0x262   : > { %22439 = vmatmul.mubr.msk.bf16.gmra.mrb[28].mxu1 %vm737_vm3, %v27197_v39 }
 0x263   : > { %22446 = vmatprep.mubr.msk.bf16.mxu1 %vm737_vm3, %v26757_v22  ;;  %v2621_v22 = vld [vmem:[#allocation2 + $0x208] sm:$0xff] }
 0x26a   : > { %22447 = vmatmul.mubr.msk.bf16.vlgmr.msra.gmra.mrb[0].mxu1 %vm737_vm3, %v26778_v36  ;;  %v2622_v36 = vld [vmem:[#allocation2 + $0x210] sm:$0xff] }
 0x26b   : > { %22450 = vmatprep.mubr.msk.bf16.mxu1 %vm737_vm3, %v26796_v50  ;;  %22479 = vmatpush3.bf16.msra.mxu1 %v26031_v45  ;;  %v27237_v50 = vpack.c.bf16 %v2622_v36, %v2621_v22  ;;  %v3520_v45 = vld [vmem:[#allocation2 + $0xe8] sm:$0xff] }
 0x26c   : > { %22480 = vmatprep.subr.bf16.mxu1 %v26032_v60  ;;  %v3547_v18 = vpack.c.bf16 %v3521_v16, %v3520_v45  ;;  %v3524_v22 = vld [vmem:[#allocation2 + $0x128] sm:$0xff] }
 0x26f   : > { %22481 = vmatpush3.bf16.msra.mxu1 %v26032_v60  ;;  %v3525_v60 = vld [vmem:[#allocation2 + $0x130] sm:$0xff] }
 0x270   : > { %22514 = vmatprep.subr.bf16.mxu1 %v26033_v15  ;;  %v3549_v36 = vpack.c.bf16 %v3525_v60, %v3524_v22 }
 0x272   : > { %22451 = vmatmul.mubr.msk.bf16.gmra.mrb[4].mxu1 %vm737_vm3, %v26814_v0  ;;  %v26034_v0 = vld [vmem:[%s31028_s30 + $0x68] sm:$0xff]  }
 0x273   : > { %22454 = vmatprep.mubr.msk.bf16.mxu1 %vm737_vm3, %v26838_v23  ;;  %v2927_v23 = vld [vmem:[#allocation2 + $0x209] sm:$0xff] }
 0x27a   : > { %22455 = vmatmul.mubr.msk.bf16.gmra.mrb[8].mxu1 %vm737_vm3, %v26856_v46  ;;  %v2928_v46 = vld [vmem:[#allocation2 + $0x211] sm:$0xff] }
 0x27b   : > { %22458 = vmatprep.mubr.msk.bf16.mxu1 %vm737_vm3, %v26874_v7  ;;  %v27277_v7 = vpack.c.bf16 %v2928_v46, %v2927_v23  ;;  %v3529_v23 = vld [vmem:[#allocation2 + $0x170] sm:$0xff] }
 0x27c   : > { %v3531_v46 = vld [vmem:[#allocation2 + $0x190] sm:$0xff] }
 0x282   : > { %22459 = vmatmul.mubr.msk.bf16.gmra.mrb[12].mxu1 %vm737_vm3, %v26892_v43  ;;  %v26036_v43 = vld [vmem:[%s31028_s30 + $0x78] sm:$0xff]  }
 0x283   : > { %22462 = vmatprep.mubr.msk.bf16.mxu1 %vm737_vm3, %v26910_v30  ;;  %v26037_v30 = vld [vmem:[%s31028_s30 + $0x80] sm:$0xff]  }
 0x28a   : > { %22463 = vmatmul.mubr.msk.bf16.gmra.mrb[16].mxu1 %vm737_vm3, %v26928_v34 }
 0x28b   : > { %22466 = vmatprep.mubr.msk.bf16.mxu1 %vm737_vm3, %v26946_v49  ;;  %v3510_v49 = vld [vmem:[#allocation2 + $0x48] sm:$0xff] }
 0x292   : > { %22467 = vmatmul.mubr.msk.bf16.gmra.mrb[20].mxu1 %vm737_vm3, %v26964_v62  ;;  %v26040_v62 = vld [vmem:[%s31051_s2 + $0x18] sm:$0xff]  }
 0x293   : > { %22470 = vmatprep.mubr.msk.bf16.mxu1 %vm737_vm3, %v26982_v63  ;;  %v3515_v63 = vld [vmem:[#allocation2 + $0x90] sm:$0xff] }
 0x29a   : > { %22471 = vmatmul.mubr.msk.bf16.gmra.mrb[24].mxu1 %vm737_vm3, %v27000_v37  ;;  %v3512_v37 = vld [vmem:[#allocation2 + $0x68] sm:$0xff] }
 0x29b   : > { %22474 = vmatprep.mubr.msk.bf16.mxu1 %vm737_vm3, %v27004_v9  ;;  %v26035_v9 = vld [vmem:[%s31028_s30 + $0x70] sm:$0xff]  }
 0x2a2   : > { %22475 = vmatmul.mubr.msk.bf16.gmra.mrb[28].mxu1 %vm737_vm3, %v27237_v50 }
 0x2a3   : > { %22482 = vmatprep.mubr.msk.bf16.mxu1 %vm737_vm3, %v27094_v56  ;;  %v3516_v56 = vld [vmem:[#allocation2 + $0xa8] sm:$0xff] }
 0x2aa   : > { %22483 = vmatmul.mubr.msk.bf16.vlgmr.msra.gmra.mrb[0].mxu1 %vm737_vm3, %v27099_v35 }
 0x2ab   : > { %22486 = vmatprep.mubr.msk.bf16.mxu1 %vm737_vm3, %v27109_v51  ;;  %22515 = vmatpush3.bf16.msra.mxu1 %v26033_v15  ;;  %v3527_v15 = vld [vmem:[#allocation2 + $0x150] sm:$0xff] }
 0x2ac   : > { %22516 = vmatprep.subr.bf16.mxu1 %v26034_v0 }
 0x2af   : > { %22517 = vmatpush3.bf16.msra.mxu1 %v26034_v0  ;;  %v3526_v0 = vld [vmem:[#allocation2 + $0x148] sm:$0xff] }
 0x2b0   : > { %22550 = vmatprep.subr.bf16.mxu1 %v26035_v9 }
 0x2b2   : > { %22487 = vmatmul.mubr.msk.bf16.gmra.mrb[4].mxu1 %vm737_vm3, %v27111_v33 }
 0x2b3   : > { %22490 = vmatprep.mubr.msk.bf16.mxu1 %vm737_vm3, %v27117_v20 }
 0x2ba   : > { %22491 = vmatmul.mubr.msk.bf16.gmra.mrb[8].mxu1 %vm737_vm3, %v27119_v59 }
 0x2bb   : > { %22494 = vmatprep.mubr.msk.bf16.mxu1 %vm737_vm3, %v27125_v8 }
 0x2c2   : > { %22495 = vmatmul.mubr.msk.bf16.gmra.mrb[12].mxu1 %vm737_vm3, %v27127_v17 }
 0x2c3   : > { %22498 = vmatprep.mubr.msk.bf16.mxu1 %vm737_vm3, %v27133_v47 }
 0x2ca   : > { %22499 = vmatmul.mubr.msk.bf16.gmra.mrb[16].mxu1 %vm737_vm3, %v27135_v32 }
 0x2cb   : > { %22502 = vmatprep.mubr.msk.bf16.mxu1 %vm737_vm3, %v27141_v53 }
 0x2d2   : > { %22503 = vmatmul.mubr.msk.bf16.gmra.mrb[20].mxu1 %vm737_vm3, %v27143_v26 }
 0x2d3   : > { %22506 = vmatprep.mubr.msk.bf16.mxu1 %vm737_vm3, %v27149_v48 }
 0x2da   : > { %22507 = vmatmul.mubr.msk.bf16.gmra.mrb[24].mxu1 %vm737_vm3, %v27151_v55 }
 0x2db   : > { %22510 = vmatprep.mubr.msk.bf16.mxu1 %vm737_vm3, %v27157_v21 }
 0x2e2   : > { %22511 = vmatmul.mubr.msk.bf16.gmra.mrb[28].mxu1 %vm737_vm3, %v27277_v7 }
 0x2e3   : > { %22518 = vmatprep.mubr.msk.bf16.mxu1 %vm737_vm3, %v27014_v27  ;;  %v3235_v27 = vld [vmem:[#allocation2 + $0x22f] sm:$0xff] }
 0x2ea   : > { %22519 = vmatmul.mubr.msk.bf16.vlgmr.msra.gmra.mrb[0].mxu1 %vm737_vm3, %v27026_v29 }
 0x2eb   : > { %22522 = vmatprep.mubr.msk.bf16.mxu1 %vm737_vm3, %v27029_v58  ;;  %22551 = vmatpush3.bf16.msra.mxu1 %v26035_v9  ;;  %v3514_v58 = vld [vmem:[#allocation2 + $0x88] sm:$0xff]  ;;  %v3550_v9 = vpack.c.bf16 %v3527_v15, %v3526_v0 }
 0x2ec   : > { %22552 = vmatprep.subr.bf16.mxu1 %v26036_v43 }
 0x2ef   : > { %22553 = vmatpush3.bf16.msra.mxu1 %v26036_v43  ;;  %v3528_v43 = vld [vmem:[#allocation2 + $0x168] sm:$0xff] }
 0x2f0   : > { %22586 = vmatprep.subr.bf16.mxu1 %v26037_v30 }
 0x2f2   : > { %22523 = vmatmul.mubr.msk.bf16.gmra.mrb[4].mxu1 %vm737_vm3, %v27035_v40 }
 0x2f3   : > { %22526 = vmatprep.mubr.msk.bf16.mxu1 %vm737_vm3, %v27037_v42  ;;  %v26038_v42 = vld [vmem:[%s31028_s30 + $0x88] sm:$0xff]  }
 0x2fa   : > { %22527 = vmatmul.mubr.msk.bf16.gmra.mrb[8].mxu1 %vm737_vm3, %v27043_v12  ;;  %v3544_v12 = vpack.c.bf16 %v3515_v63, %v3514_v58  ;;  %v3536_v63 = vld [vmem:[#allocation2 + $0x1e8] sm:$0xff]  ;;  %v3541_v58 = vld [vmem:[#allocation2 + $0x230] sm:$0xff] }
 0x2fb   : > { %22530 = vmatprep.mubr.msk.bf16.mxu1 %vm737_vm3, %v27045_v3  ;;  %v3234_v3 = vld [vmem:[#allocation2 + $0x227] sm:$0xff] }
 0x2fc   : > { %v3251_v40 = vpack.c.bf16 %v3235_v27, %v3234_v3  ;;  %v3530_v3 = vld [vmem:[#allocation2 + $0x188] sm:$0xff] }
 0x2fd   : > { %v3552_v27 = vpack.c.bf16 %v3531_v46, %v3530_v3 }
 0x302   : > { %22531 = vmatmul.mubr.msk.bf16.gmra.mrb[12].mxu1 %vm737_vm3, %v27051_v24  ;;  %v3517_v24 = vld [vmem:[#allocation2 + $0xb0] sm:$0xff] }
 0x303   : > { %22534 = vmatprep.mubr.msk.bf16.mxu1 %vm737_vm3, %v27053_v54  ;;  %v3511_v54 = vld [vmem:[#allocation2 + $0x50] sm:$0xff] }
 0x304   : > { %v3542_v34 = vpack.c.bf16 %v3511_v54, %v3510_v49  ;;  %v3535_v54 = vld [vmem:[#allocation2 + $0x1d0] sm:$0xff]  ;;  %v3532_v49 = vld [vmem:[#allocation2 + $0x1a8] sm:$0xff] }
 0x30a   : > { %22535 = vmatmul.mubr.msk.bf16.gmra.mrb[16].mxu1 %vm737_vm3, %v27062_v13  ;;  %v3519_v13 = vld [vmem:[#allocation2 + $0xd0] sm:$0xff] }
 0x30b   : > { %22538 = vmatprep.mubr.msk.bf16.mxu1 %vm737_vm3, %v27064_v57  ;;  %v26039_v57 = vld [vmem:[%s31051_s2 + $0x10] sm:$0xff]  }
 0x30c   : > { %22622 = vmatprep.subr.bf16.mxu0 %v26039_v57 }
 0x30d   : > { %22623 = vmatpush3.bf16.msra.mxu0 %v26039_v57  ;;  %v3534_v57 = vld [vmem:[#allocation2 + $0x1c8] sm:$0xff] }
 0x30e   : > { %22624 = vmatprep.subr.bf16.mxu0 %v26040_v62 }
 0x311   : > { %22625 = vmatpush3.bf16.msra.mxu0 %v26040_v62  ;;  %v3554_v62 = vpack.c.bf16 %v3535_v54, %v3534_v57 }
 0x312   : > { %22539 = vmatmul.mubr.msk.bf16.gmra.mrb[20].mxu1 %vm737_vm3, %v27081_v19  ;;  %v3545_v19 = vpack.c.bf16 %v3517_v24, %v3516_v56 }
 0x313   : > { %22542 = vmatprep.mubr.msk.bf16.mxu1 %vm737_vm3, %v27083_v2  ;;  %v3518_v2 = vld [vmem:[#allocation2 + $0xc8] sm:$0xff] }
 0x314   : > { %v3546_v5 = vpack.c.bf16 %v3519_v13, %v3518_v2 }
 0x31a   : > { %22543 = vmatmul.mubr.msk.bf16.gmra.mrb[24].mxu1 %vm737_vm3, %v27089_v61  ;;  %v3513_v61 = vld [vmem:[#allocation2 + $0x70] sm:$0xff] }
 0x31b   : > { %22546 = vmatprep.mubr.msk.bf16.mxu1 %vm737_vm3, %v27197_v39  ;;  %v3543_v29 = vpack.c.bf16 %v3513_v61, %v3512_v37  ;;  %v3548_v39 = vpack.c.bf16 %v3523_v31, %v3522_v44  ;;  %v3537_v61 = vld [vmem:[#allocation2 + $0x1f0] sm:$0xff] }
 0x31c   : > { %v3555_v37 = vpack.c.bf16 %v3537_v61, %v3536_v63 }
 0x322   : > { %22547 = vmatmul.mubr.msk.bf16.gmra.mrb[28].mxu1 %vm737_vm3, %v3251_v40  ;;  %v3533_v40 = vld [vmem:[#allocation2 + $0x1b0] sm:$0xff] }
 0x323   : > { %22554 = vmatprep.mubr.msk.bf16.mxu1 %vm737_vm3, %v3542_v34  ;;  %v3553_v34 = vpack.c.bf16 %v3533_v40, %v3532_v49 }
 0x32a   : > { %22555 = vmatmul.mubr.msk.bf16.vlgmr.msra.gmra.mrb[0].mxu1 %vm737_vm3, %v3543_v29  ;;  %v3540_v29 = vld [vmem:[#allocation2 + $0x228] sm:$0xff] }
 0x32b   : > { %22558 = vmatprep.mubr.msk.bf16.mxu1 %vm737_vm3, %v3544_v12  ;;  %22587 = vmatpush3.bf16.msra.mxu1 %v26037_v30  ;;  %v3551_v30 = vpack.c.bf16 %v3529_v23, %v3528_v43 }
 0x32c   : > { %22588 = vmatprep.subr.bf16.mxu1 %v26038_v42 }
 0x32f   : > { %22589 = vmatpush3.bf16.msra.mxu1 %v26038_v42  ;;  %v3557_v42 = vpack.c.bf16 %v3541_v58, %v3540_v29 }
 0x332   : > { %22559 = vmatmul.mubr.msk.bf16.gmra.mrb[4].mxu1 %vm737_vm3, %v3545_v19 }
 0x333   : > { %22562 = vmatprep.mubr.msk.bf16.mxu1 %vm737_vm3, %v3546_v5 }
 0x33a   : > { %22563 = vmatmul.mubr.msk.bf16.gmra.mrb[8].mxu1 %vm737_vm3, %v3547_v18 }
 0x33b   : > { %22566 = vmatprep.mubr.msk.bf16.mxu1 %vm737_vm3, %v3548_v39 }
 0x342   : > { %22567 = vmatmul.mubr.msk.bf16.gmra.mrb[12].mxu1 %vm737_vm3, %v3549_v36 }
 0x343   : > { %22570 = vmatprep.mubr.msk.bf16.mxu1 %vm737_vm3, %v3550_v9 }
 0x34a   : > { %22571 = vmatmul.mubr.msk.bf16.gmra.mrb[16].mxu1 %vm737_vm3, %v3551_v30  ;;  %v26042_v30 = vld [vmem:[%s31051_s2 + $0x8] sm:$0xff]  }
 0x34b   : > { %22574 = vmatprep.mubr.msk.bf16.mxu1 %vm737_vm3, %v3552_v27 }
 0x352   : > { %22575 = vmatmul.mubr.msk.bf16.gmra.mrb[20].mxu1 %vm737_vm3, %v3553_v34 }
 0x353   : > { %22578 = vmatprep.mubr.msk.bf16.mxu1 %vm737_vm3, %v3554_v62 }
 0x35a   : > { %22579 = vmatmul.mubr.msk.bf16.gmra.mrb[24].mxu1 %vm737_vm3, %v3555_v37  ;;  %v27418_v37 = vld [vmem:[%s31051_s2 + $0x20] sm:$0xff]  }
 0x35b   : > { %22582 = vmatprep.mubr.msk.bf16.mxu1 %vm737_vm3, %v27237_v50 }
 0x362   : > { %22583 = vmatmul.mubr.msk.bf16.gmra.mrb[28].mxu1 %vm737_vm3, %v3557_v42 }
 0x363   : > { %22590 = vmatprep.mubr.msk.bf16.mxu1 %vm737_vm3, %v27099_v35 }
 0x36a   : > { %22591 = vmatmul.mubr.msk.bf16.vlgmr.msra.gmra.mrb[0].mxu1 %vm737_vm3, %v27109_v51 }
 0x36b   : > { %22594 = vmatprep.mubr.msk.bf16.mxu1 %vm737_vm3, %v27111_v33 }
 0x372   : > { %22595 = vmatmul.mubr.msk.bf16.gmra.mrb[4].mxu1 %vm737_vm3, %v27117_v20 }
 0x373   : > { %22598 = vmatprep.mubr.msk.bf16.mxu1 %vm737_vm3, %v27119_v59 }
 0x37a   : > { %22599 = vmatmul.mubr.msk.bf16.gmra.mrb[8].mxu1 %vm737_vm3, %v27125_v8 }
 0x37b   : > { %22602 = vmatprep.mubr.msk.bf16.mxu1 %vm737_vm3, %v27127_v17  ;;  %v3846_v17 = vld [vmem:[#allocation2 + $0x229] sm:$0xff] }
 0x382   : > { %22603 = vmatmul.mubr.msk.bf16.gmra.mrb[12].mxu1 %vm737_vm3, %v27133_v47  ;;  %v4278_v47 = vld [vmem:[#allocation2 + $0x10] sm:$0xff] }
 0x383   : > { %22606 = vmatprep.mubr.msk.bf16.mxu1 %vm737_vm3, %v27135_v32  ;;  %v3847_v32 = vld [vmem:[#allocation2 + $0x231] sm:$0xff] }
 0x384   : > { %v3863_v20 = vpack.c.bf16 %v3847_v32, %v3846_v17 }
 0x38a   : > { %22607 = vmatmul.mubr.msk.bf16.gmra.mrb[16].mxu1 %vm737_vm3, %v27141_v53  ;;  %v4277_v53 = vld [vmem:[#allocation2 + $0x8] sm:$0xff] }
 0x38b   : > { %22610 = vmatprep.mubr.msk.bf16.mxu1 %vm737_vm3, %v27143_v26  ;;  %v4309_v26 = vpack.c.bf16 %v4278_v47, %v4277_v53 }
 0x38d   : > { %22626 = vmatprep.mubr.msk.bf16.mxu0 %vm737_vm3, %v4309_v26 }
 0x392   : > { %22611 = vmatmul.mubr.msk.bf16.gmra.mrb[20].mxu1 %vm737_vm3, %v27149_v48  ;;  %v27382_v48 = vld [vmem:[%s31052_s24] ss:$0 sm:$0xff]  ;;  %s26291_s24 = smov [#allocation4]  }
 0x393   : > { %22614 = vmatprep.mubr.msk.bf16.mxu1 %vm737_vm3, %v27151_v55  ;;  %v26041_v55 = vld [vmem:[%s31051_s2] sm:$0xff]  }
 0x394   : > { %22658 = vmatprep.subr.bf16.mxu0 %v26041_v55 }
 0x39a   : > { %22615 = vmatmul.mubr.msk.bf16.gmra.mrb[24].mxu1 %vm737_vm3, %v27157_v21 }
 0x39b   : > { %22618 = vmatprep.mubr.msk.bf16.mxu1 %vm737_vm3, %v27277_v7 }
 0x3a2   : > { %22619 = vmatmul.mubr.msk.bf16.gmra.mrb[28].mxu1 %vm737_vm3, %v3863_v20 }
 0x43d   : > { %v22592_v59 = vpop.f32.mrb[0].mxu1 }
 0x43e   : > { %v4131_v35 = vadd.f32 %v22592_v59, %v27382_v48  ;;  %v3963_v51 = vpop.f32.mrb[1].mxu1 }
 0x43f   : > { %v4129_v33 = vadd.f32 %v27382_v48, %v3963_v51  ;;  %v22593_v8 = vpop.f32.mrb[2].mxu1 }
 0x440   : > { %v4163_v21 = vmax.f32 %v4131_v35, 0.0  ;;  %v4132_v50 = vadd.f32 %v22593_v8, %v27382_v48  ;;  %v3966_v7 = vpop.f32.mrb[3].mxu1 }
 0x441   : > { %v4161_v12 = vmax.f32 %v4129_v33, 0.0  ;;  %v4130_v24 = vadd.f32 %v27382_v48, %v3966_v7 }
 0x442   : > { %4195 = vst.msk [vmem:[#allocation2 + $0x48] sm:$0xff] %vm737_vm3, %v4163_v21  ;;  %v4164_v13 = vmax.f32 %v4132_v50, 0.0 }
 0x443   : > { %4193 = vst.msk [vmem:[#allocation2 + $0x28] sm:$0xff] %vm737_vm3, %v4161_v12  ;;  %v4162_v56 = vmax.f32 %v4130_v24, 0.0 }
 0x444   : > { %4196 = vst.msk [vmem:[#allocation2 + $0x50] sm:$0xff] %vm737_vm3, %v4164_v13 }
 0x445   : > { %4194 = vst.msk [vmem:[#allocation2 + $0x30] sm:$0xff] %vm737_vm3, %v4162_v56  ;;  %v22596_v19 = vpop.f32.mrb[4].mxu1 }
 0x446   : > { %v4135_v2 = vadd.f32 %v22596_v19, %v27382_v48  ;;  %v3979_v5 = vpop.f32.mrb[5].mxu1 }
 0x447   : > { %v4133_v16 = vadd.f32 %v27382_v48, %v3979_v5  ;;  %v22597_v31 = vpop.f32.mrb[6].mxu1 }
 0x448   : > { %v4167_v45 = vmax.f32 %v4135_v2, 0.0  ;;  %v4136_v18 = vadd.f32 %v22597_v31, %v27382_v48  ;;  %v3982_v44 = vpop.f32.mrb[7].mxu1 }
 0x449   : > { %v4165_v39 = vmax.f32 %v4133_v16, 0.0  ;;  %v4134_v60 = vadd.f32 %v27382_v48, %v3982_v44  ;;  %v4281_v43 = vld [vmem:[#allocation2 + $0x48] sm:$0xff] }
 0x44a   : > { %4199 = vst.msk [vmem:[#allocation2 + $0x88] sm:$0xff] %vm737_vm3, %v4167_v45  ;;  %v4168_v15 = vmax.f32 %v4136_v18, 0.0  ;;  %v4279_v0 = vld [vmem:[#allocation2 + $0x28] sm:$0xff] }
 0x44b   : > { %4197 = vst.msk [vmem:[#allocation2 + $0x68] sm:$0xff] %vm737_vm3, %v4165_v39  ;;  %v4166_v22 = vmax.f32 %v4134_v60, 0.0  ;;  %v4282_v36 = vld [vmem:[#allocation2 + $0x50] sm:$0xff] }
 0x44c   : > { %4200 = vst.msk [vmem:[#allocation2 + $0x90] sm:$0xff] %vm737_vm3, %v4168_v15  ;;  %v4280_v9 = vld [vmem:[#allocation2 + $0x30] sm:$0xff]  ;;  %v27406_v40 = vpack.c.bf16 %v4282_v36, %v4281_v43 }
 0x44d   : > { %4198 = vst.msk [vmem:[#allocation2 + $0x70] sm:$0xff] %vm737_vm3, %v4166_v22  ;;  %v22600_v23 = vpop.f32.mrb[8].mxu1  ;;  %v27400_v46 = vpack.c.bf16 %v4280_v9, %v4279_v0 }
 0x44e   : > { %v4139_v3 = vadd.f32 %v22600_v23, %v27382_v48  ;;  %v3995_v27 = vpop.f32.mrb[9].mxu1 }
 0x44f   : > { %v4137_v54 = vadd.f32 %v27382_v48, %v3995_v27  ;;  %v22601_v49 = vpop.f32.mrb[10].mxu1  ;;  %22627 = vmatmul.mubr.msk.bf16.vlgmr.msra.gmra.mrb[64].mxu0 %vm737_vm3, %v27400_v46 }
 0x450   : > { %v4171_v34 = vmax.f32 %v4139_v3, 0.0  ;;  %v4140_v57 = vadd.f32 %v22601_v49, %v27382_v48  ;;  %v3998_v62 = vpop.f32.mrb[11].mxu1  ;;  %22630 = vmatprep.mubr.msk.bf16.mxu0 %vm737_vm3, %v27406_v40  ;;  %22659 = vmatpush3.bf16.msra.mxu0 %v26041_v55 }
 0x451   : > { %v4169_v61 = vmax.f32 %v4137_v54, 0.0  ;;  %v4138_v63 = vadd.f32 %v27382_v48, %v3998_v62  ;;  %22660 = vmatprep.subr.bf16.mxu0 %v26042_v30  ;;  %v4285_v47 = vld [vmem:[#allocation2 + $0x88] sm:$0xff] }
 0x452   : > { %4203 = vst.msk [vmem:[#allocation2 + $0xc8] sm:$0xff] %vm737_vm3, %v4171_v34  ;;  %v4172_v29 = vmax.f32 %v4140_v57, 0.0  ;;  %v4283_v17 = vld [vmem:[#allocation2 + $0x68] sm:$0xff] }
 0x453   : > { %4201 = vst.msk [vmem:[#allocation2 + $0xa8] sm:$0xff] %vm737_vm3, %v4169_v61  ;;  %v4170_v58 = vmax.f32 %v4138_v63, 0.0  ;;  %v4286_v42 = vld [vmem:[#allocation2 + $0x90] sm:$0xff] }
 0x454   : > { %4204 = vst.msk [vmem:[#allocation2 + $0xd0] sm:$0xff] %vm737_vm3, %v4172_v29  ;;  %v4284_v32 = vld [vmem:[#allocation2 + $0x70] sm:$0xff]  ;;  %22661 = vmatpush3.bf16.msra.mxu0 %v26042_v30  ;;  %v27428_v59 = vpack.c.bf16 %v4286_v42, %v4285_v47 }
 0x455   : > { %4202 = vst.msk [vmem:[#allocation2 + $0xb0] sm:$0xff] %vm737_vm3, %v4170_v58  ;;  %v22604_v20 = vpop.f32.mrb[12].mxu1  ;;  %v27424_v53 = vpack.c.bf16 %v4284_v32, %v4283_v17  ;;  %22694 = vmatprep.subr.bf16.mxu0 %v27418_v37 }
 0x456   : > { %v4143_v26 = vadd.f32 %v22604_v20, %v27382_v48  ;;  %v4011_v55 = vpop.f32.mrb[13].mxu1 }
 0x457   : > { %v4141_v35 = vadd.f32 %v27382_v48, %v4011_v55  ;;  %v22605_v51 = vpop.f32.mrb[14].mxu1  ;;  %22631 = vmatmul.mubr.msk.bf16.gmra.mrb[68].mxu0 %vm737_vm3, %v27424_v53 }
 0x458   : > { %v4175_v33 = vmax.f32 %v4143_v26, 0.0  ;;  %v4144_v8 = vadd.f32 %v22605_v51, %v27382_v48  ;;  %v4014_v21 = vpop.f32.mrb[15].mxu1  ;;  %22634 = vmatprep.mubr.msk.bf16.mxu0 %vm737_vm3, %v27428_v59 }
 0x459   : > { %v4173_v50 = vmax.f32 %v4141_v35, 0.0  ;;  %v4142_v7 = vadd.f32 %v27382_v48, %v4014_v21  ;;  %v4289_v16 = vld [vmem:[#allocation2 + $0xc8] sm:$0xff] }
 0x45a   : > { %4207 = vst.msk [vmem:[#allocation2 + $0x108] sm:$0xff] %vm737_vm3, %v4175_v33  ;;  %v4176_v12 = vmax.f32 %v4144_v8, 0.0  ;;  %v4287_v56 = vld [vmem:[#allocation2 + $0xa8] sm:$0xff] }
 0x45b   : > { %4205 = vst.msk [vmem:[#allocation2 + $0xe8] sm:$0xff] %vm737_vm3, %v4173_v50  ;;  %v4174_v24 = vmax.f32 %v4142_v7, 0.0  ;;  %v4290_v13 = vld [vmem:[#allocation2 + $0xd0] sm:$0xff] }
 0x45c   : > { %4208 = vst.msk [vmem:[#allocation2 + $0x110] sm:$0xff] %vm737_vm3, %v4176_v12  ;;  %v4288_v19 = vld [vmem:[#allocation2 + $0xb0] sm:$0xff]  ;;  %v27444_v18 = vpack.c.bf16 %v4290_v13, %v4289_v16 }
 0x45d   : > { %4206 = vst.msk [vmem:[#allocation2 + $0xf0] sm:$0xff] %vm737_vm3, %v4174_v24  ;;  %v22608_v2 = vpop.f32.mrb[16].mxu1  ;;  %v27441_v5 = vpack.c.bf16 %v4288_v19, %v4287_v56 }
 0x45e   : > { %v4147_v31 = vadd.f32 %v22608_v2, %v27382_v48  ;;  %v4027_v45 = vpop.f32.mrb[17].mxu1 }
 0x45f   : > { %v4145_v44 = vadd.f32 %v27382_v48, %v4027_v45  ;;  %v22609_v39 = vpop.f32.mrb[18].mxu1  ;;  %22635 = vmatmul.mubr.msk.bf16.gmra.mrb[72].mxu0 %vm737_vm3, %v27441_v5 }
 0x460   : > { %v4179_v60 = vmax.f32 %v4147_v31, 0.0  ;;  %v4148_v15 = vadd.f32 %v22609_v39, %v27382_v48  ;;  %v4030_v22 = vpop.f32.mrb[19].mxu1  ;;  %22638 = vmatprep.mubr.msk.bf16.mxu0 %vm737_vm3, %v27444_v18 }
 0x461   : > { %v4177_v36 = vmax.f32 %v4145_v44, 0.0  ;;  %v4146_v0 = vadd.f32 %v27382_v48, %v4030_v22  ;;  %v4293_v49 = vld [vmem:[#allocation2 + $0x108] sm:$0xff] }
 0x462   : > { %4211 = vst.msk [vmem:[#allocation2 + $0x148] sm:$0xff] %vm737_vm3, %v4179_v60  ;;  %v4180_v9 = vmax.f32 %v4148_v15, 0.0  ;;  %v4291_v30 = vld [vmem:[#allocation2 + $0xe8] sm:$0xff] }
 0x463   : > { %4209 = vst.msk [vmem:[#allocation2 + $0x128] sm:$0xff] %vm737_vm3, %v4177_v36  ;;  %v4178_v23 = vmax.f32 %v4146_v0, 0.0  ;;  %v4294_v43 = vld [vmem:[#allocation2 + $0x110] sm:$0xff] }
 0x464   : > { %4212 = vst.msk [vmem:[#allocation2 + $0x150] sm:$0xff] %vm737_vm3, %v4180_v9  ;;  %v4292_v3 = vld [vmem:[#allocation2 + $0xf0] sm:$0xff]  ;;  %v27460_v62 = vpack.c.bf16 %v4294_v43, %v4293_v49 }
 0x465   : > { %4210 = vst.msk [vmem:[#allocation2 + $0x130] sm:$0xff] %vm737_vm3, %v4178_v23  ;;  %v22612_v27 = vpop.f32.mrb[20].mxu1  ;;  %v27457_v54 = vpack.c.bf16 %v4292_v3, %v4291_v30 }
 0x466   : > { %v4151_v34 = vadd.f32 %v22612_v27, %v27382_v48  ;;  %v4043_v57 = vpop.f32.mrb[21].mxu1 }
 0x467   : > { %v4149_v61 = vadd.f32 %v27382_v48, %v4043_v57  ;;  %v22613_v63 = vpop.f32.mrb[22].mxu1  ;;  %22639 = vmatmul.mubr.msk.bf16.gmra.mrb[76].mxu0 %vm737_vm3, %v27457_v54 }
 0x468   : > { %v4183_v29 = vmax.f32 %v4151_v34, 0.0  ;;  %v4152_v58 = vadd.f32 %v22613_v63, %v27382_v48  ;;  %v4046_v42 = vpop.f32.mrb[23].mxu1  ;;  %22642 = vmatprep.mubr.msk.bf16.mxu0 %vm737_vm3, %v27460_v62 }
 0x469   : > { %v4181_v17 = vmax.f32 %v4149_v61, 0.0  ;;  %v4150_v32 = vadd.f32 %v27382_v48, %v4046_v42  ;;  %v4297_v8 = vld [vmem:[#allocation2 + $0x148] sm:$0xff] }
 0x46a   : > { %4215 = vst.msk [vmem:[#allocation2 + $0x188] sm:$0xff] %vm737_vm3, %v4183_v29  ;;  %v4184_v20 = vmax.f32 %v4152_v58, 0.0  ;;  %v4295_v55 = vld [vmem:[#allocation2 + $0x128] sm:$0xff] }
 0x46b   : > { %4213 = vst.msk [vmem:[#allocation2 + $0x168] sm:$0xff] %vm737_vm3, %v4181_v17  ;;  %v4182_v47 = vmax.f32 %v4150_v32, 0.0  ;;  %v4298_v26 = vld [vmem:[#allocation2 + $0x150] sm:$0xff] }
 0x46c   : > { %4216 = vst.msk [vmem:[#allocation2 + $0x190] sm:$0xff] %vm737_vm3, %v4184_v20  ;;  %v4296_v35 = vld [vmem:[#allocation2 + $0x130] sm:$0xff]  ;;  %v27476_v7 = vpack.c.bf16 %v4298_v26, %v4297_v8 }
 0x46d   : > { %4214 = vst.msk [vmem:[#allocation2 + $0x170] sm:$0xff] %vm737_vm3, %v4182_v47  ;;  %v22616_v51 = vpop.f32.mrb[24].mxu1  ;;  %v27473_v33 = vpack.c.bf16 %v4296_v35, %v4295_v55  ;;  %v4226_v47 = vld [vmem:[#allocation2 + $0xf] sm:$0xff] }
 0x46e   : > { %v4155_v21 = vadd.f32 %v22616_v51, %v27382_v48  ;;  %v4059_v50 = vpop.f32.mrb[25].mxu1  ;;  %v4228_v8 = vld [vmem:[#allocation2 + $0x2f] sm:$0xff] }
 0x46f   : > { %v4153_v12 = vadd.f32 %v27382_v48, %v4059_v50  ;;  %v22617_v24 = vpop.f32.mrb[26].mxu1  ;;  %22643 = vmatmul.mubr.msk.bf16.gmra.mrb[80].mxu0 %vm737_vm3, %v27473_v33  ;;  %v4227_v50 = vld [vmem:[#allocation2 + $0x27] sm:$0xff] }
 0x470   : > { %v4187_v13 = vmax.f32 %v4155_v21, 0.0  ;;  %v4156_v56 = vadd.f32 %v22617_v24, %v27382_v48  ;;  %v4062_v19 = vpop.f32.mrb[27].mxu1  ;;  %22646 = vmatprep.mubr.msk.bf16.mxu0 %vm737_vm3, %v27476_v7  ;;  %v4230_v21 = vld [vmem:[#allocation2 + $0x4f] sm:$0xff]  ;;  %v4229_v24 = vld [vmem:[#allocation2 + $0x47] sm:$0xff] }
 0x471   : > { %v4185_v2 = vmax.f32 %v4153_v12, 0.0  ;;  %v4154_v16 = vadd.f32 %v27382_v48, %v4062_v19  ;;  %v4301_v36 = vld [vmem:[#allocation2 + $0x188] sm:$0xff]  ;;  %v27518_v12 = vpack.c.bf16 %v4228_v8, %v4227_v50  ;;  %v27533_v19 = vld [vmem:[%s31051_s2 + $0x30] sm:$0xff]  }
 0x472   : > { %4219 = vst.msk [vmem:[#allocation2 + $0x1c8] sm:$0xff] %vm737_vm3, %v4187_v13  ;;  %v4188_v31 = vmax.f32 %v4156_v56, 0.0  ;;  %v4299_v39 = vld [vmem:[#allocation2 + $0x168] sm:$0xff]  ;;  %v27523_v56 = vpack.c.bf16 %v4230_v21, %v4229_v24 }
 0x473   : > { %4217 = vst.msk [vmem:[#allocation2 + $0x1a8] sm:$0xff] %vm737_vm3, %v4185_v2  ;;  %v4186_v45 = vmax.f32 %v4154_v16, 0.0  ;;  %v4302_v44 = vld [vmem:[#allocation2 + $0x190] sm:$0xff]  ;;  %v26044_v13 = vld [vmem:[%s31051_s2 + $0x28] sm:$0xff]  }
 0x474   : > { %4220 = vst.msk [vmem:[#allocation2 + $0x1d0] sm:$0xff] %vm737_vm3, %v4188_v31  ;;  %v4300_v60 = vld [vmem:[#allocation2 + $0x170] sm:$0xff]  ;;  %v27492_v23 = vpack.c.bf16 %v4302_v44, %v4301_v36  ;;  %v4231_v31 = vld [vmem:[#allocation2 + $0x67] sm:$0xff] }
 0x475   : > { %4218 = vst.msk [vmem:[#allocation2 + $0x1b0] sm:$0xff] %vm737_vm3, %v4186_v45  ;;  %v22620_v15 = vpop.f32.mrb[28].mxu1  ;;  %v27489_v22 = vpack.c.bf16 %v4300_v60, %v4299_v39  ;;  %v4232_v2 = vld [vmem:[#allocation2 + $0x6f] sm:$0xff]  ;;  %v4233_v44 = vld [vmem:[#allocation2 + $0x87] sm:$0xff] }
 0x476   : > { %v4159_v0 = vadd.f32 %v22620_v15, %v27382_v48  ;;  %v4075_v9 = vpop.f32.mrb[29].mxu1  ;;  %v4234_v16 = vld [vmem:[#allocation2 + $0x8f] sm:$0xff]  ;;  %v27535_v45 = vpack.c.bf16 %v4232_v2, %v4231_v31  ;;  %v4235_v15 = vld [vmem:[#allocation2 + $0xa7] sm:$0xff] }
 0x477   : > { %v4157_v43 = vadd.f32 %v27382_v48, %v4075_v9  ;;  %v22621_v30 = vpop.f32.mrb[30].mxu1  ;;  %22647 = vmatmul.mubr.msk.bf16.gmra.mrb[84].mxu0 %vm737_vm3, %v27489_v22  ;;  %v27538_v39 = vpack.c.bf16 %v4234_v16, %v4233_v44  ;;  %v4238_v60 = vld [vmem:[#allocation2 + $0xcf] sm:$0xff] }
 0x478   : > { %v4191_v3 = vmax.f32 %v4159_v0, 0.0  ;;  %v4160_v27 = vadd.f32 %v22621_v30, %v27382_v48  ;;  %v4078_v49 = vpop.f32.mrb[31].mxu1  ;;  %22650 = vmatprep.mubr.msk.bf16.mxu0 %vm737_vm3, %v27492_v23  ;;  %v4237_v0 = vld [vmem:[#allocation2 + $0xc7] sm:$0xff]  ;;  %v4242_v30 = vld [vmem:[#allocation2 + $0x10f] sm:$0xff] }
 0x479   : > { %v4189_v34 = vmax.f32 %v4157_v43, 0.0  ;;  %v4158_v57 = vadd.f32 %v27382_v48, %v4078_v49  ;;  %v4305_v32 = vld [vmem:[#allocation2 + $0x1c8] sm:$0xff]  ;;  %v27546_v9 = vpack.c.bf16 %v4238_v60, %v4237_v0  ;;  %v4773_v31 = vld [vmem:[#allocation2 + $0x11] sm:$0xff] }
 0x47a   : > { %4223 = vst.msk [vmem:[#allocation2 + $0x208] sm:$0xff] %vm737_vm3, %v4191_v3  ;;  %v4192_v61 = vmax.f32 %v4160_v27, 0.0  ;;  %v4303_v58 = vld [vmem:[#allocation2 + $0x1a8] sm:$0xff] }
 0x47b   : > { %4221 = vst.msk [vmem:[#allocation2 + $0x1e8] sm:$0xff] %vm737_vm3, %v4189_v34  ;;  %v4190_v63 = vmax.f32 %v4158_v57, 0.0  ;;  %v4306_v29 = vld [vmem:[#allocation2 + $0x1d0] sm:$0xff]  ;;  %v4225_v48 = vld [vmem:[#allocation2 + $0x7] sm:$0xff] }
 0x47c   : > { %4224 = vst.msk [vmem:[#allocation2 + $0x210] sm:$0xff] %vm737_vm3, %v4192_v61  ;;  %v4304_v42 = vld [vmem:[#allocation2 + $0x1b0] sm:$0xff]  ;;  %v27507_v20 = vpack.c.bf16 %v4306_v29, %v4305_v32  ;;  %v4257_v35 = vpack.c.bf16 %v4226_v47, %v4225_v48  ;;  %v4239_v3 = vld [vmem:[#allocation2 + $0xe7] sm:$0xff] }
 0x47d   : > { %4222 = vst.msk [vmem:[#allocation2 + $0x1f0] sm:$0xff] %vm737_vm3, %v4190_v63  ;;  %v27505_v17 = vpack.c.bf16 %v4304_v42, %v4303_v58  ;;  %v4240_v43 = vld [vmem:[#allocation2 + $0xef] sm:$0xff]  ;;  %v4241_v49 = vld [vmem:[#allocation2 + $0x107] sm:$0xff] }
 0x47e   : > { %v27552_v27 = vpack.c.bf16 %v4240_v43, %v4239_v3  ;;  %v27554_v34 = vpack.c.bf16 %v4242_v30, %v4241_v49  ;;  %v4244_v57 = vld [vmem:[#allocation2 + $0x12f] sm:$0xff]  ;;  %v4243_v63 = vld [vmem:[#allocation2 + $0x127] sm:$0xff] }
 0x47f   : > { %22651 = vmatmul.mubr.msk.bf16.gmra.mrb[88].mxu0 %vm737_vm3, %v27505_v17  ;;  %v4246_v61 = vld [vmem:[#allocation2 + $0x14f] sm:$0xff]  ;;  %v27560_v29 = vpack.c.bf16 %v4244_v57, %v4243_v63  ;;  %v4245_v58 = vld [vmem:[#allocation2 + $0x147] sm:$0xff]  ;;  %v26046_v57 = vld [vmem:[%s31051_s2 + $0x38] sm:$0xff]  }
 0x480   : > { %22654 = vmatprep.mubr.msk.bf16.mxu0 %vm737_vm3, %v27507_v20  ;;  %v27562_v42 = vpack.c.bf16 %v4246_v61, %v4245_v58  ;;  %v4248_v32 = vld [vmem:[#allocation2 + $0x16f] sm:$0xff]  ;;  %v4247_v47 = vld [vmem:[#allocation2 + $0x167] sm:$0xff] }
 0x481   : > { %v4250_v48 = vld [vmem:[#allocation2 + $0x18f] sm:$0xff]  ;;  %v4251_v50 = vld [vmem:[#allocation2 + $0x1a7] sm:$0xff] }
 0x482   : > { %v4307_v26 = vld [vmem:[#allocation2 + $0x1e8] sm:$0xff]  ;;  %v4775_v43 = vld [vmem:[#allocation2 + $0x31] sm:$0xff]  ;;  %v26047_v63 = vld [vmem:[%s31051_s2 + $0x40] sm:$0xff]  }
 0x483   : > { %v4252_v8 = vld [vmem:[#allocation2 + $0x1af] sm:$0xff] }
 0x484   : > { %v4308_v55 = vld [vmem:[#allocation2 + $0x1f0] sm:$0xff]  ;;  %v27576_v24 = vpack.c.bf16 %v4252_v8, %v4251_v50 }
 0x485   : > { %v27513_v51 = vpack.c.bf16 %v4308_v55, %v4307_v26  ;;  %v27568_v26 = vpack.c.bf16 %v4248_v32, %v4247_v47  ;;  %v4249_v55 = vld [vmem:[#allocation2 + $0x187] sm:$0xff]  ;;  %v4254_v21 = vld [vmem:[#allocation2 + $0x1cf] sm:$0xff] }
 0x486   : > { %v4772_v16 = vld [vmem:[#allocation2 + $0x9] sm:$0xff]  ;;  %v4777_v3 = vld [vmem:[#allocation2 + $0x51] sm:$0xff] }
 0x487   : > { %22655 = vmatmul.mubr.msk.bf16.gmra.mrb[92].mxu0 %vm737_vm3, %v27513_v51  ;;  %v4256_v44 = vld [vmem:[#allocation2 + $0x1ef] sm:$0xff]  ;;  %v4804_v60 = vpack.c.bf16 %v4773_v31, %v4772_v16 }
 0x488   : > { %22662 = vmatprep.mubr.msk.bf16.mxu0 %vm737_vm3, %v4257_v35  ;;  %v27570_v35 = vpack.c.bf16 %v4250_v48, %v4249_v55  ;;  %v4774_v0 = vld [vmem:[#allocation2 + $0x29] sm:$0xff]  ;;  %v4779_v32 = vld [vmem:[#allocation2 + $0x71] sm:$0xff] }
 0x489   : > { %v4776_v30 = vld [vmem:[#allocation2 + $0x49] sm:$0xff]  ;;  %v27589_v49 = vpack.c.bf16 %v4775_v43, %v4774_v0  ;;  %v4781_v47 = vld [vmem:[#allocation2 + $0x91] sm:$0xff] }
 0x48a   : > { %v27594_v61 = vpack.c.bf16 %v4777_v3, %v4776_v30  ;;  %v4778_v58 = vld [vmem:[#allocation2 + $0x69] sm:$0xff]  ;;  %v4789_v0 = vld [vmem:[#allocation2 + $0x111] sm:$0xff] }
 0x48b   : > { %v4780_v48 = vld [vmem:[#allocation2 + $0x89] sm:$0xff]  ;;  %v27604_v55 = vpack.c.bf16 %v4779_v32, %v4778_v58  ;;  %v4793_v32 = vld [vmem:[#allocation2 + $0x151] sm:$0xff] }
 0x48c   : > { %v27606_v8 = vpack.c.bf16 %v4781_v47, %v4780_v48  ;;  %v4784_v50 = vld [vmem:[#allocation2 + $0xc9] sm:$0xff] }
 0x48d   : > { %v4790_v3 = vld [vmem:[#allocation2 + $0x129] sm:$0xff] }
 0x48e   : > { %v4792_v58 = vld [vmem:[#allocation2 + $0x149] sm:$0xff] }
 0x48f   : > { %22663 = vmatmul.mubr.msk.bf16.vlgmr.msra.gmra.mrb[64].mxu0 %vm737_vm3, %v27518_v12  ;;  %v27630_v47 = vpack.c.bf16 %v4793_v32, %v4792_v58 }
 0x490   : > { %22666 = vmatprep.mubr.msk.bf16.mxu0 %vm737_vm3, %v27523_v56  ;;  %22695 = vmatpush3.bf16.msra.mxu0 %v27418_v37  ;;  %v4236_v37 = vld [vmem:[#allocation2 + $0xaf] sm:$0xff] }
 0x491   : > { %22696 = vmatprep.subr.bf16.mxu0 %v26044_v13  ;;  %v27544_v36 = vpack.c.bf16 %v4236_v37, %v4235_v15  ;;  %v4255_v37 = vld [vmem:[#allocation2 + $0x1e7] sm:$0xff] }
 0x492   : > { %v27584_v15 = vpack.c.bf16 %v4256_v44, %v4255_v37  ;;  %v4786_v44 = vld [vmem:[#allocation2 + $0xe9] sm:$0xff]  ;;  %v4787_v37 = vld [vmem:[#allocation2 + $0xf1] sm:$0xff] }
 0x493   : > { %v27620_v43 = vpack.c.bf16 %v4787_v37, %v4786_v44 }
 0x494   : > { %22697 = vmatpush3.bf16.msra.mxu0 %v26044_v13  ;;  %v4253_v13 = vld [vmem:[#allocation2 + $0x1c7] sm:$0xff] }
 0x495   : > { %22730 = vmatprep.subr.bf16.mxu0 %v27533_v19  ;;  %v27578_v2 = vpack.c.bf16 %v4254_v21, %v4253_v13  ;;  %v4783_v21 = vld [vmem:[#allocation2 + $0xb1] sm:$0xff] }
 0x496   : > { %v4785_v13 = vld [vmem:[#allocation2 + $0xd1] sm:$0xff] }
 0x497   : > { %22667 = vmatmul.mubr.msk.bf16.gmra.mrb[68].mxu0 %vm737_vm3, %v27535_v45  ;;  %v27614_v31 = vpack.c.bf16 %v4785_v13, %v4784_v50  ;;  %v4796_v50 = vld [vmem:[#allocation2 + $0x189] sm:$0xff]  ;;  %v4797_v13 = vld [vmem:[#allocation2 + $0x191] sm:$0xff] }
 0x498   : > { %22670 = vmatprep.mubr.msk.bf16.mxu0 %vm737_vm3, %v27538_v39  ;;  %v27638_v37 = vpack.c.bf16 %v4797_v13, %v4796_v50  ;;  %v26048_v13 = vld [vmem:[%s31051_s2 + $0x48] sm:$0xff]  }
 0x49f   : > { %22671 = vmatmul.mubr.msk.bf16.gmra.mrb[72].mxu0 %vm737_vm3, %v27544_v36 }
 0x4a0   : > { %22674 = vmatprep.mubr.msk.bf16.mxu0 %vm737_vm3, %v27546_v9 }
 0x4a7   : > { %22675 = vmatmul.mubr.msk.bf16.gmra.mrb[76].mxu0 %vm737_vm3, %v27552_v27 }
 0x4a8   : > { %22678 = vmatprep.mubr.msk.bf16.mxu0 %vm737_vm3, %v27554_v34 }
 0x4af   : > { %22679 = vmatmul.mubr.msk.bf16.gmra.mrb[80].mxu0 %vm737_vm3, %v27560_v29 }
 0x4b0   : > { %22682 = vmatprep.mubr.msk.bf16.mxu0 %vm737_vm3, %v27562_v42 }
 0x4b7   : > { %22683 = vmatmul.mubr.msk.bf16.gmra.mrb[84].mxu0 %vm737_vm3, %v27568_v26 }
 0x4b8   : > { %22686 = vmatprep.mubr.msk.bf16.mxu0 %vm737_vm3, %v27570_v35 }
 0x4bf   : > { %22687 = vmatmul.mubr.msk.bf16.gmra.mrb[88].mxu0 %vm737_vm3, %v27576_v24 }
 0x4c0   : > { %22690 = vmatprep.mubr.msk.bf16.mxu0 %vm737_vm3, %v27578_v2 }
 0x4c7   : > { %22691 = vmatmul.mubr.msk.bf16.gmra.mrb[92].mxu0 %vm737_vm3, %v27584_v15 }
 0x4c8   : > { %22698 = vmatprep.mubr.msk.bf16.mxu0 %vm737_vm3, %v4804_v60  ;;  %v4788_v60 = vld [vmem:[#allocation2 + $0x109] sm:$0xff] }
 0x4c9   : > { %v27622_v30 = vpack.c.bf16 %v4789_v0, %v4788_v60  ;;  %v4798_v60 = vld [vmem:[#allocation2 + $0x1a9] sm:$0xff]  ;;  %v4799_v0 = vld [vmem:[#allocation2 + $0x1b1] sm:$0xff] }
 0x4ca   : > { %v27644_v58 = vpack.c.bf16 %v4799_v0, %v4798_v60  ;;  %v26049_v60 = vld [vmem:[%s31051_s2 + $0x50] sm:$0xff]  }
 0x4cf   : > { %22699 = vmatmul.mubr.msk.bf16.vlgmr.msra.gmra.mrb[64].mxu0 %vm737_vm3, %v27589_v49 }
 0x4d0   : > { %22702 = vmatprep.mubr.msk.bf16.mxu0 %vm737_vm3, %v27594_v61  ;;  %22731 = vmatpush3.bf16.msra.mxu0 %v27533_v19  ;;  %v4782_v19 = vld [vmem:[#allocation2 + $0xa9] sm:$0xff] }
 0x4d1   : > { %22732 = vmatprep.subr.bf16.mxu0 %v26046_v57  ;;  %v27612_v16 = vpack.c.bf16 %v4783_v21, %v4782_v19  ;;  %v4794_v19 = vld [vmem:[#allocation2 + $0x169] sm:$0xff]  ;;  %v4795_v21 = vld [vmem:[#allocation2 + $0x171] sm:$0xff] }
 0x4d2   : > { %v27636_v44 = vpack.c.bf16 %v4795_v21, %v4794_v19  ;;  %v4802_v19 = vld [vmem:[#allocation2 + $0x1e9] sm:$0xff]  ;;  %v4803_v21 = vld [vmem:[#allocation2 + $0x1f1] sm:$0xff] }
 0x4d3   : > { %v27652_v50 = vpack.c.bf16 %v4803_v21, %v4802_v19  ;;  %v6311_v19 = vld [vmem:[#allocation2 + $0xd0] sm:$0xff]  ;;  %v6308_v21 = vld [vmem:[#allocation2 + $0xa8] sm:$0xff] }
 0x4d4   : > { %22733 = vmatpush3.bf16.msra.mxu0 %v26046_v57  ;;  %v4791_v57 = vld [vmem:[#allocation2 + $0x131] sm:$0xff] }
 0x4d5   : > { %22766 = vmatprep.subr.bf16.mxu0 %v26047_v63  ;;  %v27628_v48 = vpack.c.bf16 %v4791_v57, %v4790_v3  ;;  %v4800_v3 = vld [vmem:[#allocation2 + $0x1c9] sm:$0xff]  ;;  %v4801_v57 = vld [vmem:[#allocation2 + $0x1d1] sm:$0xff] }
 0x4d6   : > { %v27646_v32 = vpack.c.bf16 %v4801_v57, %v4800_v3  ;;  %v26050_v3 = vld [vmem:[%s31051_s2 + $0x58] sm:$0xff]   ;;  %v26051_v57 = vld [vmem:[%s31051_s2 + $0x60] sm:$0xff]  }
 0x4d7   : > { %22703 = vmatmul.mubr.msk.bf16.gmra.mrb[68].mxu0 %vm737_vm3, %v27604_v55 }
 0x4d8   : > { %22706 = vmatprep.mubr.msk.bf16.mxu0 %vm737_vm3, %v27606_v8 }
 0x4df   : > { %22707 = vmatmul.mubr.msk.bf16.gmra.mrb[72].mxu0 %vm737_vm3, %v27612_v16 }
 0x4e0   : > { %22710 = vmatprep.mubr.msk.bf16.mxu0 %vm737_vm3, %v27614_v31 }
 0x4e7   : > { %22711 = vmatmul.mubr.msk.bf16.gmra.mrb[76].mxu0 %vm737_vm3, %v27620_v43 }
 0x4e8   : > { %22714 = vmatprep.mubr.msk.bf16.mxu0 %vm737_vm3, %v27622_v30 }
 0x4ef   : > { %22715 = vmatmul.mubr.msk.bf16.gmra.mrb[80].mxu0 %vm737_vm3, %v27628_v48 }
 0x4f0   : > { %22718 = vmatprep.mubr.msk.bf16.mxu0 %vm737_vm3, %v27630_v47 }
 0x4f7   : > { %22719 = vmatmul.mubr.msk.bf16.gmra.mrb[84].mxu0 %vm737_vm3, %v27636_v44 }
 0x4f8   : > { %22722 = vmatprep.mubr.msk.bf16.mxu0 %vm737_vm3, %v27638_v37 }
 0x4ff   : > { %22723 = vmatmul.mubr.msk.bf16.gmra.mrb[88].mxu0 %vm737_vm3, %v27644_v58 }
 0x500   : > { %22726 = vmatprep.mubr.msk.bf16.mxu0 %vm737_vm3, %v27646_v32 }
 0x507   : > { %22727 = vmatmul.mubr.msk.bf16.gmra.mrb[92].mxu0 %vm737_vm3, %v27652_v50 }
 0x508   : > { %22734 = vmatprep.mubr.msk.bf16.mxu0 %vm737_vm3, %v27518_v12  ;;  %v5109_v12 = vld [vmem:[#allocation2 + $0x20f] sm:$0xff] }
 0x50f   : > { %22735 = vmatmul.mubr.msk.bf16.vlgmr.msra.gmra.mrb[64].mxu0 %vm737_vm3, %v27523_v56 }
 0x510   : > { %22738 = vmatprep.mubr.msk.bf16.mxu0 %vm737_vm3, %v27535_v45  ;;  %22767 = vmatpush3.bf16.msra.mxu0 %v26047_v63  ;;  %v5108_v63 = vld [vmem:[#allocation2 + $0x207] sm:$0xff] }
 0x511   : > { %22768 = vmatprep.subr.bf16.mxu0 %v26048_v13  ;;  %v27692_v0 = vpack.c.bf16 %v5109_v12, %v5108_v63  ;;  %v6313_v63 = vld [vmem:[#allocation2 + $0xf0] sm:$0xff] }
 0x514   : > { %22769 = vmatpush3.bf16.msra.mxu0 %v26048_v13 }
 0x515   : > { %22802 = vmatprep.subr.bf16.mxu0 %v26049_v60 }
 0x517   : > { %22739 = vmatmul.mubr.msk.bf16.gmra.mrb[68].mxu0 %vm737_vm3, %v27538_v39 }
 0x518   : > { %22742 = vmatprep.mubr.msk.bf16.mxu0 %vm737_vm3, %v27544_v36 }
 0x51f   : > { %22743 = vmatmul.mubr.msk.bf16.gmra.mrb[72].mxu0 %vm737_vm3, %v27546_v9 }
 0x520   : > { %22746 = vmatprep.mubr.msk.bf16.mxu0 %vm737_vm3, %v27552_v27 }
 0x527   : > { %22747 = vmatmul.mubr.msk.bf16.gmra.mrb[76].mxu0 %vm737_vm3, %v27554_v34 }
 0x528   : > { %22750 = vmatprep.mubr.msk.bf16.mxu0 %vm737_vm3, %v27560_v29 }
 0x52f   : > { %22751 = vmatmul.mubr.msk.bf16.gmra.mrb[80].mxu0 %vm737_vm3, %v27562_v42 }
 0x530   : > { %22754 = vmatprep.mubr.msk.bf16.mxu0 %vm737_vm3, %v27568_v26 }
 0x537   : > { %22755 = vmatmul.mubr.msk.bf16.gmra.mrb[84].mxu0 %vm737_vm3, %v27570_v35 }
 0x538   : > { %22758 = vmatprep.mubr.msk.bf16.mxu0 %vm737_vm3, %v27576_v24 }
 0x53f   : > { %22759 = vmatmul.mubr.msk.bf16.gmra.mrb[88].mxu0 %vm737_vm3, %v27578_v2 }
 0x540   : > { %22762 = vmatprep.mubr.msk.bf16.mxu0 %vm737_vm3, %v27584_v15 }
 0x547   : > { %22763 = vmatmul.mubr.msk.bf16.gmra.mrb[92].mxu0 %vm737_vm3, %v27692_v0 }
 0x548   : > { %22770 = vmatprep.mubr.msk.bf16.mxu0 %vm737_vm3, %v27400_v46  ;;  %v5415_v46 = vld [vmem:[#allocation2 + $0x210] sm:$0xff] }
 0x54f   : > { %22771 = vmatmul.mubr.msk.bf16.vlgmr.msra.gmra.mrb[64].mxu0 %vm737_vm3, %v27406_v40  ;;  %v5414_v40 = vld [vmem:[#allocation2 + $0x208] sm:$0xff] }
 0x550   : > { %22774 = vmatprep.mubr.msk.bf16.mxu0 %vm737_vm3, %v27424_v53  ;;  %22803 = vmatpush3.bf16.msra.mxu0 %v26049_v60  ;;  %v27732_v53 = vpack.c.bf16 %v5415_v46, %v5414_v40  ;;  %v6310_v60 = vld [vmem:[#allocation2 + $0xc8] sm:$0xff] }
 0x551   : > { %22804 = vmatprep.subr.bf16.mxu0 %v26050_v3  ;;  %v6338_v12 = vpack.c.bf16 %v6311_v19, %v6310_v60  ;;  %v6314_v46 = vld [vmem:[#allocation2 + $0x108] sm:$0xff] }
 0x554   : > { %22805 = vmatpush3.bf16.msra.mxu0 %v26050_v3  ;;  %v6312_v3 = vld [vmem:[#allocation2 + $0xe8] sm:$0xff] }
 0x555   : > { %22838 = vmatprep.subr.bf16.mxu0 %v26051_v57 }
 0x557   : > { %22775 = vmatmul.mubr.msk.bf16.gmra.mrb[68].mxu0 %vm737_vm3, %v27428_v59  ;;  %v26052_v59 = vld [vmem:[%s31051_s2 + $0x68] sm:$0xff]  }
 0x558   : > { %22778 = vmatprep.mubr.msk.bf16.mxu0 %vm737_vm3, %v27441_v5  ;;  %v26053_v5 = vld [vmem:[%s31051_s2 + $0x70] sm:$0xff]  }
 0x55f   : > { %22779 = vmatmul.mubr.msk.bf16.gmra.mrb[72].mxu0 %vm737_vm3, %v27444_v18  ;;  %v5720_v18 = vld [vmem:[#allocation2 + $0x209] sm:$0xff] }
 0x560   : > { %22782 = vmatprep.mubr.msk.bf16.mxu0 %vm737_vm3, %v27457_v54  ;;  %v5721_v54 = vld [vmem:[#allocation2 + $0x211] sm:$0xff] }
 0x567   : > { %22783 = vmatmul.mubr.msk.bf16.gmra.mrb[76].mxu0 %vm737_vm3, %v27460_v62  ;;  %v27772_v62 = vpack.c.bf16 %v5721_v54, %v5720_v18  ;;  %v6316_v18 = vld [vmem:[#allocation2 + $0x128] sm:$0xff] }
 0x568   : > { %22786 = vmatprep.mubr.msk.bf16.mxu0 %vm737_vm3, %v27473_v33  ;;  %v26054_v33 = vld [vmem:[%s31051_s2 + $0x78] sm:$0xff]  }
 0x56f   : > { %22787 = vmatmul.mubr.msk.bf16.gmra.mrb[80].mxu0 %vm737_vm3, %v27476_v7  ;;  %v26055_v7 = vld [vmem:[%s31051_s2 + $0x80] sm:$0xff]  }
 0x570   : > { %22790 = vmatprep.mubr.msk.bf16.mxu0 %vm737_vm3, %v27489_v22 }
 0x577   : > { %22791 = vmatmul.mubr.msk.bf16.gmra.mrb[84].mxu0 %vm737_vm3, %v27492_v23 }
 0x578   : > { %22794 = vmatprep.mubr.msk.bf16.mxu0 %vm737_vm3, %v27505_v17 }
 0x57f   : > { %22795 = vmatmul.mubr.msk.bf16.gmra.mrb[88].mxu0 %vm737_vm3, %v27507_v20 }
 0x580   : > { %22798 = vmatprep.mubr.msk.bf16.mxu0 %vm737_vm3, %v27513_v51 }
 0x587   : > { %22799 = vmatmul.mubr.msk.bf16.gmra.mrb[92].mxu0 %vm737_vm3, %v27732_v53 }
 0x588   : > { %22806 = vmatprep.mubr.msk.bf16.mxu0 %vm737_vm3, %v27589_v49  ;;  %v6309_v49 = vld [vmem:[#allocation2 + $0xb0] sm:$0xff] }
 0x589   : > { %v6337_v13 = vpack.c.bf16 %v6309_v49, %v6308_v21 }
 0x58f   : > { %22807 = vmatmul.mubr.msk.bf16.vlgmr.msra.gmra.mrb[64].mxu0 %vm737_vm3, %v27594_v61 }
 0x590   : > { %22810 = vmatprep.mubr.msk.bf16.mxu0 %vm737_vm3, %v27604_v55  ;;  %22839 = vmatpush3.bf16.msra.mxu0 %v26051_v57  ;;  %v6339_v57 = vpack.c.bf16 %v6313_v63, %v6312_v3 }
 0x591   : > { %22840 = vmatprep.subr.bf16.mxu0 %v26052_v59 }
 0x594   : > { %22841 = vmatpush3.bf16.msra.mxu0 %v26052_v59  ;;  %v6317_v59 = vld [vmem:[#allocation2 + $0x130] sm:$0xff] }
 0x595   : > { %22874 = vmatprep.subr.bf16.mxu0 %v26053_v5  ;;  %v6341_v54 = vpack.c.bf16 %v6317_v59, %v6316_v18  ;;  %v31061_v18 = vmax.f32 %v26787_v41, 0.0 }
 0x597   : > { %22811 = vmatmul.mubr.msk.bf16.gmra.mrb[68].mxu0 %vm737_vm3, %v27606_v8 }
 0x598   : > { %22814 = vmatprep.mubr.msk.bf16.mxu0 %vm737_vm3, %v27612_v16 }
 0x59f   : > { %22815 = vmatmul.mubr.msk.bf16.gmra.mrb[72].mxu0 %vm737_vm3, %v27614_v31 }
 0x5a0   : > { %22818 = vmatprep.mubr.msk.bf16.mxu0 %vm737_vm3, %v27620_v43 }
 0x5a7   : > { %22819 = vmatmul.mubr.msk.bf16.gmra.mrb[76].mxu0 %vm737_vm3, %v27622_v30 }
 0x5a8   : > { %22822 = vmatprep.mubr.msk.bf16.mxu0 %vm737_vm3, %v27628_v48 }
 0x5af   : > { %22823 = vmatmul.mubr.msk.bf16.gmra.mrb[80].mxu0 %vm737_vm3, %v27630_v47 }
 0x5b0   : > { %22826 = vmatprep.mubr.msk.bf16.mxu0 %vm737_vm3, %v27636_v44 }
 0x5b7   : > { %22827 = vmatmul.mubr.msk.bf16.gmra.mrb[84].mxu0 %vm737_vm3, %v27638_v37 }
 0x5b8   : > { %22830 = vmatprep.mubr.msk.bf16.mxu0 %vm737_vm3, %v27644_v58 }
 0x5bf   : > { %22831 = vmatmul.mubr.msk.bf16.gmra.mrb[88].mxu0 %vm737_vm3, %v27646_v32 }
 0x5c0   : > { %22834 = vmatprep.mubr.msk.bf16.mxu0 %vm737_vm3, %v27652_v50 }
 0x5c7   : > { %22835 = vmatmul.mubr.msk.bf16.gmra.mrb[92].mxu0 %vm737_vm3, %v27772_v62 }
 0x5c8   : > { %22842 = vmatprep.mubr.msk.bf16.mxu0 %vm737_vm3, %v27523_v56  ;;  %v6026_v56 = vld [vmem:[#allocation2 + $0x227] sm:$0xff] }
 0x5cf   : > { %22843 = vmatmul.mubr.msk.bf16.vlgmr.msra.gmra.mrb[64].mxu0 %vm737_vm3, %v27535_v45  ;;  %v6027_v45 = vld [vmem:[#allocation2 + $0x22f] sm:$0xff] }
 0x5d0   : > { %22846 = vmatprep.mubr.msk.bf16.mxu0 %vm737_vm3, %v27538_v39  ;;  %22875 = vmatpush3.bf16.msra.mxu0 %v26053_v5  ;;  %v6043_v39 = vpack.c.bf16 %v6027_v45, %v6026_v56  ;;  %v6319_v5 = vld [vmem:[#allocation2 + $0x150] sm:$0xff]  ;;  %v6332_v56 = vld [vmem:[#allocation2 + $0x228] sm:$0xff] }
 0x5d1   : > { %22876 = vmatprep.subr.bf16.mxu0 %v26054_v33  ;;  %v6333_v45 = vld [vmem:[#allocation2 + $0x230] sm:$0xff] }
 0x5d4   : > { %22877 = vmatpush3.bf16.msra.mxu0 %v26054_v33  ;;  %v6318_v33 = vld [vmem:[#allocation2 + $0x148] sm:$0xff] }
 0x5d5   : > { %22910 = vmatprep.subr.bf16.mxu0 %v26055_v7 }
 0x5d7   : > { %22847 = vmatmul.mubr.msk.bf16.gmra.mrb[68].mxu0 %vm737_vm3, %v27544_v36  ;;  %v6303_v36 = vld [vmem:[#allocation2 + $0x50] sm:$0xff] }
 0x5d8   : > { %22850 = vmatprep.mubr.msk.bf16.mxu0 %vm737_vm3, %v27546_v9  ;;  %v6302_v9 = vld [vmem:[#allocation2 + $0x48] sm:$0xff] }
 0x5df   : > { %22851 = vmatmul.mubr.msk.bf16.gmra.mrb[72].mxu0 %vm737_vm3, %v27552_v27  ;;  %v6334_v27 = vpack.c.bf16 %v6303_v36, %v6302_v9  ;;  %v31056_v9 = vmax.f32 %v26730_v1, 0.0 }
 0x5e0   : > { %22854 = vmatprep.mubr.msk.bf16.mxu0 %vm737_vm3, %v27554_v34  ;;  %v26057_v34 = vld [vmem:[%s31053_s6 + $0x10] sm:$0xff]  }
 0x5e1   : > { %22946 = vmatprep.subr.bf16.mxu1 %v26057_v34 }
 0x5e2   : > { %22947 = vmatpush3.bf16.msra.mxu1 %v26057_v34 }
 0x5e7   : > { %22855 = vmatmul.mubr.msk.bf16.gmra.mrb[76].mxu0 %vm737_vm3, %v27560_v29  ;;  %v6305_v29 = vld [vmem:[#allocation2 + $0x70] sm:$0xff] }
 0x5e8   : > { %22858 = vmatprep.mubr.msk.bf16.mxu0 %vm737_vm3, %v27562_v42  ;;  %v6307_v42 = vld [vmem:[#allocation2 + $0x90] sm:$0xff] }
 0x5ef   : > { %22859 = vmatmul.mubr.msk.bf16.gmra.mrb[80].mxu0 %vm737_vm3, %v27568_v26  ;;  %v6304_v26 = vld [vmem:[#allocation2 + $0x68] sm:$0xff] }
 0x5f0   : > { %22862 = vmatprep.mubr.msk.bf16.mxu0 %vm737_vm3, %v27570_v35  ;;  %v6335_v35 = vpack.c.bf16 %v6305_v29, %v6304_v26 }
 0x5f7   : > { %22863 = vmatmul.mubr.msk.bf16.gmra.mrb[84].mxu0 %vm737_vm3, %v27576_v24  ;;  %v6306_v24 = vld [vmem:[#allocation2 + $0x88] sm:$0xff] }
 0x5f8   : > { %22866 = vmatprep.mubr.msk.bf16.mxu0 %vm737_vm3, %v27578_v2  ;;  %v26056_v2 = vld [vmem:[%s31051_s2 + $0x88] sm:$0xff]  }
 0x5ff   : > { %22867 = vmatmul.mubr.msk.bf16.gmra.mrb[88].mxu0 %vm737_vm3, %v27584_v15  ;;  %v6336_v15 = vpack.c.bf16 %v6307_v42, %v6306_v24  ;;  %v31057_v42 = vmax.f32 %v26748_v14, 0.0  ;;  %v31058_v24 = vmax.f32 %v26734_v4, 0.0 }
 0x600   : > { %22870 = vmatprep.mubr.msk.bf16.mxu0 %vm737_vm3, %v27692_v0  ;;  %v6315_v0 = vld [vmem:[#allocation2 + $0x110] sm:$0xff] }
 0x601   : > { %v6340_v40 = vpack.c.bf16 %v6315_v0, %v6314_v46  ;;  %v31059_v0 = vmax.f32 %v26781_v38, 0.0  ;;  %v31060_v46 = vmax.f32 %v26763_v25, 0.0 }
 0x607   : > { %22871 = vmatmul.mubr.msk.bf16.gmra.mrb[92].mxu0 %vm737_vm3, %v6043_v39  ;;  %v6349_v39 = vpack.c.bf16 %v6333_v45, %v6332_v56 }
 0x608   : > { %22878 = vmatprep.mubr.msk.bf16.mxu0 %vm737_vm3, %v6334_v27 }
 0x60f   : > { %22879 = vmatmul.mubr.msk.bf16.vlgmr.msra.gmra.mrb[64].mxu0 %vm737_vm3, %v6335_v35 }
 0x610   : > { %22882 = vmatprep.mubr.msk.bf16.mxu0 %vm737_vm3, %v6336_v15  ;;  %22911 = vmatpush3.bf16.msra.mxu0 %v26055_v7  ;;  %v6342_v7 = vpack.c.bf16 %v6319_v5, %v6318_v33 }
 0x611   : > { %22912 = vmatprep.subr.bf16.mxu0 %v26056_v2 }
 0x614   : > { %22913 = vmatpush3.bf16.msra.mxu0 %v26056_v2 }
 0x617   : > { %22883 = vmatmul.mubr.msk.bf16.gmra.mrb[68].mxu0 %vm737_vm3, %v6337_v13 }
 0x618   : > { %22886 = vmatprep.mubr.msk.bf16.mxu0 %vm737_vm3, %v6338_v12 }
 0x61f   : > { %22887 = vmatmul.mubr.msk.bf16.gmra.mrb[72].mxu0 %vm737_vm3, %v6339_v57 }
 0x620   : > { %22890 = vmatprep.mubr.msk.bf16.mxu0 %vm737_vm3, %v6340_v40 }
 0x627   : > { %22891 = vmatmul.mubr.msk.bf16.gmra.mrb[76].mxu0 %vm737_vm3, %v6341_v54 }
 0x628   : > { %22894 = vmatprep.mubr.msk.bf16.mxu0 %vm737_vm3, %v6342_v7  ;;  %v31062_v7 = vmax.f32 %v26769_v28, 0.0 }
 0x62f   : > { %22895 = vmatmul.mubr.msk.bf16.gmra.mrb[80].mxu0 %vm737_vm3, %v27489_v22  ;;  %v6638_v22 = vld [vmem:[#allocation2 + $0x229] sm:$0xff] }
 0x630   : > { %22898 = vmatprep.mubr.msk.bf16.mxu0 %vm737_vm3, %v27492_v23  ;;  %v6639_v23 = vld [vmem:[#allocation2 + $0x231] sm:$0xff] }
 0x637   : > { %22899 = vmatmul.mubr.msk.bf16.gmra.mrb[84].mxu0 %vm737_vm3, %v27505_v17  ;;  %v6655_v17 = vpack.c.bf16 %v6639_v23, %v6638_v22 }
 0x638   : > { %22902 = vmatprep.mubr.msk.bf16.mxu0 %vm737_vm3, %v27507_v20  ;;  %v26058_v20 = vld [vmem:[%s31053_s6 + $0x18] sm:$0xff]  }
 0x639   : > { %22948 = vmatprep.subr.bf16.mxu1 %v26058_v20 }
 0x63a   : > { %22949 = vmatpush3.bf16.msra.mxu1 %v26058_v20 }
 0x63f   : > { %22903 = vmatmul.mubr.msk.bf16.gmra.mrb[88].mxu0 %vm737_vm3, %v27513_v51  ;;  %v7133_v51 = vld [vmem:[#allocation2 + $0x8] sm:$0xff] }
 0x640   : > { %22906 = vmatprep.mubr.msk.bf16.mxu0 %vm737_vm3, %v27732_v53  ;;  %v31055_v53 = vmax.f32 %v26744_v11, 0.0 }
 0x647   : > { %22907 = vmatmul.mubr.msk.bf16.gmra.mrb[92].mxu0 %vm737_vm3, %v6349_v39 }
 0x648   : > { %22914 = vmatprep.mubr.msk.bf16.mxu0 %vm737_vm3, %v27594_v61  ;;  %v7134_v61 = vld [vmem:[#allocation2 + $0x10] sm:$0xff] }
 0x64f   : > { %22915 = vmatmul.mubr.msk.bf16.vlgmr.msra.gmra.mrb[64].mxu0 %vm737_vm3, %v27604_v55  ;;  %v7165_v55 = vpack.c.bf16 %v7134_v61, %v7133_v51 }
 0x650   : > { %22918 = vmatprep.mubr.msk.bf16.mxu0 %vm737_vm3, %v27606_v8  ;;  %v27879_v8 = vld [vmem:[%s31053_s6] sm:$0xff]  }
 0x651   : > { %22950 = vmatprep.mubr.msk.bf16.mxu1 %vm737_vm3, %v7165_v55  ;;  %22982 = vmatprep.subr.bf16.mxu1 %v27879_v8 }
 0x657   : > { %22919 = vmatmul.mubr.msk.bf16.gmra.mrb[68].mxu0 %vm737_vm3, %v27612_v16  ;;  %v27885_v16 = vld [vmem:[%s31054_s0] ss:$0 sm:$0xff]  ;;  %s31196_s0 = sld [smem:[#allocation45_spill]] }
 0x658   : > { %22922 = vmatprep.mubr.msk.bf16.mxu0 %vm737_vm3, %v27614_v31 }
 0x65d   : > { %s30807_s5 = scalar_lea.hbm %s31196_s0, %s21033_s7  ;;  %s26229_s7 = sshll.u32 %s26291_s24, 4  ;;  %s26230_s7 = int_to_ptr.vmem [resolvable:$false] %s26229_s7 }
 0x65e   : > { %s26231_s8 = scalar_lea.vmem %s26230_s7, 2048  ;;  %p26232_p0 = scmp.lt.s32.totalorder %s30809_s27, %s26230_s7 }
 0x65f   : > { %22923 = vmatmul.mubr.msk.bf16.gmra.mrb[72].mxu0 %vm737_vm3, %v27620_v43  ;;  %p26233_p1 = scmp.lt.s32.totalorder %s26231_s8, %s26225_s1 }
 0x660   : > { %22926 = vmatprep.mubr.msk.bf16.mxu0 %vm737_vm3, %v27622_v30 }
 0x661   : > { %p26234_p2 = por %p26233_p1, %p26232_p0 }
 0x663   : > { %p26235_p3 = pnand %p26234_p2, %p26228_p13 }
 0x667   : > { %22927 = vmatmul.mubr.msk.bf16.gmra.mrb[76].mxu0 %vm737_vm3, %v27628_v48 }
 0x668   : > { %22930 = vmatprep.mubr.msk.bf16.mxu0 %vm737_vm3, %v27630_v47 }
 0x66f   : > { %22931 = vmatmul.mubr.msk.bf16.gmra.mrb[80].mxu0 %vm737_vm3, %v27636_v44 }
 0x670   : > { %22934 = vmatprep.mubr.msk.bf16.mxu0 %vm737_vm3, %v27638_v37 }
 0x677   : > { %22935 = vmatmul.mubr.msk.bf16.gmra.mrb[84].mxu0 %vm737_vm3, %v27644_v58 }
 0x678   : > { %22938 = vmatprep.mubr.msk.bf16.mxu0 %vm737_vm3, %v27646_v32 }
 0x67f   : > { %22939 = vmatmul.mubr.msk.bf16.gmra.mrb[88].mxu0 %vm737_vm3, %v27652_v50 }
 0x680   : > { %22942 = vmatprep.mubr.msk.bf16.mxu0 %vm737_vm3, %v27772_v62 }
 0x687   : > { %22943 = vmatmul.mubr.msk.bf16.gmra.mrb[92].mxu0 %vm737_vm3, %v6655_v17 }
 0x722   : > { %v22916_v31 = vpop.f32.mrb[64].mxu0 }
 0x723   : > { %v6923_v43 = vadd.f32 %v22916_v31, %v27885_v16  ;;  %v6755_v30 = vpop.f32.mrb[65].mxu0 }
 0x724   : > { %v6921_v48 = vadd.f32 %v27885_v16, %v6755_v30  ;;  %v22917_v47 = vpop.f32.mrb[66].mxu0 }
 0x725   : > { %v6955_v44 = vmax.f32 %v6923_v43, 0.0  ;;  %v6924_v37 = vadd.f32 %v22917_v47, %v27885_v16  ;;  %v6758_v58 = vpop.f32.mrb[67].mxu0  ;;  %v26060_v47 = vld [vmem:[%s31053_s6 + $0x8] sm:$0xff]  }
 0x726   : > { %v6953_v32 = vmax.f32 %v6921_v48, 0.0  ;;  %v6922_v50 = vadd.f32 %v27885_v16, %v6758_v58 }
 0x727   : > { %v27893_v62 = vadd.f32 %v6955_v44, %v31055_v53  ;;  %v6956_v36 = vmax.f32 %v6924_v37, 0.0  ;;  %v31063_v44 = vmax.f32 %v26817_v6, 0.0 }
 0x728   : > { %v27897_v27 = vadd.f32 %v6953_v32, %v31056_v9  ;;  %v6954_v34 = vmax.f32 %v6922_v50, 0.0  ;;  %v31064_v50 = vmax.f32 %v26799_v52, 0.0  ;;  %v31066_v52 = vld [vmem:[#allocation15_spill] sm:$0xff] }
 0x729   : > { %v30980_v29 = vmax.f32 %v27893_v62, 0.0  ;;  %v27902_v26 = vadd.f32 %v6956_v36, %v31057_v42 }
 0x72a   : > { %v30979_v35 = vmax.f32 %v27897_v27, 0.0  ;;  %v27907_v2 = vadd.f32 %v6954_v34, %v31058_v24  ;;  %v22920_v11 = vpop.f32.mrb[68].mxu0  ;;  %v31065_v34 = vmax.f32 %v26828_v10, 0.0  ;;  %v31067_v24 = vmax.f32 %v31066_v52, 0.0 }
 0x72b   : > { %7051 = vst.msk [vmem:[#allocation2 + $0x48] sm:$0xff] %vm737_vm3, %v30980_v29  ;;  %v30978_v1 = vmax.f32 %v27902_v26, 0.0  ;;  %v6927_v15 = vadd.f32 %v22920_v11, %v27885_v16  ;;  %v6771_v49 = vpop.f32.mrb[69].mxu0 }
 0x72c   : > { %7049 = vst.msk [vmem:[#allocation2 + $0x28] sm:$0xff] %vm737_vm3, %v30979_v35  ;;  %v30972_v14 = vmax.f32 %v27907_v2, 0.0  ;;  %v6925_v4 = vadd.f32 %v27885_v16, %v6771_v49  ;;  %v22921_v19 = vpop.f32.mrb[70].mxu0  ;;  %v27996_v49 = vld [vmem:[%s31053_s6 + $0x20] sm:$0xff]  }
 0x72d   : > { %7052 = vst.msk [vmem:[#allocation2 + $0x50] sm:$0xff] %vm737_vm3, %v30978_v1  ;;  %v6959_v21 = vmax.f32 %v6927_v15, 0.0  ;;  %v6928_v13 = vadd.f32 %v22921_v19, %v27885_v16  ;;  %v6774_v60 = vpop.f32.mrb[71].mxu0 }
 0x72e   : > { %7050 = vst.msk [vmem:[#allocation2 + $0x30] sm:$0xff] %vm737_vm3, %v30972_v14  ;;  %v6957_v12 = vmax.f32 %v6925_v4, 0.0  ;;  %v6926_v63 = vadd.f32 %v27885_v16, %v6774_v60 }
 0x72f   : > { %v27929_v3 = vadd.f32 %v6959_v21, %v31059_v0  ;;  %v6960_v57 = vmax.f32 %v6928_v13, 0.0 }
 0x730   : > { %v27933_v40 = vadd.f32 %v6957_v12, %v31060_v46  ;;  %v6958_v59 = vmax.f32 %v6926_v63, 0.0 }
 0x731   : > { %v30971_v5 = vmax.f32 %v27929_v3, 0.0  ;;  %v27938_v54 = vadd.f32 %v6960_v57, %v31061_v18 }
 0x732   : > { %v30970_v33 = vmax.f32 %v27933_v40, 0.0  ;;  %v27943_v56 = vadd.f32 %v6958_v59, %v31062_v7  ;;  %v22924_v38 = vpop.f32.mrb[72].mxu0  ;;  %v7137_v48 = vld [vmem:[#allocation2 + $0x48] sm:$0xff] }
 0x733   : > { %7055 = vst.msk [vmem:[#allocation2 + $0x88] sm:$0xff] %vm737_vm3, %v30971_v5  ;;  %v30968_v25 = vmax.f32 %v27938_v54, 0.0  ;;  %v6931_v45 = vadd.f32 %v22924_v38, %v27885_v16  ;;  %v6787_v39 = vpop.f32.mrb[73].mxu0  ;;  %v7135_v61 = vld [vmem:[#allocation2 + $0x28] sm:$0xff] }
 0x734   : > { %7053 = vst.msk [vmem:[#allocation2 + $0x68] sm:$0xff] %vm737_vm3, %v30970_v33  ;;  %v30967_v41 = vmax.f32 %v27943_v56, 0.0  ;;  %v6929_v28 = vadd.f32 %v27885_v16, %v6787_v39  ;;  %v22925_v22 = vpop.f32.mrb[74].mxu0  ;;  %v7138_v23 = vld [vmem:[#allocation2 + $0x50] sm:$0xff] }
 0x735   : > { %7056 = vst.msk [vmem:[#allocation2 + $0x90] sm:$0xff] %vm737_vm3, %v30968_v25  ;;  %v6963_v17 = vmax.f32 %v6931_v45, 0.0  ;;  %v6932_v20 = vadd.f32 %v22925_v22, %v27885_v16  ;;  %v6790_v51 = vpop.f32.mrb[75].mxu0  ;;  %v7136_v55 = vld [vmem:[#allocation2 + $0x30] sm:$0xff]  ;;  %v27972_v32 = vpack.c.bf16 %v7138_v23, %v7137_v48  ;;  %v31069_v45 = vld [vmem:[#allocation18_spill] sm:$0xff] }
 0x736   : > { %7054 = vst.msk [vmem:[#allocation2 + $0x70] sm:$0xff] %vm737_vm3, %v30967_v41  ;;  %v6961_v31 = vmax.f32 %v6929_v28, 0.0  ;;  %v6930_v43 = vadd.f32 %v27885_v16, %v6790_v51  ;;  %v27963_v30 = vpack.c.bf16 %v7136_v55, %v7135_v61  ;;  %v31070_v39 = vmax.f32 %v31069_v45, 0.0 }
 0x737   : > { %v27970_v37 = vadd.f32 %v6963_v17, %v31063_v44  ;;  %v6964_v58 = vmax.f32 %v6932_v20, 0.0  ;;  %v31072_v17 = vld [vmem:[#allocation16_spill] sm:$0xff]  ;;  %v31078_v44 = vld [vmem:[#allocation17_spill] sm:$0xff] }
 0x738   : > { %v27976_v53 = vadd.f32 %v6961_v31, %v31064_v50  ;;  %v6962_v36 = vmax.f32 %v6930_v43, 0.0  ;;  %22951 = vmatmul.mubr.msk.bf16.vlgmr.msra.gmra.mrb[32].mxu1 %vm737_vm3, %v27963_v30  ;;  %v31073_v20 = vmax.f32 %v31072_v17, 0.0  ;;  %v31075_v31 = vld [vmem:[#allocation19_spill] sm:$0xff] }
 0x739   : > { %v30966_v9 = vmax.f32 %v27970_v37, 0.0  ;;  %v27983_v42 = vadd.f32 %v6964_v58, %v31065_v34  ;;  %22954 = vmatprep.mubr.msk.bf16.mxu1 %vm737_vm3, %v27972_v32  ;;  %22983 = vmatpush3.bf16.msra.mxu1 %v27879_v8  ;;  %v31076_v43 = vmax.f32 %v31075_v31, 0.0  ;;  %v31079_v58 = vmax.f32 %v31078_v44, 0.0 }
 0x73a   : > { %v30962_v6 = vmax.f32 %v27976_v53, 0.0  ;;  %v27991_v11 = vadd.f32 %v6962_v36, %v31067_v24  ;;  %v22928_v15 = vpop.f32.mrb[76].mxu0  ;;  %22984 = vmatprep.subr.bf16.mxu1 %v26060_v47  ;;  %v7141_v38 = vld [vmem:[#allocation2 + $0x88] sm:$0xff] }
 0x73b   : > { %7059 = vst.msk [vmem:[#allocation2 + $0xc8] sm:$0xff] %vm737_vm3, %v30966_v9  ;;  %v30961_v10 = vmax.f32 %v27983_v42, 0.0  ;;  %v6935_v8 = vadd.f32 %v22928_v15, %v27885_v16  ;;  %v6803_v4 = vpop.f32.mrb[77].mxu0  ;;  %v7139_v57 = vld [vmem:[#allocation2 + $0x68] sm:$0xff] }
 0x73c   : > { %31068 = vst [vmem:[#allocation15_spill] sm:$0xff] %v27991_v11  ;;  %7057 = vst.msk [vmem:[#allocation2 + $0xa8] sm:$0xff] %vm737_vm3, %v30962_v6  ;;  %v30960_v19 = vmax.f32 %v27991_v11, 0.0  ;;  %v6933_v21 = vadd.f32 %v27885_v16, %v6803_v4  ;;  %v22929_v13 = vpop.f32.mrb[78].mxu0  ;;  %v7142_v60 = vld [vmem:[#allocation2 + $0x90] sm:$0xff]  ;;  %v31117_v9 = vld [vmem:[#allocation34_spill] sm:$0xff] }
 0x73d   : > { %7060 = vst.msk [vmem:[#allocation2 + $0xd0] sm:$0xff] %vm737_vm3, %v30961_v10  ;;  %v6967_v12 = vmax.f32 %v6935_v8, 0.0  ;;  %v6936_v63 = vadd.f32 %v22929_v13, %v27885_v16  ;;  %v6806_v0 = vpop.f32.mrb[79].mxu0  ;;  %v7140_v46 = vld [vmem:[#allocation2 + $0x70] sm:$0xff]  ;;  %22985 = vmatpush3.bf16.msra.mxu1 %v26060_v47  ;;  %v28023_v23 = vpack.c.bf16 %v7142_v60, %v7141_v38  ;;  %v31081_v38 = vld [vmem:[#allocation22_spill] sm:$0xff]  ;;  %v31118_v41 = vmax.f32 %v31117_v9, 0.0 }
 0x73e   : > { %7058 = vst.msk [vmem:[#allocation2 + $0xb0] sm:$0xff] %vm737_vm3, %v30960_v19  ;;  %v6965_v59 = vmax.f32 %v6933_v21, 0.0  ;;  %v6934_v18 = vadd.f32 %v27885_v16, %v6806_v0  ;;  %v28016_v7 = vpack.c.bf16 %v7140_v46, %v7139_v57  ;;  %23018 = vmatprep.subr.bf16.mxu1 %v27996_v49  ;;  %v31082_v45 = vmax.f32 %v31081_v38, 0.0  ;;  %v31126_v9 = vld [vmem:[#allocation33_spill] sm:$0xff] }
 0x73f   : > { %v28021_v28 = vadd.f32 %v6967_v12, %v31070_v39  ;;  %v6968_v22 = vmax.f32 %v6936_v63, 0.0 }
 0x740   : > { %v28027_v51 = vadd.f32 %v6965_v59, %v31073_v20  ;;  %v6966_v61 = vmax.f32 %v6934_v18, 0.0  ;;  %22955 = vmatmul.mubr.msk.bf16.gmra.mrb[36].mxu1 %vm737_vm3, %v28016_v7  ;;  %v31084_v20 = vld [vmem:[#allocation20_spill] sm:$0xff] }
 0x741   : > { %31071 = vst [vmem:[#allocation18_spill] sm:$0xff] %v28021_v28  ;;  %v30958_v55 = vmax.f32 %v28021_v28, 0.0  ;;  %v28034_v48 = vadd.f32 %v6968_v22, %v31076_v43  ;;  %22958 = vmatprep.mubr.msk.bf16.mxu1 %vm737_vm3, %v28023_v23 }
 0x742   : > { %31074 = vst [vmem:[#allocation16_spill] sm:$0xff] %v28027_v51  ;;  %v30957_v47 = vmax.f32 %v28027_v51, 0.0  ;;  %v28041_v50 = vadd.f32 %v6966_v61, %v31079_v58  ;;  %v22932_v36 = vpop.f32.mrb[80].mxu0  ;;  %v7145_v18 = vld [vmem:[#allocation2 + $0xc8] sm:$0xff]  ;;  %v31085_v61 = vmax.f32 %v31084_v20, 0.0  ;;  %v31087_v58 = vld [vmem:[#allocation23_spill] sm:$0xff] }
 0x743   : > { %31077 = vst [vmem:[#allocation19_spill] sm:$0xff] %v28034_v48  ;;  %7063 = vst.msk [vmem:[#allocation2 + $0x108] sm:$0xff] %vm737_vm3, %v30958_v55  ;;  %v30956_v34 = vmax.f32 %v28034_v48, 0.0  ;;  %v6939_v52 = vadd.f32 %v22932_v36, %v27885_v16  ;;  %v6819_v24 = vpop.f32.mrb[81].mxu0  ;;  %v7143_v63 = vld [vmem:[#allocation2 + $0xa8] sm:$0xff]  ;;  %v31088_v36 = vmax.f32 %v31087_v58, 0.0 }
 0x744   : > { %31080 = vst [vmem:[#allocation17_spill] sm:$0xff] %v28041_v50  ;;  %7061 = vst.msk [vmem:[#allocation2 + $0xe8] sm:$0xff] %vm737_vm3, %v30957_v47  ;;  %v30952_v15 = vmax.f32 %v28041_v50, 0.0  ;;  %v6937_v8 = vadd.f32 %v27885_v16, %v6819_v24  ;;  %v22933_v4 = vpop.f32.mrb[82].mxu0  ;;  %v7146_v21 = vld [vmem:[#allocation2 + $0xd0] sm:$0xff]  ;;  %v7093_v1 = vld [vmem:[#allocation2 + $0xc7] sm:$0xff] }
 0x745   : > { %7064 = vst.msk [vmem:[#allocation2 + $0x110] sm:$0xff] %vm737_vm3, %v30956_v34  ;;  %v6971_v13 = vmax.f32 %v6939_v52, 0.0  ;;  %v6940_v60 = vadd.f32 %v22933_v4, %v27885_v16  ;;  %v6822_v12 = vpop.f32.mrb[83].mxu0  ;;  %v7144_v0 = vld [vmem:[#allocation2 + $0xb0] sm:$0xff]  ;;  %v28067_v17 = vpack.c.bf16 %v7146_v21, %v7145_v18  ;;  %v31105_v34 = vld [vmem:[#allocation30_spill] sm:$0xff] }
 0x746   : > { %7062 = vst.msk [vmem:[#allocation2 + $0xf0] sm:$0xff] %vm737_vm3, %v30952_v15  ;;  %v6969_v57 = vmax.f32 %v6937_v8, 0.0  ;;  %v6938_v46 = vadd.f32 %v27885_v16, %v6822_v12  ;;  %v28061_v59 = vpack.c.bf16 %v7144_v0, %v7143_v63  ;;  %v31090_v8 = vld [vmem:[#allocation21_spill] sm:$0xff]  ;;  %v31106_v47 = vmax.f32 %v31105_v34, 0.0 }
 0x747   : > { %v28065_v39 = vadd.f32 %v6971_v13, %v31082_v45  ;;  %v6972_v22 = vmax.f32 %v6940_v60, 0.0  ;;  %v31091_v4 = vmax.f32 %v31090_v8, 0.0  ;;  %v31114_v34 = vld [vmem:[#allocation29_spill] sm:$0xff] }
 0x748   : > { %v28071_v31 = vadd.f32 %v6969_v57, %v31085_v61  ;;  %v6970_v43 = vmax.f32 %v6938_v46, 0.0  ;;  %22959 = vmatmul.mubr.msk.bf16.gmra.mrb[40].mxu1 %vm737_vm3, %v28061_v59 }
 0x749   : > { %31083 = vst [vmem:[#allocation22_spill] sm:$0xff] %v28065_v39  ;;  %v30951_v44 = vmax.f32 %v28065_v39, 0.0  ;;  %v28078_v52 = vadd.f32 %v6972_v22, %v31088_v36  ;;  %22962 = vmatprep.mubr.msk.bf16.mxu1 %vm737_vm3, %v28067_v17 }
 0x74a   : > { %31086 = vst [vmem:[#allocation20_spill] sm:$0xff] %v28071_v31  ;;  %v30950_v24 = vmax.f32 %v28071_v31, 0.0  ;;  %v28085_v21 = vadd.f32 %v6970_v43, %v31091_v4  ;;  %v22936_v13 = vpop.f32.mrb[84].mxu0  ;;  %v7149_v8 = vld [vmem:[#allocation2 + $0x108] sm:$0xff] }
 0x74b   : > { %31089 = vst [vmem:[#allocation23_spill] sm:$0xff] %v28078_v52  ;;  %7067 = vst.msk [vmem:[#allocation2 + $0x148] sm:$0xff] %vm737_vm3, %v30951_v44  ;;  %v30949_v60 = vmax.f32 %v28078_v52, 0.0  ;;  %v6943_v12 = vadd.f32 %v22936_v13, %v27885_v16  ;;  %v6835_v63 = vpop.f32.mrb[85].mxu0  ;;  %v7147_v20 = vld [vmem:[#allocation2 + $0xe8] sm:$0xff] }
 0x74c   : > { %31092 = vst [vmem:[#allocation21_spill] sm:$0xff] %v28085_v21  ;;  %7065 = vst.msk [vmem:[#allocation2 + $0x128] sm:$0xff] %vm737_vm3, %v30950_v24  ;;  %v30955_v0 = vmax.f32 %v28085_v21, 0.0  ;;  %v6941_v57 = vadd.f32 %v27885_v16, %v6835_v63  ;;  %v22937_v46 = vpop.f32.mrb[86].mxu0  ;;  %v7150_v18 = vld [vmem:[#allocation2 + $0x110] sm:$0xff]  ;;  %v31093_v4 = vld [vmem:[#allocation26_spill] sm:$0xff] }
 0x74d   : > { %7068 = vst.msk [vmem:[#allocation2 + $0x150] sm:$0xff] %vm737_vm3, %v30949_v60  ;;  %v6975_v38 = vmax.f32 %v6943_v12, 0.0  ;;  %v6944_v45 = vadd.f32 %v22937_v46, %v27885_v16  ;;  %v6838_v22 = vpop.f32.mrb[87].mxu0  ;;  %v7148_v61 = vld [vmem:[#allocation2 + $0xf0] sm:$0xff]  ;;  %v31094_v13 = vmax.f32 %v31093_v4, 0.0  ;;  %v28111_v60 = vpack.c.bf16 %v7150_v18, %v7149_v8  ;;  %v31096_v46 = vld [vmem:[#allocation24_spill] sm:$0xff] }
 0x74e   : > { %7066 = vst.msk [vmem:[#allocation2 + $0x130] sm:$0xff] %vm737_vm3, %v30955_v0  ;;  %v6973_v43 = vmax.f32 %v6941_v57, 0.0  ;;  %v6942_v58 = vadd.f32 %v27885_v16, %v6838_v22  ;;  %v28105_v36 = vpack.c.bf16 %v7148_v61, %v7147_v20  ;;  %v31097_v24 = vmax.f32 %v31096_v46, 0.0  ;;  %v31099_v22 = vld [vmem:[#allocation27_spill] sm:$0xff]  ;;  %v7097_v35 = vld [vmem:[#allocation2 + $0x107] sm:$0xff] }
 0x74f   : > { %v28109_v63 = vadd.f32 %v6975_v38, %v31094_v13  ;;  %v6976_v12 = vmax.f32 %v6944_v45, 0.0  ;;  %v31100_v20 = vmax.f32 %v31099_v22, 0.0  ;;  %v31102_v38 = vld [vmem:[#allocation25_spill] sm:$0xff] }
 0x750   : > { %v28115_v44 = vadd.f32 %v6973_v43, %v31097_v24  ;;  %v6974_v15 = vmax.f32 %v6942_v58, 0.0  ;;  %22963 = vmatmul.mubr.msk.bf16.gmra.mrb[44].mxu1 %vm737_vm3, %v28105_v36  ;;  %v31103_v45 = vmax.f32 %v31102_v38, 0.0 }
 0x751   : > { %31095 = vst [vmem:[#allocation26_spill] sm:$0xff] %v28109_v63  ;;  %v30954_v57 = vmax.f32 %v28109_v63, 0.0  ;;  %v28122_v61 = vadd.f32 %v6976_v12, %v31100_v20  ;;  %22966 = vmatprep.mubr.msk.bf16.mxu1 %vm737_vm3, %v28111_v60  ;;  %v7641_v63 = vld [vmem:[#allocation2 + $0xd1] sm:$0xff] }
 0x752   : > { %31098 = vst [vmem:[#allocation24_spill] sm:$0xff] %v28115_v44  ;;  %v30953_v18 = vmax.f32 %v28115_v44, 0.0  ;;  %v28129_v8 = vadd.f32 %v6974_v15, %v31103_v45  ;;  %v22940_v24 = vpop.f32.mrb[88].mxu0  ;;  %v7153_v0 = vld [vmem:[#allocation2 + $0x148] sm:$0xff] }
 0x753   : > { %31101 = vst [vmem:[#allocation27_spill] sm:$0xff] %v28122_v61  ;;  %7071 = vst.msk [vmem:[#allocation2 + $0x188] sm:$0xff] %vm737_vm3, %v30954_v57  ;;  %v30959_v43 = vmax.f32 %v28122_v61, 0.0  ;;  %v6947_v58 = vadd.f32 %v22940_v24, %v27885_v16  ;;  %v6851_v4 = vpop.f32.mrb[89].mxu0  ;;  %v7151_v45 = vld [vmem:[#allocation2 + $0x128] sm:$0xff]  ;;  %v26064_v61 = vld [vmem:[%s31053_s6 + $0x38] sm:$0xff]  }
 0x754   : > { %31104 = vst [vmem:[#allocation25_spill] sm:$0xff] %v28129_v8  ;;  %7069 = vst.msk [vmem:[#allocation2 + $0x168] sm:$0xff] %vm737_vm3, %v30953_v18  ;;  %v30965_v13 = vmax.f32 %v28129_v8, 0.0  ;;  %v6945_v12 = vadd.f32 %v27885_v16, %v6851_v4  ;;  %v22941_v15 = vpop.f32.mrb[90].mxu0  ;;  %v7154_v46 = vld [vmem:[#allocation2 + $0x150] sm:$0xff] }
 0x755   : > { %7072 = vst.msk [vmem:[#allocation2 + $0x190] sm:$0xff] %vm737_vm3, %v30959_v43  ;;  %v6979_v22 = vmax.f32 %v6947_v58, 0.0  ;;  %v6948_v20 = vadd.f32 %v22941_v15, %v27885_v16  ;;  %v6854_v38 = vpop.f32.mrb[91].mxu0  ;;  %v7152_v24 = vld [vmem:[#allocation2 + $0x130] sm:$0xff]  ;;  %v28155_v43 = vpack.c.bf16 %v7154_v46, %v7153_v0  ;;  %v31108_v15 = vld [vmem:[#allocation28_spill] sm:$0xff]  ;;  %v31115_v0 = vmax.f32 %v31114_v34, 0.0 }
 0x756   : > { %7070 = vst.msk [vmem:[#allocation2 + $0x170] sm:$0xff] %vm737_vm3, %v30965_v13  ;;  %v6977_v18 = vmax.f32 %v6945_v12, 0.0  ;;  %v6946_v57 = vadd.f32 %v27885_v16, %v6854_v38  ;;  %v28149_v4 = vpack.c.bf16 %v7152_v24, %v7151_v45  ;;  %v31109_v19 = vmax.f32 %v31108_v15, 0.0  ;;  %v31111_v38 = vld [vmem:[#allocation31_spill] sm:$0xff] }
 0x757   : > { %v28153_v55 = vadd.f32 %v6979_v22, %v31106_v47  ;;  %v6980_v58 = vmax.f32 %v6948_v20, 0.0  ;;  %v31112_v45 = vmax.f32 %v31111_v38, 0.0 }
 0x758   : > { %v28159_v10 = vadd.f32 %v6977_v18, %v31109_v19  ;;  %v6978_v6 = vmax.f32 %v6946_v57, 0.0  ;;  %22967 = vmatmul.mubr.msk.bf16.gmra.mrb[48].mxu1 %vm737_vm3, %v28149_v4 }
 0x759   : > { %31107 = vst [vmem:[#allocation30_spill] sm:$0xff] %v28153_v55  ;;  %v30964_v12 = vmax.f32 %v28153_v55, 0.0  ;;  %v28166_v24 = vadd.f32 %v6980_v58, %v31112_v45  ;;  %22970 = vmatprep.mubr.msk.bf16.mxu1 %vm737_vm3, %v28155_v43 }
 0x75a   : > { %31110 = vst [vmem:[#allocation28_spill] sm:$0xff] %v28159_v10  ;;  %v30963_v47 = vmax.f32 %v28159_v10, 0.0  ;;  %v28173_v46 = vadd.f32 %v6978_v6, %v31115_v0  ;;  %v22944_v19 = vpop.f32.mrb[92].mxu0  ;;  %v7157_v13 = vld [vmem:[#allocation2 + $0x188] sm:$0xff] }
 0x75b   : > { %31113 = vst [vmem:[#allocation31_spill] sm:$0xff] %v28166_v24  ;;  %7075 = vst.msk [vmem:[#allocation2 + $0x1c8] sm:$0xff] %vm737_vm3, %v30964_v12  ;;  %v30969_v57 = vmax.f32 %v28166_v24, 0.0  ;;  %v6951_v18 = vadd.f32 %v22944_v19, %v27885_v16  ;;  %v6867_v22 = vpop.f32.mrb[93].mxu0  ;;  %v7155_v0 = vld [vmem:[#allocation2 + $0x168] sm:$0xff] }
 0x75c   : > { %31116 = vst [vmem:[#allocation29_spill] sm:$0xff] %v28173_v46  ;;  %7073 = vst.msk [vmem:[#allocation2 + $0x1a8] sm:$0xff] %vm737_vm3, %v30963_v47  ;;  %v30977_v20 = vmax.f32 %v28173_v46, 0.0  ;;  %v6949_v58 = vadd.f32 %v27885_v16, %v6867_v22  ;;  %v22945_v6 = vpop.f32.mrb[94].mxu0  ;;  %v7158_v15 = vld [vmem:[#allocation2 + $0x190] sm:$0xff] }
 0x75d   : > { %7076 = vst.msk [vmem:[#allocation2 + $0x1d0] sm:$0xff] %vm737_vm3, %v30969_v57  ;;  %v6983_v38 = vmax.f32 %v6951_v18, 0.0  ;;  %v6952_v45 = vadd.f32 %v22945_v6, %v27885_v16  ;;  %v6870_v34 = vpop.f32.mrb[95].mxu0  ;;  %v7156_v19 = vld [vmem:[#allocation2 + $0x170] sm:$0xff]  ;;  %v28199_v57 = vpack.c.bf16 %v7158_v15, %v7157_v13  ;;  %v31120_v6 = vld [vmem:[#allocation32_spill] sm:$0xff]  ;;  %v31127_v13 = vmax.f32 %v31126_v9, 0.0 }
 0x75e   : > { %7074 = vst.msk [vmem:[#allocation2 + $0x1b0] sm:$0xff] %vm737_vm3, %v30977_v20  ;;  %v6981_v47 = vmax.f32 %v6949_v58, 0.0  ;;  %v6950_v12 = vadd.f32 %v27885_v16, %v6870_v34  ;;  %v28193_v22 = vpack.c.bf16 %v7156_v19, %v7155_v0  ;;  %v31121_v33 = vmax.f32 %v31120_v6, 0.0  ;;  %v31123_v58 = vld [vmem:[#allocation35_spill] sm:$0xff]  ;;  %v7081_v6 = vld [vmem:[#allocation2 + $0x7] sm:$0xff] }
 0x75f   : > { %v28197_v25 = vadd.f32 %v6983_v38, %v31118_v41  ;;  %v6984_v18 = vmax.f32 %v6952_v45, 0.0  ;;  %v31124_v34 = vmax.f32 %v31123_v58, 0.0  ;;  %v7082_v58 = vld [vmem:[#allocation2 + $0xf] sm:$0xff] }
 0x760   : > { %v28203_v5 = vadd.f32 %v6981_v47, %v31121_v33  ;;  %v6982_v14 = vmax.f32 %v6950_v12, 0.0  ;;  %22971 = vmatmul.mubr.msk.bf16.gmra.mrb[52].mxu1 %vm737_vm3, %v28193_v22 }
 0x761   : > { %31119 = vst [vmem:[#allocation34_spill] sm:$0xff] %v28197_v25  ;;  %v30976_v16 = vmax.f32 %v28197_v25, 0.0  ;;  %v28210_v0 = vadd.f32 %v6984_v18, %v31124_v34  ;;  %22974 = vmatprep.mubr.msk.bf16.mxu1 %vm737_vm3, %v28199_v57 }
 0x762   : > { %31122 = vst [vmem:[#allocation32_spill] sm:$0xff] %v28203_v5  ;;  %v30975_v41 = vmax.f32 %v28203_v5, 0.0  ;;  %v28217_v15 = vadd.f32 %v6982_v14, %v31127_v13  ;;  %v7161_v19 = vld [vmem:[#allocation2 + $0x1c8] sm:$0xff]  ;;  %v7113_v13 = vpack.c.bf16 %v7082_v58, %v7081_v6  ;;  %v28261_v6 = vld [vmem:[%s31053_s6 + $0x30] sm:$0xff]  }
 0x763   : > { %31125 = vst [vmem:[#allocation35_spill] sm:$0xff] %v28210_v0  ;;  %7079 = vst.msk [vmem:[#allocation2 + $0x208] sm:$0xff] %vm737_vm3, %v30976_v16  ;;  %v30973_v33 = vmax.f32 %v28210_v0, 0.0  ;;  %v7159_v38 = vld [vmem:[#allocation2 + $0x1a8] sm:$0xff] }
 0x764   : > { %31128 = vst [vmem:[#allocation33_spill] sm:$0xff] %v28217_v15  ;;  %7077 = vst.msk [vmem:[#allocation2 + $0x1e8] sm:$0xff] %vm737_vm3, %v30975_v41  ;;  %v30974_v12 = vmax.f32 %v28217_v15, 0.0  ;;  %v7162_v47 = vld [vmem:[#allocation2 + $0x1d0] sm:$0xff]  ;;  %v26062_v41 = vld [vmem:[%s31053_s6 + $0x28] sm:$0xff]  }
 0x765   : > { %7080 = vst.msk [vmem:[#allocation2 + $0x210] sm:$0xff] %vm737_vm3, %v30973_v33  ;;  %v7160_v14 = vld [vmem:[#allocation2 + $0x1b0] sm:$0xff]  ;;  %v28235_v18 = vpack.c.bf16 %v7162_v47, %v7161_v19  ;;  %v7101_v15 = vld [vmem:[#allocation2 + $0x147] sm:$0xff] }
 0x766   : > { %7078 = vst.msk [vmem:[#allocation2 + $0x1f0] sm:$0xff] %vm737_vm3, %v30974_v12  ;;  %v28233_v45 = vpack.c.bf16 %v7160_v14, %v7159_v38  ;;  %v7084_v47 = vld [vmem:[#allocation2 + $0x2f] sm:$0xff]  ;;  %v7083_v14 = vld [vmem:[#allocation2 + $0x27] sm:$0xff] }
 0x767   : > { %v7086_v38 = vld [vmem:[#allocation2 + $0x4f] sm:$0xff]  ;;  %v28246_v19 = vpack.c.bf16 %v7084_v47, %v7083_v14  ;;  %v7085_v12 = vld [vmem:[#allocation2 + $0x47] sm:$0xff] }
 0x768   : > { %22975 = vmatmul.mubr.msk.bf16.gmra.mrb[56].mxu1 %vm737_vm3, %v28233_v45  ;;  %v28251_v16 = vpack.c.bf16 %v7086_v38, %v7085_v12  ;;  %v7088_v58 = vld [vmem:[#allocation2 + $0x6f] sm:$0xff]  ;;  %v7091_v14 = vld [vmem:[#allocation2 + $0xa7] sm:$0xff] }
 0x769   : > { %22978 = vmatprep.mubr.msk.bf16.mxu1 %vm737_vm3, %v28235_v18  ;;  %v7094_v38 = vld [vmem:[#allocation2 + $0xcf] sm:$0xff]  ;;  %v7105_v5 = vld [vmem:[#allocation2 + $0x187] sm:$0xff] }
 0x76a   : > { %v7109_v46 = vld [vmem:[#allocation2 + $0x1c7] sm:$0xff] }
 0x76b   : > { %v7163_v34 = vld [vmem:[#allocation2 + $0x1e8] sm:$0xff] }
 0x76d   : > { %v7164_v9 = vld [vmem:[#allocation2 + $0x1f0] sm:$0xff] }
 0x76e   : > { %v28241_v33 = vpack.c.bf16 %v7164_v9, %v7163_v34  ;;  %v7090_v34 = vld [vmem:[#allocation2 + $0x8f] sm:$0xff]  ;;  %v7087_v9 = vld [vmem:[#allocation2 + $0x67] sm:$0xff] }
 0x76f   : > { %v28263_v12 = vpack.c.bf16 %v7088_v58, %v7087_v9  ;;  %v7096_v58 = vld [vmem:[#allocation2 + $0xef] sm:$0xff]  ;;  %v7095_v9 = vld [vmem:[#allocation2 + $0xe7] sm:$0xff] }
 0x770   : > { %22979 = vmatmul.mubr.msk.bf16.gmra.mrb[60].mxu1 %vm737_vm3, %v28241_v33 }
 0x771   : > { %22986 = vmatprep.mubr.msk.bf16.mxu1 %vm737_vm3, %v7113_v13  ;;  %v7089_v13 = vld [vmem:[#allocation2 + $0x87] sm:$0xff] }
 0x772   : > { %v28266_v47 = vpack.c.bf16 %v7090_v34, %v7089_v13  ;;  %v7098_v34 = vld [vmem:[#allocation2 + $0x10f] sm:$0xff]  ;;  %v28280_v13 = vpack.c.bf16 %v7096_v58, %v7095_v9 }
 0x773   : > { %v28282_v29 = vpack.c.bf16 %v7098_v34, %v7097_v35  ;;  %v7104_v35 = vld [vmem:[#allocation2 + $0x16f] sm:$0xff]  ;;  %v7103_v34 = vld [vmem:[#allocation2 + $0x167] sm:$0xff] }
 0x774   : > { %v7106_v58 = vld [vmem:[#allocation2 + $0x18f] sm:$0xff]  ;;  %v28296_v9 = vpack.c.bf16 %v7104_v35, %v7103_v34  ;;  %v7111_v34 = vld [vmem:[#allocation2 + $0x1e7] sm:$0xff] }
 0x775   : > { %v28298_v25 = vpack.c.bf16 %v7106_v58, %v7105_v5  ;;  %v7628_v5 = vld [vmem:[#allocation2 + $0x9] sm:$0xff]  ;;  %v7629_v35 = vld [vmem:[#allocation2 + $0x11] sm:$0xff] }
 0x776   : > { %v7112_v58 = vld [vmem:[#allocation2 + $0x1ef] sm:$0xff]  ;;  %v7660_v10 = vpack.c.bf16 %v7629_v35, %v7628_v5 }
 0x777   : > { %v28312_v55 = vpack.c.bf16 %v7112_v58, %v7111_v34  ;;  %v7634_v5 = vld [vmem:[#allocation2 + $0x69] sm:$0xff]  ;;  %v7635_v35 = vld [vmem:[#allocation2 + $0x71] sm:$0xff] }
 0x778   : > { %22987 = vmatmul.mubr.msk.bf16.vlgmr.msra.gmra.mrb[32].mxu1 %vm737_vm3, %v28246_v19  ;;  %v7636_v58 = vld [vmem:[#allocation2 + $0x89] sm:$0xff]  ;;  %v7637_v34 = vld [vmem:[#allocation2 + $0x91] sm:$0xff] }
 0x779   : > { %22990 = vmatprep.mubr.msk.bf16.mxu1 %vm737_vm3, %v28251_v16  ;;  %23019 = vmatpush3.bf16.msra.mxu1 %v27996_v49  ;;  %v7092_v49 = vld [vmem:[#allocation2 + $0xaf] sm:$0xff] }
 0x77a   : > { %23020 = vmatprep.subr.bf16.mxu1 %v26062_v41  ;;  %v28272_v20 = vpack.c.bf16 %v7092_v49, %v7091_v14  ;;  %v7102_v49 = vld [vmem:[#allocation2 + $0x14f] sm:$0xff] }
 0x77b   : > { %v28290_v0 = vpack.c.bf16 %v7102_v49, %v7101_v15  ;;  %v7108_v15 = vld [vmem:[#allocation2 + $0x1af] sm:$0xff]  ;;  %v7107_v49 = vld [vmem:[#allocation2 + $0x1a7] sm:$0xff] }
 0x77d   : > { %23021 = vmatpush3.bf16.msra.mxu1 %v26062_v41  ;;  %v28274_v41 = vpack.c.bf16 %v7094_v38, %v7093_v1  ;;  %v7100_v1 = vld [vmem:[#allocation2 + $0x12f] sm:$0xff]  ;;  %v7099_v38 = vld [vmem:[#allocation2 + $0x127] sm:$0xff] }
 0x77e   : > { %23054 = vmatprep.subr.bf16.mxu1 %v28261_v6  ;;  %v28288_v14 = vpack.c.bf16 %v7100_v1, %v7099_v38  ;;  %v7110_v1 = vld [vmem:[#allocation2 + $0x1cf] sm:$0xff]  ;;  %v28304_v38 = vpack.c.bf16 %v7108_v15, %v7107_v49 }
 0x77f   : > { %v28306_v24 = vpack.c.bf16 %v7110_v1, %v7109_v46  ;;  %v7630_v46 = vld [vmem:[#allocation2 + $0x29] sm:$0xff]  ;;  %v7631_v15 = vld [vmem:[#allocation2 + $0x31] sm:$0xff] }
 0x780   : > { %22991 = vmatmul.mubr.msk.bf16.gmra.mrb[36].mxu1 %vm737_vm3, %v28263_v12  ;;  %v7632_v1 = vld [vmem:[#allocation2 + $0x49] sm:$0xff]  ;;  %v7633_v49 = vld [vmem:[#allocation2 + $0x51] sm:$0xff]  ;;  %v28317_v8 = vpack.c.bf16 %v7631_v15, %v7630_v46  ;;  %v28332_v46 = vpack.c.bf16 %v7635_v35, %v7634_v5  ;;  %v28334_v15 = vpack.c.bf16 %v7637_v34, %v7636_v58 }
 0x781   : > { %22994 = vmatprep.mubr.msk.bf16.mxu1 %vm737_vm3, %v28266_v47  ;;  %v28322_v44 = vpack.c.bf16 %v7633_v49, %v7632_v1  ;;  %v7639_v1 = vld [vmem:[#allocation2 + $0xb1] sm:$0xff]  ;;  %v7640_v49 = vld [vmem:[#allocation2 + $0xc9] sm:$0xff] }
 0x782   : > { %v28342_v52 = vpack.c.bf16 %v7641_v63, %v7640_v49  ;;  %v7643_v5 = vld [vmem:[#allocation2 + $0xf1] sm:$0xff]  ;;  %v7644_v35 = vld [vmem:[#allocation2 + $0x109] sm:$0xff] }
 0x783   : > { %v7645_v58 = vld [vmem:[#allocation2 + $0x111] sm:$0xff]  ;;  %v7646_v63 = vld [vmem:[#allocation2 + $0x129] sm:$0xff] }
 0x784   : > { %v28350_v31 = vpack.c.bf16 %v7645_v58, %v7644_v35  ;;  %v7649_v49 = vld [vmem:[#allocation2 + $0x151] sm:$0xff]  ;;  %v7652_v35 = vld [vmem:[#allocation2 + $0x189] sm:$0xff] }
 0x785   : > { %v7653_v58 = vld [vmem:[#allocation2 + $0x191] sm:$0xff] }
 0x786   : > { %v28366_v51 = vpack.c.bf16 %v7653_v58, %v7652_v35  ;;  %v26066_v58 = vld [vmem:[%s31053_s6 + $0x48] sm:$0xff]  }
 0x788   : > { %22995 = vmatmul.mubr.msk.bf16.gmra.mrb[40].mxu1 %vm737_vm3, %v28272_v20 }
 0x789   : > { %22998 = vmatprep.mubr.msk.bf16.mxu1 %vm737_vm3, %v28274_v41 }
 0x790   : > { %22999 = vmatmul.mubr.msk.bf16.gmra.mrb[44].mxu1 %vm737_vm3, %v28280_v13 }
 0x791   : > { %23002 = vmatprep.mubr.msk.bf16.mxu1 %vm737_vm3, %v28282_v29 }
 0x798   : > { %23003 = vmatmul.mubr.msk.bf16.gmra.mrb[48].mxu1 %vm737_vm3, %v28288_v14 }
 0x799   : > { %23006 = vmatprep.mubr.msk.bf16.mxu1 %vm737_vm3, %v28290_v0 }
 0x7a0   : > { %23007 = vmatmul.mubr.msk.bf16.gmra.mrb[52].mxu1 %vm737_vm3, %v28296_v9 }
 0x7a1   : > { %23010 = vmatprep.mubr.msk.bf16.mxu1 %vm737_vm3, %v28298_v25 }
 0x7a8   : > { %23011 = vmatmul.mubr.msk.bf16.gmra.mrb[56].mxu1 %vm737_vm3, %v28304_v38 }
 0x7a9   : > { %23014 = vmatprep.mubr.msk.bf16.mxu1 %vm737_vm3, %v28306_v24 }
 0x7b0   : > { %23015 = vmatmul.mubr.msk.bf16.gmra.mrb[60].mxu1 %vm737_vm3, %v28312_v55 }
 0x7b1   : > { %23022 = vmatprep.mubr.msk.bf16.mxu1 %vm737_vm3, %v7660_v10  ;;  %v26065_v10 = vld [vmem:[%s31053_s6 + $0x40] sm:$0xff]  }
 0x7b8   : > { %23023 = vmatmul.mubr.msk.bf16.vlgmr.msra.gmra.mrb[32].mxu1 %vm737_vm3, %v28317_v8 }
 0x7b9   : > { %23026 = vmatprep.mubr.msk.bf16.mxu1 %vm737_vm3, %v28322_v44  ;;  %23055 = vmatpush3.bf16.msra.mxu1 %v28261_v6  ;;  %v7638_v6 = vld [vmem:[#allocation2 + $0xa9] sm:$0xff] }
 0x7ba   : > { %23056 = vmatprep.subr.bf16.mxu1 %v26064_v61  ;;  %v28340_v21 = vpack.c.bf16 %v7639_v1, %v7638_v6  ;;  %v7647_v6 = vld [vmem:[#allocation2 + $0x131] sm:$0xff]  ;;  %v7648_v1 = vld [vmem:[#allocation2 + $0x149] sm:$0xff] }
 0x7bb   : > { %v28356_v39 = vpack.c.bf16 %v7647_v6, %v7646_v63  ;;  %v28358_v50 = vpack.c.bf16 %v7649_v49, %v7648_v1  ;;  %v7654_v63 = vld [vmem:[#allocation2 + $0x1a9] sm:$0xff]  ;;  %v7655_v6 = vld [vmem:[#allocation2 + $0x1b1] sm:$0xff] }
 0x7bc   : > { %v7656_v1 = vld [vmem:[#allocation2 + $0x1c9] sm:$0xff]  ;;  %v7657_v49 = vld [vmem:[#allocation2 + $0x1d1] sm:$0xff]  ;;  %v28372_v28 = vpack.c.bf16 %v7655_v6, %v7654_v63 }
 0x7bd   : > { %23057 = vmatpush3.bf16.msra.mxu1 %v26064_v61  ;;  %v7642_v61 = vld [vmem:[#allocation2 + $0xe9] sm:$0xff]  ;;  %v28374_v11 = vpack.c.bf16 %v7657_v49, %v7656_v1  ;;  %v26068_v1 = vld [vmem:[%s31053_s6 + $0x58] sm:$0xff]   ;;  %v26069_v49 = vld [vmem:[%s31053_s6 + $0x60] sm:$0xff]  }
 0x7be   : > { %23090 = vmatprep.subr.bf16.mxu1 %v26065_v10  ;;  %v28348_v34 = vpack.c.bf16 %v7643_v5, %v7642_v61  ;;  %v7650_v61 = vld [vmem:[#allocation2 + $0x169] sm:$0xff]  ;;  %v7651_v5 = vld [vmem:[#allocation2 + $0x171] sm:$0xff] }
 0x7bf   : > { %v28364_v48 = vpack.c.bf16 %v7651_v5, %v7650_v61  ;;  %v7658_v61 = vld [vmem:[#allocation2 + $0x1e9] sm:$0xff]  ;;  %v7659_v5 = vld [vmem:[#allocation2 + $0x1f1] sm:$0xff] }
 0x7c0   : > { %23027 = vmatmul.mubr.msk.bf16.gmra.mrb[36].mxu1 %vm737_vm3, %v28332_v46  ;;  %v28380_v35 = vpack.c.bf16 %v7659_v5, %v7658_v61  ;;  %v26067_v63 = vld [vmem:[%s31053_s6 + $0x50] sm:$0xff]   ;;  %v9164_v5 = vld [vmem:[#allocation2 + $0xa8] sm:$0xff] }
 0x7c1   : > { %23030 = vmatprep.mubr.msk.bf16.mxu1 %vm737_vm3, %v28334_v15  ;;  %v9167_v61 = vld [vmem:[#allocation2 + $0xd0] sm:$0xff] }
 0x7c8   : > { %23031 = vmatmul.mubr.msk.bf16.gmra.mrb[40].mxu1 %vm737_vm3, %v28340_v21 }
 0x7c9   : > { %23034 = vmatprep.mubr.msk.bf16.mxu1 %vm737_vm3, %v28342_v52 }
 0x7d0   : > { %23035 = vmatmul.mubr.msk.bf16.gmra.mrb[44].mxu1 %vm737_vm3, %v28348_v34 }
 0x7d1   : > { %23038 = vmatprep.mubr.msk.bf16.mxu1 %vm737_vm3, %v28350_v31 }
 0x7d8   : > { %23039 = vmatmul.mubr.msk.bf16.gmra.mrb[48].mxu1 %vm737_vm3, %v28356_v39 }
 0x7d9   : > { %23042 = vmatprep.mubr.msk.bf16.mxu1 %vm737_vm3, %v28358_v50 }
 0x7e0   : > { %23043 = vmatmul.mubr.msk.bf16.gmra.mrb[52].mxu1 %vm737_vm3, %v28364_v48 }
 0x7e1   : > { %23046 = vmatprep.mubr.msk.bf16.mxu1 %vm737_vm3, %v28366_v51 }
 0x7e8   : > { %23047 = vmatmul.mubr.msk.bf16.gmra.mrb[56].mxu1 %vm737_vm3, %v28372_v28 }
 0x7e9   : > { %23050 = vmatprep.mubr.msk.bf16.mxu1 %vm737_vm3, %v28374_v11 }
 0x7f0   : > { %23051 = vmatmul.mubr.msk.bf16.gmra.mrb[60].mxu1 %vm737_vm3, %v28380_v35 }
 0x7f1   : > { %23058 = vmatprep.mubr.msk.bf16.mxu1 %vm737_vm3, %v28246_v19  ;;  %v7965_v19 = vld [vmem:[#allocation2 + $0x20f] sm:$0xff] }
 0x7f8   : > { %23059 = vmatmul.mubr.msk.bf16.vlgmr.msra.gmra.mrb[32].mxu1 %vm737_vm3, %v28251_v16 }
 0x7f9   : > { %23062 = vmatprep.mubr.msk.bf16.mxu1 %vm737_vm3, %v28263_v12  ;;  %23091 = vmatpush3.bf16.msra.mxu1 %v26065_v10  ;;  %v7964_v10 = vld [vmem:[#allocation2 + $0x207] sm:$0xff] }
 0x7fa   : > { %23092 = vmatprep.subr.bf16.mxu1 %v26066_v58  ;;  %v28420_v6 = vpack.c.bf16 %v7965_v19, %v7964_v10  ;;  %v9169_v10 = vld [vmem:[#allocation2 + $0xf0] sm:$0xff] }
 0x7fd   : > { %23093 = vmatpush3.bf16.msra.mxu1 %v26066_v58 }
 0x7fe   : > { %23126 = vmatprep.subr.bf16.mxu1 %v26067_v63 }
 0x800   : > { %23063 = vmatmul.mubr.msk.bf16.gmra.mrb[36].mxu1 %vm737_vm3, %v28266_v47 }
 0x801   : > { %23066 = vmatprep.mubr.msk.bf16.mxu1 %vm737_vm3, %v28272_v20 }
 0x808   : > { %23067 = vmatmul.mubr.msk.bf16.gmra.mrb[40].mxu1 %vm737_vm3, %v28274_v41 }
 0x809   : > { %23070 = vmatprep.mubr.msk.bf16.mxu1 %vm737_vm3, %v28280_v13 }
 0x810   : > { %23071 = vmatmul.mubr.msk.bf16.gmra.mrb[44].mxu1 %vm737_vm3, %v28282_v29 }
 0x811   : > { %23074 = vmatprep.mubr.msk.bf16.mxu1 %vm737_vm3, %v28288_v14 }
 0x818   : > { %23075 = vmatmul.mubr.msk.bf16.gmra.mrb[48].mxu1 %vm737_vm3, %v28290_v0 }
 0x819   : > { %23078 = vmatprep.mubr.msk.bf16.mxu1 %vm737_vm3, %v28296_v9 }
 0x820   : > { %23079 = vmatmul.mubr.msk.bf16.gmra.mrb[52].mxu1 %vm737_vm3, %v28298_v25 }
 0x821   : > { %23082 = vmatprep.mubr.msk.bf16.mxu1 %vm737_vm3, %v28304_v38 }
 0x828   : > { %23083 = vmatmul.mubr.msk.bf16.gmra.mrb[56].mxu1 %vm737_vm3, %v28306_v24 }
 0x829   : > { %23086 = vmatprep.mubr.msk.bf16.mxu1 %vm737_vm3, %v28312_v55 }
 0x830   : > { %23087 = vmatmul.mubr.msk.bf16.gmra.mrb[60].mxu1 %vm737_vm3, %v28420_v6 }
 0x831   : > { %23094 = vmatprep.mubr.msk.bf16.mxu1 %vm737_vm3, %v27963_v30  ;;  %v8271_v30 = vld [vmem:[#allocation2 + $0x210] sm:$0xff] }
 0x838   : > { %23095 = vmatmul.mubr.msk.bf16.vlgmr.msra.gmra.mrb[32].mxu1 %vm737_vm3, %v27972_v32  ;;  %v8270_v32 = vld [vmem:[#allocation2 + $0x208] sm:$0xff] }
 0x839   : > { %23098 = vmatprep.mubr.msk.bf16.mxu1 %vm737_vm3, %v28016_v7  ;;  %23127 = vmatpush3.bf16.msra.mxu1 %v26067_v63  ;;  %v28460_v7 = vpack.c.bf16 %v8271_v30, %v8270_v32  ;;  %v9166_v63 = vld [vmem:[#allocation2 + $0xc8] sm:$0xff] }
 0x83a   : > { %23128 = vmatprep.subr.bf16.mxu1 %v26068_v1  ;;  %v9194_v19 = vpack.c.bf16 %v9167_v61, %v9166_v63  ;;  %v9170_v30 = vld [vmem:[#allocation2 + $0x108] sm:$0xff] }
 0x83d   : > { %23129 = vmatpush3.bf16.msra.mxu1 %v26068_v1  ;;  %v9168_v1 = vld [vmem:[#allocation2 + $0xe8] sm:$0xff] }
 0x83e   : > { %23162 = vmatprep.subr.bf16.mxu1 %v26069_v49 }
 0x840   : > { %23099 = vmatmul.mubr.msk.bf16.gmra.mrb[36].mxu1 %vm737_vm3, %v28023_v23  ;;  %v26070_v23 = vld [vmem:[%s31053_s6 + $0x68] sm:$0xff]  }
 0x841   : > { %23102 = vmatprep.mubr.msk.bf16.mxu1 %vm737_vm3, %v28061_v59  ;;  %v26071_v59 = vld [vmem:[%s31053_s6 + $0x70] sm:$0xff]  }
 0x848   : > { %23103 = vmatmul.mubr.msk.bf16.gmra.mrb[40].mxu1 %vm737_vm3, %v28067_v17  ;;  %v8576_v17 = vld [vmem:[#allocation2 + $0x209] sm:$0xff] }
 0x849   : > { %23106 = vmatprep.mubr.msk.bf16.mxu1 %vm737_vm3, %v28105_v36 }
 0x850   : > { %23107 = vmatmul.mubr.msk.bf16.gmra.mrb[44].mxu1 %vm737_vm3, %v28111_v60  ;;  %v8577_v60 = vld [vmem:[#allocation2 + $0x211] sm:$0xff] }
 0x851   : > { %23110 = vmatprep.mubr.msk.bf16.mxu1 %vm737_vm3, %v28149_v4  ;;  %v28500_v36 = vpack.c.bf16 %v8577_v60, %v8576_v17  ;;  %v8883_v4 = vld [vmem:[#allocation2 + $0x22f] sm:$0xff] }
 0x852   : > { %v9172_v17 = vld [vmem:[#allocation2 + $0x128] sm:$0xff] }
 0x858   : > { %23111 = vmatmul.mubr.msk.bf16.gmra.mrb[48].mxu1 %vm737_vm3, %v28155_v43  ;;  %v26073_v43 = vld [vmem:[%s31053_s6 + $0x80] sm:$0xff]  }
 0x859   : > { %23114 = vmatprep.mubr.msk.bf16.mxu1 %vm737_vm3, %v28193_v22 }
 0x860   : > { %23115 = vmatmul.mubr.msk.bf16.gmra.mrb[52].mxu1 %vm737_vm3, %v28199_v57 }
 0x861   : > { %23118 = vmatprep.mubr.msk.bf16.mxu1 %vm737_vm3, %v28233_v45 }
 0x868   : > { %23119 = vmatmul.mubr.msk.bf16.gmra.mrb[56].mxu1 %vm737_vm3, %v28235_v18 }
 0x869   : > { %23122 = vmatprep.mubr.msk.bf16.mxu1 %vm737_vm3, %v28241_v33 }
 0x870   : > { %23123 = vmatmul.mubr.msk.bf16.gmra.mrb[60].mxu1 %vm737_vm3, %v28460_v7 }
 0x871   : > { %23130 = vmatprep.mubr.msk.bf16.mxu1 %vm737_vm3, %v28317_v8  ;;  %v26072_v8 = vld [vmem:[%s31053_s6 + $0x78] sm:$0xff]  }
 0x878   : > { %23131 = vmatmul.mubr.msk.bf16.vlgmr.msra.gmra.mrb[32].mxu1 %vm737_vm3, %v28322_v44 }
 0x879   : > { %23134 = vmatprep.mubr.msk.bf16.mxu1 %vm737_vm3, %v28332_v46  ;;  %23163 = vmatpush3.bf16.msra.mxu1 %v26069_v49  ;;  %v9195_v49 = vpack.c.bf16 %v9169_v10, %v9168_v1 }
 0x87a   : > { %23164 = vmatprep.subr.bf16.mxu1 %v26070_v23 }
 0x87d   : > { %23165 = vmatpush3.bf16.msra.mxu1 %v26070_v23  ;;  %v9173_v23 = vld [vmem:[#allocation2 + $0x130] sm:$0xff] }
 0x87e   : > { %23198 = vmatprep.subr.bf16.mxu1 %v26071_v59  ;;  %v9197_v60 = vpack.c.bf16 %v9173_v23, %v9172_v17 }
 0x880   : > { %23135 = vmatmul.mubr.msk.bf16.gmra.mrb[36].mxu1 %vm737_vm3, %v28334_v15 }
 0x881   : > { %23138 = vmatprep.mubr.msk.bf16.mxu1 %vm737_vm3, %v28340_v21 }
 0x888   : > { %23139 = vmatmul.mubr.msk.bf16.gmra.mrb[40].mxu1 %vm737_vm3, %v28342_v52 }
 0x889   : > { %23142 = vmatprep.mubr.msk.bf16.mxu1 %vm737_vm3, %v28348_v34 }
 0x890   : > { %23143 = vmatmul.mubr.msk.bf16.gmra.mrb[44].mxu1 %vm737_vm3, %v28350_v31 }
 0x891   : > { %23146 = vmatprep.mubr.msk.bf16.mxu1 %vm737_vm3, %v28356_v39 }
 0x898   : > { %23147 = vmatmul.mubr.msk.bf16.gmra.mrb[48].mxu1 %vm737_vm3, %v28358_v50 }
 0x899   : > { %23150 = vmatprep.mubr.msk.bf16.mxu1 %vm737_vm3, %v28364_v48 }
 0x8a0   : > { %23151 = vmatmul.mubr.msk.bf16.gmra.mrb[52].mxu1 %vm737_vm3, %v28366_v51 }
 0x8a1   : > { %23154 = vmatprep.mubr.msk.bf16.mxu1 %vm737_vm3, %v28372_v28 }
 0x8a8   : > { %23155 = vmatmul.mubr.msk.bf16.gmra.mrb[56].mxu1 %vm737_vm3, %v28374_v11 }
 0x8a9   : > { %23158 = vmatprep.mubr.msk.bf16.mxu1 %vm737_vm3, %v28380_v35 }
 0x8b0   : > { %23159 = vmatmul.mubr.msk.bf16.gmra.mrb[60].mxu1 %vm737_vm3, %v28500_v36 }
 0x8b1   : > { %23166 = vmatprep.mubr.msk.bf16.mxu1 %vm737_vm3, %v28251_v16  ;;  %v9159_v16 = vld [vmem:[#allocation2 + $0x50] sm:$0xff] }
 0x8b8   : > { %23167 = vmatmul.mubr.msk.bf16.vlgmr.msra.gmra.mrb[32].mxu1 %vm737_vm3, %v28263_v12 }
 0x8b9   : > { %23170 = vmatprep.mubr.msk.bf16.mxu1 %vm737_vm3, %v28266_v47  ;;  %23199 = vmatpush3.bf16.msra.mxu1 %v26071_v59  ;;  %v9160_v47 = vld [vmem:[#allocation2 + $0x68] sm:$0xff]  ;;  %v9175_v59 = vld [vmem:[#allocation2 + $0x150] sm:$0xff] }
 0x8ba   : > { %23200 = vmatprep.subr.bf16.mxu1 %v26072_v8 }
 0x8bd   : > { %23201 = vmatpush3.bf16.msra.mxu1 %v26072_v8  ;;  %v9174_v8 = vld [vmem:[#allocation2 + $0x148] sm:$0xff] }
 0x8be   : > { %23234 = vmatprep.subr.bf16.mxu1 %v26073_v43 }
 0x8c0   : > { %23171 = vmatmul.mubr.msk.bf16.gmra.mrb[36].mxu1 %vm737_vm3, %v28272_v20 }
 0x8c1   : > { %23174 = vmatprep.mubr.msk.bf16.mxu1 %vm737_vm3, %v28274_v41 }
 0x8c8   : > { %23175 = vmatmul.mubr.msk.bf16.gmra.mrb[40].mxu1 %vm737_vm3, %v28280_v13  ;;  %v9162_v13 = vld [vmem:[#allocation2 + $0x88] sm:$0xff] }
 0x8c9   : > { %23178 = vmatprep.mubr.msk.bf16.mxu1 %vm737_vm3, %v28282_v29  ;;  %v8882_v29 = vld [vmem:[#allocation2 + $0x227] sm:$0xff] }
 0x8ca   : > { %v8899_v20 = vpack.c.bf16 %v8883_v4, %v8882_v29  ;;  %v9188_v29 = vld [vmem:[#allocation2 + $0x228] sm:$0xff]  ;;  %v9189_v4 = vld [vmem:[#allocation2 + $0x230] sm:$0xff] }
 0x8d0   : > { %23179 = vmatmul.mubr.msk.bf16.gmra.mrb[44].mxu1 %vm737_vm3, %v28288_v14  ;;  %v26074_v14 = vld [vmem:[%s31053_s6 + $0x88] sm:$0xff]  }
 0x8d1   : > { %23182 = vmatprep.mubr.msk.bf16.mxu1 %vm737_vm3, %v28290_v0  ;;  %v9158_v0 = vld [vmem:[#allocation2 + $0x48] sm:$0xff] }
 0x8d2   : > { %v9190_v12 = vpack.c.bf16 %v9159_v16, %v9158_v0 }
 0x8d8   : > { %23183 = vmatmul.mubr.msk.bf16.gmra.mrb[48].mxu1 %vm737_vm3, %v28296_v9 }
 0x8d9   : > { %23186 = vmatprep.mubr.msk.bf16.mxu1 %vm737_vm3, %v28298_v25  ;;  %v26075_v25 = vld [vmem:[%s30864_s10 + $0x10] sm:$0xff]  }
 0x8da   : > { %23270 = vmatprep.subr.bf16.mxu0 %v26075_v25 }
 0x8db   : > { %23271 = vmatpush3.bf16.msra.mxu0 %v26075_v25 }
 0x8e0   : > { %23187 = vmatmul.mubr.msk.bf16.gmra.mrb[52].mxu1 %vm737_vm3, %v28304_v38  ;;  %v9165_v38 = vld [vmem:[#allocation2 + $0xb0] sm:$0xff] }
 0x8e1   : > { %23190 = vmatprep.mubr.msk.bf16.mxu1 %vm737_vm3, %v28306_v24  ;;  %v9161_v24 = vld [vmem:[#allocation2 + $0x70] sm:$0xff]  ;;  %v9193_v58 = vpack.c.bf16 %v9165_v38, %v9164_v5 }
 0x8e2   : > { %v9191_v41 = vpack.c.bf16 %v9161_v24, %v9160_v47 }
 0x8e8   : > { %23191 = vmatmul.mubr.msk.bf16.gmra.mrb[56].mxu1 %vm737_vm3, %v28312_v55  ;;  %v9163_v55 = vld [vmem:[#allocation2 + $0x90] sm:$0xff] }
 0x8e9   : > { %23194 = vmatprep.mubr.msk.bf16.mxu1 %vm737_vm3, %v28420_v6  ;;  %v9192_v9 = vpack.c.bf16 %v9163_v55, %v9162_v13  ;;  %v9171_v6 = vld [vmem:[#allocation2 + $0x110] sm:$0xff] }
 0x8ea   : > { %v9196_v32 = vpack.c.bf16 %v9171_v6, %v9170_v30  ;;  %v26078_v6 = vld [vmem:[%s30864_s10 + $0x8] sm:$0xff]  }
 0x8f0   : > { %23195 = vmatmul.mubr.msk.bf16.gmra.mrb[60].mxu1 %vm737_vm3, %v8899_v20  ;;  %v9205_v20 = vpack.c.bf16 %v9189_v4, %v9188_v29  ;;  %v28646_v29 = vld [vmem:[%s30864_s10 + $0x20] sm:$0xff]  }
 0x8f1   : > { %23202 = vmatprep.mubr.msk.bf16.mxu1 %vm737_vm3, %v9190_v12 }
 0x8f8   : > { %23203 = vmatmul.mubr.msk.bf16.vlgmr.msra.gmra.mrb[32].mxu1 %vm737_vm3, %v9191_v41 }
 0x8f9   : > { %23206 = vmatprep.mubr.msk.bf16.mxu1 %vm737_vm3, %v9192_v9  ;;  %23235 = vmatpush3.bf16.msra.mxu1 %v26073_v43  ;;  %v9198_v43 = vpack.c.bf16 %v9175_v59, %v9174_v8 }
 0x8fa   : > { %23236 = vmatprep.subr.bf16.mxu1 %v26074_v14 }
 0x8fd   : > { %23237 = vmatpush3.bf16.msra.mxu1 %v26074_v14 }
 0x900   : > { %23207 = vmatmul.mubr.msk.bf16.gmra.mrb[36].mxu1 %vm737_vm3, %v9193_v58 }
 0x901   : > { %23210 = vmatprep.mubr.msk.bf16.mxu1 %vm737_vm3, %v9194_v19 }
 0x908   : > { %23211 = vmatmul.mubr.msk.bf16.gmra.mrb[40].mxu1 %vm737_vm3, %v9195_v49 }
 0x909   : > { %23214 = vmatprep.mubr.msk.bf16.mxu1 %vm737_vm3, %v9196_v32 }
 0x910   : > { %23215 = vmatmul.mubr.msk.bf16.gmra.mrb[44].mxu1 %vm737_vm3, %v9197_v60 }
 0x911   : > { %23218 = vmatprep.mubr.msk.bf16.mxu1 %vm737_vm3, %v9198_v43 }
 0x918   : > { %23219 = vmatmul.mubr.msk.bf16.gmra.mrb[48].mxu1 %vm737_vm3, %v28193_v22 }
 0x919   : > { %23222 = vmatprep.mubr.msk.bf16.mxu1 %vm737_vm3, %v28199_v57 }
 0x920   : > { %23223 = vmatmul.mubr.msk.bf16.gmra.mrb[52].mxu1 %vm737_vm3, %v28233_v45 }
 0x921   : > { %23226 = vmatprep.mubr.msk.bf16.mxu1 %vm737_vm3, %v28235_v18 }
 0x928   : > { %23227 = vmatmul.mubr.msk.bf16.gmra.mrb[56].mxu1 %vm737_vm3, %v28241_v33 }
 0x929   : > { %23230 = vmatprep.mubr.msk.bf16.mxu1 %vm737_vm3, %v28460_v7 }
 0x930   : > { %23231 = vmatmul.mubr.msk.bf16.gmra.mrb[60].mxu1 %vm737_vm3, %v9205_v20 }
 0x931   : > { %23238 = vmatprep.mubr.msk.bf16.mxu1 %vm737_vm3, %v28322_v44  ;;  %v26077_v44 = vld [vmem:[%s30864_s10] sm:$0xff]  }
 0x938   : > { %23239 = vmatmul.mubr.msk.bf16.vlgmr.msra.gmra.mrb[32].mxu1 %vm737_vm3, %v28332_v46 }
 0x939   : > { %23242 = vmatprep.mubr.msk.bf16.mxu1 %vm737_vm3, %v28334_v15 }
 0x940   : > { %23243 = vmatmul.mubr.msk.bf16.gmra.mrb[36].mxu1 %vm737_vm3, %v28340_v21 }
 0x941   : > { %23246 = vmatprep.mubr.msk.bf16.mxu1 %vm737_vm3, %v28342_v52  ;;  %v28610_v52 = vld [vmem:[%s30863_s9] ss:$0 sm:$0xff] }
 0x948   : > { %23247 = vmatmul.mubr.msk.bf16.gmra.mrb[40].mxu1 %vm737_vm3, %v28348_v34 }
 0x949   : > { %23250 = vmatprep.mubr.msk.bf16.mxu1 %vm737_vm3, %v28350_v31 }
 0x950   : > { %23251 = vmatmul.mubr.msk.bf16.gmra.mrb[44].mxu1 %vm737_vm3, %v28356_v39  ;;  %v9494_v39 = vld [vmem:[#allocation2 + $0x229] sm:$0xff] }
 0x951   : > { %23254 = vmatprep.mubr.msk.bf16.mxu1 %vm737_vm3, %v28358_v50  ;;  %v9495_v50 = vld [vmem:[#allocation2 + $0x231] sm:$0xff] }
 0x952   : > { %v9511_v31 = vpack.c.bf16 %v9495_v50, %v9494_v39 }
 0x958   : > { %23255 = vmatmul.mubr.msk.bf16.gmra.mrb[48].mxu1 %vm737_vm3, %v28364_v48  ;;  %v9926_v48 = vld [vmem:[#allocation2 + $0x10] sm:$0xff] }
 0x959   : > { %23258 = vmatprep.mubr.msk.bf16.mxu1 %vm737_vm3, %v28366_v51  ;;  %v26076_v51 = vld [vmem:[%s30864_s10 + $0x18] sm:$0xff]  }
 0x95a   : > { %23272 = vmatprep.subr.bf16.mxu0 %v26076_v51 }
 0x95b   : > { %23273 = vmatpush3.bf16.msra.mxu0 %v26076_v51 }
 0x95c   : > { %23306 = vmatprep.subr.bf16.mxu0 %v26077_v44 }
 0x960   : > { %23259 = vmatmul.mubr.msk.bf16.gmra.mrb[52].mxu1 %vm737_vm3, %v28372_v28  ;;  %v9925_v28 = vld [vmem:[#allocation2 + $0x8] sm:$0xff] }
 0x961   : > { %23262 = vmatprep.mubr.msk.bf16.mxu1 %vm737_vm3, %v28374_v11  ;;  %v9957_v11 = vpack.c.bf16 %v9926_v48, %v9925_v28 }
 0x963   : > { %23274 = vmatprep.mubr.msk.bf16.mxu0 %vm737_vm3, %v9957_v11 }
 0x968   : > { %23263 = vmatmul.mubr.msk.bf16.gmra.mrb[56].mxu1 %vm737_vm3, %v28380_v35 }
 0x969   : > { %23266 = vmatprep.mubr.msk.bf16.mxu1 %vm737_vm3, %v28500_v36 }
 0x970   : > { %23267 = vmatmul.mubr.msk.bf16.gmra.mrb[60].mxu1 %vm737_vm3, %v9511_v31 }
 0xa0b   : > { %v23240_v21 = vpop.f32.mrb[32].mxu1 }
 0xa0c   : > { %v9779_v57 = vadd.f32 %v23240_v21, %v28610_v52  ;;  %v9611_v22 = vpop.f32.mrb[33].mxu1 }
 0xa0d   : > { %v9777_v33 = vadd.f32 %v28610_v52, %v9611_v22  ;;  %v23241_v45 = vpop.f32.mrb[34].mxu1 }
 0xa0e   : > { %v9811_v18 = vmax.f32 %v9779_v57, 0.0  ;;  %v9780_v46 = vadd.f32 %v23241_v45, %v28610_v52  ;;  %v9614_v15 = vpop.f32.mrb[35].mxu1 }
 0xa0f   : > { %v9809_v34 = vmax.f32 %v9777_v33, 0.0  ;;  %v9778_v35 = vadd.f32 %v28610_v52, %v9614_v15 }
 0xa10   : > { %9843 = vst.msk [vmem:[#allocation2 + $0x48] sm:$0xff] %vm737_vm3, %v9811_v18  ;;  %v9812_v7 = vmax.f32 %v9780_v46, 0.0 }
 0xa11   : > { %9841 = vst.msk [vmem:[#allocation2 + $0x28] sm:$0xff] %vm737_vm3, %v9809_v34  ;;  %v9810_v36 = vmax.f32 %v9778_v35, 0.0 }
 0xa12   : > { %9844 = vst.msk [vmem:[#allocation2 + $0x50] sm:$0xff] %vm737_vm3, %v9812_v7 }
 0xa13   : > { %9842 = vst.msk [vmem:[#allocation2 + $0x30] sm:$0xff] %vm737_vm3, %v9810_v36  ;;  %v23244_v16 = vpop.f32.mrb[36].mxu1 }
 0xa14   : > { %v9783_v0 = vadd.f32 %v23244_v16, %v28610_v52  ;;  %v9627_v12 = vpop.f32.mrb[37].mxu1 }
 0xa15   : > { %v9781_v25 = vadd.f32 %v28610_v52, %v9627_v12  ;;  %v23245_v24 = vpop.f32.mrb[38].mxu1 }
 0xa16   : > { %v9815_v55 = vmax.f32 %v9783_v0, 0.0  ;;  %v9784_v47 = vadd.f32 %v23245_v24, %v28610_v52  ;;  %v9630_v41 = vpop.f32.mrb[39].mxu1 }
 0xa17   : > { %v9813_v13 = vmax.f32 %v9781_v25, 0.0  ;;  %v9782_v14 = vadd.f32 %v28610_v52, %v9630_v41  ;;  %v9929_v10 = vld [vmem:[#allocation2 + $0x48] sm:$0xff] }
 0xa18   : > { %9847 = vst.msk [vmem:[#allocation2 + $0x88] sm:$0xff] %vm737_vm3, %v9815_v55  ;;  %v9816_v9 = vmax.f32 %v9784_v47, 0.0  ;;  %v9927_v5 = vld [vmem:[#allocation2 + $0x28] sm:$0xff] }
 0xa19   : > { %9845 = vst.msk [vmem:[#allocation2 + $0x68] sm:$0xff] %vm737_vm3, %v9813_v13  ;;  %v9814_v38 = vmax.f32 %v9782_v14, 0.0  ;;  %v9930_v61 = vld [vmem:[#allocation2 + $0x50] sm:$0xff] }
 0xa1a   : > { %9848 = vst.msk [vmem:[#allocation2 + $0x90] sm:$0xff] %vm737_vm3, %v9816_v9  ;;  %v9928_v58 = vld [vmem:[#allocation2 + $0x30] sm:$0xff]  ;;  %v28634_v30 = vpack.c.bf16 %v9930_v61, %v9929_v10 }
 0xa1b   : > { %9846 = vst.msk [vmem:[#allocation2 + $0x70] sm:$0xff] %vm737_vm3, %v9814_v38  ;;  %v23248_v63 = vpop.f32.mrb[40].mxu1  ;;  %v28628_v19 = vpack.c.bf16 %v9928_v58, %v9927_v5 }
 0xa1c   : > { %v9787_v1 = vadd.f32 %v23248_v63, %v28610_v52  ;;  %v9643_v49 = vpop.f32.mrb[41].mxu1 }
 0xa1d   : > { %v9785_v32 = vadd.f32 %v28610_v52, %v9643_v49  ;;  %v23249_v23 = vpop.f32.mrb[42].mxu1  ;;  %23275 = vmatmul.mubr.msk.bf16.vlgmr.msra.gmra.mrb[96].mxu0 %vm737_vm3, %v28628_v19 }
 0xa1e   : > { %v9819_v59 = vmax.f32 %v9787_v1, 0.0  ;;  %v9788_v17 = vadd.f32 %v23249_v23, %v28610_v52  ;;  %v9646_v60 = vpop.f32.mrb[43].mxu1  ;;  %23278 = vmatprep.mubr.msk.bf16.mxu0 %vm737_vm3, %v28634_v30  ;;  %23307 = vmatpush3.bf16.msra.mxu0 %v26077_v44 }
 0xa1f   : > { %v9817_v8 = vmax.f32 %v9785_v32, 0.0  ;;  %v9786_v43 = vadd.f32 %v28610_v52, %v9646_v60  ;;  %23308 = vmatprep.subr.bf16.mxu0 %v26078_v6  ;;  %v9933_v48 = vld [vmem:[#allocation2 + $0x88] sm:$0xff] }
 0xa20   : > { %9851 = vst.msk [vmem:[#allocation2 + $0xc8] sm:$0xff] %vm737_vm3, %v9819_v59  ;;  %v9820_v4 = vmax.f32 %v9788_v17, 0.0  ;;  %v9931_v50 = vld [vmem:[#allocation2 + $0x68] sm:$0xff] }
 0xa21   : > { %9849 = vst.msk [vmem:[#allocation2 + $0xa8] sm:$0xff] %vm737_vm3, %v9817_v8  ;;  %v9818_v20 = vmax.f32 %v9786_v43, 0.0  ;;  %v9934_v39 = vld [vmem:[#allocation2 + $0x90] sm:$0xff] }
 0xa22   : > { %9852 = vst.msk [vmem:[#allocation2 + $0xd0] sm:$0xff] %vm737_vm3, %v9820_v4  ;;  %v9932_v31 = vld [vmem:[#allocation2 + $0x70] sm:$0xff]  ;;  %23309 = vmatpush3.bf16.msra.mxu0 %v26078_v6  ;;  %v28656_v21 = vpack.c.bf16 %v9934_v39, %v9933_v48 }
 0xa23   : > { %9850 = vst.msk [vmem:[#allocation2 + $0xb0] sm:$0xff] %vm737_vm3, %v9818_v20  ;;  %v23252_v51 = vpop.f32.mrb[44].mxu1  ;;  %v28652_v28 = vpack.c.bf16 %v9932_v31, %v9931_v50  ;;  %23342 = vmatprep.subr.bf16.mxu0 %v28646_v29 }
 0xa24   : > { %v9791_v11 = vadd.f32 %v23252_v51, %v28610_v52  ;;  %v9659_v44 = vpop.f32.mrb[45].mxu1 }
 0xa25   : > { %v9789_v57 = vadd.f32 %v28610_v52, %v9659_v44  ;;  %v23253_v22 = vpop.f32.mrb[46].mxu1  ;;  %23279 = vmatmul.mubr.msk.bf16.gmra.mrb[100].mxu0 %vm737_vm3, %v28652_v28 }
 0xa26   : > { %v9823_v33 = vmax.f32 %v9791_v11, 0.0  ;;  %v9792_v45 = vadd.f32 %v23253_v22, %v28610_v52  ;;  %v9662_v18 = vpop.f32.mrb[47].mxu1  ;;  %23282 = vmatprep.mubr.msk.bf16.mxu0 %vm737_vm3, %v28656_v21 }
 0xa27   : > { %v9821_v46 = vmax.f32 %v9789_v57, 0.0  ;;  %v9790_v15 = vadd.f32 %v28610_v52, %v9662_v18  ;;  %v9937_v25 = vld [vmem:[#allocation2 + $0xc8] sm:$0xff] }
 0xa28   : > { %9855 = vst.msk [vmem:[#allocation2 + $0x108] sm:$0xff] %vm737_vm3, %v9823_v33  ;;  %v9824_v34 = vmax.f32 %v9792_v45, 0.0  ;;  %v9935_v36 = vld [vmem:[#allocation2 + $0xa8] sm:$0xff] }
 0xa29   : > { %9853 = vst.msk [vmem:[#allocation2 + $0xe8] sm:$0xff] %vm737_vm3, %v9821_v46  ;;  %v9822_v35 = vmax.f32 %v9790_v15, 0.0  ;;  %v9938_v7 = vld [vmem:[#allocation2 + $0xd0] sm:$0xff] }
 0xa2a   : > { %9856 = vst.msk [vmem:[#allocation2 + $0x110] sm:$0xff] %vm737_vm3, %v9824_v34  ;;  %v9936_v16 = vld [vmem:[#allocation2 + $0xb0] sm:$0xff]  ;;  %v28672_v47 = vpack.c.bf16 %v9938_v7, %v9937_v25 }
 0xa2b   : > { %9854 = vst.msk [vmem:[#allocation2 + $0xf0] sm:$0xff] %vm737_vm3, %v9822_v35  ;;  %v23256_v0 = vpop.f32.mrb[48].mxu1  ;;  %v28669_v12 = vpack.c.bf16 %v9936_v16, %v9935_v36 }
 0xa2c   : > { %v9795_v24 = vadd.f32 %v23256_v0, %v28610_v52  ;;  %v9675_v55 = vpop.f32.mrb[49].mxu1 }
 0xa2d   : > { %v9793_v41 = vadd.f32 %v28610_v52, %v9675_v55  ;;  %v23257_v13 = vpop.f32.mrb[50].mxu1  ;;  %23283 = vmatmul.mubr.msk.bf16.gmra.mrb[104].mxu0 %vm737_vm3, %v28669_v12 }
 0xa2e   : > { %v9827_v14 = vmax.f32 %v9795_v24, 0.0  ;;  %v9796_v9 = vadd.f32 %v23257_v13, %v28610_v52  ;;  %v9678_v38 = vpop.f32.mrb[51].mxu1  ;;  %23286 = vmatprep.mubr.msk.bf16.mxu0 %vm737_vm3, %v28672_v47 }
 0xa2f   : > { %v9825_v61 = vmax.f32 %v9793_v41, 0.0  ;;  %v9794_v5 = vadd.f32 %v28610_v52, %v9678_v38  ;;  %v9941_v23 = vld [vmem:[#allocation2 + $0x108] sm:$0xff] }
 0xa30   : > { %9859 = vst.msk [vmem:[#allocation2 + $0x148] sm:$0xff] %vm737_vm3, %v9827_v14  ;;  %v9828_v58 = vmax.f32 %v9796_v9, 0.0  ;;  %v9939_v6 = vld [vmem:[#allocation2 + $0xe8] sm:$0xff] }
 0xa31   : > { %9857 = vst.msk [vmem:[#allocation2 + $0x128] sm:$0xff] %vm737_vm3, %v9825_v61  ;;  %v9826_v63 = vmax.f32 %v9794_v5, 0.0  ;;  %v9942_v10 = vld [vmem:[#allocation2 + $0x110] sm:$0xff] }
 0xa32   : > { %9860 = vst.msk [vmem:[#allocation2 + $0x150] sm:$0xff] %vm737_vm3, %v9828_v58  ;;  %v9940_v1 = vld [vmem:[#allocation2 + $0xf0] sm:$0xff]  ;;  %v28688_v60 = vpack.c.bf16 %v9942_v10, %v9941_v23 }
 0xa33   : > { %9858 = vst.msk [vmem:[#allocation2 + $0x130] sm:$0xff] %vm737_vm3, %v9826_v63  ;;  %v23260_v49 = vpop.f32.mrb[52].mxu1  ;;  %v28685_v32 = vpack.c.bf16 %v9940_v1, %v9939_v6 }
 0xa34   : > { %v9799_v59 = vadd.f32 %v23260_v49, %v28610_v52  ;;  %v9691_v17 = vpop.f32.mrb[53].mxu1 }
 0xa35   : > { %v9797_v8 = vadd.f32 %v28610_v52, %v9691_v17  ;;  %v23261_v43 = vpop.f32.mrb[54].mxu1  ;;  %23287 = vmatmul.mubr.msk.bf16.gmra.mrb[108].mxu0 %vm737_vm3, %v28685_v32 }
 0xa36   : > { %v9831_v4 = vmax.f32 %v9799_v59, 0.0  ;;  %v9800_v20 = vadd.f32 %v23261_v43, %v28610_v52  ;;  %v9694_v39 = vpop.f32.mrb[55].mxu1  ;;  %23290 = vmatprep.mubr.msk.bf16.mxu0 %vm737_vm3, %v28688_v60 }
 0xa37   : > { %v9829_v50 = vmax.f32 %v9797_v8, 0.0  ;;  %v9798_v31 = vadd.f32 %v28610_v52, %v9694_v39  ;;  %v9945_v45 = vld [vmem:[#allocation2 + $0x148] sm:$0xff] }
 0xa38   : > { %9863 = vst.msk [vmem:[#allocation2 + $0x188] sm:$0xff] %vm737_vm3, %v9831_v4  ;;  %v9832_v51 = vmax.f32 %v9800_v20, 0.0  ;;  %v9943_v44 = vld [vmem:[#allocation2 + $0x128] sm:$0xff] }
 0xa39   : > { %9861 = vst.msk [vmem:[#allocation2 + $0x168] sm:$0xff] %vm737_vm3, %v9829_v50  ;;  %v9830_v48 = vmax.f32 %v9798_v31, 0.0  ;;  %v9946_v11 = vld [vmem:[#allocation2 + $0x150] sm:$0xff] }
 0xa3a   : > { %9864 = vst.msk [vmem:[#allocation2 + $0x190] sm:$0xff] %vm737_vm3, %v9832_v51  ;;  %v9944_v57 = vld [vmem:[#allocation2 + $0x130] sm:$0xff]  ;;  %v28704_v15 = vpack.c.bf16 %v9946_v11, %v9945_v45 }
 0xa3b   : > { %9862 = vst.msk [vmem:[#allocation2 + $0x170] sm:$0xff] %vm737_vm3, %v9830_v48  ;;  %v23264_v22 = vpop.f32.mrb[56].mxu1  ;;  %v28701_v33 = vpack.c.bf16 %v9944_v57, %v9943_v44  ;;  %v9874_v48 = vld [vmem:[#allocation2 + $0xf] sm:$0xff] }
 0xa3c   : > { %v9803_v18 = vadd.f32 %v23264_v22, %v28610_v52  ;;  %v9707_v46 = vpop.f32.mrb[57].mxu1  ;;  %v9876_v45 = vld [vmem:[#allocation2 + $0x2f] sm:$0xff] }
 0xa3d   : > { %v9801_v34 = vadd.f32 %v28610_v52, %v9707_v46  ;;  %v23265_v35 = vpop.f32.mrb[58].mxu1  ;;  %23291 = vmatmul.mubr.msk.bf16.gmra.mrb[112].mxu0 %vm737_vm3, %v28701_v33  ;;  %v9875_v46 = vld [vmem:[#allocation2 + $0x27] sm:$0xff] }
 0xa3e   : > { %v9835_v7 = vmax.f32 %v9803_v18, 0.0  ;;  %v9804_v36 = vadd.f32 %v23265_v35, %v28610_v52  ;;  %v9710_v16 = vpop.f32.mrb[59].mxu1  ;;  %23294 = vmatprep.mubr.msk.bf16.mxu0 %vm737_vm3, %v28704_v15  ;;  %v9878_v18 = vld [vmem:[#allocation2 + $0x4f] sm:$0xff]  ;;  %v9877_v35 = vld [vmem:[#allocation2 + $0x47] sm:$0xff] }
 0xa3f   : > { %v9833_v0 = vmax.f32 %v9801_v34, 0.0  ;;  %v9802_v25 = vadd.f32 %v28610_v52, %v9710_v16  ;;  %v9949_v61 = vld [vmem:[#allocation2 + $0x188] sm:$0xff]  ;;  %v28746_v34 = vpack.c.bf16 %v9876_v45, %v9875_v46  ;;  %v28761_v16 = vld [vmem:[%s30864_s10 + $0x30] sm:$0xff]  }
 0xa40   : > { %9867 = vst.msk [vmem:[#allocation2 + $0x1c8] sm:$0xff] %vm737_vm3, %v9835_v7  ;;  %v9836_v24 = vmax.f32 %v9804_v36, 0.0  ;;  %v9947_v13 = vld [vmem:[#allocation2 + $0x168] sm:$0xff]  ;;  %v28751_v36 = vpack.c.bf16 %v9878_v18, %v9877_v35 }
 0xa41   : > { %9865 = vst.msk [vmem:[#allocation2 + $0x1a8] sm:$0xff] %vm737_vm3, %v9833_v0  ;;  %v9834_v55 = vmax.f32 %v9802_v25, 0.0  ;;  %v9950_v41 = vld [vmem:[#allocation2 + $0x190] sm:$0xff]  ;;  %v26080_v7 = vld [vmem:[%s30864_s10 + $0x28] sm:$0xff]  }
 0xa42   : > { %9868 = vst.msk [vmem:[#allocation2 + $0x1d0] sm:$0xff] %vm737_vm3, %v9836_v24  ;;  %v9948_v14 = vld [vmem:[#allocation2 + $0x170] sm:$0xff]  ;;  %v28720_v63 = vpack.c.bf16 %v9950_v41, %v9949_v61  ;;  %v9879_v24 = vld [vmem:[#allocation2 + $0x67] sm:$0xff] }
 0xa43   : > { %9866 = vst.msk [vmem:[#allocation2 + $0x1b0] sm:$0xff] %vm737_vm3, %v9834_v55  ;;  %v23268_v9 = vpop.f32.mrb[60].mxu1  ;;  %v28717_v38 = vpack.c.bf16 %v9948_v14, %v9947_v13  ;;  %v9880_v0 = vld [vmem:[#allocation2 + $0x6f] sm:$0xff]  ;;  %v9881_v41 = vld [vmem:[#allocation2 + $0x87] sm:$0xff] }
 0xa44   : > { %v9807_v5 = vadd.f32 %v23268_v9, %v28610_v52  ;;  %v9723_v58 = vpop.f32.mrb[61].mxu1  ;;  %v9882_v25 = vld [vmem:[#allocation2 + $0x8f] sm:$0xff]  ;;  %v28763_v55 = vpack.c.bf16 %v9880_v0, %v9879_v24  ;;  %v9883_v9 = vld [vmem:[#allocation2 + $0xa7] sm:$0xff] }
 0xa45   : > { %v9805_v10 = vadd.f32 %v28610_v52, %v9723_v58  ;;  %v23269_v6 = vpop.f32.mrb[62].mxu1  ;;  %23295 = vmatmul.mubr.msk.bf16.gmra.mrb[116].mxu0 %vm737_vm3, %v28717_v38  ;;  %v28766_v13 = vpack.c.bf16 %v9882_v25, %v9881_v41  ;;  %v9886_v14 = vld [vmem:[#allocation2 + $0xcf] sm:$0xff] }
 0xa46   : > { %v9839_v1 = vmax.f32 %v9807_v5, 0.0  ;;  %v9808_v49 = vadd.f32 %v23269_v6, %v28610_v52  ;;  %v9726_v23 = vpop.f32.mrb[63].mxu1  ;;  %23298 = vmatprep.mubr.msk.bf16.mxu0 %vm737_vm3, %v28720_v63  ;;  %v9885_v5 = vld [vmem:[#allocation2 + $0xc7] sm:$0xff]  ;;  %v9890_v6 = vld [vmem:[#allocation2 + $0x10f] sm:$0xff] }
 0xa47   : > { %v9837_v59 = vmax.f32 %v9805_v10, 0.0  ;;  %v9806_v17 = vadd.f32 %v28610_v52, %v9726_v23  ;;  %v9953_v31 = vld [vmem:[#allocation2 + $0x1c8] sm:$0xff]  ;;  %v28774_v58 = vpack.c.bf16 %v9886_v14, %v9885_v5  ;;  %v10421_v24 = vld [vmem:[#allocation2 + $0x11] sm:$0xff] }
 0xa48   : > { %9871 = vst.msk [vmem:[#allocation2 + $0x208] sm:$0xff] %vm737_vm3, %v9839_v1  ;;  %v9840_v8 = vmax.f32 %v9808_v49, 0.0  ;;  %v9951_v20 = vld [vmem:[#allocation2 + $0x1a8] sm:$0xff] }
 0xa49   : > { %9869 = vst.msk [vmem:[#allocation2 + $0x1e8] sm:$0xff] %vm737_vm3, %v9837_v59  ;;  %v9838_v43 = vmax.f32 %v9806_v17, 0.0  ;;  %v9954_v4 = vld [vmem:[#allocation2 + $0x1d0] sm:$0xff]  ;;  %v9873_v52 = vld [vmem:[#allocation2 + $0x7] sm:$0xff] }
 0xa4a   : > { %9872 = vst.msk [vmem:[#allocation2 + $0x210] sm:$0xff] %vm737_vm3, %v9840_v8  ;;  %v9952_v39 = vld [vmem:[#allocation2 + $0x1b0] sm:$0xff]  ;;  %v28735_v51 = vpack.c.bf16 %v9954_v4, %v9953_v31  ;;  %v9905_v57 = vpack.c.bf16 %v9874_v48, %v9873_v52  ;;  %v9887_v1 = vld [vmem:[#allocation2 + $0xe7] sm:$0xff] }
 0xa4b   : > { %9870 = vst.msk [vmem:[#allocation2 + $0x1f0] sm:$0xff] %vm737_vm3, %v9838_v43  ;;  %v28733_v50 = vpack.c.bf16 %v9952_v39, %v9951_v20  ;;  %v9888_v10 = vld [vmem:[#allocation2 + $0xef] sm:$0xff]  ;;  %v9889_v23 = vld [vmem:[#allocation2 + $0x107] sm:$0xff] }
 0xa4c   : > { %v28780_v49 = vpack.c.bf16 %v9888_v10, %v9887_v1  ;;  %v28782_v59 = vpack.c.bf16 %v9890_v6, %v9889_v23  ;;  %v9892_v17 = vld [vmem:[#allocation2 + $0x12f] sm:$0xff]  ;;  %v9891_v43 = vld [vmem:[#allocation2 + $0x127] sm:$0xff] }
 0xa4d   : > { %23299 = vmatmul.mubr.msk.bf16.gmra.mrb[120].mxu0 %vm737_vm3, %v28733_v50  ;;  %v9894_v8 = vld [vmem:[#allocation2 + $0x14f] sm:$0xff]  ;;  %v28788_v4 = vpack.c.bf16 %v9892_v17, %v9891_v43  ;;  %v9893_v20 = vld [vmem:[#allocation2 + $0x147] sm:$0xff]  ;;  %v26082_v17 = vld [vmem:[%s30864_s10 + $0x38] sm:$0xff]  }
 0xa4e   : > { %23302 = vmatprep.mubr.msk.bf16.mxu0 %vm737_vm3, %v28735_v51  ;;  %v28790_v39 = vpack.c.bf16 %v9894_v8, %v9893_v20  ;;  %v9896_v31 = vld [vmem:[#allocation2 + $0x16f] sm:$0xff]  ;;  %v9895_v48 = vld [vmem:[#allocation2 + $0x167] sm:$0xff] }
 0xa4f   : > { %v9898_v52 = vld [vmem:[#allocation2 + $0x18f] sm:$0xff]  ;;  %v9899_v46 = vld [vmem:[#allocation2 + $0x1a7] sm:$0xff] }
 0xa50   : > { %v9955_v11 = vld [vmem:[#allocation2 + $0x1e8] sm:$0xff]  ;;  %v10423_v10 = vld [vmem:[#allocation2 + $0x31] sm:$0xff]  ;;  %v26083_v43 = vld [vmem:[%s30864_s10 + $0x40] sm:$0xff]  }
 0xa51   : > { %v9900_v45 = vld [vmem:[#allocation2 + $0x1af] sm:$0xff] }
 0xa52   : > { %v9956_v44 = vld [vmem:[#allocation2 + $0x1f0] sm:$0xff]  ;;  %v28804_v35 = vpack.c.bf16 %v9900_v45, %v9899_v46 }
 0xa53   : > { %v28741_v22 = vpack.c.bf16 %v9956_v44, %v9955_v11  ;;  %v28796_v11 = vpack.c.bf16 %v9896_v31, %v9895_v48  ;;  %v9897_v44 = vld [vmem:[#allocation2 + $0x187] sm:$0xff]  ;;  %v9902_v18 = vld [vmem:[#allocation2 + $0x1cf] sm:$0xff] }
 0xa54   : > { %v10420_v25 = vld [vmem:[#allocation2 + $0x9] sm:$0xff]  ;;  %v10425_v1 = vld [vmem:[#allocation2 + $0x51] sm:$0xff] }
 0xa55   : > { %23303 = vmatmul.mubr.msk.bf16.gmra.mrb[124].mxu0 %vm737_vm3, %v28741_v22  ;;  %v9904_v41 = vld [vmem:[#allocation2 + $0x1ef] sm:$0xff]  ;;  %v10452_v14 = vpack.c.bf16 %v10421_v24, %v10420_v25 }
 0xa56   : > { %23310 = vmatprep.mubr.msk.bf16.mxu0 %vm737_vm3, %v9905_v57  ;;  %v28798_v57 = vpack.c.bf16 %v9898_v52, %v9897_v44  ;;  %v10422_v5 = vld [vmem:[#allocation2 + $0x29] sm:$0xff]  ;;  %v10427_v31 = vld [vmem:[#allocation2 + $0x71] sm:$0xff] }
 0xa57   : > { %v10424_v6 = vld [vmem:[#allocation2 + $0x49] sm:$0xff]  ;;  %v28817_v23 = vpack.c.bf16 %v10423_v10, %v10422_v5  ;;  %v10429_v48 = vld [vmem:[#allocation2 + $0x91] sm:$0xff] }
 0xa58   : > { %v28822_v8 = vpack.c.bf16 %v10425_v1, %v10424_v6  ;;  %v10426_v20 = vld [vmem:[#allocation2 + $0x69] sm:$0xff]  ;;  %v10437_v5 = vld [vmem:[#allocation2 + $0x111] sm:$0xff] }
 0xa59   : > { %v10428_v52 = vld [vmem:[#allocation2 + $0x89] sm:$0xff]  ;;  %v28832_v44 = vpack.c.bf16 %v10427_v31, %v10426_v20  ;;  %v10441_v31 = vld [vmem:[#allocation2 + $0x151] sm:$0xff] }
 0xa5a   : > { %v28834_v45 = vpack.c.bf16 %v10429_v48, %v10428_v52  ;;  %v10432_v46 = vld [vmem:[#allocation2 + $0xc9] sm:$0xff] }
 0xa5b   : > { %v10438_v1 = vld [vmem:[#allocation2 + $0x129] sm:$0xff] }
 0xa5c   : > { %v10440_v20 = vld [vmem:[#allocation2 + $0x149] sm:$0xff] }
 0xa5d   : > { %23311 = vmatmul.mubr.msk.bf16.vlgmr.msra.gmra.mrb[96].mxu0 %vm737_vm3, %v28746_v34  ;;  %v28858_v48 = vpack.c.bf16 %v10441_v31, %v10440_v20 }
 0xa5e   : > { %23314 = vmatprep.mubr.msk.bf16.mxu0 %vm737_vm3, %v28751_v36  ;;  %23343 = vmatpush3.bf16.msra.mxu0 %v28646_v29  ;;  %v9884_v29 = vld [vmem:[#allocation2 + $0xaf] sm:$0xff] }
 0xa5f   : > { %23344 = vmatprep.subr.bf16.mxu0 %v26080_v7  ;;  %v28772_v61 = vpack.c.bf16 %v9884_v29, %v9883_v9  ;;  %v9903_v29 = vld [vmem:[#allocation2 + $0x1e7] sm:$0xff] }
 0xa60   : > { %v28812_v9 = vpack.c.bf16 %v9904_v41, %v9903_v29  ;;  %v10434_v41 = vld [vmem:[#allocation2 + $0xe9] sm:$0xff]  ;;  %v10435_v29 = vld [vmem:[#allocation2 + $0xf1] sm:$0xff] }
 0xa61   : > { %v28848_v10 = vpack.c.bf16 %v10435_v29, %v10434_v41 }
 0xa62   : > { %23345 = vmatpush3.bf16.msra.mxu0 %v26080_v7  ;;  %v9901_v7 = vld [vmem:[#allocation2 + $0x1c7] sm:$0xff] }
 0xa63   : > { %23378 = vmatprep.subr.bf16.mxu0 %v28761_v16  ;;  %v28806_v0 = vpack.c.bf16 %v9902_v18, %v9901_v7  ;;  %v10431_v18 = vld [vmem:[#allocation2 + $0xb1] sm:$0xff] }
 0xa64   : > { %v10433_v7 = vld [vmem:[#allocation2 + $0xd1] sm:$0xff] }
 0xa65   : > { %23315 = vmatmul.mubr.msk.bf16.gmra.mrb[100].mxu0 %vm737_vm3, %v28763_v55  ;;  %v28842_v24 = vpack.c.bf16 %v10433_v7, %v10432_v46  ;;  %v10444_v46 = vld [vmem:[#allocation2 + $0x189] sm:$0xff]  ;;  %v10445_v7 = vld [vmem:[#allocation2 + $0x191] sm:$0xff] }
 0xa66   : > { %23318 = vmatprep.mubr.msk.bf16.mxu0 %vm737_vm3, %v28766_v13  ;;  %v28866_v29 = vpack.c.bf16 %v10445_v7, %v10444_v46  ;;  %v26084_v7 = vld [vmem:[%s30864_s10 + $0x48] sm:$0xff]  }
 0xa6d   : > { %23319 = vmatmul.mubr.msk.bf16.gmra.mrb[104].mxu0 %vm737_vm3, %v28772_v61 }
 0xa6e   : > { %23322 = vmatprep.mubr.msk.bf16.mxu0 %vm737_vm3, %v28774_v58 }
 0xa75   : > { %23323 = vmatmul.mubr.msk.bf16.gmra.mrb[108].mxu0 %vm737_vm3, %v28780_v49 }
 0xa76   : > { %23326 = vmatprep.mubr.msk.bf16.mxu0 %vm737_vm3, %v28782_v59 }
 0xa7d   : > { %23327 = vmatmul.mubr.msk.bf16.gmra.mrb[112].mxu0 %vm737_vm3, %v28788_v4 }
 0xa7e   : > { %23330 = vmatprep.mubr.msk.bf16.mxu0 %vm737_vm3, %v28790_v39 }
 0xa85   : > { %23331 = vmatmul.mubr.msk.bf16.gmra.mrb[116].mxu0 %vm737_vm3, %v28796_v11 }
 0xa86   : > { %23334 = vmatprep.mubr.msk.bf16.mxu0 %vm737_vm3, %v28798_v57 }
 0xa8d   : > { %23335 = vmatmul.mubr.msk.bf16.gmra.mrb[120].mxu0 %vm737_vm3, %v28804_v35 }
 0xa8e   : > { %23338 = vmatprep.mubr.msk.bf16.mxu0 %vm737_vm3, %v28806_v0 }
 0xa95   : > { %23339 = vmatmul.mubr.msk.bf16.gmra.mrb[124].mxu0 %vm737_vm3, %v28812_v9 }
 0xa96   : > { %23346 = vmatprep.mubr.msk.bf16.mxu0 %vm737_vm3, %v10452_v14  ;;  %v10436_v14 = vld [vmem:[#allocation2 + $0x109] sm:$0xff] }
 0xa97   : > { %v28850_v6 = vpack.c.bf16 %v10437_v5, %v10436_v14  ;;  %v10446_v14 = vld [vmem:[#allocation2 + $0x1a9] sm:$0xff]  ;;  %v10447_v5 = vld [vmem:[#allocation2 + $0x1b1] sm:$0xff] }
 0xa98   : > { %v28872_v20 = vpack.c.bf16 %v10447_v5, %v10446_v14  ;;  %v26085_v14 = vld [vmem:[%s30864_s10 + $0x50] sm:$0xff]  }
 0xa9d   : > { %23347 = vmatmul.mubr.msk.bf16.vlgmr.msra.gmra.mrb[96].mxu0 %vm737_vm3, %v28817_v23 }
 0xa9e   : > { %23350 = vmatprep.mubr.msk.bf16.mxu0 %vm737_vm3, %v28822_v8  ;;  %23379 = vmatpush3.bf16.msra.mxu0 %v28761_v16  ;;  %v10430_v16 = vld [vmem:[#allocation2 + $0xa9] sm:$0xff] }
 0xa9f   : > { %23380 = vmatprep.subr.bf16.mxu0 %v26082_v17  ;;  %v28840_v25 = vpack.c.bf16 %v10431_v18, %v10430_v16  ;;  %v10442_v16 = vld [vmem:[#allocation2 + $0x169] sm:$0xff]  ;;  %v10443_v18 = vld [vmem:[#allocation2 + $0x171] sm:$0xff] }
 0xaa0   : > { %v28864_v41 = vpack.c.bf16 %v10443_v18, %v10442_v16  ;;  %v10450_v16 = vld [vmem:[#allocation2 + $0x1e9] sm:$0xff]  ;;  %v10451_v18 = vld [vmem:[#allocation2 + $0x1f1] sm:$0xff] }
 0xaa1   : > { %v28880_v46 = vpack.c.bf16 %v10451_v18, %v10450_v16  ;;  %v11959_v16 = vld [vmem:[#allocation2 + $0xd0] sm:$0xff]  ;;  %v11956_v18 = vld [vmem:[#allocation2 + $0xa8] sm:$0xff] }
 0xaa2   : > { %23381 = vmatpush3.bf16.msra.mxu0 %v26082_v17  ;;  %v10439_v17 = vld [vmem:[#allocation2 + $0x131] sm:$0xff] }
 0xaa3   : > { %23414 = vmatprep.subr.bf16.mxu0 %v26083_v43  ;;  %v28856_v52 = vpack.c.bf16 %v10439_v17, %v10438_v1  ;;  %v10448_v1 = vld [vmem:[#allocation2 + $0x1c9] sm:$0xff]  ;;  %v10449_v17 = vld [vmem:[#allocation2 + $0x1d1] sm:$0xff] }
 0xaa4   : > { %v28874_v31 = vpack.c.bf16 %v10449_v17, %v10448_v1  ;;  %v26086_v1 = vld [vmem:[%s30864_s10 + $0x58] sm:$0xff]   ;;  %v26087_v17 = vld [vmem:[%s30864_s10 + $0x60] sm:$0xff]  }
 0xaa5   : > { %23351 = vmatmul.mubr.msk.bf16.gmra.mrb[100].mxu0 %vm737_vm3, %v28832_v44 }
 0xaa6   : > { %23354 = vmatprep.mubr.msk.bf16.mxu0 %vm737_vm3, %v28834_v45 }
 0xaad   : > { %23355 = vmatmul.mubr.msk.bf16.gmra.mrb[104].mxu0 %vm737_vm3, %v28840_v25 }
 0xaae   : > { %23358 = vmatprep.mubr.msk.bf16.mxu0 %vm737_vm3, %v28842_v24 }
 0xab5   : > { %23359 = vmatmul.mubr.msk.bf16.gmra.mrb[108].mxu0 %vm737_vm3, %v28848_v10 }
 0xab6   : > { %23362 = vmatprep.mubr.msk.bf16.mxu0 %vm737_vm3, %v28850_v6 }
 0xabd   : > { %23363 = vmatmul.mubr.msk.bf16.gmra.mrb[112].mxu0 %vm737_vm3, %v28856_v52 }
 0xabe   : > { %23366 = vmatprep.mubr.msk.bf16.mxu0 %vm737_vm3, %v28858_v48 }
 0xac5   : > { %23367 = vmatmul.mubr.msk.bf16.gmra.mrb[116].mxu0 %vm737_vm3, %v28864_v41 }
 0xac6   : > { %23370 = vmatprep.mubr.msk.bf16.mxu0 %vm737_vm3, %v28866_v29 }
 0xacd   : > { %23371 = vmatmul.mubr.msk.bf16.gmra.mrb[120].mxu0 %vm737_vm3, %v28872_v20 }
 0xace   : > { %23374 = vmatprep.mubr.msk.bf16.mxu0 %vm737_vm3, %v28874_v31 }
 0xad5   : > { %23375 = vmatmul.mubr.msk.bf16.gmra.mrb[124].mxu0 %vm737_vm3, %v28880_v46 }
 0xad6   : > { %23382 = vmatprep.mubr.msk.bf16.mxu0 %vm737_vm3, %v28746_v34  ;;  %v10757_v34 = vld [vmem:[#allocation2 + $0x20f] sm:$0xff] }
 0xadd   : > { %23383 = vmatmul.mubr.msk.bf16.vlgmr.msra.gmra.mrb[96].mxu0 %vm737_vm3, %v28751_v36 }
 0xade   : > { %23386 = vmatprep.mubr.msk.bf16.mxu0 %vm737_vm3, %v28763_v55  ;;  %23415 = vmatpush3.bf16.msra.mxu0 %v26083_v43  ;;  %v10756_v43 = vld [vmem:[#allocation2 + $0x207] sm:$0xff] }
 0xadf   : > { %23416 = vmatprep.subr.bf16.mxu0 %v26084_v7  ;;  %v28920_v5 = vpack.c.bf16 %v10757_v34, %v10756_v43  ;;  %v11961_v43 = vld [vmem:[#allocation2 + $0xf0] sm:$0xff] }
 0xae2   : > { %23417 = vmatpush3.bf16.msra.mxu0 %v26084_v7 }
 0xae3   : > { %23450 = vmatprep.subr.bf16.mxu0 %v26085_v14 }
 0xae5   : > { %23387 = vmatmul.mubr.msk.bf16.gmra.mrb[100].mxu0 %vm737_vm3, %v28766_v13 }
 0xae6   : > { %23390 = vmatprep.mubr.msk.bf16.mxu0 %vm737_vm3, %v28772_v61 }
 0xaed   : > { %23391 = vmatmul.mubr.msk.bf16.gmra.mrb[104].mxu0 %vm737_vm3, %v28774_v58 }
 0xaee   : > { %23394 = vmatprep.mubr.msk.bf16.mxu0 %vm737_vm3, %v28780_v49 }
 0xaf5   : > { %23395 = vmatmul.mubr.msk.bf16.gmra.mrb[108].mxu0 %vm737_vm3, %v28782_v59 }
 0xaf6   : > { %23398 = vmatprep.mubr.msk.bf16.mxu0 %vm737_vm3, %v28788_v4 }
 0xafd   : > { %23399 = vmatmul.mubr.msk.bf16.gmra.mrb[112].mxu0 %vm737_vm3, %v28790_v39 }
 0xafe   : > { %23402 = vmatprep.mubr.msk.bf16.mxu0 %vm737_vm3, %v28796_v11 }
 0xb05   : > { %23403 = vmatmul.mubr.msk.bf16.gmra.mrb[116].mxu0 %vm737_vm3, %v28798_v57 }
 0xb06   : > { %23406 = vmatprep.mubr.msk.bf16.mxu0 %vm737_vm3, %v28804_v35 }
 0xb0d   : > { %23407 = vmatmul.mubr.msk.bf16.gmra.mrb[120].mxu0 %vm737_vm3, %v28806_v0 }
 0xb0e   : > { %23410 = vmatprep.mubr.msk.bf16.mxu0 %vm737_vm3, %v28812_v9 }
 0xb15   : > { %23411 = vmatmul.mubr.msk.bf16.gmra.mrb[124].mxu0 %vm737_vm3, %v28920_v5 }
 0xb16   : > { %23418 = vmatprep.mubr.msk.bf16.mxu0 %vm737_vm3, %v28628_v19  ;;  %v11063_v19 = vld [vmem:[#allocation2 + $0x210] sm:$0xff] }
 0xb1d   : > { %23419 = vmatmul.mubr.msk.bf16.vlgmr.msra.gmra.mrb[96].mxu0 %vm737_vm3, %v28634_v30  ;;  %v11062_v30 = vld [vmem:[#allocation2 + $0x208] sm:$0xff] }
 0xb1e   : > { %23422 = vmatprep.mubr.msk.bf16.mxu0 %vm737_vm3, %v28652_v28  ;;  %23451 = vmatpush3.bf16.msra.mxu0 %v26085_v14  ;;  %v28960_v28 = vpack.c.bf16 %v11063_v19, %v11062_v30  ;;  %v11958_v14 = vld [vmem:[#allocation2 + $0xc8] sm:$0xff] }
 0xb1f   : > { %23452 = vmatprep.subr.bf16.mxu0 %v26086_v1  ;;  %v11986_v34 = vpack.c.bf16 %v11959_v16, %v11958_v14  ;;  %v11962_v19 = vld [vmem:[#allocation2 + $0x108] sm:$0xff] }
 0xb22   : > { %23453 = vmatpush3.bf16.msra.mxu0 %v26086_v1  ;;  %v11960_v1 = vld [vmem:[#allocation2 + $0xe8] sm:$0xff] }
 0xb23   : > { %23486 = vmatprep.subr.bf16.mxu0 %v26087_v17 }
 0xb25   : > { %23423 = vmatmul.mubr.msk.bf16.gmra.mrb[100].mxu0 %vm737_vm3, %v28656_v21  ;;  %v26088_v21 = vld [vmem:[%s30864_s10 + $0x68] sm:$0xff]  }
 0xb26   : > { %23426 = vmatprep.mubr.msk.bf16.mxu0 %vm737_vm3, %v28669_v12  ;;  %v26089_v12 = vld [vmem:[%s30864_s10 + $0x70] sm:$0xff]  }
 0xb2d   : > { %23427 = vmatmul.mubr.msk.bf16.gmra.mrb[104].mxu0 %vm737_vm3, %v28672_v47  ;;  %v11368_v47 = vld [vmem:[#allocation2 + $0x209] sm:$0xff] }
 0xb2e   : > { %23430 = vmatprep.mubr.msk.bf16.mxu0 %vm737_vm3, %v28685_v32  ;;  %v11369_v32 = vld [vmem:[#allocation2 + $0x211] sm:$0xff] }
 0xb35   : > { %23431 = vmatmul.mubr.msk.bf16.gmra.mrb[108].mxu0 %vm737_vm3, %v28688_v60  ;;  %v29000_v60 = vpack.c.bf16 %v11369_v32, %v11368_v47  ;;  %v11964_v47 = vld [vmem:[#allocation2 + $0x128] sm:$0xff] }
 0xb36   : > { %23434 = vmatprep.mubr.msk.bf16.mxu0 %vm737_vm3, %v28701_v33  ;;  %v26090_v33 = vld [vmem:[%s30864_s10 + $0x78] sm:$0xff]  }
 0xb3d   : > { %23435 = vmatmul.mubr.msk.bf16.gmra.mrb[112].mxu0 %vm737_vm3, %v28704_v15  ;;  %v26091_v15 = vld [vmem:[%s30864_s10 + $0x80] sm:$0xff]  }
 0xb3e   : > { %23438 = vmatprep.mubr.msk.bf16.mxu0 %vm737_vm3, %v28717_v38 }
 0xb45   : > { %23439 = vmatmul.mubr.msk.bf16.gmra.mrb[116].mxu0 %vm737_vm3, %v28720_v63 }
 0xb46   : > { %23442 = vmatprep.mubr.msk.bf16.mxu0 %vm737_vm3, %v28733_v50 }
 0xb4d   : > { %23443 = vmatmul.mubr.msk.bf16.gmra.mrb[120].mxu0 %vm737_vm3, %v28735_v51 }
 0xb4e   : > { %23446 = vmatprep.mubr.msk.bf16.mxu0 %vm737_vm3, %v28741_v22 }
 0xb55   : > { %23447 = vmatmul.mubr.msk.bf16.gmra.mrb[124].mxu0 %vm737_vm3, %v28960_v28 }
 0xb56   : > { %23454 = vmatprep.mubr.msk.bf16.mxu0 %vm737_vm3, %v28817_v23  ;;  %v11957_v23 = vld [vmem:[#allocation2 + $0xb0] sm:$0xff] }
 0xb57   : > { %v11985_v7 = vpack.c.bf16 %v11957_v23, %v11956_v18 }
 0xb5d   : > { %23455 = vmatmul.mubr.msk.bf16.vlgmr.msra.gmra.mrb[96].mxu0 %vm737_vm3, %v28822_v8 }
 0xb5e   : > { %23458 = vmatprep.mubr.msk.bf16.mxu0 %vm737_vm3, %v28832_v44  ;;  %23487 = vmatpush3.bf16.msra.mxu0 %v26087_v17  ;;  %v11987_v17 = vpack.c.bf16 %v11961_v43, %v11960_v1 }
 0xb5f   : > { %23488 = vmatprep.subr.bf16.mxu0 %v26088_v21 }
 0xb62   : > { %23489 = vmatpush3.bf16.msra.mxu0 %v26088_v21  ;;  %v11965_v21 = vld [vmem:[#allocation2 + $0x130] sm:$0xff] }
 0xb63   : > { %23522 = vmatprep.subr.bf16.mxu0 %v26089_v12  ;;  %v11989_v32 = vpack.c.bf16 %v11965_v21, %v11964_v47  ;;  %v31134_v21 = vmax.f32 %v27933_v40, 0.0 }
 0xb65   : > { %23459 = vmatmul.mubr.msk.bf16.gmra.mrb[100].mxu0 %vm737_vm3, %v28834_v45 }
 0xb66   : > { %23462 = vmatprep.mubr.msk.bf16.mxu0 %vm737_vm3, %v28840_v25 }
 0xb6d   : > { %23463 = vmatmul.mubr.msk.bf16.gmra.mrb[104].mxu0 %vm737_vm3, %v28842_v24 }
 0xb6e   : > { %23466 = vmatprep.mubr.msk.bf16.mxu0 %vm737_vm3, %v28848_v10 }
 0xb75   : > { %23467 = vmatmul.mubr.msk.bf16.gmra.mrb[108].mxu0 %vm737_vm3, %v28850_v6 }
 0xb76   : > { %23470 = vmatprep.mubr.msk.bf16.mxu0 %vm737_vm3, %v28856_v52 }
 0xb7d   : > { %23471 = vmatmul.mubr.msk.bf16.gmra.mrb[112].mxu0 %vm737_vm3, %v28858_v48 }
 0xb7e   : > { %23474 = vmatprep.mubr.msk.bf16.mxu0 %vm737_vm3, %v28864_v41 }
 0xb85   : > { %23475 = vmatmul.mubr.msk.bf16.gmra.mrb[116].mxu0 %vm737_vm3, %v28866_v29 }
 0xb86   : > { %23478 = vmatprep.mubr.msk.bf16.mxu0 %vm737_vm3, %v28872_v20 }
 0xb8d   : > { %23479 = vmatmul.mubr.msk.bf16.gmra.mrb[120].mxu0 %vm737_vm3, %v28874_v31 }
 0xb8e   : > { %23482 = vmatprep.mubr.msk.bf16.mxu0 %vm737_vm3, %v28880_v46 }
 0xb95   : > { %23483 = vmatmul.mubr.msk.bf16.gmra.mrb[124].mxu0 %vm737_vm3, %v29000_v60 }
 0xb96   : > { %23490 = vmatprep.mubr.msk.bf16.mxu0 %vm737_vm3, %v28751_v36  ;;  %v11674_v36 = vld [vmem:[#allocation2 + $0x227] sm:$0xff] }
 0xb9d   : > { %23491 = vmatmul.mubr.msk.bf16.vlgmr.msra.gmra.mrb[96].mxu0 %vm737_vm3, %v28763_v55  ;;  %v11675_v55 = vld [vmem:[#allocation2 + $0x22f] sm:$0xff] }
 0xb9e   : > { %23494 = vmatprep.mubr.msk.bf16.mxu0 %vm737_vm3, %v28766_v13  ;;  %23523 = vmatpush3.bf16.msra.mxu0 %v26089_v12  ;;  %v11691_v13 = vpack.c.bf16 %v11675_v55, %v11674_v36  ;;  %v11967_v12 = vld [vmem:[#allocation2 + $0x150] sm:$0xff]  ;;  %v11980_v36 = vld [vmem:[#allocation2 + $0x228] sm:$0xff] }
 0xb9f   : > { %23524 = vmatprep.subr.bf16.mxu0 %v26090_v33  ;;  %v11981_v55 = vld [vmem:[#allocation2 + $0x230] sm:$0xff] }
 0xba2   : > { %23525 = vmatpush3.bf16.msra.mxu0 %v26090_v33  ;;  %v11966_v33 = vld [vmem:[#allocation2 + $0x148] sm:$0xff] }
 0xba3   : > { %23558 = vmatprep.subr.bf16.mxu0 %v26091_v15 }
 0xba5   : > { %23495 = vmatmul.mubr.msk.bf16.gmra.mrb[100].mxu0 %vm737_vm3, %v28772_v61  ;;  %v11951_v61 = vld [vmem:[#allocation2 + $0x50] sm:$0xff] }
 0xba6   : > { %23498 = vmatprep.mubr.msk.bf16.mxu0 %vm737_vm3, %v28774_v58  ;;  %v11950_v58 = vld [vmem:[#allocation2 + $0x48] sm:$0xff] }
 0xbad   : > { %23499 = vmatmul.mubr.msk.bf16.gmra.mrb[104].mxu0 %vm737_vm3, %v28780_v49  ;;  %v11982_v49 = vpack.c.bf16 %v11951_v61, %v11950_v58  ;;  %v31130_v58 = vmax.f32 %v27897_v27, 0.0 }
 0xbae   : > { %23502 = vmatprep.mubr.msk.bf16.mxu0 %vm737_vm3, %v28782_v59  ;;  %v26093_v59 = vld [vmem:[%s30866_s12 + $0x10] sm:$0xff]  }
 0xbaf   : > { %23594 = vmatprep.subr.bf16.mxu1 %v26093_v59 }
 0xbb0   : > { %23595 = vmatpush3.bf16.msra.mxu1 %v26093_v59 }
 0xbb5   : > { %23503 = vmatmul.mubr.msk.bf16.gmra.mrb[108].mxu0 %vm737_vm3, %v28788_v4  ;;  %v11953_v4 = vld [vmem:[#allocation2 + $0x70] sm:$0xff] }
 0xbb6   : > { %23506 = vmatprep.mubr.msk.bf16.mxu0 %vm737_vm3, %v28790_v39  ;;  %v11955_v39 = vld [vmem:[#allocation2 + $0x90] sm:$0xff] }
 0xbbd   : > { %23507 = vmatmul.mubr.msk.bf16.gmra.mrb[112].mxu0 %vm737_vm3, %v28796_v11  ;;  %v11952_v11 = vld [vmem:[#allocation2 + $0x68] sm:$0xff] }
 0xbbe   : > { %23510 = vmatprep.mubr.msk.bf16.mxu0 %vm737_vm3, %v28798_v57  ;;  %v11983_v57 = vpack.c.bf16 %v11953_v4, %v11952_v11 }
 0xbc5   : > { %23511 = vmatmul.mubr.msk.bf16.gmra.mrb[116].mxu0 %vm737_vm3, %v28804_v35  ;;  %v11954_v35 = vld [vmem:[#allocation2 + $0x88] sm:$0xff] }
 0xbc6   : > { %23514 = vmatprep.mubr.msk.bf16.mxu0 %vm737_vm3, %v28806_v0  ;;  %v26092_v0 = vld [vmem:[%s30864_s10 + $0x88] sm:$0xff]  }
 0xbcd   : > { %23515 = vmatmul.mubr.msk.bf16.gmra.mrb[120].mxu0 %vm737_vm3, %v28812_v9  ;;  %v11984_v9 = vpack.c.bf16 %v11955_v39, %v11954_v35  ;;  %v31131_v39 = vmax.f32 %v27902_v26, 0.0  ;;  %v31132_v35 = vmax.f32 %v27907_v2, 0.0 }
 0xbce   : > { %23518 = vmatprep.mubr.msk.bf16.mxu0 %vm737_vm3, %v28920_v5  ;;  %v11963_v5 = vld [vmem:[#allocation2 + $0x110] sm:$0xff] }
 0xbcf   : > { %v11988_v30 = vpack.c.bf16 %v11963_v5, %v11962_v19 }
 0xbd5   : > { %23519 = vmatmul.mubr.msk.bf16.gmra.mrb[124].mxu0 %vm737_vm3, %v11691_v13  ;;  %v11997_v13 = vpack.c.bf16 %v11981_v55, %v11980_v36  ;;  %v31136_v55 = vmax.f32 %v27943_v56, 0.0 }
 0xbd6   : > { %23526 = vmatprep.mubr.msk.bf16.mxu0 %vm737_vm3, %v11982_v49 }
 0xbdd   : > { %23527 = vmatmul.mubr.msk.bf16.vlgmr.msra.gmra.mrb[96].mxu0 %vm737_vm3, %v11983_v57 }
 0xbde   : > { %23530 = vmatprep.mubr.msk.bf16.mxu0 %vm737_vm3, %v11984_v9  ;;  %23559 = vmatpush3.bf16.msra.mxu0 %v26091_v15  ;;  %v11990_v15 = vpack.c.bf16 %v11967_v12, %v11966_v33  ;;  %v31135_v33 = vmax.f32 %v27938_v54, 0.0 }
 0xbdf   : > { %23560 = vmatprep.subr.bf16.mxu0 %v26092_v0 }
 0xbe2   : > { %23561 = vmatpush3.bf16.msra.mxu0 %v26092_v0 }
 0xbe5   : > { %23531 = vmatmul.mubr.msk.bf16.gmra.mrb[100].mxu0 %vm737_vm3, %v11985_v7 }
 0xbe6   : > { %23534 = vmatprep.mubr.msk.bf16.mxu0 %vm737_vm3, %v11986_v34 }
 0xbed   : > { %23535 = vmatmul.mubr.msk.bf16.gmra.mrb[104].mxu0 %vm737_vm3, %v11987_v17  ;;  %v31133_v17 = vmax.f32 %v27929_v3, 0.0 }
 0xbee   : > { %23538 = vmatprep.mubr.msk.bf16.mxu0 %vm737_vm3, %v11988_v30 }
 0xbf5   : > { %23539 = vmatmul.mubr.msk.bf16.gmra.mrb[108].mxu0 %vm737_vm3, %v11989_v32 }
 0xbf6   : > { %23542 = vmatprep.mubr.msk.bf16.mxu0 %vm737_vm3, %v11990_v15 }
 0xbfd   : > { %23543 = vmatmul.mubr.msk.bf16.gmra.mrb[112].mxu0 %vm737_vm3, %v28717_v38  ;;  %v12286_v38 = vld [vmem:[#allocation2 + $0x229] sm:$0xff] }
 0xbfe   : > { %23546 = vmatprep.mubr.msk.bf16.mxu0 %vm737_vm3, %v28720_v63  ;;  %v12287_v63 = vld [vmem:[#allocation2 + $0x231] sm:$0xff] }
 0xc05   : > { %23547 = vmatmul.mubr.msk.bf16.gmra.mrb[116].mxu0 %vm737_vm3, %v28733_v50  ;;  %v12303_v50 = vpack.c.bf16 %v12287_v63, %v12286_v38 }
 0xc06   : > { %23550 = vmatprep.mubr.msk.bf16.mxu0 %vm737_vm3, %v28735_v51  ;;  %v26094_v51 = vld [vmem:[%s30866_s12 + $0x18] sm:$0xff]  }
 0xc07   : > { %23596 = vmatprep.subr.bf16.mxu1 %v26094_v51 }
 0xc08   : > { %23597 = vmatpush3.bf16.msra.mxu1 %v26094_v51 }
 0xc0d   : > { %23551 = vmatmul.mubr.msk.bf16.gmra.mrb[120].mxu0 %vm737_vm3, %v28741_v22  ;;  %v12797_v22 = vld [vmem:[#allocation2 + $0x8] sm:$0xff] }
 0xc0e   : > { %23554 = vmatprep.mubr.msk.bf16.mxu0 %vm737_vm3, %v28960_v28  ;;  %v31129_v28 = vmax.f32 %v27893_v62, 0.0 }
 0xc15   : > { %23555 = vmatmul.mubr.msk.bf16.gmra.mrb[124].mxu0 %vm737_vm3, %v11997_v13 }
 0xc16   : > { %23562 = vmatprep.mubr.msk.bf16.mxu0 %vm737_vm3, %v28822_v8  ;;  %v12798_v8 = vld [vmem:[#allocation2 + $0x10] sm:$0xff] }
 0xc1d   : > { %23563 = vmatmul.mubr.msk.bf16.vlgmr.msra.gmra.mrb[96].mxu0 %vm737_vm3, %v28832_v44  ;;  %v12829_v44 = vpack.c.bf16 %v12798_v8, %v12797_v22 }
 0xc1e   : > { %23566 = vmatprep.mubr.msk.bf16.mxu0 %vm737_vm3, %v28834_v45  ;;  %v29107_v45 = vld [vmem:[%s30866_s12] sm:$0xff]  }
 0xc1f   : > { %23598 = vmatprep.mubr.msk.bf16.mxu1 %vm737_vm3, %v12829_v44  ;;  %23630 = vmatprep.subr.bf16.mxu1 %v29107_v45 }
 0xc25   : > { %23567 = vmatmul.mubr.msk.bf16.gmra.mrb[100].mxu0 %vm737_vm3, %v28840_v25  ;;  %v29113_v25 = vld [vmem:[%s30865_s11] ss:$0 sm:$0xff] }
 0xc26   : > { %23570 = vmatprep.mubr.msk.bf16.mxu0 %vm737_vm3, %v28842_v24 }
 0xc2d   : > { %23571 = vmatmul.mubr.msk.bf16.gmra.mrb[104].mxu0 %vm737_vm3, %v28848_v10 }
 0xc2e   : > { %23574 = vmatprep.mubr.msk.bf16.mxu0 %vm737_vm3, %v28850_v6 }
 0xc35   : > { %23575 = vmatmul.mubr.msk.bf16.gmra.mrb[108].mxu0 %vm737_vm3, %v28856_v52 }
 0xc36   : > { %23578 = vmatprep.mubr.msk.bf16.mxu0 %vm737_vm3, %v28858_v48 }
 0xc3d   : > { %23579 = vmatmul.mubr.msk.bf16.gmra.mrb[112].mxu0 %vm737_vm3, %v28864_v41 }
 0xc3e   : > { %23582 = vmatprep.mubr.msk.bf16.mxu0 %vm737_vm3, %v28866_v29 }
 0xc45   : > { %23583 = vmatmul.mubr.msk.bf16.gmra.mrb[116].mxu0 %vm737_vm3, %v28872_v20 }
 0xc46   : > { %23586 = vmatprep.mubr.msk.bf16.mxu0 %vm737_vm3, %v28874_v31 }
 0xc4d   : > { %23587 = vmatmul.mubr.msk.bf16.gmra.mrb[120].mxu0 %vm737_vm3, %v28880_v46 }
 0xc4e   : > { %23590 = vmatprep.mubr.msk.bf16.mxu0 %vm737_vm3, %v29000_v60 }
 0xc55   : > { %23591 = vmatmul.mubr.msk.bf16.gmra.mrb[124].mxu0 %vm737_vm3, %v12303_v50 }
 0xcf0   : > { %v23564_v24 = vpop.f32.mrb[96].mxu0 }
 0xcf1   : > { %v12571_v10 = vadd.f32 %v23564_v24, %v29113_v25  ;;  %v12403_v6 = vpop.f32.mrb[97].mxu0 }
 0xcf2   : > { %v12569_v52 = vadd.f32 %v29113_v25, %v12403_v6  ;;  %v23565_v48 = vpop.f32.mrb[98].mxu0 }
 0xcf3   : > { %v12603_v41 = vmax.f32 %v12571_v10, 0.0  ;;  %v12572_v29 = vadd.f32 %v23565_v48, %v29113_v25  ;;  %v12406_v20 = vpop.f32.mrb[99].mxu0 }
 0xcf4   : > { %v12601_v31 = vmax.f32 %v12569_v52, 0.0  ;;  %v12570_v46 = vadd.f32 %v29113_v25, %v12406_v20 }
 0xcf5   : > { %v12635_v60 = vadd.f32 %v12603_v41, %v31129_v28  ;;  %v12604_v61 = vmax.f32 %v12572_v29, 0.0 }
 0xcf6   : > { %v12633_v49 = vadd.f32 %v12601_v31, %v31130_v58  ;;  %v12602_v59 = vmax.f32 %v12570_v46, 0.0  ;;  %v26096_v31 = vld [vmem:[%s30866_s12 + $0x8] sm:$0xff]   ;;  %v31137_v46 = vmax.f32 %v27970_v37, 0.0  ;;  %v31138_v58 = vmax.f32 %v27976_v53, 0.0  ;;  %v29182_v53 = vld [vmem:[%s30866_s12 + $0x20] sm:$0xff]  }
 0xcf7   : > { %v12667_v4 = vmax.f32 %v12635_v60, 0.0  ;;  %v12636_v11 = vadd.f32 %v12604_v61, %v31131_v39  ;;  %v31139_v39 = vmax.f32 %v27983_v42, 0.0 }
 0xcf8   : > { %v12665_v57 = vmax.f32 %v12633_v49, 0.0  ;;  %v12634_v0 = vadd.f32 %v12602_v59, %v31132_v35  ;;  %v23568_v9 = vpop.f32.mrb[100].mxu0 }
 0xcf9   : > { %12715 = vst.msk [vmem:[#allocation2 + $0x48] sm:$0xff] %vm737_vm3, %v12667_v4  ;;  %v12668_v23 = vmax.f32 %v12636_v11, 0.0  ;;  %v12575_v62 = vadd.f32 %v23568_v9, %v29113_v25  ;;  %v12419_v16 = vpop.f32.mrb[101].mxu0 }
 0xcfa   : > { %12713 = vst.msk [vmem:[#allocation2 + $0x28] sm:$0xff] %vm737_vm3, %v12665_v57  ;;  %v12666_v27 = vmax.f32 %v12634_v0, 0.0  ;;  %v12573_v18 = vadd.f32 %v29113_v25, %v12419_v16  ;;  %v23569_v7 = vpop.f32.mrb[102].mxu0 }
 0xcfb   : > { %v29131_v14 = vpack.c.bf16 %v12668_v23, %v12667_v4  ;;  %12716 = vst.msk [vmem:[#allocation2 + $0x50] sm:$0xff] %vm737_vm3, %v12668_v23  ;;  %v12607_v26 = vmax.f32 %v12575_v62, 0.0  ;;  %v12576_v2 = vadd.f32 %v23569_v7, %v29113_v25  ;;  %v12422_v34 = vpop.f32.mrb[103].mxu0 }
 0xcfc   : > { %v29135_v43 = vpack.c.bf16 %v12666_v27, %v12665_v57  ;;  %12714 = vst.msk [vmem:[#allocation2 + $0x30] sm:$0xff] %vm737_vm3, %v12666_v27  ;;  %v12605_v5 = vmax.f32 %v12573_v18, 0.0  ;;  %v12574_v1 = vadd.f32 %v29113_v25, %v12422_v34  ;;  %v31140_v57 = vld [vmem:[#allocation15_spill] sm:$0xff] }
 0xcfd   : > { %v12639_v19 = vadd.f32 %v12607_v26, %v31133_v17  ;;  %v12608_v30 = vmax.f32 %v12576_v2, 0.0  ;;  %v31141_v35 = vmax.f32 %v31140_v57, 0.0 }
 0xcfe   : > { %v12637_v12 = vadd.f32 %v12605_v5, %v31134_v21  ;;  %v12606_v47 = vmax.f32 %v12574_v1, 0.0 }
 0xcff   : > { %v12671_v32 = vmax.f32 %v12639_v19, 0.0  ;;  %v12640_v15 = vadd.f32 %v12608_v30, %v31135_v33 }
 0xd00   : > { %v12669_v36 = vmax.f32 %v12637_v12, 0.0  ;;  %v12638_v13 = vadd.f32 %v12606_v47, %v31136_v55  ;;  %v23572_v38 = vpop.f32.mrb[104].mxu0  ;;  %v12801_v20 = vld [vmem:[#allocation2 + $0x48] sm:$0xff]  ;;  %v31145_v55 = vld [vmem:[#allocation16_spill] sm:$0xff] }
 0xd01   : > { %12719 = vst.msk [vmem:[#allocation2 + $0x88] sm:$0xff] %vm737_vm3, %v12671_v32  ;;  %v12672_v63 = vmax.f32 %v12640_v15, 0.0  ;;  %v12579_v3 = vadd.f32 %v23572_v38, %v29113_v25  ;;  %v12435_v50 = vpop.f32.mrb[105].mxu0  ;;  %v12799_v10 = vld [vmem:[#allocation2 + $0x28] sm:$0xff] }
 0xd02   : > { %12717 = vst.msk [vmem:[#allocation2 + $0x68] sm:$0xff] %vm737_vm3, %v12669_v36  ;;  %v12670_v40 = vmax.f32 %v12638_v13, 0.0  ;;  %v12577_v51 = vadd.f32 %v29113_v25, %v12435_v50  ;;  %v23573_v22 = vpop.f32.mrb[106].mxu0  ;;  %v12802_v8 = vld [vmem:[#allocation2 + $0x50] sm:$0xff]  ;;  %v31143_v47 = vld [vmem:[#allocation18_spill] sm:$0xff]  ;;  %v31146_v13 = vmax.f32 %v31145_v55, 0.0 }
 0xd03   : > { %v29151_v54 = vpack.c.bf16 %v12672_v63, %v12671_v32  ;;  %12720 = vst.msk [vmem:[#allocation2 + $0x90] sm:$0xff] %vm737_vm3, %v12672_v63  ;;  %v12611_v56 = vmax.f32 %v12579_v3, 0.0  ;;  %v12580_v44 = vadd.f32 %v23573_v22, %v29113_v25  ;;  %v12438_v24 = vpop.f32.mrb[107].mxu0  ;;  %v12800_v6 = vld [vmem:[#allocation2 + $0x30] sm:$0xff]  ;;  %v29166_v61 = vpack.c.bf16 %v12802_v8, %v12801_v20  ;;  %v31149_v8 = vld [vmem:[#allocation17_spill] sm:$0xff] }
 0xd04   : > { %v29155_v52 = vpack.c.bf16 %v12670_v40, %v12669_v36  ;;  %12718 = vst.msk [vmem:[#allocation2 + $0x70] sm:$0xff] %vm737_vm3, %v12670_v40  ;;  %v12609_v48 = vmax.f32 %v12577_v51, 0.0  ;;  %v12578_v41 = vadd.f32 %v29113_v25, %v12438_v24  ;;  %v29159_v29 = vpack.c.bf16 %v12800_v6, %v12799_v10  ;;  %v31147_v50 = vld [vmem:[#allocation19_spill] sm:$0xff] }
 0xd05   : > { %v12643_v28 = vadd.f32 %v12611_v56, %v31137_v46  ;;  %v12612_v60 = vmax.f32 %v12580_v44, 0.0  ;;  %v31144_v32 = vmax.f32 %v31143_v47, 0.0  ;;  %v31148_v40 = vmax.f32 %v31147_v50, 0.0 }
 0xd06   : > { %v12641_v49 = vadd.f32 %v12609_v48, %v31138_v58  ;;  %v12610_v59 = vmax.f32 %v12578_v41, 0.0  ;;  %23599 = vmatmul.mubr.msk.bf16.vlgmr.msra.gmra.mrb[64].mxu1 %vm737_vm3, %v29159_v29  ;;  %v31150_v56 = vmax.f32 %v31149_v8, 0.0 }
 0xd07   : > { %v12675_v4 = vmax.f32 %v12643_v28, 0.0  ;;  %v12644_v11 = vadd.f32 %v12612_v60, %v31139_v39  ;;  %23602 = vmatprep.mubr.msk.bf16.mxu1 %vm737_vm3, %v29166_v61  ;;  %23631 = vmatpush3.bf16.msra.mxu1 %v29107_v45 }
 0xd08   : > { %v12673_v37 = vmax.f32 %v12641_v49, 0.0  ;;  %v12642_v0 = vadd.f32 %v12610_v59, %v31141_v35  ;;  %v23576_v9 = vpop.f32.mrb[108].mxu0  ;;  %23632 = vmatprep.subr.bf16.mxu1 %v26096_v31  ;;  %v12805_v12 = vld [vmem:[#allocation2 + $0x88] sm:$0xff] }
 0xd09   : > { %12723 = vst.msk [vmem:[#allocation2 + $0xc8] sm:$0xff] %vm737_vm3, %v12675_v4  ;;  %v12676_v42 = vmax.f32 %v12644_v11, 0.0  ;;  %v12583_v23 = vadd.f32 %v23576_v9, %v29113_v25  ;;  %v12451_v62 = vpop.f32.mrb[109].mxu0  ;;  %v12803_v5 = vld [vmem:[#allocation2 + $0x68] sm:$0xff] }
 0xd0a   : > { %12721 = vst.msk [vmem:[#allocation2 + $0xa8] sm:$0xff] %vm737_vm3, %v12673_v37  ;;  %v12674_v45 = vmax.f32 %v12642_v0, 0.0  ;;  %v12581_v16 = vadd.f32 %v29113_v25, %v12451_v62  ;;  %v23577_v27 = vpop.f32.mrb[110].mxu0  ;;  %v12806_v18 = vld [vmem:[#allocation2 + $0x90] sm:$0xff]  ;;  %v31153_v0 = vld [vmem:[#allocation22_spill] sm:$0xff] }
 0xd0b   : > { %v29188_v7 = vpack.c.bf16 %v12676_v42, %v12675_v4  ;;  %12724 = vst.msk [vmem:[#allocation2 + $0xd0] sm:$0xff] %vm737_vm3, %v12676_v42  ;;  %v12615_v26 = vmax.f32 %v12583_v23, 0.0  ;;  %v12584_v2 = vadd.f32 %v23577_v27, %v29113_v25  ;;  %v12454_v34 = vpop.f32.mrb[111].mxu0  ;;  %v12804_v1 = vld [vmem:[#allocation2 + $0x70] sm:$0xff]  ;;  %23633 = vmatpush3.bf16.msra.mxu1 %v26096_v31  ;;  %v29201_v36 = vpack.c.bf16 %v12806_v18, %v12805_v12 }
 0xd0c   : > { %v29192_v17 = vpack.c.bf16 %v12674_v45, %v12673_v37  ;;  %12722 = vst.msk [vmem:[#allocation2 + $0xb0] sm:$0xff] %vm737_vm3, %v12674_v45  ;;  %v12613_v19 = vmax.f32 %v12581_v16, 0.0  ;;  %v12582_v30 = vadd.f32 %v29113_v25, %v12454_v34  ;;  %v29196_v21 = vpack.c.bf16 %v12804_v1, %v12803_v5  ;;  %23666 = vmatprep.subr.bf16.mxu1 %v29182_v53  ;;  %v31155_v45 = vld [vmem:[#allocation20_spill] sm:$0xff] }
 0xd0d   : > { %31142 = vst [vmem:[#allocation15_spill] sm:$0xff] %v29188_v7  ;;  %v12647_v33 = vadd.f32 %v12615_v26, %v31144_v32  ;;  %v12616_v15 = vmax.f32 %v12584_v2, 0.0  ;;  %v31154_v9 = vmax.f32 %v31153_v0, 0.0  ;;  %v31156_v16 = vmax.f32 %v31155_v45, 0.0  ;;  %v31157_v2 = vld [vmem:[#allocation23_spill] sm:$0xff] }
 0xd0e   : > { %v12645_v38 = vadd.f32 %v12613_v19, %v31146_v13  ;;  %v12614_v63 = vmax.f32 %v12582_v30, 0.0  ;;  %23603 = vmatmul.mubr.msk.bf16.gmra.mrb[68].mxu1 %vm737_vm3, %v29196_v21  ;;  %v31158_v34 = vmax.f32 %v31157_v2, 0.0  ;;  %v31159_v19 = vld [vmem:[#allocation21_spill] sm:$0xff] }
 0xd0f   : > { %v12679_v3 = vmax.f32 %v12647_v33, 0.0  ;;  %v12648_v51 = vadd.f32 %v12616_v15, %v31148_v40  ;;  %23606 = vmatprep.mubr.msk.bf16.mxu1 %vm737_vm3, %v29201_v36  ;;  %v31160_v30 = vmax.f32 %v31159_v19, 0.0 }
 0xd10   : > { %v12677_v22 = vmax.f32 %v12645_v38, 0.0  ;;  %v12646_v44 = vadd.f32 %v12614_v63, %v31150_v56  ;;  %v23580_v24 = vpop.f32.mrb[112].mxu0  ;;  %v12809_v35 = vld [vmem:[#allocation2 + $0xc8] sm:$0xff] }
 0xd11   : > { %12727 = vst.msk [vmem:[#allocation2 + $0x108] sm:$0xff] %vm737_vm3, %v12679_v3  ;;  %v12680_v10 = vmax.f32 %v12648_v51, 0.0  ;;  %v12587_v6 = vadd.f32 %v23580_v24, %v29113_v25  ;;  %v12467_v48 = vpop.f32.mrb[113].mxu0  ;;  %v12807_v59 = vld [vmem:[#allocation2 + $0xa8] sm:$0xff] }
 0xd12   : > { %12725 = vst.msk [vmem:[#allocation2 + $0xe8] sm:$0xff] %vm737_vm3, %v12677_v22  ;;  %v12678_v41 = vmax.f32 %v12646_v44, 0.0  ;;  %v12585_v20 = vadd.f32 %v29113_v25, %v12467_v48  ;;  %v23581_v31 = vpop.f32.mrb[114].mxu0  ;;  %v12810_v46 = vld [vmem:[#allocation2 + $0xd0] sm:$0xff] }
 0xd13   : > { %v29217_v28 = vpack.c.bf16 %v12680_v10, %v12679_v3  ;;  %12728 = vst.msk [vmem:[#allocation2 + $0x110] sm:$0xff] %vm737_vm3, %v12680_v10  ;;  %v12619_v60 = vmax.f32 %v12587_v6, 0.0  ;;  %v12588_v58 = vadd.f32 %v23581_v31, %v29113_v25  ;;  %v12470_v49 = vpop.f32.mrb[115].mxu0  ;;  %v12808_v4 = vld [vmem:[#allocation2 + $0xb0] sm:$0xff]  ;;  %v29229_v62 = vpack.c.bf16 %v12810_v46, %v12809_v35  ;;  %v31161_v10 = vld [vmem:[#allocation26_spill] sm:$0xff]  ;;  %v31163_v31 = vld [vmem:[#allocation24_spill] sm:$0xff] }
 0xd14   : > { %v29221_v39 = vpack.c.bf16 %v12678_v41, %v12677_v22  ;;  %12726 = vst.msk [vmem:[#allocation2 + $0xf0] sm:$0xff] %vm737_vm3, %v12678_v41  ;;  %v12617_v11 = vmax.f32 %v12585_v20, 0.0  ;;  %v12586_v37 = vadd.f32 %v29113_v25, %v12470_v49  ;;  %v29225_v57 = vpack.c.bf16 %v12808_v4, %v12807_v59  ;;  %v31165_v4 = vld [vmem:[#allocation27_spill] sm:$0xff] }
 0xd15   : > { %31151 = vst [vmem:[#allocation18_spill] sm:$0xff] %v29217_v28  ;;  %v12651_v42 = vadd.f32 %v12619_v60, %v31154_v9  ;;  %v12620_v23 = vmax.f32 %v12588_v58, 0.0  ;;  %v31162_v6 = vmax.f32 %v31161_v10, 0.0  ;;  %v31164_v46 = vmax.f32 %v31163_v31, 0.0  ;;  %v31167_v9 = vld [vmem:[#allocation25_spill] sm:$0xff] }
 0xd16   : > { %31152 = vst [vmem:[#allocation16_spill] sm:$0xff] %v29221_v39  ;;  %v12649_v27 = vadd.f32 %v12617_v11, %v31156_v16  ;;  %v12618_v18 = vmax.f32 %v12586_v37, 0.0  ;;  %23607 = vmatmul.mubr.msk.bf16.gmra.mrb[72].mxu1 %vm737_vm3, %v29225_v57  ;;  %v31166_v11 = vmax.f32 %v31165_v4, 0.0 }
 0xd17   : > { %v12683_v26 = vmax.f32 %v12651_v42, 0.0  ;;  %v12652_v5 = vadd.f32 %v12620_v23, %v31158_v34  ;;  %23610 = vmatprep.mubr.msk.bf16.mxu1 %vm737_vm3, %v29229_v62  ;;  %v31168_v42 = vmax.f32 %v31167_v9, 0.0 }
 0xd18   : > { %v12681_v1 = vmax.f32 %v12649_v27, 0.0  ;;  %v12650_v12 = vadd.f32 %v12618_v18, %v31160_v30  ;;  %v23584_v47 = vpop.f32.mrb[116].mxu0  ;;  %v12813_v24 = vld [vmem:[#allocation2 + $0x108] sm:$0xff] }
 0xd19   : > { %12731 = vst.msk [vmem:[#allocation2 + $0x148] sm:$0xff] %vm737_vm3, %v12683_v26  ;;  %v12684_v32 = vmax.f32 %v12652_v5, 0.0  ;;  %v12591_v33 = vadd.f32 %v23584_v47, %v29113_v25  ;;  %v12483_v15 = vpop.f32.mrb[117].mxu0  ;;  %v12811_v51 = vld [vmem:[#allocation2 + $0xe8] sm:$0xff] }
 0xd1a   : > { %12729 = vst.msk [vmem:[#allocation2 + $0x128] sm:$0xff] %vm737_vm3, %v12681_v1  ;;  %v12682_v55 = vmax.f32 %v12650_v12, 0.0  ;;  %v12589_v13 = vadd.f32 %v29113_v25, %v12483_v15  ;;  %v23585_v38 = vpop.f32.mrb[118].mxu0  ;;  %v12814_v63 = vld [vmem:[#allocation2 + $0x110] sm:$0xff] }
 0xd1b   : > { %12732 = vst.msk [vmem:[#allocation2 + $0x150] sm:$0xff] %vm737_vm3, %v12684_v32  ;;  %v12623_v3 = vmax.f32 %v12591_v33, 0.0  ;;  %v12592_v50 = vadd.f32 %v23585_v38, %v29113_v25  ;;  %v12486_v40 = vpop.f32.mrb[119].mxu0  ;;  %v12812_v22 = vld [vmem:[#allocation2 + $0xf0] sm:$0xff]  ;;  %v29253_v20 = vpack.c.bf16 %v12814_v63, %v12813_v24  ;;  %v29265_v35 = vpack.c.bf16 %v12684_v32, %v12683_v26 }
 0xd1c   : > { %12730 = vst.msk [vmem:[#allocation2 + $0x130] sm:$0xff] %vm737_vm3, %v12682_v55  ;;  %v12621_v8 = vmax.f32 %v12589_v13, 0.0  ;;  %v12590_v56 = vadd.f32 %v29113_v25, %v12486_v40  ;;  %v29249_v44 = vpack.c.bf16 %v12812_v22, %v12811_v51  ;;  %v29259_v49 = vpack.c.bf16 %v12682_v55, %v12681_v1  ;;  %v31169_v13 = vld [vmem:[#allocation30_spill] sm:$0xff]  ;;  %v31171_v40 = vld [vmem:[#allocation28_spill] sm:$0xff]  ;;  %v31173_v24 = vld [vmem:[#allocation31_spill] sm:$0xff] }
 0xd1d   : > { %v12655_v48 = vadd.f32 %v12623_v3, %v31162_v6  ;;  %v12624_v41 = vmax.f32 %v12592_v50, 0.0  ;;  %v31170_v38 = vmax.f32 %v31169_v13, 0.0  ;;  %v31172_v51 = vmax.f32 %v31171_v40, 0.0 }
 0xd1e   : > { %v12653_v60 = vadd.f32 %v12621_v8, %v31164_v46  ;;  %v12622_v58 = vmax.f32 %v12590_v56, 0.0  ;;  %23611 = vmatmul.mubr.msk.bf16.gmra.mrb[76].mxu1 %vm737_vm3, %v29249_v44  ;;  %v31174_v10 = vmax.f32 %v31173_v24, 0.0  ;;  %v31175_v46 = vld [vmem:[#allocation29_spill] sm:$0xff] }
 0xd1f   : > { %v12687_v59 = vmax.f32 %v12655_v48, 0.0  ;;  %v12656_v37 = vadd.f32 %v12624_v41, %v31166_v11  ;;  %23614 = vmatprep.mubr.msk.bf16.mxu1 %vm737_vm3, %v29253_v20  ;;  %v31183_v24 = vld [vmem:[#allocation33_spill] sm:$0xff] }
 0xd20   : > { %v12685_v0 = vmax.f32 %v12653_v60, 0.0  ;;  %v12654_v23 = vadd.f32 %v12622_v58, %v31168_v42  ;;  %v23588_v45 = vpop.f32.mrb[120].mxu0  ;;  %v12817_v55 = vld [vmem:[#allocation2 + $0x148] sm:$0xff]  ;;  %v31176_v60 = vmax.f32 %v31175_v46, 0.0 }
 0xd21   : > { %12735 = vst.msk [vmem:[#allocation2 + $0x188] sm:$0xff] %vm737_vm3, %v12687_v59  ;;  %v12688_v16 = vmax.f32 %v12656_v37, 0.0  ;;  %v12595_v27 = vadd.f32 %v23588_v45, %v29113_v25  ;;  %v12499_v18 = vpop.f32.mrb[121].mxu0  ;;  %v12815_v12 = vld [vmem:[#allocation2 + $0x128] sm:$0xff] }
 0xd22   : > { %12733 = vst.msk [vmem:[#allocation2 + $0x168] sm:$0xff] %vm737_vm3, %v12685_v0  ;;  %v12686_v2 = vmax.f32 %v12654_v23, 0.0  ;;  %v12593_v34 = vadd.f32 %v29113_v25, %v12499_v18  ;;  %v23589_v5 = vpop.f32.mrb[122].mxu0  ;;  %v12818_v1 = vld [vmem:[#allocation2 + $0x150] sm:$0xff] }
 0xd23   : > { %12736 = vst.msk [vmem:[#allocation2 + $0x190] sm:$0xff] %vm737_vm3, %v12688_v16  ;;  %v12627_v26 = vmax.f32 %v12595_v27, 0.0  ;;  %v12596_v19 = vadd.f32 %v23589_v5, %v29113_v25  ;;  %v12502_v30 = vpop.f32.mrb[123].mxu0  ;;  %v12816_v47 = vld [vmem:[#allocation2 + $0x130] sm:$0xff]  ;;  %v29281_v50 = vpack.c.bf16 %v12818_v1, %v12817_v55  ;;  %v29293_v41 = vpack.c.bf16 %v12688_v16, %v12687_v59 }
 0xd24   : > { %12734 = vst.msk [vmem:[#allocation2 + $0x170] sm:$0xff] %vm737_vm3, %v12686_v2  ;;  %v12625_v32 = vmax.f32 %v12593_v34, 0.0  ;;  %v12594_v33 = vadd.f32 %v29113_v25, %v12502_v30  ;;  %v29277_v15 = vpack.c.bf16 %v12816_v47, %v12815_v12  ;;  %v29291_v48 = vpack.c.bf16 %v12686_v2, %v12685_v0 }
 0xd25   : > { %v12659_v63 = vadd.f32 %v12627_v26, %v31170_v38  ;;  %v12628_v3 = vmax.f32 %v12596_v19, 0.0  ;;  %v31177_v19 = vld [vmem:[#allocation34_spill] sm:$0xff] }
 0xd26   : > { %v12657_v22 = vadd.f32 %v12625_v32, %v31172_v51  ;;  %v12626_v8 = vmax.f32 %v12594_v33, 0.0  ;;  %23615 = vmatmul.mubr.msk.bf16.gmra.mrb[80].mxu1 %vm737_vm3, %v29277_v15  ;;  %v31178_v30 = vmax.f32 %v31177_v19, 0.0  ;;  %v31179_v33 = vld [vmem:[#allocation32_spill] sm:$0xff]  ;;  %v26098_v19 = vld [vmem:[%s30866_s12 + $0x28] sm:$0xff]  }
 0xd27   : > { %v12691_v56 = vmax.f32 %v12659_v63, 0.0  ;;  %v12660_v6 = vadd.f32 %v12628_v3, %v31174_v10  ;;  %23618 = vmatprep.mubr.msk.bf16.mxu1 %vm737_vm3, %v29281_v50  ;;  %v31180_v55 = vmax.f32 %v31179_v33, 0.0  ;;  %v31181_v3 = vld [vmem:[#allocation35_spill] sm:$0xff]  ;;  %v31184_v10 = vmax.f32 %v31183_v24, 0.0 }
 0xd28   : > { %v12689_v31 = vmax.f32 %v12657_v22, 0.0  ;;  %v12658_v58 = vadd.f32 %v12626_v8, %v31176_v60  ;;  %v23592_v4 = vpop.f32.mrb[124].mxu0  ;;  %v12821_v26 = vld [vmem:[#allocation2 + $0x188] sm:$0xff]  ;;  %v31182_v40 = vmax.f32 %v31181_v3, 0.0 }
 0xd29   : > { %12739 = vst.msk [vmem:[#allocation2 + $0x1c8] sm:$0xff] %vm737_vm3, %v12691_v56  ;;  %v12692_v11 = vmax.f32 %v12660_v6, 0.0  ;;  %v12599_v37 = vadd.f32 %v23592_v4, %v29113_v25  ;;  %v12515_v9 = vpop.f32.mrb[125].mxu0  ;;  %v12819_v18 = vld [vmem:[#allocation2 + $0x168] sm:$0xff] }
 0xd2a   : > { %12737 = vst.msk [vmem:[#allocation2 + $0x1a8] sm:$0xff] %vm737_vm3, %v12689_v31  ;;  %v12690_v42 = vmax.f32 %v12658_v58, 0.0  ;;  %v12597_v23 = vadd.f32 %v29113_v25, %v12515_v9  ;;  %v23593_v0 = vpop.f32.mrb[126].mxu0  ;;  %v12822_v45 = vld [vmem:[#allocation2 + $0x190] sm:$0xff] }
 0xd2b   : > { %12740 = vst.msk [vmem:[#allocation2 + $0x1d0] sm:$0xff] %vm737_vm3, %v12692_v11  ;;  %v12631_v59 = vmax.f32 %v12599_v37, 0.0  ;;  %v12600_v16 = vadd.f32 %v23593_v0, %v29113_v25  ;;  %v12518_v27 = vpop.f32.mrb[127].mxu0  ;;  %v12820_v2 = vld [vmem:[#allocation2 + $0x170] sm:$0xff]  ;;  %v29309_v32 = vpack.c.bf16 %v12822_v45, %v12821_v26  ;;  %v29321_v22 = vpack.c.bf16 %v12692_v11, %v12691_v56  ;;  %v12749_v26 = vld [vmem:[#allocation2 + $0x47] sm:$0xff] }
 0xd2c   : > { %12738 = vst.msk [vmem:[#allocation2 + $0x1b0] sm:$0xff] %vm737_vm3, %v12690_v42  ;;  %v12629_v34 = vmax.f32 %v12597_v23, 0.0  ;;  %v12598_v5 = vadd.f32 %v29113_v25, %v12518_v27  ;;  %v29305_v1 = vpack.c.bf16 %v12820_v2, %v12819_v18  ;;  %v29319_v51 = vpack.c.bf16 %v12690_v42, %v12689_v31  ;;  %v12745_v23 = vld [vmem:[#allocation2 + $0x7] sm:$0xff]  ;;  %v12746_v0 = vld [vmem:[#allocation2 + $0xf] sm:$0xff] }
 0xd2d   : > { %v12663_v12 = vadd.f32 %v12631_v59, %v31178_v30  ;;  %v12632_v47 = vmax.f32 %v12600_v16, 0.0  ;;  %v12777_v16 = vpack.c.bf16 %v12746_v0, %v12745_v23  ;;  %v12748_v18 = vld [vmem:[#allocation2 + $0x2f] sm:$0xff]  ;;  %v12763_v23 = vld [vmem:[#allocation2 + $0x127] sm:$0xff] }
 0xd2e   : > { %v12661_v13 = vadd.f32 %v12629_v34, %v31180_v55  ;;  %v12630_v38 = vmax.f32 %v12598_v5, 0.0  ;;  %23619 = vmatmul.mubr.msk.bf16.gmra.mrb[84].mxu1 %vm737_vm3, %v29305_v1  ;;  %v12750_v2 = vld [vmem:[#allocation2 + $0x4f] sm:$0xff]  ;;  %v12747_v34 = vld [vmem:[#allocation2 + $0x27] sm:$0xff] }
 0xd2f   : > { %v12695_v63 = vmax.f32 %v12663_v12, 0.0  ;;  %v12664_v25 = vadd.f32 %v12632_v47, %v31182_v40  ;;  %23622 = vmatprep.mubr.msk.bf16.mxu1 %vm737_vm3, %v29309_v32  ;;  %v29346_v5 = vpack.c.bf16 %v12748_v18, %v12747_v34  ;;  %v29351_v30 = vpack.c.bf16 %v12750_v2, %v12749_v26  ;;  %v29361_v12 = vld [vmem:[%s30866_s12 + $0x30] sm:$0xff]   ;;  %v12751_v55 = vld [vmem:[#allocation2 + $0x67] sm:$0xff] }
 0xd30   : > { %v12693_v8 = vmax.f32 %v12661_v13, 0.0  ;;  %v12662_v6 = vadd.f32 %v12630_v38, %v31184_v10  ;;  %v12825_v31 = vld [vmem:[#allocation2 + $0x1c8] sm:$0xff] }
 0xd31   : > { %12743 = vst.msk [vmem:[#allocation2 + $0x208] sm:$0xff] %vm737_vm3, %v12695_v63  ;;  %v12696_v46 = vmax.f32 %v12664_v25, 0.0  ;;  %v12823_v4 = vld [vmem:[#allocation2 + $0x1a8] sm:$0xff] }
 0xd32   : > { %12741 = vst.msk [vmem:[#allocation2 + $0x1e8] sm:$0xff] %vm737_vm3, %v12693_v8  ;;  %v12694_v60 = vmax.f32 %v12662_v6, 0.0  ;;  %v12826_v58 = vld [vmem:[#allocation2 + $0x1d0] sm:$0xff]  ;;  %v12753_v38 = vld [vmem:[#allocation2 + $0x87] sm:$0xff] }
 0xd33   : > { %12744 = vst.msk [vmem:[#allocation2 + $0x210] sm:$0xff] %vm737_vm3, %v12696_v46  ;;  %v12824_v37 = vld [vmem:[#allocation2 + $0x1b0] sm:$0xff]  ;;  %v29328_v9 = vpack.c.bf16 %v12696_v46, %v12695_v63  ;;  %v29335_v42 = vpack.c.bf16 %v12826_v58, %v12825_v31  ;;  %v12755_v40 = vld [vmem:[#allocation2 + $0xa7] sm:$0xff] }
 0xd34   : > { %12742 = vst.msk [vmem:[#allocation2 + $0x1f0] sm:$0xff] %vm737_vm3, %v12694_v60  ;;  %v29331_v56 = vpack.c.bf16 %v12824_v37, %v12823_v4  ;;  %v29333_v11 = vpack.c.bf16 %v12694_v60, %v12693_v8  ;;  %v12752_v47 = vld [vmem:[#allocation2 + $0x6f] sm:$0xff]  ;;  %v12757_v8 = vld [vmem:[#allocation2 + $0xc7] sm:$0xff] }
 0xd35   : > { %31185 = vst [vmem:[#allocation19_spill] sm:$0xff] %v29328_v9  ;;  %v12754_v33 = vld [vmem:[#allocation2 + $0x8f] sm:$0xff]  ;;  %v29363_v13 = vpack.c.bf16 %v12752_v47, %v12751_v55  ;;  %v12759_v46 = vld [vmem:[#allocation2 + $0xe7] sm:$0xff] }
 0xd36   : > { %31186 = vst [vmem:[#allocation17_spill] sm:$0xff] %v29333_v11  ;;  %23623 = vmatmul.mubr.msk.bf16.gmra.mrb[88].mxu1 %vm737_vm3, %v29331_v56  ;;  %v29366_v63 = vpack.c.bf16 %v12754_v33, %v12753_v38  ;;  %v12758_v3 = vld [vmem:[#allocation2 + $0xcf] sm:$0xff]  ;;  %v12761_v58 = vld [vmem:[#allocation2 + $0x107] sm:$0xff] }
 0xd37   : > { %23626 = vmatprep.mubr.msk.bf16.mxu1 %vm737_vm3, %v29335_v42  ;;  %v29374_v24 = vpack.c.bf16 %v12758_v3, %v12757_v8  ;;  %v12760_v10 = vld [vmem:[#allocation2 + $0xef] sm:$0xff]  ;;  %v12767_v2 = vld [vmem:[#allocation2 + $0x167] sm:$0xff] }
 0xd38   : > { %v12762_v6 = vld [vmem:[#allocation2 + $0x10f] sm:$0xff]  ;;  %v29380_v60 = vpack.c.bf16 %v12760_v10, %v12759_v46  ;;  %v12769_v26 = vld [vmem:[#allocation2 + $0x187] sm:$0xff] }
 0xd39   : > { %v12827_v45 = vld [vmem:[#allocation2 + $0x1e8] sm:$0xff]  ;;  %v29382_v4 = vpack.c.bf16 %v12762_v6, %v12761_v58  ;;  %v13293_v8 = vld [vmem:[#allocation2 + $0x11] sm:$0xff] }
 0xd3a   : > { %v12764_v37 = vld [vmem:[#allocation2 + $0x12f] sm:$0xff]  ;;  %v12771_v55 = vld [vmem:[#allocation2 + $0x1a7] sm:$0xff] }
 0xd3b   : > { %v12828_v59 = vld [vmem:[#allocation2 + $0x1f0] sm:$0xff]  ;;  %v29388_v0 = vpack.c.bf16 %v12764_v37, %v12763_v23  ;;  %v12775_v6 = vld [vmem:[#allocation2 + $0x1e7] sm:$0xff] }
 0xd3c   : > { %v29341_v27 = vpack.c.bf16 %v12828_v59, %v12827_v45  ;;  %v12766_v31 = vld [vmem:[#allocation2 + $0x14f] sm:$0xff]  ;;  %v12765_v45 = vld [vmem:[#allocation2 + $0x147] sm:$0xff] }
 0xd3d   : > { %v29390_v59 = vpack.c.bf16 %v12766_v31, %v12765_v45  ;;  %v12770_v18 = vld [vmem:[#allocation2 + $0x18f] sm:$0xff] }
 0xd3e   : > { %23627 = vmatmul.mubr.msk.bf16.gmra.mrb[92].mxu1 %vm737_vm3, %v29341_v27  ;;  %v12772_v47 = vld [vmem:[#allocation2 + $0x1af] sm:$0xff] }
 0xd3f   : > { %23634 = vmatprep.mubr.msk.bf16.mxu1 %vm737_vm3, %v12777_v16  ;;  %v12768_v16 = vld [vmem:[#allocation2 + $0x16f] sm:$0xff]  ;;  %v29404_v38 = vpack.c.bf16 %v12772_v47, %v12771_v55 }
 0xd40   : > { %v29396_v34 = vpack.c.bf16 %v12768_v16, %v12767_v2  ;;  %v12774_v33 = vld [vmem:[#allocation2 + $0x1cf] sm:$0xff] }
 0xd41   : > { %v12776_v10 = vld [vmem:[#allocation2 + $0x1ef] sm:$0xff] }
 0xd42   : > { %v29412_v58 = vpack.c.bf16 %v12776_v10, %v12775_v6  ;;  %v13294_v37 = vld [vmem:[#allocation2 + $0x29] sm:$0xff]  ;;  %v13295_v31 = vld [vmem:[#allocation2 + $0x31] sm:$0xff] }
 0xd43   : > { %v13296_v23 = vld [vmem:[#allocation2 + $0x49] sm:$0xff]  ;;  %v13297_v45 = vld [vmem:[#allocation2 + $0x51] sm:$0xff]  ;;  %v29417_v16 = vpack.c.bf16 %v13295_v31, %v13294_v37 }
 0xd44   : > { %v29422_v2 = vpack.c.bf16 %v13297_v45, %v13296_v23  ;;  %v13298_v47 = vld [vmem:[#allocation2 + $0x69] sm:$0xff]  ;;  %v13303_v10 = vld [vmem:[#allocation2 + $0xb1] sm:$0xff] }
 0xd45   : > { %v13300_v55 = vld [vmem:[#allocation2 + $0x89] sm:$0xff]  ;;  %v13307_v45 = vld [vmem:[#allocation2 + $0xf1] sm:$0xff] }
 0xd46   : > { %23635 = vmatmul.mubr.msk.bf16.vlgmr.msra.gmra.mrb[64].mxu1 %vm737_vm3, %v29346_v5  ;;  %v13304_v6 = vld [vmem:[#allocation2 + $0xc9] sm:$0xff] }
 0xd47   : > { %23638 = vmatprep.mubr.msk.bf16.mxu1 %vm737_vm3, %v29351_v30  ;;  %23667 = vmatpush3.bf16.msra.mxu1 %v29182_v53  ;;  %v12756_v53 = vld [vmem:[#allocation2 + $0xaf] sm:$0xff] }
 0xd48   : > { %23668 = vmatprep.subr.bf16.mxu1 %v26098_v19  ;;  %v29372_v25 = vpack.c.bf16 %v12756_v53, %v12755_v40  ;;  %v12773_v53 = vld [vmem:[#allocation2 + $0x1c7] sm:$0xff] }
 0xd49   : > { %v29406_v3 = vpack.c.bf16 %v12774_v33, %v12773_v53  ;;  %v13292_v40 = vld [vmem:[#allocation2 + $0x9] sm:$0xff]  ;;  %v13299_v33 = vld [vmem:[#allocation2 + $0x71] sm:$0xff] }
 0xd4a   : > { %v13324_v46 = vpack.c.bf16 %v13293_v8, %v13292_v40  ;;  %v13301_v53 = vld [vmem:[#allocation2 + $0x91] sm:$0xff]  ;;  %v29432_v40 = vpack.c.bf16 %v13299_v33, %v13298_v47  ;;  %v13306_v23 = vld [vmem:[#allocation2 + $0xe9] sm:$0xff] }
 0xd4b   : > { %23669 = vmatpush3.bf16.msra.mxu1 %v26098_v19  ;;  %v29398_v19 = vpack.c.bf16 %v12770_v18, %v12769_v26  ;;  %v26100_v18 = vld [vmem:[%s30866_s12 + $0x38] sm:$0xff]   ;;  %v26101_v26 = vld [vmem:[%s30866_s12 + $0x40] sm:$0xff]   ;;  %v29434_v8 = vpack.c.bf16 %v13301_v53, %v13300_v55  ;;  %v29448_v33 = vpack.c.bf16 %v13307_v45, %v13306_v23  ;;  %v13310_v53 = vld [vmem:[#allocation2 + $0x129] sm:$0xff] }
 0xd4c   : > { %23702 = vmatprep.subr.bf16.mxu1 %v29361_v12  ;;  %v13309_v47 = vld [vmem:[#allocation2 + $0x111] sm:$0xff]  ;;  %v13314_v23 = vld [vmem:[#allocation2 + $0x169] sm:$0xff] }
 0xd4d   : > { %v13315_v45 = vld [vmem:[#allocation2 + $0x171] sm:$0xff] }
 0xd4e   : > { %23639 = vmatmul.mubr.msk.bf16.gmra.mrb[68].mxu1 %vm737_vm3, %v29363_v13  ;;  %v29464_v9 = vpack.c.bf16 %v13315_v45, %v13314_v23  ;;  %v13322_v23 = vld [vmem:[#allocation2 + $0x1e9] sm:$0xff]  ;;  %v13323_v45 = vld [vmem:[#allocation2 + $0x1f1] sm:$0xff] }
 0xd4f   : > { %23642 = vmatprep.mubr.msk.bf16.mxu1 %vm737_vm3, %v29366_v63 }
 0xd56   : > { %23643 = vmatmul.mubr.msk.bf16.gmra.mrb[72].mxu1 %vm737_vm3, %v29372_v25 }
 0xd57   : > { %23646 = vmatprep.mubr.msk.bf16.mxu1 %vm737_vm3, %v29374_v24 }
 0xd5e   : > { %23647 = vmatmul.mubr.msk.bf16.gmra.mrb[76].mxu1 %vm737_vm3, %v29380_v60 }
 0xd5f   : > { %23650 = vmatprep.mubr.msk.bf16.mxu1 %vm737_vm3, %v29382_v4 }
 0xd66   : > { %23651 = vmatmul.mubr.msk.bf16.gmra.mrb[80].mxu1 %vm737_vm3, %v29388_v0 }
 0xd67   : > { %23654 = vmatprep.mubr.msk.bf16.mxu1 %vm737_vm3, %v29390_v59 }
 0xd6e   : > { %23655 = vmatmul.mubr.msk.bf16.gmra.mrb[84].mxu1 %vm737_vm3, %v29396_v34 }
 0xd6f   : > { %23658 = vmatprep.mubr.msk.bf16.mxu1 %vm737_vm3, %v29398_v19 }
 0xd76   : > { %23659 = vmatmul.mubr.msk.bf16.gmra.mrb[88].mxu1 %vm737_vm3, %v29404_v38 }
 0xd77   : > { %23662 = vmatprep.mubr.msk.bf16.mxu1 %vm737_vm3, %v29406_v3 }
 0xd7e   : > { %23663 = vmatmul.mubr.msk.bf16.gmra.mrb[92].mxu1 %vm737_vm3, %v29412_v58 }
 0xd7f   : > { %23670 = vmatprep.mubr.msk.bf16.mxu1 %vm737_vm3, %v13324_v46  ;;  %v13305_v46 = vld [vmem:[#allocation2 + $0xd1] sm:$0xff] }
 0xd80   : > { %v29442_v31 = vpack.c.bf16 %v13305_v46, %v13304_v6  ;;  %v13313_v6 = vld [vmem:[#allocation2 + $0x151] sm:$0xff] }
 0xd86   : > { %23671 = vmatmul.mubr.msk.bf16.vlgmr.msra.gmra.mrb[64].mxu1 %vm737_vm3, %v29417_v16 }
 0xd87   : > { %23674 = vmatprep.mubr.msk.bf16.mxu1 %vm737_vm3, %v29422_v2  ;;  %23703 = vmatpush3.bf16.msra.mxu1 %v29361_v12  ;;  %v13302_v12 = vld [vmem:[#allocation2 + $0xa9] sm:$0xff] }
 0xd88   : > { %23704 = vmatprep.subr.bf16.mxu1 %v26100_v18  ;;  %v29440_v37 = vpack.c.bf16 %v13303_v10, %v13302_v12  ;;  %v13311_v12 = vld [vmem:[#allocation2 + $0x131] sm:$0xff]  ;;  %v13312_v10 = vld [vmem:[#allocation2 + $0x149] sm:$0xff] }
 0xd89   : > { %v29456_v46 = vpack.c.bf16 %v13311_v12, %v13310_v53  ;;  %v29458_v28 = vpack.c.bf16 %v13313_v6, %v13312_v10  ;;  %v13318_v53 = vld [vmem:[#allocation2 + $0x1a9] sm:$0xff]  ;;  %v13319_v12 = vld [vmem:[#allocation2 + $0x1b1] sm:$0xff] }
 0xd8a   : > { %v13320_v10 = vld [vmem:[#allocation2 + $0x1c9] sm:$0xff]  ;;  %v13321_v6 = vld [vmem:[#allocation2 + $0x1d1] sm:$0xff]  ;;  %v29472_v11 = vpack.c.bf16 %v13319_v12, %v13318_v53 }
 0xd8b   : > { %23705 = vmatpush3.bf16.msra.mxu1 %v26100_v18  ;;  %v13308_v18 = vld [vmem:[#allocation2 + $0x109] sm:$0xff]  ;;  %v29474_v7 = vpack.c.bf16 %v13321_v6, %v13320_v10  ;;  %v26104_v10 = vld [vmem:[%s30866_s12 + $0x58] sm:$0xff]   ;;  %v26105_v6 = vld [vmem:[%s30866_s12 + $0x60] sm:$0xff]  }
 0xd8c   : > { %23738 = vmatprep.subr.bf16.mxu1 %v26101_v26  ;;  %v29450_v55 = vpack.c.bf16 %v13309_v47, %v13308_v18  ;;  %v13316_v18 = vld [vmem:[#allocation2 + $0x189] sm:$0xff]  ;;  %v13317_v47 = vld [vmem:[#allocation2 + $0x191] sm:$0xff] }
 0xd8d   : > { %v29466_v39 = vpack.c.bf16 %v13317_v47, %v13316_v18  ;;  %v29480_v18 = vpack.c.bf16 %v13323_v45, %v13322_v23  ;;  %v26102_v47 = vld [vmem:[%s30866_s12 + $0x48] sm:$0xff]   ;;  %v26103_v53 = vld [vmem:[%s30866_s12 + $0x50] sm:$0xff]  }
 0xd8e   : > { %23675 = vmatmul.mubr.msk.bf16.gmra.mrb[68].mxu1 %vm737_vm3, %v29432_v40  ;;  %v14835_v23 = vld [vmem:[#allocation2 + $0x110] sm:$0xff]  ;;  %v14832_v45 = vld [vmem:[#allocation2 + $0xe8] sm:$0xff] }
 0xd8f   : > { %23678 = vmatprep.mubr.msk.bf16.mxu1 %vm737_vm3, %v29434_v8 }
 0xd96   : > { %23679 = vmatmul.mubr.msk.bf16.gmra.mrb[72].mxu1 %vm737_vm3, %v29440_v37 }
 0xd97   : > { %23682 = vmatprep.mubr.msk.bf16.mxu1 %vm737_vm3, %v29442_v31 }
 0xd9e   : > { %23683 = vmatmul.mubr.msk.bf16.gmra.mrb[76].mxu1 %vm737_vm3, %v29448_v33 }
 0xd9f   : > { %23686 = vmatprep.mubr.msk.bf16.mxu1 %vm737_vm3, %v29450_v55 }
 0xda6   : > { %23687 = vmatmul.mubr.msk.bf16.gmra.mrb[80].mxu1 %vm737_vm3, %v29456_v46 }
 0xda7   : > { %23690 = vmatprep.mubr.msk.bf16.mxu1 %vm737_vm3, %v29458_v28 }
 0xdae   : > { %23691 = vmatmul.mubr.msk.bf16.gmra.mrb[84].mxu1 %vm737_vm3, %v29464_v9 }
 0xdaf   : > { %23694 = vmatprep.mubr.msk.bf16.mxu1 %vm737_vm3, %v29466_v39 }
 0xdb6   : > { %23695 = vmatmul.mubr.msk.bf16.gmra.mrb[88].mxu1 %vm737_vm3, %v29472_v11 }
 0xdb7   : > { %23698 = vmatprep.mubr.msk.bf16.mxu1 %vm737_vm3, %v29474_v7 }
 0xdbe   : > { %23699 = vmatmul.mubr.msk.bf16.gmra.mrb[92].mxu1 %vm737_vm3, %v29480_v18 }
 0xdbf   : > { %23706 = vmatprep.mubr.msk.bf16.mxu1 %vm737_vm3, %v29346_v5  ;;  %v13629_v5 = vld [vmem:[#allocation2 + $0x20f] sm:$0xff] }
 0xdc6   : > { %23707 = vmatmul.mubr.msk.bf16.vlgmr.msra.gmra.mrb[64].mxu1 %vm737_vm3, %v29351_v30 }
 0xdc7   : > { %23710 = vmatprep.mubr.msk.bf16.mxu1 %vm737_vm3, %v29363_v13  ;;  %23739 = vmatpush3.bf16.msra.mxu1 %v26101_v26  ;;  %v13628_v26 = vld [vmem:[#allocation2 + $0x207] sm:$0xff] }
 0xdc8   : > { %23740 = vmatprep.subr.bf16.mxu1 %v26102_v47  ;;  %v29520_v12 = vpack.c.bf16 %v13629_v5, %v13628_v26  ;;  %v14837_v26 = vld [vmem:[#allocation2 + $0x130] sm:$0xff] }
 0xdcb   : > { %23741 = vmatpush3.bf16.msra.mxu1 %v26102_v47 }
 0xdcc   : > { %23774 = vmatprep.subr.bf16.mxu1 %v26103_v53 }
 0xdce   : > { %23711 = vmatmul.mubr.msk.bf16.gmra.mrb[68].mxu1 %vm737_vm3, %v29366_v63 }
 0xdcf   : > { %23714 = vmatprep.mubr.msk.bf16.mxu1 %vm737_vm3, %v29372_v25 }
 0xdd6   : > { %23715 = vmatmul.mubr.msk.bf16.gmra.mrb[72].mxu1 %vm737_vm3, %v29374_v24 }
 0xdd7   : > { %23718 = vmatprep.mubr.msk.bf16.mxu1 %vm737_vm3, %v29380_v60 }
 0xdde   : > { %23719 = vmatmul.mubr.msk.bf16.gmra.mrb[76].mxu1 %vm737_vm3, %v29382_v4 }
 0xddf   : > { %23722 = vmatprep.mubr.msk.bf16.mxu1 %vm737_vm3, %v29388_v0 }
 0xde6   : > { %23723 = vmatmul.mubr.msk.bf16.gmra.mrb[80].mxu1 %vm737_vm3, %v29390_v59 }
 0xde7   : > { %23726 = vmatprep.mubr.msk.bf16.mxu1 %vm737_vm3, %v29396_v34 }
 0xdee   : > { %23727 = vmatmul.mubr.msk.bf16.gmra.mrb[84].mxu1 %vm737_vm3, %v29398_v19 }
 0xdef   : > { %23730 = vmatprep.mubr.msk.bf16.mxu1 %vm737_vm3, %v29404_v38 }
 0xdf6   : > { %23731 = vmatmul.mubr.msk.bf16.gmra.mrb[88].mxu1 %vm737_vm3, %v29406_v3 }
 0xdf7   : > { %23734 = vmatprep.mubr.msk.bf16.mxu1 %vm737_vm3, %v29412_v58 }
 0xdfe   : > { %23735 = vmatmul.mubr.msk.bf16.gmra.mrb[92].mxu1 %vm737_vm3, %v29520_v12 }
 0xdff   : > { %23742 = vmatprep.mubr.msk.bf16.mxu1 %vm737_vm3, %v29159_v29  ;;  %v13935_v29 = vld [vmem:[#allocation2 + $0x210] sm:$0xff] }
 0xe06   : > { %23743 = vmatmul.mubr.msk.bf16.vlgmr.msra.gmra.mrb[64].mxu1 %vm737_vm3, %v29166_v61  ;;  %v13934_v61 = vld [vmem:[#allocation2 + $0x208] sm:$0xff] }
 0xe07   : > { %23746 = vmatprep.mubr.msk.bf16.mxu1 %vm737_vm3, %v29196_v21  ;;  %23775 = vmatpush3.bf16.msra.mxu1 %v26103_v53  ;;  %v29560_v21 = vpack.c.bf16 %v13935_v29, %v13934_v61  ;;  %v14834_v53 = vld [vmem:[#allocation2 + $0x108] sm:$0xff]  ;;  %v14841_v61 = vld [vmem:[#allocation2 + $0x170] sm:$0xff] }
 0xe08   : > { %23776 = vmatprep.subr.bf16.mxu1 %v26104_v10  ;;  %v14860_v5 = vpack.c.bf16 %v14835_v23, %v14834_v53 }
 0xe0b   : > { %23777 = vmatpush3.bf16.msra.mxu1 %v26104_v10 }
 0xe0c   : > { %23810 = vmatprep.subr.bf16.mxu1 %v26105_v6 }
 0xe0e   : > { %23747 = vmatmul.mubr.msk.bf16.gmra.mrb[68].mxu1 %vm737_vm3, %v29201_v36  ;;  %v26106_v36 = vld [vmem:[%s30866_s12 + $0x68] sm:$0xff]  }
 0xe0f   : > { %23750 = vmatprep.mubr.msk.bf16.mxu1 %vm737_vm3, %v29225_v57  ;;  %v26107_v57 = vld [vmem:[%s30866_s12 + $0x70] sm:$0xff]  }
 0xe16   : > { %23751 = vmatmul.mubr.msk.bf16.gmra.mrb[72].mxu1 %vm737_vm3, %v29229_v62  ;;  %v14240_v62 = vld [vmem:[#allocation2 + $0x209] sm:$0xff] }
 0xe17   : > { %23754 = vmatprep.mubr.msk.bf16.mxu1 %vm737_vm3, %v29249_v44  ;;  %v14241_v44 = vld [vmem:[#allocation2 + $0x211] sm:$0xff] }
 0xe1e   : > { %23755 = vmatmul.mubr.msk.bf16.gmra.mrb[76].mxu1 %vm737_vm3, %v29253_v20  ;;  %v29600_v20 = vpack.c.bf16 %v14241_v44, %v14240_v62  ;;  %v14842_v44 = vld [vmem:[#allocation2 + $0x188] sm:$0xff] }
 0xe1f   : > { %23758 = vmatprep.mubr.msk.bf16.mxu1 %vm737_vm3, %v29277_v15  ;;  %v26108_v15 = vld [vmem:[%s30866_s12 + $0x78] sm:$0xff]  }
 0xe26   : > { %23759 = vmatmul.mubr.msk.bf16.gmra.mrb[80].mxu1 %vm737_vm3, %v29281_v50  ;;  %v26109_v50 = vld [vmem:[%s30866_s12 + $0x80] sm:$0xff]  }
 0xe27   : > { %23762 = vmatprep.mubr.msk.bf16.mxu1 %vm737_vm3, %v29305_v1  ;;  %v14546_v1 = vld [vmem:[#allocation2 + $0x227] sm:$0xff] }
 0xe2e   : > { %23763 = vmatmul.mubr.msk.bf16.gmra.mrb[84].mxu1 %vm737_vm3, %v29309_v32  ;;  %v14547_v32 = vld [vmem:[#allocation2 + $0x22f] sm:$0xff] }
 0xe2f   : > { %23766 = vmatprep.mubr.msk.bf16.mxu1 %vm737_vm3, %v29331_v56  ;;  %v14563_v56 = vpack.c.bf16 %v14547_v32, %v14546_v1  ;;  %v14847_v1 = vld [vmem:[#allocation2 + $0x1d0] sm:$0xff]  ;;  %v14844_v32 = vld [vmem:[#allocation2 + $0x1a8] sm:$0xff] }
 0xe36   : > { %23767 = vmatmul.mubr.msk.bf16.gmra.mrb[88].mxu1 %vm737_vm3, %v29335_v42  ;;  %v14823_v42 = vld [vmem:[#allocation2 + $0x50] sm:$0xff] }
 0xe37   : > { %23770 = vmatprep.mubr.msk.bf16.mxu1 %vm737_vm3, %v29341_v27  ;;  %v14822_v27 = vld [vmem:[#allocation2 + $0x48] sm:$0xff] }
 0xe3e   : > { %23771 = vmatmul.mubr.msk.bf16.gmra.mrb[92].mxu1 %vm737_vm3, %v29560_v21 }
 0xe3f   : > { %23778 = vmatprep.mubr.msk.bf16.mxu1 %vm737_vm3, %v29417_v16  ;;  %v14833_v16 = vld [vmem:[#allocation2 + $0xf0] sm:$0xff] }
 0xe40   : > { %v14859_v47 = vpack.c.bf16 %v14833_v16, %v14832_v45 }
 0xe46   : > { %23779 = vmatmul.mubr.msk.bf16.vlgmr.msra.gmra.mrb[64].mxu1 %vm737_vm3, %v29422_v2 }
 0xe47   : > { %23782 = vmatprep.mubr.msk.bf16.mxu1 %vm737_vm3, %v29432_v40  ;;  %23811 = vmatpush3.bf16.msra.mxu1 %v26105_v6  ;;  %v14838_v6 = vld [vmem:[#allocation2 + $0x148] sm:$0xff] }
 0xe48   : > { %23812 = vmatprep.subr.bf16.mxu1 %v26106_v36 }
 0xe4b   : > { %23813 = vmatpush3.bf16.msra.mxu1 %v26106_v36  ;;  %v14843_v36 = vld [vmem:[#allocation2 + $0x190] sm:$0xff] }
 0xe4c   : > { %23846 = vmatprep.subr.bf16.mxu1 %v26107_v57 }
 0xe4e   : > { %23783 = vmatmul.mubr.msk.bf16.gmra.mrb[68].mxu1 %vm737_vm3, %v29434_v8 }
 0xe4f   : > { %23786 = vmatprep.mubr.msk.bf16.mxu1 %vm737_vm3, %v29440_v37 }
 0xe56   : > { %23787 = vmatmul.mubr.msk.bf16.gmra.mrb[72].mxu1 %vm737_vm3, %v29442_v31 }
 0xe57   : > { %23790 = vmatprep.mubr.msk.bf16.mxu1 %vm737_vm3, %v29448_v33 }
 0xe5e   : > { %23791 = vmatmul.mubr.msk.bf16.gmra.mrb[76].mxu1 %vm737_vm3, %v29450_v55 }
 0xe5f   : > { %23794 = vmatprep.mubr.msk.bf16.mxu1 %vm737_vm3, %v29456_v46 }
 0xe66   : > { %23795 = vmatmul.mubr.msk.bf16.gmra.mrb[80].mxu1 %vm737_vm3, %v29458_v28 }
 0xe67   : > { %23798 = vmatprep.mubr.msk.bf16.mxu1 %vm737_vm3, %v29464_v9 }
 0xe6e   : > { %23799 = vmatmul.mubr.msk.bf16.gmra.mrb[84].mxu1 %vm737_vm3, %v29466_v39 }
 0xe6f   : > { %23802 = vmatprep.mubr.msk.bf16.mxu1 %vm737_vm3, %v29472_v11 }
 0xe76   : > { %23803 = vmatmul.mubr.msk.bf16.gmra.mrb[88].mxu1 %vm737_vm3, %v29474_v7 }
 0xe77   : > { %23806 = vmatprep.mubr.msk.bf16.mxu1 %vm737_vm3, %v29480_v18 }
 0xe7e   : > { %23807 = vmatmul.mubr.msk.bf16.gmra.mrb[92].mxu1 %vm737_vm3, %v29600_v20 }
 0xe7f   : > { %23814 = vmatprep.mubr.msk.bf16.mxu1 %vm737_vm3, %v29351_v30  ;;  %v14854_v30 = vpack.c.bf16 %v14823_v42, %v14822_v27  ;;  %v14846_v42 = vld [vmem:[#allocation2 + $0x1c8] sm:$0xff] }
 0xe80   : > { %v14866_v27 = vpack.c.bf16 %v14847_v1, %v14846_v42 }
 0xe86   : > { %23815 = vmatmul.mubr.msk.bf16.vlgmr.msra.gmra.mrb[64].mxu1 %vm737_vm3, %v29363_v13  ;;  %v14825_v13 = vld [vmem:[#allocation2 + $0x70] sm:$0xff] }
 0xe87   : > { %23818 = vmatprep.mubr.msk.bf16.mxu1 %vm737_vm3, %v29366_v63  ;;  %23847 = vmatpush3.bf16.msra.mxu1 %v26107_v57  ;;  %v14827_v63 = vld [vmem:[#allocation2 + $0x90] sm:$0xff]  ;;  %v14840_v57 = vld [vmem:[#allocation2 + $0x168] sm:$0xff] }
 0xe88   : > { %23848 = vmatprep.subr.bf16.mxu1 %v26108_v15  ;;  %v14863_v62 = vpack.c.bf16 %v14841_v61, %v14840_v57 }
 0xe8b   : > { %23849 = vmatpush3.bf16.msra.mxu1 %v26108_v15  ;;  %v14864_v15 = vpack.c.bf16 %v14843_v36, %v14842_v44 }
 0xe8c   : > { %23882 = vmatprep.subr.bf16.mxu1 %v26109_v50 }
 0xe8e   : > { %23819 = vmatmul.mubr.msk.bf16.gmra.mrb[68].mxu1 %vm737_vm3, %v29372_v25  ;;  %v14824_v25 = vld [vmem:[#allocation2 + $0x68] sm:$0xff] }
 0xe8f   : > { %23822 = vmatprep.mubr.msk.bf16.mxu1 %vm737_vm3, %v29374_v24  ;;  %v14855_v24 = vpack.c.bf16 %v14825_v13, %v14824_v25  ;;  %v14848_v13 = vld [vmem:[#allocation2 + $0x1e8] sm:$0xff] }
 0xe90   : > { %v14852_v25 = vld [vmem:[#allocation2 + $0x228] sm:$0xff] }
 0xe96   : > { %23823 = vmatmul.mubr.msk.bf16.gmra.mrb[72].mxu1 %vm737_vm3, %v29380_v60  ;;  %v14826_v60 = vld [vmem:[#allocation2 + $0x88] sm:$0xff] }
 0xe97   : > { %23826 = vmatprep.mubr.msk.bf16.mxu1 %vm737_vm3, %v29382_v4  ;;  %v26110_v4 = vld [vmem:[%s30866_s12 + $0x88] sm:$0xff]  }
 0xe9e   : > { %23827 = vmatmul.mubr.msk.bf16.gmra.mrb[76].mxu1 %vm737_vm3, %v29388_v0  ;;  %v14856_v0 = vpack.c.bf16 %v14827_v63, %v14826_v60 }
 0xe9f   : > { %23830 = vmatprep.mubr.msk.bf16.mxu1 %vm737_vm3, %v29390_v59  ;;  %v14829_v59 = vld [vmem:[#allocation2 + $0xb0] sm:$0xff] }
 0xea6   : > { %23831 = vmatmul.mubr.msk.bf16.gmra.mrb[80].mxu1 %vm737_vm3, %v29396_v34  ;;  %v14831_v34 = vld [vmem:[#allocation2 + $0xd0] sm:$0xff] }
 0xea7   : > { %23834 = vmatprep.mubr.msk.bf16.mxu1 %vm737_vm3, %v29398_v19  ;;  %v14828_v19 = vld [vmem:[#allocation2 + $0xa8] sm:$0xff] }
 0xeae   : > { %23835 = vmatmul.mubr.msk.bf16.gmra.mrb[84].mxu1 %vm737_vm3, %v29404_v38  ;;  %v14857_v38 = vpack.c.bf16 %v14829_v59, %v14828_v19 }
 0xeaf   : > { %23838 = vmatprep.mubr.msk.bf16.mxu1 %vm737_vm3, %v29406_v3  ;;  %v14830_v3 = vld [vmem:[#allocation2 + $0xc8] sm:$0xff] }
 0xeb6   : > { %23839 = vmatmul.mubr.msk.bf16.gmra.mrb[88].mxu1 %vm737_vm3, %v29412_v58  ;;  %v14858_v58 = vpack.c.bf16 %v14831_v34, %v14830_v3 }
 0xeb7   : > { %23842 = vmatprep.mubr.msk.bf16.mxu1 %vm737_vm3, %v29520_v12  ;;  %v14839_v12 = vld [vmem:[#allocation2 + $0x150] sm:$0xff] }
 0xeb8   : > { %v14862_v29 = vpack.c.bf16 %v14839_v12, %v14838_v6 }
 0xebe   : > { %23843 = vmatmul.mubr.msk.bf16.gmra.mrb[92].mxu1 %vm737_vm3, %v14563_v56 }
 0xebf   : > { %23850 = vmatprep.mubr.msk.bf16.mxu1 %vm737_vm3, %v14854_v30  ;;  %v14849_v30 = vld [vmem:[#allocation2 + $0x1f0] sm:$0xff] }
 0xec0   : > { %v14867_v63 = vpack.c.bf16 %v14849_v30, %v14848_v13 }
 0xec6   : > { %23851 = vmatmul.mubr.msk.bf16.vlgmr.msra.gmra.mrb[64].mxu1 %vm737_vm3, %v14855_v24  ;;  %v14853_v24 = vld [vmem:[#allocation2 + $0x230] sm:$0xff] }
 0xec7   : > { %23883 = vmatpush3.bf16.msra.mxu1 %v26109_v50  ;;  %23854 = vmatprep.mubr.msk.bf16.mxu1 %vm737_vm3, %v14856_v0  ;;  %v14845_v50 = vld [vmem:[#allocation2 + $0x1b0] sm:$0xff]  ;;  %v14869_v60 = vpack.c.bf16 %v14853_v24, %v14852_v25 }
 0xec8   : > { %23884 = vmatprep.subr.bf16.mxu1 %v26110_v4  ;;  %v14865_v56 = vpack.c.bf16 %v14845_v50, %v14844_v32 }
 0xecb   : > { %23885 = vmatpush3.bf16.msra.mxu1 %v26110_v4 }
 0xecc   : > { %24411 = vmatprep.subr.bf16.mxu1 %v29259_v49  ;;  %v14836_v49 = vld [vmem:[#allocation2 + $0x128] sm:$0xff] }
 0xecd   : > { %v14861_v10 = vpack.c.bf16 %v14837_v26, %v14836_v49 }
 0xece   : > { %23855 = vmatmul.mubr.msk.bf16.gmra.mrb[68].mxu1 %vm737_vm3, %v14857_v38 }
 0xecf   : > { %23858 = vmatprep.mubr.msk.bf16.mxu1 %vm737_vm3, %v14858_v58 }
 0xed6   : > { %23859 = vmatmul.mubr.msk.bf16.gmra.mrb[72].mxu1 %vm737_vm3, %v14859_v47 }
 0xed7   : > { %23862 = vmatprep.mubr.msk.bf16.mxu1 %vm737_vm3, %v14860_v5 }
 0xede   : > { %23863 = vmatmul.mubr.msk.bf16.gmra.mrb[76].mxu1 %vm737_vm3, %v14861_v10 }
 0xedf   : > { %23866 = vmatprep.mubr.msk.bf16.mxu1 %vm737_vm3, %v14862_v29 }
 0xee6   : > { %23867 = vmatmul.mubr.msk.bf16.gmra.mrb[80].mxu1 %vm737_vm3, %v14863_v62 }
 0xee7   : > { %23870 = vmatprep.mubr.msk.bf16.mxu1 %vm737_vm3, %v14864_v15 }
 0xeee   : > { %23871 = vmatmul.mubr.msk.bf16.gmra.mrb[84].mxu1 %vm737_vm3, %v14865_v56 }
 0xeef   : > { %23874 = vmatprep.mubr.msk.bf16.mxu1 %vm737_vm3, %v14866_v27 }
 0xef6   : > { %23875 = vmatmul.mubr.msk.bf16.gmra.mrb[88].mxu1 %vm737_vm3, %v14867_v63 }
 0xef7   : > { %23878 = vmatprep.mubr.msk.bf16.mxu1 %vm737_vm3, %v29560_v21 }
 0xefe   : > { %23879 = vmatmul.mubr.msk.bf16.gmra.mrb[92].mxu1 %vm737_vm3, %v14869_v60 }
 0xeff   : > { %23886 = vmatprep.mubr.msk.bf16.mxu1 %vm737_vm3, %v29422_v2  ;;  %v29750_v2 = vld [vmem:[%s31192_s4 + $0x30] sm:$0xff] }
 0xf06   : > { %23887 = vmatmul.mubr.msk.bf16.vlgmr.msra.gmra.mrb[64].mxu1 %vm737_vm3, %v29432_v40  ;;  %v29756_v40 = vld [vmem:[%s31192_s4 + $0x48] sm:$0xff] }
 0xf07   : > { %24413 = vmatpush3.bf16.msra.mxu1 %v29135_v43  ;;  %23890 = vmatprep.mubr.msk.bf16.mxu1 %vm737_vm3, %v29434_v8  ;;  %v31188_v43 = vld [vmem:[#allocation17_spill] sm:$0xff] }
 0xf08   : > { %24415 = vmatprep.subr.bf16.mxu1 %v29265_v35  ;;  %v15159_v35 = vld [vmem:[#allocation2 + $0x231] sm:$0xff]  ;;  %v29762_v8 = vld [vmem:[%s31192_s4 + $0x40] sm:$0xff] }
 0xf0b   : > { %24417 = vmatpush3.bf16.msra.mxu1 %v29131_v14  ;;  %v31187_v14 = vld [vmem:[#allocation15_spill] sm:$0xff] }
 0xf0c   : > { %24419 = vmatprep.subr.bf16.mxu1 %v29291_v48 }
 0xf0e   : > { %23891 = vmatmul.mubr.msk.bf16.gmra.mrb[68].mxu1 %vm737_vm3, %v29440_v37  ;;  %v29768_v37 = vld [vmem:[%s31192_s4 + $0x58] sm:$0xff] }
 0xf0f   : > { %24421 = vmatpush3.bf16.msra.mxu1 %v29155_v52  ;;  %23894 = vmatprep.mubr.msk.bf16.mxu1 %vm737_vm3, %v29442_v31  ;;  %v31190_v52 = vld [vmem:[#allocation19_spill] sm:$0xff] }
 0xf10   : > { %24423 = vmatprep.subr.bf16.mxu1 %v29293_v41  ;;  %v29720_v41 = vld [vmem:[%s31192_s4 + $0x18] sm:$0xff]  ;;  %v29774_v31 = vld [vmem:[%s31192_s4 + $0x50] sm:$0xff] }
 0xf13   : > { %24425 = vmatpush3.bf16.msra.mxu1 %v29151_v54  ;;  %v31189_v54 = vld [vmem:[#allocation16_spill] sm:$0xff] }
 0xf14   : > { %24427 = vmatprep.subr.bf16.mxu1 %v29319_v51  ;;  %v29726_v51 = vld [vmem:[%s31192_s4 + $0x10] sm:$0xff] }
 0xf16   : > { %23895 = vmatmul.mubr.msk.bf16.gmra.mrb[72].mxu1 %vm737_vm3, %v29448_v33  ;;  %v29780_v33 = vld [vmem:[%s31192_s4 + $0x68] sm:$0xff] }
 0xf17   : > { %24429 = vmatpush3.bf16.msra.mxu1 %v29192_v17  ;;  %23898 = vmatprep.mubr.msk.bf16.mxu1 %vm737_vm3, %v29450_v55  ;;  %v31191_v17 = vld [vmem:[#allocation18_spill] sm:$0xff]  ;;  %v29786_v55 = vld [vmem:[%s31192_s4 + $0x60] sm:$0xff] }
 0xf18   : > { %24431 = vmatprep.subr.bf16.mxu1 %v29321_v22  ;;  %v29732_v22 = vld [vmem:[%s31192_s4 + $0x28] sm:$0xff] }
 0xf1b   : > { %24433 = vmatpush3.bf16.msra.mxu1 %v31187_v14 }
 0xf1c   : > { %24435 = vmatprep.subr.bf16.mxu1 %v31188_v43 }
 0xf1e   : > { %23899 = vmatmul.mubr.msk.bf16.gmra.mrb[76].mxu1 %vm737_vm3, %v29456_v46  ;;  %v29792_v46 = vld [vmem:[%s31192_s4 + $0x78] sm:$0xff] }
 0xf1f   : > { %24437 = vmatpush3.bf16.msra.mxu1 %v31189_v54  ;;  %23902 = vmatprep.mubr.msk.bf16.mxu1 %vm737_vm3, %v29458_v28  ;;  %v15158_v28 = vld [vmem:[#allocation2 + $0x229] sm:$0xff] }
 0xf20   : > { %24439 = vmatprep.subr.bf16.mxu1 %v31190_v52  ;;  %v15175_v48 = vpack.c.bf16 %v15159_v35, %v15158_v28 }
 0xf23   : > { %24441 = vmatpush3.bf16.msra.mxu1 %v31191_v17 }
 0xf26   : > { %23903 = vmatmul.mubr.msk.bf16.gmra.mrb[80].mxu1 %vm737_vm3, %v29464_v9  ;;  %v29738_v9 = vld [vmem:[%s31192_s4 + $0x20] sm:$0xff] }
 0xf27   : > { %23906 = vmatprep.mubr.msk.bf16.mxu1 %vm737_vm3, %v29466_v39  ;;  %v12698_v39 = vld [vmem:[%s31192_s4 + $0x8] sm:$0xff] }
 0xf28   : > { %15505 = vmatprep.mubr.f32.mxu0 %v12698_v39 }
 0xf2e   : > { %23907 = vmatmul.mubr.msk.bf16.gmra.mrb[84].mxu1 %vm737_vm3, %v29472_v11  ;;  %v29744_v11 = vld [vmem:[%s31192_s4 + $0x38] sm:$0xff] }
 0xf2f   : > { %23910 = vmatprep.mubr.msk.bf16.mxu1 %vm737_vm3, %v29474_v7  ;;  %v29714_v7 = vld [vmem:[%s31192_s4] sm:$0xff] }
 0xf36   : > { %23911 = vmatmul.mubr.msk.bf16.gmra.mrb[88].mxu1 %vm737_vm3, %v29480_v18  ;;  %v29798_v18 = vld [vmem:[%s31192_s4 + $0x70] sm:$0xff] }
 0xf37   : > { %23914 = vmatprep.mubr.msk.bf16.mxu1 %vm737_vm3, %v29600_v20 }
 0xf3e   : > { %23915 = vmatmul.mubr.msk.bf16.gmra.mrb[92].mxu1 %vm737_vm3, %v15175_v48 }
 0xf3f   : > { %16804 = vmatprep.mubr.f32.mxu1 %v12698_v39  ;;  %v31193_v39 = vmov 0.0  }
 0xf40   : > { %817 = vst.msk [vmem:[#allocation3 + $0x20] sm:$0xff] %vm811_vm5, %v31193_v39  ;;  %812 = vst.msk [vmem:[#allocation3] sm:$0xff] %vm811_vm5, %v31193_v39 }
 0xf41   : > { %813 = vst.msk [vmem:[#allocation3 + $0x8] sm:$0xff] %vm811_vm5, %v31193_v39  ;;  %816 = vst.msk [vmem:[#allocation3 + $0x18] sm:$0xff] %vm811_vm5, %v31193_v39 }
 0xf42   : > { %819 = vst.msk [vmem:[#allocation3 + $0x30] sm:$0xff] %vm811_vm5, %v31193_v39  ;;  %820 = vst.msk [vmem:[#allocation3 + $0x38] sm:$0xff] %vm811_vm5, %v31193_v39 }
 0xf43   : > { %822 = vst.msk [vmem:[#allocation3 + $0x48] sm:$0xff] %vm811_vm5, %v31193_v39  ;;  %823 = vst.msk [vmem:[#allocation3 + $0x50] sm:$0xff] %vm811_vm5, %v31193_v39 }
 0xf44   : > { %825 = vst.msk [vmem:[#allocation3 + $0x60] sm:$0xff] %vm811_vm5, %v31193_v39  ;;  %826 = vst.msk [vmem:[#allocation3 + $0x68] sm:$0xff] %vm811_vm5, %v31193_v39 }
 0xf45   : > { %828 = vst.msk [vmem:[#allocation3 + $0x78] sm:$0xff] %vm811_vm5, %v31193_v39  ;;  %829 = vst.msk [vmem:[#allocation3 + $0x80] sm:$0xff] %vm811_vm5, %v31193_v39 }
 0xf46   : > { %16805 = vmatmul.mubr.f32.vlgmr.msra.gmra.mrb[96].mxu1 %v29714_v7  ;;  %831 = vst.msk [vmem:[#allocation3 + $0x90] sm:$0xff] %vm811_vm5, %v31193_v39  ;;  %832 = vst.msk [vmem:[#allocation3 + $0x98] sm:$0xff] %vm811_vm5, %v31193_v39 }
 0xf47   : > { %16809 = vmatprep.mubr.f32.mxu1 %v29720_v41  ;;  %834 = vst.msk [vmem:[#allocation3 + $0xa8] sm:$0xff] %vm811_vm5, %v31193_v39  ;;  %835 = vst.msk [vmem:[#allocation3 + $0xb0] sm:$0xff] %vm811_vm5, %v31193_v39 }
 0xf48   : > { %837 = vst.msk [vmem:[#allocation3 + $0xc0] sm:$0xff] %vm811_vm5, %v31193_v39  ;;  %838 = vst.msk [vmem:[#allocation3 + $0xc8] sm:$0xff] %vm811_vm5, %v31193_v39 }
 0xf49   : > { %840 = vst.msk [vmem:[#allocation3 + $0xd8] sm:$0xff] %vm811_vm5, %v31193_v39  ;;  %841 = vst.msk [vmem:[#allocation3 + $0xe0] sm:$0xff] %vm811_vm5, %v31193_v39 }
 0xf4a   : > { %16810 = vmatmul.mubr.f32.gmra.mrb[98].mxu1 %v29726_v51  ;;  %815 = vst.msk [vmem:[#allocation3 + $0x10] sm:$0x1] %vm814_vm6, %v31193_v39  ;;  %818 = vst.msk [vmem:[#allocation3 + $0x28] sm:$0x1] %vm814_vm6, %v31193_v39 }
 0xf4b   : > { %16814 = vmatprep.mubr.f32.mxu1 %v29732_v22  ;;  %821 = vst.msk [vmem:[#allocation3 + $0x40] sm:$0x1] %vm814_vm6, %v31193_v39  ;;  %824 = vst.msk [vmem:[#allocation3 + $0x58] sm:$0x1] %vm814_vm6, %v31193_v39 }
 0xf4c   : > { %827 = vst.msk [vmem:[#allocation3 + $0x70] sm:$0x1] %vm814_vm6, %v31193_v39  ;;  %830 = vst.msk [vmem:[#allocation3 + $0x88] sm:$0x1] %vm814_vm6, %v31193_v39 }
 0xf4d   : > { %833 = vst.msk [vmem:[#allocation3 + $0xa0] sm:$0x1] %vm814_vm6, %v31193_v39  ;;  %836 = vst.msk [vmem:[#allocation3 + $0xb8] sm:$0x1] %vm814_vm6, %v31193_v39 }
 0xf4e   : > { %16815 = vmatmul.mubr.f32.gmra.mrb[100].mxu1 %v29738_v9  ;;  %839 = vst.msk [vmem:[#allocation3 + $0xd0] sm:$0x1] %vm814_vm6, %v31193_v39  ;;  %842 = vst.msk [vmem:[#allocation3 + $0xe8] sm:$0x1] %vm814_vm6, %v31193_v39 }
 0xf4f   : > { %16819 = vmatprep.mubr.f32.mxu1 %v29744_v11 }
 0xf52   : > { %16820 = vmatmul.mubr.f32.gmra.mrb[102].mxu1 %v29750_v2 }
 0xf53   : > { %16824 = vmatprep.mubr.f32.mxu1 %v29756_v40 }
 0xf56   : > { %16825 = vmatmul.mubr.f32.gmra.mrb[104].mxu1 %v29762_v8 }
 0xf57   : > { %16829 = vmatprep.mubr.f32.mxu1 %v29768_v37 }
 0xf5a   : > { %16830 = vmatmul.mubr.f32.gmra.mrb[106].mxu1 %v29774_v31 }
 0xf5b   : > { %16834 = vmatprep.mubr.f32.mxu1 %v29780_v33 }
 0xf5e   : > { %16835 = vmatmul.mubr.f32.gmra.mrb[108].mxu1 %v29786_v55 }
 0xf5f   : > { %16839 = vmatprep.mubr.f32.mxu1 %v29792_v46 }
 0xf62   : > { %16840 = vmatmul.mubr.f32.gmra.mrb[110].mxu1 %v29798_v18 }
 0xfd9   : > { %v23888_v21 = vpop.f32.mrb[64].mxu1 }
 0xfda   : > { %v15275_v20 = vpop.f32.mrb[65].mxu1 }
 0xfdb   : > { %v23889_v4 = vpop.f32.mrb[66].mxu1 }
 0xfdc   : > { %v24384_v0 = vpack.c.bf16 %v23889_v4, %v23888_v21  ;;  %v15278_v59 = vpop.f32.mrb[67].mxu1 }
 0xfdd   : > { %v24380_v34 = vpack.c.bf16 %v15278_v59, %v15275_v20 }
 0xfe1   : > { %v23892_v19 = vpop.f32.mrb[68].mxu1 }
 0xfe2   : > { %v15291_v38 = vpop.f32.mrb[69].mxu1 }
 0xfe3   : > { %v23893_v3 = vpop.f32.mrb[70].mxu1 }
 0xfe4   : > { %v24392_v58 = vpack.c.bf16 %v23893_v3, %v23892_v19  ;;  %v15294_v16 = vpop.f32.mrb[71].mxu1 }
 0xfe5   : > { %v24388_v23 = vpack.c.bf16 %v15294_v16, %v15291_v38  ;;  %v29891_v38 = vld [vmem:[#allocation3 + $0x8] sm:$0xff] }
 0xfe9   : > { %v23896_v45 = vpop.f32.mrb[72].mxu1 }
 0xfea   : > { %v15307_v47 = vpop.f32.mrb[73].mxu1 }
 0xfeb   : > { %v23897_v53 = vpop.f32.mrb[74].mxu1 }
 0xfec   : > { %v24400_v5 = vpack.c.bf16 %v23897_v53, %v23896_v45  ;;  %v15310_v26 = vpop.f32.mrb[75].mxu1 }
 0xfed   : > { %v24396_v12 = vpack.c.bf16 %v15310_v26, %v15307_v47 }
 0xff1   : > { %v23900_v49 = vpop.f32.mrb[76].mxu1 }
 0xff2   : > { %v15323_v10 = vpop.f32.mrb[77].mxu1 }
 0xff3   : > { %v23901_v6 = vpop.f32.mrb[78].mxu1 }
 0xff4   : > { %v24408_v29 = vpack.c.bf16 %v23901_v6, %v23900_v49  ;;  %v15326_v61 = vpop.f32.mrb[79].mxu1 }
 0xff5   : > { %v24404_v36 = vpack.c.bf16 %v15326_v61, %v15323_v10 }
 0xff9   : > { %v23904_v57 = vpop.f32.mrb[80].mxu1 }
 0xffa   : > { %v15339_v62 = vpop.f32.mrb[81].mxu1 }
 0xffb   : > { %v23905_v44 = vpop.f32.mrb[82].mxu1 }
 0xffc   : > { %v24382_v15 = vpack.c.bf16 %v23905_v44, %v23904_v57  ;;  %v15342_v50 = vpop.f32.mrb[83].mxu1 }
 0xffd   : > { %v24378_v1 = vpack.c.bf16 %v15342_v50, %v15339_v62 }
 0xfff   : > { %24379 = vmatprep.subr.bf16.mxu0 %v24378_v1 }
0x1000   : > { %24381 = vmatpush3.bf16.msra.mxu0 %v24380_v34 }
0x1001   : > { %v23908_v32 = vpop.f32.mrb[84].mxu1  ;;  %24383 = vmatprep.subr.bf16.mxu0 %v24382_v15  ;;  %v26116_v15 = vld [vmem:[%s30870_s16 + $0x8] sm:$0xff]  }
0x1002   : > { %v15355_v56 = vpop.f32.mrb[85].mxu1 }
0x1003   : > { %v23909_v42 = vpop.f32.mrb[86].mxu1 }
0x1004   : > { %v24390_v27 = vpack.c.bf16 %v23909_v42, %v23908_v32  ;;  %v15358_v30 = vpop.f32.mrb[87].mxu1  ;;  %24385 = vmatpush3.bf16.msra.mxu0 %v24384_v0 }
0x1005   : > { %v24386_v13 = vpack.c.bf16 %v15358_v30, %v15355_v56 }
0x1007   : > { %24387 = vmatprep.subr.bf16.mxu0 %v24386_v13  ;;  %v26117_v13 = vld [vmem:[%s30870_s16 + $0x10] sm:$0xff]  }
0x1008   : > { %24389 = vmatpush3.bf16.msra.mxu0 %v24388_v23 }
0x1009   : > { %v23912_v63 = vpop.f32.mrb[88].mxu1  ;;  %24391 = vmatprep.subr.bf16.mxu0 %v24390_v27 }
0x100a   : > { %v15371_v25 = vpop.f32.mrb[89].mxu1 }
0x100b   : > { %v23913_v24 = vpop.f32.mrb[90].mxu1 }
0x100c   : > { %v24398_v60 = vpack.c.bf16 %v23913_v24, %v23912_v63  ;;  %v15374_v14 = vpop.f32.mrb[91].mxu1  ;;  %24393 = vmatpush3.bf16.msra.mxu0 %v24392_v58 }
0x100d   : > { %v24394_v43 = vpack.c.bf16 %v15374_v14, %v15371_v25 }
0x100f   : > { %24395 = vmatprep.subr.bf16.mxu0 %v24394_v43 }
0x1010   : > { %24397 = vmatpush3.bf16.msra.mxu0 %v24396_v12 }
0x1011   : > { %v23916_v54 = vpop.f32.mrb[92].mxu1  ;;  %24399 = vmatprep.subr.bf16.mxu0 %v24398_v60 }
0x1012   : > { %v15387_v52 = vpop.f32.mrb[93].mxu1 }
0x1013   : > { %v23917_v17 = vpop.f32.mrb[94].mxu1 }
0x1014   : > { %v24406_v28 = vpack.c.bf16 %v23917_v17, %v23916_v54  ;;  %v15390_v35 = vpop.f32.mrb[95].mxu1  ;;  %24401 = vmatpush3.bf16.msra.mxu0 %v24400_v5 }
0x1015   : > { %v24402_v48 = vpack.c.bf16 %v15390_v35, %v15387_v52 }
0x1017   : > { %24403 = vmatprep.subr.bf16.mxu0 %v24402_v48  ;;  %v26118_v48 = vld [vmem:[%s30870_s16 + $0x18] sm:$0xff]  }
0x1018   : > { %24405 = vmatpush3.bf16.msra.mxu0 %v24404_v36 }
0x1019   : > { %24407 = vmatprep.subr.bf16.mxu0 %v24406_v28  ;;  %v22116_v1 = vpop.f32.mrb[96].mxu1 }
0x101a   : > { %v22117_v42 = vpop.f32.mrb[97].mxu1 }
0x101b   : > { %v29922_v60 = vadd.f32 %v22117_v42, %v22116_v1  ;;  %v26122_v42 = vld [vmem:[%s30870_s16 + $0x58] sm:$0xff]  }
0x101c   : > { %24409 = vmatpush3.bf16.msra.mxu0 %v24408_v29 }
0x101d   : > { %v22119_v27 = vpop.f32.mrb[98].mxu1 }
0x101e   : > { %v22120_v25 = vpop.f32.mrb[99].mxu1 }
0x101f   : > { %15506 = vmatmul.mubr.f32.vlgmr.msra.gmra.mrb[128].mxu0 %v29714_v7  ;;  %v26111_v7 = vld [vmem:[%s30870_s16 + $0x20] sm:$0xff]   ;;  %v29924_v14 = vadd.f32 %v22120_v25, %v22119_v27 }
0x1020   : > { %15510 = vmatprep.mubr.f32.mxu0 %v29720_v41  ;;  %23918 = vmatprep.subr.bf16.mxu0 %v26111_v7  ;;  %v26112_v41 = vld [vmem:[%s30870_s16 + $0x28] sm:$0xff]  }
0x1021   : > { %23919 = vmatpush3.bf16.msra.mxu0 %v26111_v7  ;;  %v16845_v28 = vpack.c.bf16 %v29924_v14, %v29922_v60  ;;  %v22122_v7 = vpop.f32.mrb[100].mxu1  ;;  %v26149_v60 = vld [vmem:[%s30872_s18 + $0x20] sm:$0xff]   ;;  %v26150_v14 = vld [vmem:[%s30872_s18 + $0x28] sm:$0xff]  }
0x1022   : > { %23920 = vmatprep.subr.bf16.mxu0 %v26112_v41 }
0x1023   : > { %15511 = vmatmul.mubr.f32.gmra.mrb[130].mxu0 %v29726_v51  ;;  %v26113_v51 = vld [vmem:[%s30870_s16 + $0x30] sm:$0xff]  }
0x1024   : > { %15515 = vmatprep.mubr.f32.mxu0 %v29732_v22  ;;  %v26114_v22 = vld [vmem:[%s30870_s16 + $0x38] sm:$0xff]  }
0x1025   : > { %23921 = vmatpush3.bf16.msra.mxu0 %v26112_v41 }
0x1026   : > { %23922 = vmatprep.subr.bf16.mxu0 %v26113_v51 }
0x1027   : > { %15516 = vmatmul.mubr.f32.gmra.mrb[132].mxu0 %v29738_v9  ;;  %v26115_v9 = vld [vmem:[%s30870_s16] sm:$0xff]  }
0x1028   : > { %15520 = vmatprep.mubr.f32.mxu0 %v29744_v11 }
0x1029   : > { %23923 = vmatpush3.bf16.msra.mxu0 %v26113_v51  ;;  %v22123_v51 = vpop.f32.mrb[101].mxu1 }
0x102a   : > { %23924 = vmatprep.subr.bf16.mxu0 %v26114_v22 }
0x102b   : > { %15521 = vmatmul.mubr.f32.gmra.mrb[134].mxu0 %v29750_v2  ;;  %v29884_v2 = vld [vmem:[%s30867_s13] ss:$0 sm:$0xff] }
0x102c   : > { %15525 = vmatprep.mubr.f32.mxu0 %v29756_v40 }
0x102d   : > { %23925 = vmatpush3.bf16.msra.mxu0 %v26114_v22  ;;  %v22125_v22 = vpop.f32.mrb[102].mxu1 }
0x102e   : > { %23934 = vmatprep.subr.bf16.mxu0 %v26115_v9 }
0x102f   : > { %15526 = vmatmul.mubr.f32.gmra.mrb[136].mxu0 %v29762_v8 }
0x1030   : > { %15530 = vmatprep.mubr.f32.mxu0 %v29768_v37 }
0x1033   : > { %15531 = vmatmul.mubr.f32.gmra.mrb[138].mxu0 %v29774_v31 }
0x1034   : > { %15535 = vmatprep.mubr.f32.mxu0 %v29780_v33 }
0x1037   : > { %15536 = vmatmul.mubr.f32.gmra.mrb[140].mxu0 %v29786_v55 }
0x1038   : > { %15540 = vmatprep.mubr.f32.mxu0 %v29792_v46 }
0x103b   : > { %15541 = vmatmul.mubr.f32.gmra.mrb[142].mxu0 %v29798_v18 }
0x10f2   : > { %v21988_v11 = vpop.f32.mrb[128].mxu0 }
0x10f3   : > { %v21989_v40 = vpop.f32.mrb[129].mxu0 }
0x10f4   : > { %v21990_v8 = vadd.f32 %v21989_v40, %v21988_v11  ;;  %v22126_v11 = vpop.f32.mrb[103].mxu1  ;;  %v29947_v40 = vadd.f32 %v22123_v51, %v22122_v7 }
0x10f6   : > { %v15508_v37 = vadd.f32 %v21990_v8, %v29884_v2  ;;  %v21991_v31 = vpop.f32.mrb[130].mxu0  ;;  %v29949_v8 = vadd.f32 %v22126_v11, %v22125_v22  ;;  %v26126_v22 = vld [vmem:[%s30870_s16 + $0x78] sm:$0xff]   ;;  %v26127_v11 = vld [vmem:[%s30870_s16 + $0x80] sm:$0xff]  }
0x10f7   : > { %v21992_v33 = vpop.f32.mrb[131].mxu0 }
0x10f8   : > { %v15546_v55 = vmax.f32 %v15508_v37, 0.0  ;;  %v21993_v46 = vadd.f32 %v21992_v33, %v21991_v31 }
0x10fa   : > { %15555 = vst.msk [vmem:[#allocation3 + $0x20] sm:$0xff] %vm811_vm5, %v15546_v55  ;;  %v15513_v18 = vadd.f32 %v21993_v46, %v29884_v2  ;;  %v21994_v21 = vpop.f32.mrb[132].mxu0  ;;  %v16846_v55 = vpack.c.bf16 %v29949_v8, %v29947_v40  ;;  %v26152_v40 = vld [vmem:[%s30872_s18 + $0x38] sm:$0xff]   ;;  %v30218_v8 = vld [vmem:[%s30872_s18] sm:$0xff]  }
0x10fb   : > { %v21995_v20 = vpop.f32.mrb[133].mxu0 }
0x10fc   : > { %v15547_v4 = vmax.f32 %v15513_v18, 0.0  ;;  %v21996_v0 = vadd.f32 %v21995_v20, %v21994_v21  ;;  %v22128_v21 = vpop.f32.mrb[104].mxu1 }
0x10fd   : > { %v22129_v20 = vpop.f32.mrb[105].mxu1 }
0x10fe   : > { %15556 = vst.msk [vmem:[#allocation3 + $0x38] sm:$0xff] %vm811_vm5, %v15547_v4  ;;  %v15518_v59 = vadd.f32 %v21996_v0, %v29884_v2  ;;  %v21997_v34 = vpop.f32.mrb[134].mxu0  ;;  %v29970_v4 = vadd.f32 %v22129_v20, %v22128_v21  ;;  %v22131_v0 = vpop.f32.mrb[106].mxu1  ;;  %v26128_v21 = vld [vmem:[%s30870_s16 + $0x88] sm:$0xff]   ;;  %v26129_v20 = vld [vmem:[%s30870_s16 + $0x90] sm:$0xff]  }
0x10ff   : > { %v21998_v19 = vpop.f32.mrb[135].mxu0 }
0x1100   : > { %v15548_v3 = vmax.f32 %v15518_v59, 0.0  ;;  %v21999_v58 = vadd.f32 %v21998_v19, %v21997_v34  ;;  %v22132_v59 = vpop.f32.mrb[107].mxu1 }
0x1101   : > { %v29893_v16 = vld [vmem:[#allocation3 + $0x20] sm:$0xff]  ;;  %v29974_v19 = vadd.f32 %v22132_v59, %v22131_v0 }
0x1102   : > { %15557 = vst.msk [vmem:[#allocation3 + $0x50] sm:$0xff] %vm811_vm5, %v15548_v3  ;;  %v15523_v23 = vadd.f32 %v21999_v58, %v29884_v2  ;;  %v22000_v45 = vpop.f32.mrb[136].mxu0  ;;  %v15591_v47 = vpack.c.bf16 %v29893_v16, %v29891_v38  ;;  %v29953_v37 = vld [vmem:[#allocation3 + $0x1f] sm:$0xff]  ;;  %v22134_v3 = vpop.f32.mrb[108].mxu1 }
0x1103   : > { %v22001_v53 = vpop.f32.mrb[137].mxu0 }
0x1104   : > { %v15549_v5 = vmax.f32 %v15523_v23, 0.0  ;;  %v22002_v26 = vadd.f32 %v22001_v53, %v22000_v45  ;;  %23926 = vmatprep.mubr.msk.bf16.mxu0 %vm811_vm5, %v15591_v47  ;;  %v16847_v45 = vpack.c.bf16 %v29974_v19, %v29970_v4  ;;  %v26120_v53 = vld [vmem:[%s30870_s16 + $0x48] sm:$0xff]  }
0x1105   : > { %v29902_v61 = vld [vmem:[#allocation3 + $0x38] sm:$0xff] }
0x1106   : > { %15558 = vst.msk [vmem:[#allocation3 + $0x68] sm:$0xff] %vm811_vm5, %v15549_v5  ;;  %v15528_v12 = vadd.f32 %v22002_v26, %v29884_v2  ;;  %v22003_v49 = vpop.f32.mrb[138].mxu0  ;;  %v15565_v23 = vld [vmem:[#allocation3 + $0x37] sm:$0xff] }
0x1107   : > { %v22004_v10 = vpop.f32.mrb[139].mxu0  ;;  %v30023_v25 = vld [vmem:[#allocation3 + $0x39] sm:$0xff] }
0x1108   : > { %v15550_v6 = vmax.f32 %v15528_v12, 0.0  ;;  %v22005_v29 = vadd.f32 %v22004_v10, %v22003_v49  ;;  %v22135_v12 = vpop.f32.mrb[109].mxu1 }
0x1109   : > { %v29904_v36 = vld [vmem:[#allocation3 + $0x50] sm:$0xff]  ;;  %v29993_v49 = vadd.f32 %v22135_v12, %v22134_v3  ;;  %v22137_v10 = vpop.f32.mrb[110].mxu1  ;;  %v16074_v3 = vpack.c.bf16 %v29902_v61, %v29893_v16  ;;  %v26136_v12 = vld [vmem:[%s30870_s16 + $0xc8] sm:$0xff]  }
0x110a   : > { %15559 = vst.msk [vmem:[#allocation3 + $0x80] sm:$0xff] %vm811_vm5, %v15550_v6  ;;  %v15533_v57 = vadd.f32 %v22005_v29, %v29884_v2  ;;  %v22006_v62 = vpop.f32.mrb[140].mxu0  ;;  %v29910_v44 = vpack.c.bf16 %v29904_v36, %v29902_v61  ;;  %v29972_v34 = vld [vmem:[#allocation3 + $0x4f] sm:$0xff]  ;;  %v22138_v29 = vpop.f32.mrb[111].mxu1 }
0x110b   : > { %v22007_v50 = vpop.f32.mrb[141].mxu0  ;;  %v29981_v47 = vpack.c.bf16 %v29972_v34, %v15565_v23  ;;  %v26121_v6 = vld [vmem:[%s30870_s16 + $0x50] sm:$0xff]  }
0x110c   : > { %v15551_v32 = vmax.f32 %v15533_v57, 0.0  ;;  %v22008_v56 = vadd.f32 %v22007_v50, %v22006_v62  ;;  %23927 = vmatmul.mubr.msk.bf16.vlgmr.msra.gmra.mrb[144].mxu0 %vm811_vm5, %v29910_v44  ;;  %v29998_v62 = vadd.f32 %v22138_v29, %v22137_v10  ;;  %v30002_v50 = vld [vmem:[#allocation3 + $0x21] sm:$0xff]  ;;  %v26133_v61 = vld [vmem:[%s30870_s16 + $0xb0] sm:$0xff]  }
0x110d   : > { %23935 = vmatpush3.bf16.msra.mxu0 %v26115_v9  ;;  %v29926_v52 = vld [vmem:[#allocation3 + $0x68] sm:$0xff]  ;;  %v26119_v9 = vld [vmem:[%s30870_s16 + $0x40] sm:$0xff]  }
0x110e   : > { %15560 = vst.msk [vmem:[#allocation3 + $0x98] sm:$0xff] %vm811_vm5, %v15551_v32  ;;  %v15538_v30 = vadd.f32 %v22008_v56, %v29884_v2  ;;  %23936 = vmatprep.subr.bf16.mxu0 %v26116_v15  ;;  %v22009_v63 = vpop.f32.mrb[142].mxu0  ;;  %v15567_v5 = vld [vmem:[#allocation3 + $0x67] sm:$0xff]  ;;  %v16848_v32 = vpack.c.bf16 %v29998_v62, %v29993_v49 }
0x110f   : > { %v22010_v24 = vpop.f32.mrb[143].mxu0 }
0x1110   : > { %v15552_v43 = vmax.f32 %v15538_v30, 0.0  ;;  %v22011_v54 = vadd.f32 %v22010_v24, %v22009_v63  ;;  %v26123_v30 = vld [vmem:[%s30870_s16 + $0x60] sm:$0xff]  }
0x1111   : > { %23937 = vmatpush3.bf16.msra.mxu0 %v26116_v15  ;;  %v29928_v17 = vld [vmem:[#allocation3 + $0x80] sm:$0xff]  ;;  %v30000_v15 = vld [vmem:[#allocation3 + $0x9] sm:$0xff] }
0x1112   : > { %15561 = vst.msk [vmem:[#allocation3 + $0xb0] sm:$0xff] %vm811_vm5, %v15552_v43  ;;  %v29935_v35 = vpack.c.bf16 %v29928_v17, %v29926_v52  ;;  %23938 = vmatprep.subr.bf16.mxu0 %v26117_v13  ;;  %v15543_v39 = vadd.f32 %v22011_v54, %v29884_v2  ;;  %v29951_v2 = vld [vmem:[#allocation3 + $0x7] sm:$0xff]  ;;  %v29976_v58 = vld [vmem:[#allocation3 + $0x7f] sm:$0xff]  ;;  %v15814_v27 = vpack.c.bf16 %v30002_v50, %v30000_v15 }
0x1113   : > { %v15571_v18 = vpack.c.bf16 %v29953_v37, %v29951_v2  ;;  %v29987_v26 = vpack.c.bf16 %v29976_v58, %v15567_v5  ;;  %v30021_v63 = vld [vmem:[#allocation3 + $0x81] sm:$0xff]  ;;  %v30029_v43 = vld [vmem:[#allocation3 + $0x69] sm:$0xff] }
0x1114   : > { %23930 = vmatprep.mubr.msk.bf16.mxu0 %vm811_vm5, %v29935_v35  ;;  %v15553_v41 = vmax.f32 %v15543_v39, 0.0  ;;  %v26124_v54 = vld [vmem:[%s30870_s16 + $0x68] sm:$0xff]   ;;  %v26125_v39 = vld [vmem:[%s30870_s16 + $0x70] sm:$0xff]  }
0x1115   : > { %23939 = vmatpush3.bf16.msra.mxu0 %v26117_v13  ;;  %v29955_v31 = vld [vmem:[#allocation3 + $0x98] sm:$0xff] }
0x1116   : > { %23940 = vmatprep.subr.bf16.mxu0 %v26118_v48  ;;  %15562 = vst.msk [vmem:[#allocation3 + $0xc8] sm:$0xff] %vm811_vm5, %v15553_v41  ;;  %v15569_v1 = vld [vmem:[#allocation3 + $0x97] sm:$0xff]  ;;  %v16076_v16 = vpack.c.bf16 %v29955_v31, %v29928_v17  ;;  %v16204_v17 = vpack.c.bf16 %v30023_v25, %v30002_v50 }
0x1117   : > { %v30019_v13 = vld [vmem:[#allocation3 + $0x51] sm:$0xff]  ;;  %v15812_v41 = vld [vmem:[#allocation3 + $0x99] sm:$0xff] }
0x1118   : > { %v30027_v24 = vpack.c.bf16 %v30019_v13, %v30023_v25  ;;  %v16206_v10 = vpack.c.bf16 %v15812_v41, %v30021_v63  ;;  %v26138_v50 = vld [vmem:[%s30870_s16 + $0xd8] sm:$0xff]  }
0x1119   : > { %v29957_v33 = vld [vmem:[#allocation3 + $0xb0] sm:$0xff]  ;;  %23941 = vmatpush3.bf16.msra.mxu0 %v26118_v48  ;;  %v30036_v48 = vpack.c.bf16 %v30021_v63, %v30029_v43  ;;  %v30163_v63 = vld [vmem:[#allocation3 + $0xe0] sm:$0xff] }
0x111a   : > { %v29963_v46 = vpack.c.bf16 %v29957_v33, %v29955_v31  ;;  %23950 = vmatprep.subr.bf16.mxu0 %v26119_v9  ;;  %v15570_v57 = vld [vmem:[#allocation3 + $0xaf] sm:$0xff]  ;;  %v26135_v31 = vld [vmem:[%s30870_s16 + $0xc0] sm:$0xff]  }
0x111b   : > { %v30006_v56 = vpack.c.bf16 %v15570_v57, %v15569_v1  ;;  %v30045_v7 = vld [vmem:[#allocation3 + $0xb1] sm:$0xff] }
0x111c   : > { %23931 = vmatmul.mubr.msk.bf16.gmra.mrb[148].mxu0 %vm811_vm5, %v29963_v46  ;;  %v30048_v51 = vpack.c.bf16 %v30045_v7, %v15812_v41 }
0x111d   : > { %23942 = vmatprep.mubr.msk.bf16.mxu0 %vm811_vm5, %v15571_v18  ;;  %v15945_v18 = vpack.c.bf16 %v15567_v5, %v29972_v34  ;;  %v30070_v0 = vld [vmem:[#allocation3 + $0xc7] sm:$0xff]  ;;  %v26130_v34 = vld [vmem:[%s30870_s16 + $0x98] sm:$0xff]  }
0x111e   : > { %v15947_v59 = vpack.c.bf16 %v30070_v0, %v15570_v57  ;;  %v30095_v5 = vld [vmem:[#allocation3 + $0xc8] sm:$0xff] }
0x111f   : > { %v16203_v29 = vld [vmem:[#allocation3 + $0xc9] sm:$0xff]  ;;  %v16468_v25 = vpack.c.bf16 %v30163_v63, %v30095_v5 }
0x1120   : > { %v16207_v57 = vpack.c.bf16 %v16203_v29, %v30045_v7 }
0x1124   : > { %23943 = vmatmul.mubr.msk.bf16.vlgmr.msra.gmra.mrb[144].mxu0 %vm811_vm5, %v29981_v47 }
0x1125   : > { %23951 = vmatpush3.bf16.msra.mxu0 %v26119_v9  ;;  %23946 = vmatprep.mubr.msk.bf16.mxu0 %vm811_vm5, %v29987_v26  ;;  %v15944_v9 = vpack.c.bf16 %v15565_v23, %v29953_v37  ;;  %v15946_v37 = vpack.c.bf16 %v15569_v1, %v29976_v58  ;;  %v26131_v58 = vld [vmem:[%s30870_s16 + $0xa0] sm:$0xff]   ;;  %v16075_v23 = vpack.c.bf16 %v29926_v52, %v29904_v36  ;;  %v26134_v52 = vld [vmem:[%s30870_s16 + $0xb8] sm:$0xff]  }
0x1126   : > { %23952 = vmatprep.subr.bf16.mxu0 %v26120_v53  ;;  %v16077_v36 = vpack.c.bf16 %v30095_v5, %v29957_v33  ;;  %v16205_v33 = vpack.c.bf16 %v30029_v43, %v30019_v13  ;;  %v26139_v1 = vld [vmem:[%s30870_s16 + $0xe0] sm:$0xff]   ;;  %v26144_v13 = vld [vmem:[%s30870_s16 + $0x108] sm:$0xff]  }
0x1127   : > { %v26148_v43 = vld [vmem:[%s30868_s14 + $0x8] sm:$0xff]  }
0x1129   : > { %23953 = vmatpush3.bf16.msra.mxu0 %v26120_v53  ;;  %v26132_v53 = vld [vmem:[%s30870_s16 + $0xa8] sm:$0xff]  }
0x112a   : > { %23954 = vmatprep.subr.bf16.mxu0 %v26121_v6 }
0x112c   : > { %23947 = vmatmul.mubr.msk.bf16.gmra.mrb[148].mxu0 %vm811_vm5, %v30006_v56 }
0x112d   : > { %23955 = vmatpush3.bf16.msra.mxu0 %v26121_v6  ;;  %23958 = vmatprep.mubr.msk.bf16.mxu0 %vm811_vm5, %v15814_v27  ;;  %v26137_v6 = vld [vmem:[%s30870_s16 + $0xd0] sm:$0xff]   ;;  %v30140_v27 = vld [vmem:[#allocation3 + $0xdf] sm:$0xff] }
0x112e   : > { %23956 = vmatprep.subr.bf16.mxu0 %v26122_v42 }
0x1131   : > { %23957 = vmatpush3.bf16.msra.mxu0 %v26122_v42  ;;  %v26140_v42 = vld [vmem:[%s30870_s16 + $0xe8] sm:$0xff]  }
0x1132   : > { %23966 = vmatprep.subr.bf16.mxu0 %v26123_v30 }
0x1134   : > { %23959 = vmatmul.mubr.msk.bf16.vlgmr.msra.gmra.mrb[144].mxu0 %vm811_vm5, %v30027_v24 }
0x1135   : > { %23962 = vmatprep.mubr.msk.bf16.mxu0 %vm811_vm5, %v30036_v48  ;;  %23967 = vmatpush3.bf16.msra.mxu0 %v26123_v30  ;;  %v16338_v30 = vpack.c.bf16 %v30140_v27, %v30070_v0 }
0x1136   : > { %23968 = vmatprep.subr.bf16.mxu0 %v26124_v54 }
0x1139   : > { %23969 = vmatpush3.bf16.msra.mxu0 %v26124_v54 }
0x113a   : > { %23970 = vmatprep.subr.bf16.mxu0 %v26125_v39 }
0x113c   : > { %23963 = vmatmul.mubr.msk.bf16.gmra.mrb[148].mxu0 %vm811_vm5, %v30048_v51 }
0x113d   : > { %23971 = vmatpush3.bf16.msra.mxu0 %v26125_v39  ;;  %23974 = vmatprep.mubr.msk.bf16.mxu0 %vm811_vm5, %v15944_v9 }
0x113e   : > { %23972 = vmatprep.subr.bf16.mxu0 %v26126_v22 }
0x1141   : > { %23973 = vmatpush3.bf16.msra.mxu0 %v26126_v22 }
0x1142   : > { %23982 = vmatprep.subr.bf16.mxu0 %v26127_v11 }
0x1144   : > { %23975 = vmatmul.mubr.msk.bf16.vlgmr.msra.gmra.mrb[144].mxu0 %vm811_vm5, %v15945_v18 }
0x1145   : > { %23978 = vmatprep.mubr.msk.bf16.mxu0 %vm811_vm5, %v15946_v37  ;;  %23983 = vmatpush3.bf16.msra.mxu0 %v26127_v11 }
0x1146   : > { %23984 = vmatprep.subr.bf16.mxu0 %v26128_v21 }
0x1149   : > { %23985 = vmatpush3.bf16.msra.mxu0 %v26128_v21 }
0x114a   : > { %23986 = vmatprep.subr.bf16.mxu0 %v26129_v20 }
0x114c   : > { %23979 = vmatmul.mubr.msk.bf16.gmra.mrb[148].mxu0 %vm811_vm5, %v15947_v59 }
0x114d   : > { %23987 = vmatpush3.bf16.msra.mxu0 %v26129_v20  ;;  %23990 = vmatprep.mubr.msk.bf16.mxu0 %vm811_vm5, %v16074_v3 }
0x114e   : > { %23988 = vmatprep.subr.bf16.mxu0 %v26130_v34 }
0x1151   : > { %23989 = vmatpush3.bf16.msra.mxu0 %v26130_v34 }
0x1152   : > { %23998 = vmatprep.subr.bf16.mxu0 %v26131_v58 }
0x1154   : > { %23991 = vmatmul.mubr.msk.bf16.vlgmr.msra.gmra.mrb[144].mxu0 %vm811_vm5, %v16075_v23 }
0x1155   : > { %23994 = vmatprep.mubr.msk.bf16.mxu0 %vm811_vm5, %v16076_v16  ;;  %23999 = vmatpush3.bf16.msra.mxu0 %v26131_v58 }
0x1156   : > { %24000 = vmatprep.subr.bf16.mxu0 %v26132_v53 }
0x1159   : > { %24001 = vmatpush3.bf16.msra.mxu0 %v26132_v53 }
0x115a   : > { %24002 = vmatprep.subr.bf16.mxu0 %v26133_v61 }
0x115c   : > { %23995 = vmatmul.mubr.msk.bf16.gmra.mrb[148].mxu0 %vm811_vm5, %v16077_v36 }
0x115d   : > { %24003 = vmatpush3.bf16.msra.mxu0 %v26133_v61  ;;  %24006 = vmatprep.mubr.msk.bf16.mxu0 %vm811_vm5, %v16204_v17 }
0x115e   : > { %24004 = vmatprep.subr.bf16.mxu0 %v26134_v52 }
0x1161   : > { %24005 = vmatpush3.bf16.msra.mxu0 %v26134_v52 }
0x1162   : > { %24014 = vmatprep.subr.bf16.mxu0 %v26135_v31 }
0x1164   : > { %24007 = vmatmul.mubr.msk.bf16.vlgmr.msra.gmra.mrb[144].mxu0 %vm811_vm5, %v16205_v33 }
0x1165   : > { %24010 = vmatprep.mubr.msk.bf16.mxu0 %vm811_vm5, %v16206_v10  ;;  %24015 = vmatpush3.bf16.msra.mxu0 %v26135_v31 }
0x1166   : > { %24016 = vmatprep.subr.bf16.mxu0 %v26136_v12 }
0x1169   : > { %24017 = vmatpush3.bf16.msra.mxu0 %v26136_v12 }
0x116a   : > { %24018 = vmatprep.subr.bf16.mxu0 %v26137_v6 }
0x116c   : > { %24011 = vmatmul.mubr.msk.bf16.gmra.mrb[148].mxu0 %vm811_vm5, %v16207_v57 }
0x116d   : > { %24019 = vmatpush3.bf16.msra.mxu0 %v26137_v6  ;;  %24022 = vmatprep.mubr.msk.bf16.mxu0 %vm811_vm5, %v29981_v47  ;;  %v26141_v47 = vld [vmem:[%s30870_s16 + $0xf0] sm:$0xff]  }
0x116e   : > { %24020 = vmatprep.subr.bf16.mxu0 %v26138_v50 }
0x1171   : > { %24021 = vmatpush3.bf16.msra.mxu0 %v26138_v50 }
0x1172   : > { %24030 = vmatprep.subr.bf16.mxu0 %v26139_v1 }
0x1174   : > { %24023 = vmatmul.mubr.msk.bf16.vlgmr.msra.gmra.mrb[144].mxu0 %vm811_vm5, %v29987_v26  ;;  %v26142_v26 = vld [vmem:[%s30870_s16 + $0xf8] sm:$0xff]  }
0x1175   : > { %24026 = vmatprep.mubr.msk.bf16.mxu0 %vm811_vm5, %v30006_v56  ;;  %24031 = vmatpush3.bf16.msra.mxu0 %v26139_v1  ;;  %v26143_v56 = vld [vmem:[%s30870_s16 + $0x100] sm:$0xff]  }
0x1176   : > { %24032 = vmatprep.subr.bf16.mxu0 %v26140_v42 }
0x1179   : > { %24033 = vmatpush3.bf16.msra.mxu0 %v26140_v42 }
0x117a   : > { %24034 = vmatprep.subr.bf16.mxu0 %v26141_v47 }
0x117c   : > { %24027 = vmatmul.mubr.msk.bf16.gmra.mrb[148].mxu0 %vm811_vm5, %v16338_v30 }
0x117d   : > { %24035 = vmatpush3.bf16.msra.mxu0 %v26141_v47  ;;  %24038 = vmatprep.mubr.msk.bf16.mxu0 %vm811_vm5, %v29910_v44  ;;  %v26145_v44 = vld [vmem:[%s30870_s16 + $0x110] sm:$0xff]  }
0x117e   : > { %24036 = vmatprep.subr.bf16.mxu0 %v26142_v26 }
0x1181   : > { %24037 = vmatpush3.bf16.msra.mxu0 %v26142_v26 }
0x1182   : > { %24046 = vmatprep.subr.bf16.mxu0 %v26143_v56 }
0x1184   : > { %24039 = vmatmul.mubr.msk.bf16.vlgmr.msra.gmra.mrb[144].mxu0 %vm811_vm5, %v29935_v35  ;;  %v26146_v35 = vld [vmem:[%s30870_s16 + $0x118] sm:$0xff]  }
0x1185   : > { %24042 = vmatprep.mubr.msk.bf16.mxu0 %vm811_vm5, %v29963_v46  ;;  %24047 = vmatpush3.bf16.msra.mxu0 %v26143_v56  ;;  %v26147_v46 = vld [vmem:[%s30868_s14] sm:$0xff]  }
0x1186   : > { %24048 = vmatprep.subr.bf16.mxu0 %v26144_v13 }
0x1189   : > { %24049 = vmatpush3.bf16.msra.mxu0 %v26144_v13 }
0x118a   : > { %24050 = vmatprep.subr.bf16.mxu0 %v26145_v44 }
0x118c   : > { %24043 = vmatmul.mubr.msk.bf16.gmra.mrb[148].mxu0 %vm811_vm5, %v16468_v25 }
0x118d   : > { %24051 = vmatpush3.bf16.msra.mxu0 %v26145_v44  ;;  %24054 = vmatprep.mubr.msk.bf16.mxu0 %vm811_vm5, %v30027_v24  ;;  %v30183_v24 = vld [vmem:[#allocation3 + $0xe1] sm:$0xff] }
0x118e   : > { %24052 = vmatprep.subr.bf16.mxu0 %v26146_v35  ;;  %v16598_v54 = vpack.c.bf16 %v30183_v24, %v16203_v29 }
0x1191   : > { %24053 = vmatpush3.bf16.msra.mxu0 %v26146_v35 }
0x1192   : > { %24062 = vmatprep.subr.bf16.mxu0 %v26147_v46 }
0x1194   : > { %24055 = vmatmul.mubr.msk.bf16.vlgmr.msra.gmra.mrb[144].mxu0 %vm811_vm5, %v30036_v48 }
0x1195   : > { %24058 = vmatprep.mubr.msk.bf16.mxu0 %vm811_vm5, %v30048_v51  ;;  %24063 = vmatpush3.bf16.msra.mxu0 %v26147_v46  ;;  %v20737_v51 = vld [vmem:[%s30869_s15] ss:$0 sm:$0xff] }
0x1196   : > { %24064 = vmatprep.subr.bf16.mxu0 %v26148_v43 }
0x1199   : > { %24065 = vmatpush3.bf16.msra.mxu0 %v26148_v43 }
0x119a   : > { %24074 = vmatprep.subr.bf16.mxu0 %v26149_v60 }
0x119c   : > { %24059 = vmatmul.mubr.msk.bf16.gmra.mrb[148].mxu0 %vm811_vm5, %v16598_v54 }
0x119d   : > { %24066 = vmatprep.mubr.msk.bf16.mxu0 %vm737_vm3, %v16845_v28  ;;  %v26151_v28 = vld [vmem:[%s30872_s18 + $0x30] sm:$0xff]  }
0x11a4   : > { %24067 = vmatmul.mubr.msk.bf16.vlgmr.msra.gmra.mrb[152].mxu0 %vm737_vm3, %v16846_v55 }
0x11a5   : > { %24070 = vmatprep.mubr.msk.bf16.mxu0 %vm737_vm3, %v16847_v45  ;;  %24075 = vmatpush3.bf16.msra.mxu0 %v26149_v60 }
0x11a6   : > { %24076 = vmatprep.subr.bf16.mxu0 %v26150_v14 }
0x11a9   : > { %24077 = vmatpush3.bf16.msra.mxu0 %v26150_v14 }
0x11aa   : > { %24078 = vmatprep.subr.bf16.mxu0 %v26151_v28 }
0x11ac   : > { %24071 = vmatmul.mubr.msk.bf16.gmra.mrb[156].mxu0 %vm737_vm3, %v16848_v32  ;;  %v20736_v32 = vld [vmem:[%s30871_s17] ss:$0 sm:$0xff] }
0x11ad   : > { %24079 = vmatpush3.bf16.msra.mxu0 %v26151_v28 }
0x11ae   : > { %24080 = vmatprep.subr.bf16.mxu0 %v26152_v40 }
0x11b1   : > { %24081 = vmatpush3.bf16.msra.mxu0 %v26152_v40 }
0x11b2   : > { %24090 = vmatprep.subr.bf16.mxu0 %v30218_v8 }
0x1267   : > { %v24056_v55 = vpop.f32.mrb[144].mxu0 }
0x1268   : > { %v16678_v4 = vpop.f32.mrb[145].mxu0  ;;  %v16726_v7 = vadd.f32 %v24056_v55, %v20736_v32 }
0x1269   : > { %v24057_v19 = vpop.f32.mrb[146].mxu0  ;;  %v16724_v41 = vadd.f32 %v20736_v32, %v16678_v4 }
0x126a   : > { %v16681_v45 = vpop.f32.mrb[147].mxu0  ;;  %v16727_v22 = vadd.f32 %v24057_v19, %v20736_v32  ;;  %v16734_v18 = vmax.f32 %v16726_v7, 0.0 }
0x126b   : > { %v16725_v9 = vadd.f32 %v20736_v32, %v16681_v45  ;;  %v16732_v20 = vmax.f32 %v16724_v41, 0.0 }
0x126c   : > { %v16735_v34 = vmax.f32 %v16727_v22, 0.0 }
0x126d   : > { %v16733_v53 = vmax.f32 %v16725_v9, 0.0  ;;  %v26156_v9 = vld [vmem:[%s30872_s18 + $0x18] sm:$0xff]  }
0x126f   : > { %v24060_v49 = vpop.f32.mrb[148].mxu0 }
0x1270   : > { %v16694_v62 = vpop.f32.mrb[149].mxu0  ;;  %v16730_v5 = vadd.f32 %v24060_v49, %v20736_v32 }
0x1271   : > { %v24061_v48 = vpop.f32.mrb[150].mxu0  ;;  %v16728_v17 = vadd.f32 %v20736_v32, %v16694_v62 }
0x1272   : > { %v16697_v39 = vpop.f32.mrb[151].mxu0  ;;  %v16731_v12 = vadd.f32 %v24061_v48, %v20736_v32  ;;  %v16738_v50 = vmax.f32 %v16730_v5, 0.0 }
0x1273   : > { %v16729_v6 = vadd.f32 %v20736_v32, %v16697_v39  ;;  %v16736_v47 = vmax.f32 %v16728_v17, 0.0  ;;  %v26155_v32 = vld [vmem:[%s30872_s18 + $0x10] sm:$0xff]   ;;  %v26160_v17 = vld [vmem:[%s30872_s18 + $0x58] sm:$0xff]  }
0x1274   : > { %v16739_v56 = vmax.f32 %v16731_v12, 0.0 }
0x1275   : > { %v16737_v35 = vmax.f32 %v16729_v6, 0.0  ;;  %v26161_v6 = vld [vmem:[%s30872_s18 + $0x60] sm:$0xff]  }
0x1277   : > { %v24068_v11 = vpop.f32.mrb[152].mxu0 }
0x1278   : > { %v16927_v21 = vadd.f32 %v24068_v11, %v20737_v51  ;;  %v16918_v37 = vpop.f32.mrb[153].mxu0 }
0x1279   : > { %v16919_v0 = vadd.f32 %v20737_v51, %v16918_v37  ;;  %v24069_v59 = vpop.f32.mrb[154].mxu0 }
0x127a   : > { %v30227_v3 = vadd.f32 %v16927_v21, %v16734_v18  ;;  %v16930_v58 = vadd.f32 %v24069_v59, %v20737_v51  ;;  %v16921_v23 = vpop.f32.mrb[155].mxu0  ;;  %v26157_v18 = vld [vmem:[%s30872_s18 + $0x40] sm:$0xff]  }
0x127b   : > { %v30229_v16 = vadd.f32 %v16919_v0, %v16732_v20  ;;  %v16922_v61 = vadd.f32 %v20737_v51, %v16921_v23 }
0x127c   : > { %v16959_v36 = vmax.f32 %v30227_v3, 0.0  ;;  %v30232_v52 = vadd.f32 %v16930_v58, %v16735_v34  ;;  %v26159_v58 = vld [vmem:[%s30872_s18 + $0x50] sm:$0xff]  }
0x127d   : > { %v16957_v31 = vmax.f32 %v30229_v16, 0.0  ;;  %v30235_v33 = vadd.f32 %v16922_v61, %v16733_v53 }
0x127e   : > { %16967 = vst.msk [vmem:[#allocation3 + $0x50] sm:$0xff] %vm811_vm5, %v16959_v36  ;;  %v16960_v10 = vmax.f32 %v30232_v52, 0.0 }
0x127f   : > { %16965 = vst.msk [vmem:[#allocation3 + $0x20] sm:$0xff] %vm811_vm5, %v16957_v31  ;;  %v16958_v29 = vmax.f32 %v30235_v33, 0.0  ;;  %v24072_v57 = vpop.f32.mrb[156].mxu0 }
0x1280   : > { %16968 = vst.msk [vmem:[#allocation3 + $0x68] sm:$0xff] %vm811_vm5, %v16960_v10  ;;  %v16943_v1 = vadd.f32 %v24072_v57, %v20737_v51  ;;  %v16934_v42 = vpop.f32.mrb[157].mxu0 }
0x1281   : > { %16966 = vst.msk [vmem:[#allocation3 + $0x38] sm:$0xff] %vm811_vm5, %v16958_v29  ;;  %v16935_v30 = vadd.f32 %v20737_v51, %v16934_v42  ;;  %v24073_v26 = vpop.f32.mrb[158].mxu0 }
0x1282   : > { %v30251_v13 = vadd.f32 %v16943_v1, %v16738_v50  ;;  %v16946_v44 = vadd.f32 %v24073_v26, %v20737_v51  ;;  %v16937_v25 = vpop.f32.mrb[159].mxu0  ;;  %v26163_v26 = vld [vmem:[%s30872_s18 + $0x70] sm:$0xff]  }
0x1283   : > { %v30253_v46 = vadd.f32 %v16935_v30, %v16736_v47  ;;  %v16938_v43 = vadd.f32 %v20737_v51, %v16937_v25  ;;  %v26162_v47 = vld [vmem:[%s30872_s18 + $0x68] sm:$0xff]  }
0x1284   : > { %v16963_v54 = vmax.f32 %v30251_v13, 0.0  ;;  %v30256_v60 = vadd.f32 %v16946_v44, %v16739_v56 }
0x1285   : > { %v16961_v14 = vmax.f32 %v30253_v46, 0.0  ;;  %v30259_v28 = vadd.f32 %v16938_v43, %v16737_v35  ;;  %v30278_v49 = vld [vmem:[#allocation3 + $0x50] sm:$0xff]  ;;  %v26164_v35 = vld [vmem:[%s30872_s18 + $0x78] sm:$0xff]   ;;  %v21018_v46 = vld [vmem:[%s30877_s23] ss:$0 sm:$0xff] }
0x1286   : > { %16971 = vst.msk [vmem:[#allocation3 + $0xb0] sm:$0xff] %vm811_vm5, %v16963_v54  ;;  %v16964_v40 = vmax.f32 %v30256_v60, 0.0  ;;  %v30265_v55 = vld [vmem:[#allocation3 + $0x20] sm:$0xff]  ;;  %v16976_v20 = vld [vmem:[#allocation3 + $0x4f] sm:$0xff] }
0x1287   : > { %16969 = vst.msk [vmem:[#allocation3 + $0x80] sm:$0xff] %vm811_vm5, %v16961_v14  ;;  %v16962_v4 = vmax.f32 %v30259_v28, 0.0  ;;  %v17001_v19 = vpack.c.bf16 %v30265_v55, %v29891_v38  ;;  %v26154_v38 = vld [vmem:[%s30872_s18 + $0x8] sm:$0xff]   ;;  %v30305_v41 = vld [vmem:[#allocation3 + $0x1f] sm:$0xff]  ;;  %v30361_v1 = vld [vmem:[#allocation3 + $0x51] sm:$0xff] }
0x1288   : > { %16972 = vst.msk [vmem:[#allocation3 + $0xc8] sm:$0xff] %vm811_vm5, %v16964_v40  ;;  %v30276_v45 = vld [vmem:[#allocation3 + $0x38] sm:$0xff]  ;;  %v30297_v48 = vld [vmem:[#allocation3 + $0x68] sm:$0xff]  ;;  %v16981_v11 = vpack.c.bf16 %v30305_v41, %v29951_v2 }
0x1289   : > { %16970 = vst.msk [vmem:[#allocation3 + $0x98] sm:$0xff] %vm811_vm5, %v16962_v4  ;;  %24082 = vmatprep.mubr.msk.bf16.mxu0 %vm811_vm5, %v17001_v19  ;;  %v30286_v62 = vpack.c.bf16 %v30278_v49, %v30276_v45  ;;  %v16975_v21 = vld [vmem:[#allocation3 + $0x37] sm:$0xff]  ;;  %v16977_v59 = vld [vmem:[#allocation3 + $0x67] sm:$0xff] }
0x128a   : > { %v30328_v0 = vpack.c.bf16 %v16976_v20, %v16975_v21  ;;  %v26158_v2 = vld [vmem:[%s30872_s18 + $0x48] sm:$0xff]   ;;  %v30357_v57 = vld [vmem:[#allocation3 + $0x39] sm:$0xff]  ;;  %v17354_v43 = vpack.c.bf16 %v16975_v21, %v30305_v41  ;;  %v26167_v41 = vld [vmem:[%s30872_s18 + $0x90] sm:$0xff]  }
0x128b   : > { %24083 = vmatmul.mubr.msk.bf16.vlgmr.msra.gmra.mrb[160].mxu0 %vm811_vm5, %v30286_v62  ;;  %v30342_v53 = vld [vmem:[#allocation3 + $0x21] sm:$0xff]  ;;  %v30367_v42 = vld [vmem:[#allocation3 + $0x69] sm:$0xff]  ;;  %v26168_v21 = vld [vmem:[%s30872_s18 + $0x98] sm:$0xff]  }
0x128c   : > { %24091 = vmatpush3.bf16.msra.mxu0 %v30218_v8  ;;  %v17224_v12 = vpack.c.bf16 %v30342_v53, %v30000_v15  ;;  %v30365_v15 = vpack.c.bf16 %v30361_v1, %v30357_v57  ;;  %v26165_v19 = vld [vmem:[%s30872_s18 + $0x80] sm:$0xff]  }
0x128d   : > { %24092 = vmatprep.subr.bf16.mxu0 %v26154_v38  ;;  %v30309_v22 = vld [vmem:[#allocation3 + $0xb0] sm:$0xff] }
0x128e   : > { %v30299_v39 = vld [vmem:[#allocation3 + $0x80] sm:$0xff]  ;;  %v16980_v61 = vld [vmem:[#allocation3 + $0xaf] sm:$0xff] }
0x128f   : > { %v30303_v7 = vpack.c.bf16 %v30299_v39, %v30297_v48  ;;  %v16978_v37 = vld [vmem:[#allocation3 + $0x7f] sm:$0xff]  ;;  %v30383_v44 = vld [vmem:[#allocation3 + $0xb1] sm:$0xff] }
0x1290   : > { %24093 = vmatpush3.bf16.msra.mxu0 %v26154_v38  ;;  %v30307_v51 = vld [vmem:[#allocation3 + $0x98] sm:$0xff]  ;;  %v30333_v34 = vpack.c.bf16 %v16978_v37, %v16977_v59  ;;  %v30359_v50 = vld [vmem:[#allocation3 + $0x81] sm:$0xff]  ;;  %v17355_v38 = vpack.c.bf16 %v16977_v59, %v16976_v20  ;;  %v17485_v59 = vpack.c.bf16 %v30297_v48, %v30278_v49 }
0x1291   : > { %24086 = vmatprep.mubr.msk.bf16.mxu0 %vm811_vm5, %v30303_v7  ;;  %v30315_v8 = vpack.c.bf16 %v30309_v22, %v30307_v51  ;;  %24094 = vmatprep.subr.bf16.mxu0 %v26155_v32  ;;  %v16979_v23 = vld [vmem:[#allocation3 + $0x97] sm:$0xff]  ;;  %v30374_v30 = vpack.c.bf16 %v30359_v50, %v30367_v42  ;;  %v26169_v20 = vld [vmem:[%s30872_s18 + $0xa0] sm:$0xff]  }
0x1292   : > { %v30344_v5 = vpack.c.bf16 %v16980_v61, %v16979_v23  ;;  %v17222_v56 = vld [vmem:[#allocation3 + $0x99] sm:$0xff] }
0x1293   : > { %24087 = vmatmul.mubr.msk.bf16.gmra.mrb[164].mxu0 %vm811_vm5, %v30315_v8  ;;  %v30386_v25 = vpack.c.bf16 %v30383_v44, %v17222_v56  ;;  %v26172_v48 = vld [vmem:[%s30872_s18 + $0xb8] sm:$0xff]  }
0x1294   : > { %24095 = vmatpush3.bf16.msra.mxu0 %v26155_v32  ;;  %24098 = vmatprep.mubr.msk.bf16.mxu0 %vm811_vm5, %v16981_v11  ;;  %v26166_v32 = vld [vmem:[%s30872_s18 + $0x88] sm:$0xff]  }
0x1295   : > { %24096 = vmatprep.subr.bf16.mxu0 %v26156_v9  ;;  %v30406_v11 = vld [vmem:[#allocation3 + $0xc7] sm:$0xff] }
0x1298   : > { %24097 = vmatpush3.bf16.msra.mxu0 %v26156_v9  ;;  %v17356_v9 = vpack.c.bf16 %v16979_v23, %v16978_v37  ;;  %v17484_v37 = vpack.c.bf16 %v30276_v45, %v30265_v55  ;;  %v17486_v55 = vpack.c.bf16 %v30307_v51, %v30299_v39  ;;  %v26171_v45 = vld [vmem:[%s30872_s18 + $0xb0] sm:$0xff]   ;;  %v17614_v39 = vpack.c.bf16 %v30357_v57, %v30342_v53  ;;  %v26173_v51 = vld [vmem:[%s30872_s18 + $0xc0] sm:$0xff]   ;;  %v26174_v23 = vld [vmem:[%s30872_s18 + $0xc8] sm:$0xff]  }
0x1299   : > { %24106 = vmatprep.subr.bf16.mxu0 %v26157_v18  ;;  %v17616_v53 = vpack.c.bf16 %v17222_v56, %v30359_v50  ;;  %v26177_v57 = vld [vmem:[%s30872_s18 + $0xe0] sm:$0xff]   ;;  %v26178_v50 = vld [vmem:[%s30872_s18 + $0xe8] sm:$0xff]  }
0x129b   : > { %24099 = vmatmul.mubr.msk.bf16.vlgmr.msra.gmra.mrb[160].mxu0 %vm811_vm5, %v30328_v0 }
0x129c   : > { %24102 = vmatprep.mubr.msk.bf16.mxu0 %vm811_vm5, %v30333_v34  ;;  %24107 = vmatpush3.bf16.msra.mxu0 %v26157_v18  ;;  %v17357_v18 = vpack.c.bf16 %v30406_v11, %v16980_v61  ;;  %v26175_v61 = vld [vmem:[%s30872_s18 + $0xd0] sm:$0xff]  }
0x129d   : > { %24108 = vmatprep.subr.bf16.mxu0 %v26158_v2 }
0x12a0   : > { %24109 = vmatpush3.bf16.msra.mxu0 %v26158_v2  ;;  %v26170_v2 = vld [vmem:[%s30872_s18 + $0xa8] sm:$0xff]  }
0x12a1   : > { %24110 = vmatprep.subr.bf16.mxu0 %v26159_v58 }
0x12a3   : > { %24103 = vmatmul.mubr.msk.bf16.gmra.mrb[164].mxu0 %vm811_vm5, %v30344_v5 }
0x12a4   : > { %24111 = vmatpush3.bf16.msra.mxu0 %v26159_v58  ;;  %24114 = vmatprep.mubr.msk.bf16.mxu0 %vm811_vm5, %v17224_v12  ;;  %v17483_v58 = vld [vmem:[#allocation3 + $0xc8] sm:$0xff] }
0x12a5   : > { %24112 = vmatprep.subr.bf16.mxu0 %v26160_v17  ;;  %v17487_v49 = vpack.c.bf16 %v17483_v58, %v30309_v22  ;;  %v17615_v22 = vpack.c.bf16 %v30367_v42, %v30361_v1  ;;  %v17747_v1 = vpack.c.bf16 %v30140_v27, %v30406_v11  ;;  %v26180_v42 = vld [vmem:[%s30872_s18 + $0xf8] sm:$0xff]   ;;  %v26182_v27 = vld [vmem:[%s30872_s18 + $0x108] sm:$0xff]  }
0x12a8   : > { %24113 = vmatpush3.bf16.msra.mxu0 %v26160_v17  ;;  %v17613_v17 = vld [vmem:[#allocation3 + $0xc9] sm:$0xff] }
0x12a9   : > { %24122 = vmatprep.subr.bf16.mxu0 %v26161_v6  ;;  %v17617_v12 = vpack.c.bf16 %v17613_v17, %v30383_v44 }
0x12ab   : > { %24115 = vmatmul.mubr.msk.bf16.vlgmr.msra.gmra.mrb[160].mxu0 %vm811_vm5, %v30365_v15 }
0x12ac   : > { %24118 = vmatprep.mubr.msk.bf16.mxu0 %vm811_vm5, %v30374_v30  ;;  %24123 = vmatpush3.bf16.msra.mxu0 %v26161_v6  ;;  %v26176_v6 = vld [vmem:[%s30872_s18 + $0xd8] sm:$0xff]  }
0x12ad   : > { %24124 = vmatprep.subr.bf16.mxu0 %v26162_v47 }
0x12b0   : > { %24125 = vmatpush3.bf16.msra.mxu0 %v26162_v47  ;;  %v26184_v47 = vld [vmem:[%s30872_s18 + $0x118] sm:$0xff]  }
0x12b1   : > { %24126 = vmatprep.subr.bf16.mxu0 %v26163_v26 }
0x12b3   : > { %24119 = vmatmul.mubr.msk.bf16.gmra.mrb[164].mxu0 %vm811_vm5, %v30386_v25 }
0x12b4   : > { %24127 = vmatpush3.bf16.msra.mxu0 %v26163_v26  ;;  %24130 = vmatprep.mubr.msk.bf16.mxu0 %vm811_vm5, %v17354_v43  ;;  %v20880_v26 = vld [vmem:[%s30873_s19] ss:$0 sm:$0xff] }
0x12b5   : > { %24128 = vmatprep.subr.bf16.mxu0 %v26164_v35 }
0x12b8   : > { %24129 = vmatpush3.bf16.msra.mxu0 %v26164_v35 }
0x12b9   : > { %24138 = vmatprep.subr.bf16.mxu0 %v26165_v19 }
0x12bb   : > { %24131 = vmatmul.mubr.msk.bf16.vlgmr.msra.gmra.mrb[160].mxu0 %vm811_vm5, %v17355_v38 }
0x12bc   : > { %24134 = vmatprep.mubr.msk.bf16.mxu0 %vm811_vm5, %v17356_v9  ;;  %24139 = vmatpush3.bf16.msra.mxu0 %v26165_v19 }
0x12bd   : > { %24140 = vmatprep.subr.bf16.mxu0 %v26166_v32 }
0x12c0   : > { %24141 = vmatpush3.bf16.msra.mxu0 %v26166_v32 }
0x12c1   : > { %24142 = vmatprep.subr.bf16.mxu0 %v26167_v41 }
0x12c3   : > { %24135 = vmatmul.mubr.msk.bf16.gmra.mrb[164].mxu0 %vm811_vm5, %v17357_v18 }
0x12c4   : > { %24143 = vmatpush3.bf16.msra.mxu0 %v26167_v41  ;;  %24146 = vmatprep.mubr.msk.bf16.mxu0 %vm811_vm5, %v17484_v37 }
0x12c5   : > { %24144 = vmatprep.subr.bf16.mxu0 %v26168_v21 }
0x12c8   : > { %24145 = vmatpush3.bf16.msra.mxu0 %v26168_v21 }
0x12c9   : > { %24154 = vmatprep.subr.bf16.mxu0 %v26169_v20 }
0x12cb   : > { %24147 = vmatmul.mubr.msk.bf16.vlgmr.msra.gmra.mrb[160].mxu0 %vm811_vm5, %v17485_v59 }
0x12cc   : > { %24150 = vmatprep.mubr.msk.bf16.mxu0 %vm811_vm5, %v17486_v55  ;;  %24155 = vmatpush3.bf16.msra.mxu0 %v26169_v20 }
0x12cd   : > { %24156 = vmatprep.subr.bf16.mxu0 %v26170_v2 }
0x12d0   : > { %24157 = vmatpush3.bf16.msra.mxu0 %v26170_v2 }
0x12d1   : > { %24158 = vmatprep.subr.bf16.mxu0 %v26171_v45 }
0x12d3   : > { %24151 = vmatmul.mubr.msk.bf16.gmra.mrb[164].mxu0 %vm811_vm5, %v17487_v49  ;;  %v18177_v49 = vld [vmem:[#allocation3 + $0x8] sm:$0xff] }
0x12d4   : > { %24159 = vmatpush3.bf16.msra.mxu0 %v26171_v45  ;;  %24162 = vmatprep.mubr.msk.bf16.mxu0 %vm811_vm5, %v17614_v39 }
0x12d5   : > { %24160 = vmatprep.subr.bf16.mxu0 %v26172_v48 }
0x12d8   : > { %24161 = vmatpush3.bf16.msra.mxu0 %v26172_v48 }
0x12d9   : > { %24170 = vmatprep.subr.bf16.mxu0 %v26173_v51 }
0x12db   : > { %24163 = vmatmul.mubr.msk.bf16.vlgmr.msra.gmra.mrb[160].mxu0 %vm811_vm5, %v17615_v22 }
0x12dc   : > { %24166 = vmatprep.mubr.msk.bf16.mxu0 %vm811_vm5, %v17616_v53  ;;  %24171 = vmatpush3.bf16.msra.mxu0 %v26173_v51 }
0x12dd   : > { %24172 = vmatprep.subr.bf16.mxu0 %v26174_v23 }
0x12e0   : > { %24173 = vmatpush3.bf16.msra.mxu0 %v26174_v23 }
0x12e1   : > { %24174 = vmatprep.subr.bf16.mxu0 %v26175_v61 }
0x12e3   : > { %24167 = vmatmul.mubr.msk.bf16.gmra.mrb[164].mxu0 %vm811_vm5, %v17617_v12 }
0x12e4   : > { %24175 = vmatpush3.bf16.msra.mxu0 %v26175_v61  ;;  %24178 = vmatprep.mubr.msk.bf16.mxu0 %vm811_vm5, %v30328_v0  ;;  %v26179_v0 = vld [vmem:[%s30872_s18 + $0xf0] sm:$0xff]  }
0x12e5   : > { %24176 = vmatprep.subr.bf16.mxu0 %v26176_v6 }
0x12e8   : > { %24177 = vmatpush3.bf16.msra.mxu0 %v26176_v6  ;;  %v26190_v6 = vld [vmem:[%s30874_s20 + $0x8] sm:$0xff]  }
0x12e9   : > { %24186 = vmatprep.subr.bf16.mxu0 %v26177_v57 }
0x12eb   : > { %24179 = vmatmul.mubr.msk.bf16.vlgmr.msra.gmra.mrb[160].mxu0 %vm811_vm5, %v30333_v34  ;;  %v26181_v34 = vld [vmem:[%s30872_s18 + $0x100] sm:$0xff]  }
0x12ec   : > { %24182 = vmatprep.mubr.msk.bf16.mxu0 %vm811_vm5, %v30344_v5  ;;  %24187 = vmatpush3.bf16.msra.mxu0 %v26177_v57  ;;  %v17877_v5 = vpack.c.bf16 %v30163_v63, %v17483_v58  ;;  %v18007_v63 = vpack.c.bf16 %v30183_v24, %v17613_v17  ;;  %v26188_v24 = vld [vmem:[%s30874_s20 + $0x38] sm:$0xff]   ;;  %v26191_v57 = vld [vmem:[%s30874_s20 + $0x10] sm:$0xff]  }
0x12ed   : > { %24188 = vmatprep.subr.bf16.mxu0 %v26178_v50 }
0x12f0   : > { %24189 = vmatpush3.bf16.msra.mxu0 %v26178_v50 }
0x12f1   : > { %24190 = vmatprep.subr.bf16.mxu0 %v26179_v0 }
0x12f3   : > { %24183 = vmatmul.mubr.msk.bf16.gmra.mrb[164].mxu0 %vm811_vm5, %v17747_v1 }
0x12f4   : > { %24191 = vmatpush3.bf16.msra.mxu0 %v26179_v0  ;;  %24194 = vmatprep.mubr.msk.bf16.mxu0 %vm811_vm5, %v30286_v62  ;;  %v26183_v62 = vld [vmem:[%s30872_s18 + $0x110] sm:$0xff]  }
0x12f5   : > { %24192 = vmatprep.subr.bf16.mxu0 %v26180_v42 }
0x12f8   : > { %24193 = vmatpush3.bf16.msra.mxu0 %v26180_v42  ;;  %v18157_v42 = vld [vmem:[#allocation3 + $0x7] sm:$0xff] }
0x12f9   : > { %24202 = vmatprep.subr.bf16.mxu0 %v26181_v34 }
0x12fb   : > { %24195 = vmatmul.mubr.msk.bf16.vlgmr.msra.gmra.mrb[160].mxu0 %vm811_vm5, %v30303_v7  ;;  %v26185_v7 = vld [vmem:[%s30874_s20 + $0x20] sm:$0xff]  }
0x12fc   : > { %24198 = vmatprep.mubr.msk.bf16.mxu0 %vm811_vm5, %v30315_v8  ;;  %24203 = vmatpush3.bf16.msra.mxu0 %v26181_v34  ;;  %v26186_v8 = vld [vmem:[%s30874_s20 + $0x28] sm:$0xff]  }
0x12fd   : > { %24204 = vmatprep.subr.bf16.mxu0 %v26182_v27 }
0x1300   : > { %24205 = vmatpush3.bf16.msra.mxu0 %v26182_v27 }
0x1301   : > { %24206 = vmatprep.subr.bf16.mxu0 %v26183_v62 }
0x1303   : > { %24199 = vmatmul.mubr.msk.bf16.gmra.mrb[164].mxu0 %vm811_vm5, %v17877_v5 }
0x1304   : > { %24207 = vmatpush3.bf16.msra.mxu0 %v26183_v62  ;;  %24210 = vmatprep.mubr.msk.bf16.mxu0 %vm811_vm5, %v30365_v15  ;;  %v26187_v15 = vld [vmem:[%s30874_s20 + $0x30] sm:$0xff]  }
0x1305   : > { %24208 = vmatprep.subr.bf16.mxu0 %v26184_v47 }
0x1308   : > { %24209 = vmatpush3.bf16.msra.mxu0 %v26184_v47  ;;  %v26192_v47 = vld [vmem:[%s30874_s20 + $0x18] sm:$0xff]  }
0x1309   : > { %24218 = vmatprep.subr.bf16.mxu0 %v26185_v7 }
0x130b   : > { %24211 = vmatmul.mubr.msk.bf16.vlgmr.msra.gmra.mrb[160].mxu0 %vm811_vm5, %v30374_v30  ;;  %v26189_v30 = vld [vmem:[%s30874_s20] sm:$0xff]  }
0x130c   : > { %24214 = vmatprep.mubr.msk.bf16.mxu0 %vm811_vm5, %v30386_v25  ;;  %24219 = vmatpush3.bf16.msra.mxu0 %v26185_v7  ;;  %v26221_v7 = vld [vmem:[%s30876_s22] sm:$0xff]  }
0x130d   : > { %24220 = vmatprep.subr.bf16.mxu0 %v26186_v8  ;;  %24362 = vmatprep.subr.bf16.mxu1 %v26221_v7 }
0x130e   : > { %24363 = vmatpush3.bf16.msra.mxu1 %v26221_v7  ;;  %v26204_v7 = vld [vmem:[%s30874_s20 + $0x98] sm:$0xff]  }
0x1310   : > { %24221 = vmatpush3.bf16.msra.mxu0 %v26186_v8  ;;  %v26193_v8 = vld [vmem:[%s30874_s20 + $0x40] sm:$0xff]  }
0x1311   : > { %24222 = vmatprep.subr.bf16.mxu0 %v26187_v15 }
0x1313   : > { %24215 = vmatmul.mubr.msk.bf16.gmra.mrb[164].mxu0 %vm811_vm5, %v18007_v63 }
0x1314   : > { %24223 = vmatpush3.bf16.msra.mxu0 %v26187_v15 }
0x1315   : > { %24224 = vmatprep.subr.bf16.mxu0 %v26188_v24 }
0x1318   : > { %24225 = vmatpush3.bf16.msra.mxu0 %v26188_v24 }
0x1319   : > { %24234 = vmatprep.subr.bf16.mxu0 %v26189_v30 }
0x13de   : > { %v24212_v56 = vpop.f32.mrb[160].mxu0 }
0x13df   : > { %v18135_v44 = vadd.f32 %v24212_v56, %v20880_v26  ;;  %v18087_v25 = vpop.f32.mrb[161].mxu0 }
0x13e0   : > { %v18133_v35 = vadd.f32 %v20880_v26, %v18087_v25  ;;  %v24213_v43 = vpop.f32.mrb[162].mxu0 }
0x13e1   : > { %v18143_v19 = vmax.f32 %v18135_v44, 0.0  ;;  %v18136_v38 = vadd.f32 %v24213_v43, %v20880_v26  ;;  %v18090_v32 = vpop.f32.mrb[163].mxu0  ;;  %v26194_v44 = vld [vmem:[%s30874_s20 + $0x48] sm:$0xff]  }
0x13e2   : > { %v18141_v9 = vmax.f32 %v18133_v35, 0.0  ;;  %v18134_v41 = vadd.f32 %v20880_v26, %v18090_v32  ;;  %v26195_v35 = vld [vmem:[%s30874_s20 + $0x50] sm:$0xff]  }
0x13e3   : > { %18151 = vst.msk [vmem:[#allocation3 + $0x50] sm:$0xff] %vm811_vm5, %v18143_v19  ;;  %v18144_v11 = vmax.f32 %v18136_v38, 0.0  ;;  %v18400_v19 = vld [vmem:[#allocation3 + $0x9] sm:$0xff] }
0x13e4   : > { %18149 = vst.msk [vmem:[#allocation3 + $0x20] sm:$0xff] %vm811_vm5, %v18141_v9  ;;  %v18142_v18 = vmax.f32 %v18134_v41, 0.0  ;;  %v26196_v41 = vld [vmem:[%s30874_s20 + $0x58] sm:$0xff]  }
0x13e5   : > { %18152 = vst.msk [vmem:[#allocation3 + $0x68] sm:$0xff] %vm811_vm5, %v18144_v11 }
0x13e6   : > { %18150 = vst.msk [vmem:[#allocation3 + $0x38] sm:$0xff] %vm811_vm5, %v18142_v18  ;;  %v24216_v21 = vpop.f32.mrb[164].mxu0  ;;  %v26197_v18 = vld [vmem:[%s30874_s20 + $0x60] sm:$0xff]  }
0x13e7   : > { %v18139_v37 = vadd.f32 %v24216_v21, %v20880_v26  ;;  %v18103_v20 = vpop.f32.mrb[165].mxu0 }
0x13e8   : > { %v18137_v59 = vadd.f32 %v20880_v26, %v18103_v20  ;;  %v24217_v2 = vpop.f32.mrb[166].mxu0 }
0x13e9   : > { %v18147_v55 = vmax.f32 %v18139_v37, 0.0  ;;  %v18140_v45 = vadd.f32 %v24217_v2, %v20880_v26  ;;  %v18106_v58 = vpop.f32.mrb[167].mxu0 }
0x13ea   : > { %v18145_v48 = vmax.f32 %v18137_v59, 0.0  ;;  %v18138_v39 = vadd.f32 %v20880_v26, %v18106_v58  ;;  %v30537_v17 = vld [vmem:[#allocation3 + $0x50] sm:$0xff] }
0x13eb   : > { %18155 = vst.msk [vmem:[#allocation3 + $0xb0] sm:$0xff] %vm811_vm5, %v18147_v55  ;;  %v18148_v51 = vmax.f32 %v18140_v45, 0.0  ;;  %v30530_v22 = vld [vmem:[#allocation3 + $0x20] sm:$0xff]  ;;  %v30618_v20 = vld [vmem:[#allocation3 + $0x51] sm:$0xff]  ;;  %v26198_v55 = vld [vmem:[%s30874_s20 + $0x68] sm:$0xff]  }
0x13ec   : > { %18153 = vst.msk [vmem:[#allocation3 + $0x80] sm:$0xff] %vm811_vm5, %v18145_v48  ;;  %v18146_v23 = vmax.f32 %v18138_v39, 0.0  ;;  %v18185_v53 = vpack.c.bf16 %v30530_v22, %v18177_v49  ;;  %v30553_v50 = vld [vmem:[#allocation3 + $0x68] sm:$0xff]  ;;  %v30561_v34 = vld [vmem:[#allocation3 + $0x1f] sm:$0xff]  ;;  %v26199_v58 = vld [vmem:[%s30874_s20 + $0x70] sm:$0xff]  }
0x13ed   : > { %18156 = vst.msk [vmem:[#allocation3 + $0xc8] sm:$0xff] %vm811_vm5, %v18148_v51  ;;  %v30535_v61 = vld [vmem:[#allocation3 + $0x38] sm:$0xff]  ;;  %v18165_v63 = vpack.c.bf16 %v30561_v34, %v18157_v42  ;;  %v18161_v56 = vld [vmem:[#allocation3 + $0x67] sm:$0xff] }
0x13ee   : > { %18154 = vst.msk [vmem:[#allocation3 + $0x98] sm:$0xff] %vm811_vm5, %v18146_v23  ;;  %24226 = vmatprep.mubr.msk.bf16.mxu0 %vm811_vm5, %v18185_v53  ;;  %v30543_v12 = vpack.c.bf16 %v30537_v17, %v30535_v61  ;;  %v18159_v15 = vld [vmem:[#allocation3 + $0x37] sm:$0xff]  ;;  %v30600_v38 = vld [vmem:[#allocation3 + $0x21] sm:$0xff]  ;;  %v30624_v2 = vld [vmem:[#allocation3 + $0x69] sm:$0xff] }
0x13ef   : > { %v18408_v11 = vpack.c.bf16 %v30600_v38, %v18400_v19  ;;  %v30614_v21 = vld [vmem:[#allocation3 + $0x39] sm:$0xff]  ;;  %v18538_v23 = vpack.c.bf16 %v18159_v15, %v30561_v34  ;;  %v26203_v34 = vld [vmem:[%s30874_s20 + $0x90] sm:$0xff]  }
0x13f0   : > { %24227 = vmatmul.mubr.msk.bf16.vlgmr.msra.gmra.mrb[168].mxu0 %vm811_vm5, %v30543_v12  ;;  %v30622_v59 = vpack.c.bf16 %v30618_v20, %v30614_v21  ;;  %v26200_v51 = vld [vmem:[%s30874_s20 + $0x78] sm:$0xff]   ;;  %v26201_v53 = vld [vmem:[%s30874_s20 + $0x80] sm:$0xff]  }
0x13f1   : > { %24235 = vmatpush3.bf16.msra.mxu0 %v26189_v30  ;;  %v18160_v30 = vld [vmem:[#allocation3 + $0x4f] sm:$0xff] }
0x13f2   : > { %24236 = vmatprep.subr.bf16.mxu0 %v26190_v6  ;;  %v30565_v62 = vld [vmem:[#allocation3 + $0xb0] sm:$0xff]  ;;  %v30586_v26 = vpack.c.bf16 %v18160_v30, %v18159_v15  ;;  %v26205_v15 = vld [vmem:[%s30874_s20 + $0xa0] sm:$0xff]  }
0x13f3   : > { %v30555_v0 = vld [vmem:[#allocation3 + $0x80] sm:$0xff]  ;;  %v18164_v32 = vld [vmem:[#allocation3 + $0xaf] sm:$0xff] }
0x13f4   : > { %v30559_v1 = vpack.c.bf16 %v30555_v0, %v30553_v50  ;;  %v18162_v24 = vld [vmem:[#allocation3 + $0x7f] sm:$0xff]  ;;  %v30640_v48 = vld [vmem:[#allocation3 + $0xb1] sm:$0xff]  ;;  %v18797_v19 = vld [vmem:[#allocation3 + $0xc9] sm:$0xff] }
0x13f5   : > { %24237 = vmatpush3.bf16.msra.mxu0 %v26190_v6  ;;  %v30563_v27 = vld [vmem:[#allocation3 + $0x98] sm:$0xff]  ;;  %v30591_v25 = vpack.c.bf16 %v18162_v24, %v18161_v56  ;;  %v30616_v37 = vld [vmem:[#allocation3 + $0x81] sm:$0xff]  ;;  %v18539_v6 = vpack.c.bf16 %v18161_v56, %v18160_v30 }
0x13f6   : > { %24230 = vmatprep.mubr.msk.bf16.mxu0 %vm811_vm5, %v30559_v1  ;;  %v30571_v5 = vpack.c.bf16 %v30565_v62, %v30563_v27  ;;  %24238 = vmatprep.subr.bf16.mxu0 %v26191_v57  ;;  %v18163_v43 = vld [vmem:[#allocation3 + $0x97] sm:$0xff]  ;;  %v30631_v45 = vpack.c.bf16 %v30616_v37, %v30624_v2  ;;  %v26206_v30 = vld [vmem:[%s30874_s20 + $0xa8] sm:$0xff]  }
0x13f7   : > { %v30602_v9 = vpack.c.bf16 %v18164_v32, %v18163_v43  ;;  %v18406_v49 = vld [vmem:[#allocation3 + $0x99] sm:$0xff]  ;;  %v18540_v42 = vpack.c.bf16 %v18163_v43, %v18162_v24  ;;  %v18669_v24 = vpack.c.bf16 %v30553_v50, %v30537_v17  ;;  %v30688_v56 = vld [vmem:[#allocation3 + $0xc8] sm:$0xff]  ;;  %v26211_v43 = vld [vmem:[%s30874_s20 + $0xd0] sm:$0xff]  }
0x13f8   : > { %24231 = vmatmul.mubr.msk.bf16.gmra.mrb[172].mxu0 %vm811_vm5, %v30571_v5  ;;  %v30643_v39 = vpack.c.bf16 %v30640_v48, %v18406_v49  ;;  %v18671_v17 = vpack.c.bf16 %v30688_v56, %v30565_v62  ;;  %v26208_v50 = vld [vmem:[%s30874_s20 + $0xb8] sm:$0xff]   ;;  %v18799_v62 = vpack.c.bf16 %v30624_v2, %v30618_v20  ;;  %v19057_v20 = vld [vmem:[#allocation3 + $0xe0] sm:$0xff] }
0x13f9   : > { %24239 = vmatpush3.bf16.msra.mxu0 %v26191_v57  ;;  %24242 = vmatprep.mubr.msk.bf16.mxu0 %vm811_vm5, %v18165_v63  ;;  %v26202_v57 = vld [vmem:[%s30874_s20 + $0x88] sm:$0xff]   ;;  %v19061_v2 = vpack.c.bf16 %v19057_v20, %v30688_v56 }
0x13fa   : > { %24240 = vmatprep.subr.bf16.mxu0 %v26192_v47 }
0x13fd   : > { %24241 = vmatpush3.bf16.msra.mxu0 %v26192_v47  ;;  %v30663_v47 = vld [vmem:[#allocation3 + $0xc7] sm:$0xff] }
0x13fe   : > { %24250 = vmatprep.subr.bf16.mxu0 %v26193_v8  ;;  %v18541_v63 = vpack.c.bf16 %v30663_v47, %v18164_v32  ;;  %v26212_v32 = vld [vmem:[%s30874_s20 + $0xd8] sm:$0xff]  }
0x1400   : > { %24243 = vmatmul.mubr.msk.bf16.vlgmr.msra.gmra.mrb[168].mxu0 %vm811_vm5, %v30586_v26 }
0x1401   : > { %24246 = vmatprep.mubr.msk.bf16.mxu0 %vm811_vm5, %v30591_v25  ;;  %24251 = vmatpush3.bf16.msra.mxu0 %v26193_v8  ;;  %v18668_v8 = vpack.c.bf16 %v30535_v61, %v30530_v22  ;;  %v18670_v22 = vpack.c.bf16 %v30563_v27, %v30555_v0  ;;  %v26207_v61 = vld [vmem:[%s30874_s20 + $0xb0] sm:$0xff]   ;;  %v18798_v0 = vpack.c.bf16 %v30614_v21, %v30600_v38  ;;  %v26209_v27 = vld [vmem:[%s30874_s20 + $0xc0] sm:$0xff]  }
0x1402   : > { %24252 = vmatprep.subr.bf16.mxu0 %v26194_v44  ;;  %v18801_v38 = vpack.c.bf16 %v18797_v19, %v30640_v48 }
0x1405   : > { %24253 = vmatpush3.bf16.msra.mxu0 %v26194_v44  ;;  %v26210_v44 = vld [vmem:[%s30874_s20 + $0xc8] sm:$0xff]  }
0x1406   : > { %24254 = vmatprep.subr.bf16.mxu0 %v26195_v35 }
0x1408   : > { %24247 = vmatmul.mubr.msk.bf16.gmra.mrb[172].mxu0 %vm811_vm5, %v30602_v9 }
0x1409   : > { %24255 = vmatpush3.bf16.msra.mxu0 %v26195_v35  ;;  %24258 = vmatprep.mubr.msk.bf16.mxu0 %vm811_vm5, %v18408_v11  ;;  %v18800_v35 = vpack.c.bf16 %v18406_v49, %v30616_v37  ;;  %v26214_v11 = vld [vmem:[%s30874_s20 + $0xe8] sm:$0xff]   ;;  %v26216_v37 = vld [vmem:[%s30874_s20 + $0xf8] sm:$0xff]   ;;  %v21017_v49 = vld [vmem:[%s30875_s21] ss:$0 sm:$0xff] }
0x140a   : > { %24256 = vmatprep.subr.bf16.mxu0 %v26196_v41 }
0x140d   : > { %24257 = vmatpush3.bf16.msra.mxu0 %v26196_v41  ;;  %v26213_v41 = vld [vmem:[%s30874_s20 + $0xe0] sm:$0xff]  }
0x140e   : > { %24266 = vmatprep.subr.bf16.mxu0 %v26197_v18 }
0x1410   : > { %24259 = vmatmul.mubr.msk.bf16.vlgmr.msra.gmra.mrb[168].mxu0 %vm811_vm5, %v30622_v59 }
0x1411   : > { %24262 = vmatprep.mubr.msk.bf16.mxu0 %vm811_vm5, %v30631_v45  ;;  %24267 = vmatpush3.bf16.msra.mxu0 %v26197_v18  ;;  %v18927_v18 = vld [vmem:[#allocation3 + $0xdf] sm:$0xff] }
0x1412   : > { %24268 = vmatprep.subr.bf16.mxu0 %v26198_v55  ;;  %v18931_v21 = vpack.c.bf16 %v18927_v18, %v30663_v47 }
0x1415   : > { %24269 = vmatpush3.bf16.msra.mxu0 %v26198_v55  ;;  %v26220_v55 = vld [vmem:[%s30874_s20 + $0x118] sm:$0xff]  }
0x1416   : > { %24270 = vmatprep.subr.bf16.mxu0 %v26199_v58 }
0x1418   : > { %24263 = vmatmul.mubr.msk.bf16.gmra.mrb[172].mxu0 %vm811_vm5, %v30643_v39 }
0x1419   : > { %24271 = vmatpush3.bf16.msra.mxu0 %v26199_v58  ;;  %24274 = vmatprep.mubr.msk.bf16.mxu0 %vm811_vm5, %v18538_v23  ;;  %v26222_v58 = vld [vmem:[%s30876_s22 + $0x8] sm:$0xff]  }
0x141a   : > { %24272 = vmatprep.subr.bf16.mxu0 %v26200_v51  ;;  %24364 = vmatprep.subr.bf16.mxu1 %v26222_v58 }
0x141b   : > { %24365 = vmatpush3.bf16.msra.mxu1 %v26222_v58 }
0x141d   : > { %24273 = vmatpush3.bf16.msra.mxu0 %v26200_v51 }
0x141e   : > { %24282 = vmatprep.subr.bf16.mxu0 %v26201_v53 }
0x1420   : > { %24275 = vmatmul.mubr.msk.bf16.vlgmr.msra.gmra.mrb[168].mxu0 %vm811_vm5, %v18539_v6 }
0x1421   : > { %24278 = vmatprep.mubr.msk.bf16.mxu0 %vm811_vm5, %v18540_v42  ;;  %24283 = vmatpush3.bf16.msra.mxu0 %v26201_v53 }
0x1422   : > { %24284 = vmatprep.subr.bf16.mxu0 %v26202_v57 }
0x1425   : > { %24285 = vmatpush3.bf16.msra.mxu0 %v26202_v57 }
0x1426   : > { %24286 = vmatprep.subr.bf16.mxu0 %v26203_v34 }
0x1428   : > { %24279 = vmatmul.mubr.msk.bf16.gmra.mrb[172].mxu0 %vm811_vm5, %v18541_v63 }
0x1429   : > { %24287 = vmatpush3.bf16.msra.mxu0 %v26203_v34  ;;  %24290 = vmatprep.mubr.msk.bf16.mxu0 %vm811_vm5, %v18668_v8 }
0x142a   : > { %24288 = vmatprep.subr.bf16.mxu0 %v26204_v7 }
0x142d   : > { %24289 = vmatpush3.bf16.msra.mxu0 %v26204_v7 }
0x142e   : > { %24298 = vmatprep.subr.bf16.mxu0 %v26205_v15 }
0x1430   : > { %24291 = vmatmul.mubr.msk.bf16.vlgmr.msra.gmra.mrb[168].mxu0 %vm811_vm5, %v18669_v24 }
0x1431   : > { %24294 = vmatprep.mubr.msk.bf16.mxu0 %vm811_vm5, %v18670_v22  ;;  %24299 = vmatpush3.bf16.msra.mxu0 %v26205_v15 }
0x1432   : > { %24300 = vmatprep.subr.bf16.mxu0 %v26206_v30 }
0x1435   : > { %24301 = vmatpush3.bf16.msra.mxu0 %v26206_v30 }
0x1436   : > { %24302 = vmatprep.subr.bf16.mxu0 %v26207_v61 }
0x1438   : > { %24295 = vmatmul.mubr.msk.bf16.gmra.mrb[172].mxu0 %vm811_vm5, %v18671_v17 }
0x1439   : > { %24303 = vmatpush3.bf16.msra.mxu0 %v26207_v61  ;;  %24306 = vmatprep.mubr.msk.bf16.mxu0 %vm811_vm5, %v18798_v0 }
0x143a   : > { %24304 = vmatprep.subr.bf16.mxu0 %v26208_v50 }
0x143d   : > { %24305 = vmatpush3.bf16.msra.mxu0 %v26208_v50 }
0x143e   : > { %24314 = vmatprep.subr.bf16.mxu0 %v26209_v27 }
0x1440   : > { %24307 = vmatmul.mubr.msk.bf16.vlgmr.msra.gmra.mrb[168].mxu0 %vm811_vm5, %v18799_v62 }
0x1441   : > { %24310 = vmatprep.mubr.msk.bf16.mxu0 %vm811_vm5, %v18800_v35  ;;  %24315 = vmatpush3.bf16.msra.mxu0 %v26209_v27 }
0x1442   : > { %24316 = vmatprep.subr.bf16.mxu0 %v26210_v44 }
0x1445   : > { %24317 = vmatpush3.bf16.msra.mxu0 %v26210_v44 }
0x1446   : > { %24318 = vmatprep.subr.bf16.mxu0 %v26211_v43 }
0x1448   : > { %24311 = vmatmul.mubr.msk.bf16.gmra.mrb[172].mxu0 %vm811_vm5, %v18801_v38 }
0x1449   : > { %24319 = vmatpush3.bf16.msra.mxu0 %v26211_v43  ;;  %24322 = vmatprep.mubr.msk.bf16.mxu0 %vm811_vm5, %v30586_v26  ;;  %v26215_v26 = vld [vmem:[%s30874_s20 + $0xf0] sm:$0xff]  }
0x144a   : > { %24320 = vmatprep.subr.bf16.mxu0 %v26212_v32 }
0x144d   : > { %24321 = vmatpush3.bf16.msra.mxu0 %v26212_v32 }
0x144e   : > { %24330 = vmatprep.subr.bf16.mxu0 %v26213_v41 }
0x1450   : > { %24323 = vmatmul.mubr.msk.bf16.vlgmr.msra.gmra.mrb[168].mxu0 %vm811_vm5, %v30591_v25  ;;  %v26217_v25 = vld [vmem:[%s30874_s20 + $0x100] sm:$0xff]  }
0x1451   : > { %24326 = vmatprep.mubr.msk.bf16.mxu0 %vm811_vm5, %v30602_v9  ;;  %24331 = vmatpush3.bf16.msra.mxu0 %v26213_v41  ;;  %v26218_v9 = vld [vmem:[%s30874_s20 + $0x108] sm:$0xff]  }
0x1452   : > { %24332 = vmatprep.subr.bf16.mxu0 %v26214_v11 }
0x1455   : > { %24333 = vmatpush3.bf16.msra.mxu0 %v26214_v11 }
0x1456   : > { %24334 = vmatprep.subr.bf16.mxu0 %v26215_v26 }
0x1458   : > { %24327 = vmatmul.mubr.msk.bf16.gmra.mrb[172].mxu0 %vm811_vm5, %v18931_v21 }
0x1459   : > { %24335 = vmatpush3.bf16.msra.mxu0 %v26215_v26  ;;  %24338 = vmatprep.mubr.msk.bf16.mxu0 %vm811_vm5, %v30543_v12  ;;  %v26219_v12 = vld [vmem:[%s30874_s20 + $0x110] sm:$0xff]  }
0x145a   : > { %24336 = vmatprep.subr.bf16.mxu0 %v26216_v37 }
0x145d   : > { %24337 = vmatpush3.bf16.msra.mxu0 %v26216_v37 }
0x145e   : > { %24346 = vmatprep.subr.bf16.mxu0 %v26217_v25 }
0x1460   : > { %24339 = vmatmul.mubr.msk.bf16.vlgmr.msra.gmra.mrb[168].mxu0 %vm811_vm5, %v30559_v1  ;;  %v19187_v1 = vld [vmem:[#allocation3 + $0xe1] sm:$0xff] }
0x1461   : > { %24342 = vmatprep.mubr.msk.bf16.mxu0 %vm811_vm5, %v30571_v5  ;;  %24347 = vmatpush3.bf16.msra.mxu0 %v26217_v25  ;;  %v19191_v5 = vpack.c.bf16 %v19187_v1, %v18797_v19 }
0x1462   : > { %24348 = vmatprep.subr.bf16.mxu0 %v26218_v9 }
0x1465   : > { %24349 = vmatpush3.bf16.msra.mxu0 %v26218_v9 }
0x1466   : > { %24350 = vmatprep.subr.bf16.mxu0 %v26219_v12 }
0x1468   : > { %24343 = vmatmul.mubr.msk.bf16.gmra.mrb[172].mxu0 %vm811_vm5, %v19061_v2 }
0x1469   : > { %24351 = vmatpush3.bf16.msra.mxu0 %v26219_v12  ;;  %24354 = vmatprep.mubr.msk.bf16.mxu0 %vm811_vm5, %v30622_v59  ;;  %v26223_v59 = vld [vmem:[%s30876_s22 + $0x10] sm:$0xff]  }
0x146a   : > { %24352 = vmatprep.subr.bf16.mxu0 %v26220_v55  ;;  %24366 = vmatprep.subr.bf16.mxu1 %v26223_v59 }
0x146b   : > { %24367 = vmatpush3.bf16.msra.mxu1 %v26223_v59 }
0x146d   : > { %24353 = vmatpush3.bf16.msra.mxu0 %v26220_v55 }
0x1470   : > { %24355 = vmatmul.mubr.msk.bf16.vlgmr.msra.gmra.mrb[168].mxu0 %vm811_vm5, %v30631_v45  ;;  %v26224_v45 = vld [vmem:[%s30876_s22 + $0x18] sm:$0xff]  }
0x1471   : > { %24358 = vmatprep.mubr.msk.bf16.mxu0 %vm811_vm5, %v30643_v39  ;;  %24368 = vmatprep.subr.bf16.mxu1 %v26224_v45 }
0x1472   : > { %24369 = vmatpush3.bf16.msra.mxu1 %v26224_v45 }
0x1478   : > { %24359 = vmatmul.mubr.msk.bf16.gmra.mrb[172].mxu0 %vm811_vm5, %v19191_v5 }
0x1543   : > { %v24356_v48 = vpop.f32.mrb[168].mxu0 }
0x1544   : > { %v19319_v39 = vadd.f32 %v24356_v48, %v21017_v49  ;;  %v19271_v51 = vpop.f32.mrb[169].mxu0 }
0x1545   : > { %v19317_v23 = vadd.f32 %v21017_v49, %v19271_v51  ;;  %v24357_v53 = vpop.f32.mrb[170].mxu0 }
0x1546   : > { %v19327_v6 = vmax.f32 %v19319_v39, 0.0  ;;  %v19320_v57 = vadd.f32 %v24357_v53, %v21017_v49  ;;  %v19274_v42 = vpop.f32.mrb[171].mxu0 }
0x1547   : > { %v19325_v34 = vmax.f32 %v19317_v23, 0.0  ;;  %v19318_v47 = vadd.f32 %v21017_v49, %v19274_v42 }
0x1548   : > { %v19335_v63 = vadd.f32 %v19327_v6, %v16959_v36  ;;  %v19328_v7 = vmax.f32 %v19320_v57, 0.0 }
0x1549   : > { %v19333_v8 = vadd.f32 %v19325_v34, %v16957_v31  ;;  %v19326_v15 = vmax.f32 %v19318_v47, 0.0 }
0x154a   : > { %v19336_v24 = vadd.f32 %v19328_v7, %v16960_v10  ;;  %v19343_v61 = vmax.f32 %v19335_v63, 0.0 }
0x154b   : > { %v19334_v30 = vadd.f32 %v19326_v15, %v16958_v29  ;;  %v24360_v22 = vpop.f32.mrb[172].mxu0  ;;  %v19341_v0 = vmax.f32 %v19333_v8, 0.0 }
0x154c   : > { %v19344_v56 = vmax.f32 %v19336_v24, 0.0  ;;  %v19323_v17 = vadd.f32 %v24360_v22, %v21017_v49  ;;  %v19287_v50 = vpop.f32.mrb[173].mxu0 }
0x154d   : > { %v19342_v27 = vmax.f32 %v19334_v30, 0.0  ;;  %v19321_v3 = vadd.f32 %v21017_v49, %v19287_v50  ;;  %v24361_v36 = vpop.f32.mrb[174].mxu0 }
0x154e   : > { %v19350_v62 = vpack.c.bf16 %v19344_v56, %v19343_v61  ;;  %v19331_v44 = vmax.f32 %v19323_v17, 0.0  ;;  %v19324_v16 = vadd.f32 %v24361_v36, %v21017_v49  ;;  %v19290_v31 = vpop.f32.mrb[175].mxu0 }
0x154f   : > { %v19349_v35 = vpack.c.bf16 %v19342_v27, %v19341_v0  ;;  %v19329_v43 = vmax.f32 %v19321_v3, 0.0  ;;  %v19322_v52 = vadd.f32 %v21017_v49, %v19290_v31 }
0x1550   : > { %v19339_v33 = vadd.f32 %v19331_v44, %v16963_v54  ;;  %v19332_v10 = vmax.f32 %v19324_v16, 0.0 }
0x1551   : > { %v19337_v29 = vadd.f32 %v19329_v43, %v16961_v14  ;;  %v19330_v19 = vmax.f32 %v19322_v52, 0.0  ;;  %24370 = vmatprep.mubr.msk.bf16.mxu1 %vm811_vm5, %v19349_v35 }
0x1552   : > { %v19340_v38 = vadd.f32 %v19332_v10, %v16964_v40  ;;  %24371 = vmatmul.mubr.msk.bf16.vlgmr.msra.gmra.mrb[112].mxu1 %vm811_vm5, %v19350_v62  ;;  %v19347_v41 = vmax.f32 %v19339_v33, 0.0 }
0x1553   : > { %v19338_v32 = vadd.f32 %v19330_v19, %v16962_v4  ;;  %v19345_v54 = vmax.f32 %v19337_v29, 0.0 }
0x1554   : > { %v19348_v13 = vmax.f32 %v19340_v38, 0.0 }
0x1555   : > { %v19346_v11 = vmax.f32 %v19338_v32, 0.0 }
0x1556   : > { %v19352_v26 = vpack.c.bf16 %v19348_v13, %v19347_v41 }
0x1557   : > { %v19351_v18 = vpack.c.bf16 %v19346_v11, %v19345_v54 }
0x1559   : > { %24374 = vmatprep.mubr.msk.bf16.mxu1 %vm811_vm5, %v19351_v18 }
0x155a   : > { %24375 = vmatmul.mubr.msk.bf16.gmra.mrb[116].mxu1 %vm811_vm5, %v19352_v26 }
0x1625   : > { %v24372_v60 = vpop.f32.mrb[112].mxu1 }
0x1626   : > { %v19447_v14 = vadd.f32 %v24372_v60, %v21018_v46  ;;  %v19438_v28 = vpop.f32.mrb[113].mxu1 }
0x1627   : > { %v19439_v40 = vadd.f32 %v21018_v46, %v19438_v28  ;;  %v24373_v4 = vpop.f32.mrb[114].mxu1 }
0x1628   : > { %19471 = vst [vmem:[%s730_s3 + $0x10] sm:$0xff] %v19447_v14  ;;  %v19450_v21 = vadd.f32 %v24373_v4, %v21018_v46  ;;  %v19441_v37 = vpop.f32.mrb[115].mxu1 }
0x1629   : > { %19469 = vst [vmem:[%s730_s3] sm:$0xff] %v19439_v40  ;;  %v19442_v25 = vadd.f32 %v21018_v46, %v19441_v37 }
0x162a   : > { %19472 = vst [vmem:[%s730_s3 + $0x18] sm:$0xff] %v19450_v21 }
0x162b   : > { %19470 = vst [vmem:[%s730_s3 + $0x8] sm:$0xff] %v19442_v25 }
0x162d   : > { %v24376_v9 = vpop.f32.mrb[116].mxu1 }
0x162e   : > { %v19463_v12 = vadd.f32 %v24376_v9, %v21018_v46  ;;  %v19454_v20 = vpop.f32.mrb[117].mxu1 }
0x162f   : > { %v19455_v2 = vadd.f32 %v21018_v46, %v19454_v20  ;;  %v24377_v55 = vpop.f32.mrb[118].mxu1 }
0x1630   : > { %19475 = vst [vmem:[%s730_s3 + $0x30] sm:$0xff] %v19463_v12  ;;  %v19466_v1 = vadd.f32 %v24377_v55, %v21018_v46  ;;  %v19457_v5 = vpop.f32.mrb[119].mxu1 }
0x1631   : > { %19473 = vst [vmem:[%s730_s3 + $0x20] sm:$0xff] %v19455_v2  ;;  %v19458_v58 = vadd.f32 %v21018_v46, %v19457_v5 }
0x1632   : > { %19476 = vst [vmem:[%s730_s3 + $0x38] sm:$0xff] %v19466_v1 }
0x1633   : > { %19474 = vst [vmem:[%s730_s3 + $0x28] sm:$0xff] %v19458_v58 }
0x1634   : > { %26238 = shalt.err (!%p26235_p3)
}
0x1635   : > { %s26239_s25 = scalar_lea.hbm %s30807_s5, 1024  ;;  %s26243_s24 = scalar_lea.hbm %s31196_s0, 2048 }
0x1636   : > { %p26240_p4 = scmp.ne.s32.totalorder %s30807_s5, %s26239_s25  ;;  %p26244_p9 = scmp.lt.u32.totalorder %s30807_s5, %s31196_s0 }
0x1637   : > { %p26245_p10 = scmp.lt.u32.totalorder %s26243_s24, %s26239_s25  ;;  %p26247_p12 = scmp.lt.u32.totalorder %s26239_s25, %s30807_s5 }
0x1638   : > { %p26241_p7 = pnand %p26240_p4, %p26457_p5 }
0x1639   : > { %p26246_p11 = por %p26245_p10, %p26244_p9 }
0x163a   : > { %p26242_p8 = pneg %p26241_p7 }
0x163b   : > { %p26248_p13 = por %p26247_p12, %p26246_p11 }
0x163d   : > { %p26249_p0 = pnand %p26248_p13, %p26242_p8 }
0x163f   : > { %26252 = shalt.err (!%p26249_p0)
}
0x1640   : > { %s26292_s1 = smov 128   ;;  %s26293_s8 = smov 8  }
0x1641   : > { %25914 = dma.vmem_to_hbm [thread:$0]  (%p26457_p5), %s30809_s27, 1024, %s30807_s5, %s30813_s28, %s26292_s1, %s26292_s1, %s26293_s8  }
0x1642 PF: > { %s31197_s2 = sld [smem:[#allocation9_spill]]  ;;  %s31198_s3 = sld [smem:[#allocation7_spill]] }
0x1648   : > { %p25920_p1 = scmp.ge.s32.totalorder %s31197_s2, 2  ;;  %s19506_s4 = sand.u32 1, %s31198_s3  }
0x1649   : > { %s19507_s25 = scalar_lea.sflag [#allocation5], %s19506_s4 }
0x164a   : > { %p25917_p2 = pnand %p25920_p1, %p26461_p6 }
0x164c   : > { %26270 = dma.done.wait (!%p25917_p2), %s19507_s25, 1024  }
0x164d   : > { %26272 = vsyncadd (!%p25917_p2), %s19507_s25, 4294966272  ;;  %s31200_s28 = sld [smem:[#allocation11_spill]]  ;;  %s31201_s24 = sld [smem:[#allocation8_spill]] }
0x164e   : > { %s31202_s27 = sld [smem:[#allocation12_spill]]  ;;  %s31203_s5 = smov %s26279_s26 }
0x1653   : > { %p34_p3 = scmp.ge.s32.totalorder %s31200_s28, 4   ;;  %s31204_s26 = smov %s31201_s24 }
0x1655   :  { %36 = sbr.rel (!%p34_p3) target bundleno = 14 (0xe), region = 219 }
0x165c   :  { %19512 = vsyncpa [#allocation5], 1 }
0x165d   :  { %19514 = vsyncpa [#allocation5 + $0x1], 1 }

</bundles_post_ra>
